<compile_context>
chip_gen: v5e
topology: v5e:2x2
jax: 0.10.0
libtpu: 0.0.40
codegen_flags: <defaults>
</compile_context>

<pallas_src>
import jax
import jax.numpy as jnp
from jax.experimental import pallas as pl
from jax.experimental.pallas import tpu as pltpu

NC = 4
NDF = 64
BN_EPS = 1e-5
LRELU_SLOPE = 0.2


# ----------------------------------------------------------------------------
# Kernel 1: conv1 -- tiled matmul + LeakyReLU (no BatchNorm), bf16 out
# ----------------------------------------------------------------------------
def _matmul_lrelu_kernel(a_ref, w_ref, o_ref):
    acc = jnp.dot(a_ref[...], w_ref[...], preferred_element_type=jnp.float32)
    o_ref[...] = jnp.where(acc > 0, acc, LRELU_SLOPE * acc).astype(o_ref.dtype)


def _m_tile(M, cap=256):
    """Largest divisor of M that is a multiple of 8 and <= cap."""
    if M <= cap or M % 8:
        return M
    t = min(cap, M // 2)
    t -= t % 8
    while t >= 8 and M % t:
        t -= 8
    return t if t >= 8 else M


def matmul_lrelu(a, w):
    M, K = a.shape
    _, C = w.shape
    tm = _m_tile(M)
    return pl.pallas_call(
        _matmul_lrelu_kernel,
        out_shape=jax.ShapeDtypeStruct((M, C), jnp.bfloat16),
        grid_spec=pltpu.PrefetchScalarGridSpec(
            num_scalar_prefetch=0,
            grid=(M // tm,),
            in_specs=[
                pl.BlockSpec((tm, K), lambda i: (i, 0)),
                pl.BlockSpec((K, C), lambda i: (0, 0)),
            ],
            out_specs=pl.BlockSpec((tm, C), lambda i: (i, 0)),
        ),
        compiler_params=pltpu.CompilerParams(
            dimension_semantics=("parallel",)),
    )(a, w)


# ----------------------------------------------------------------------------
# Kernel 2: conv2..4 -- fused matmul + BatchNorm(batch stats) + LeakyReLU.
# Grid = (Cout tiles ["parallel"], K tiles ["arbitrary"]).  f32 accumulator in
# VMEM; BN + LeakyReLU applied as an epilogue on the last K step.  BN stats are
# per output channel, so the Cout split is exact.
# ----------------------------------------------------------------------------
def _mm_bn_lrelu_kernel(a_ref, w_ref, g_ref, b_ref, o_ref, acc_ref):
    k = pl.program_id(1)

    @pl.when(k == 0)
    def _():
        acc_ref[...] = jnp.zeros_like(acc_ref)

    acc_ref[...] += jnp.dot(a_ref[...], w_ref[...],
                            preferred_element_type=jnp.float32)

    @pl.when(k == pl.num_programs(1) - 1)
    def _():
        acc = acc_ref[...]
        m = acc.shape[0]
        mean = jnp.sum(acc, axis=0, keepdims=True) * (1.0 / m)
        centered = acc - mean
        var = jnp.sum(centered * centered, axis=0, keepdims=True) * (1.0 / m)
        scale = g_ref[...] * jax.lax.rsqrt(var + BN_EPS)
        y = centered * scale + b_ref[...]
        o_ref[...] = jnp.where(y > 0, y, LRELU_SLOPE * y).astype(o_ref.dtype)


def matmul_bn_lrelu(a, w, gamma2d, beta2d):
    M, K = a.shape
    _, C = w.shape
    tn = C if C <= 128 else 128          # Cout tile (conv2:128, conv3/4: 128)
    tk = K if K <= 2048 else 2048        # K tile   (conv4: 2x2048 -> pipelined W)
    grid = (C // tn, K // tk)
    return pl.pallas_call(
        _mm_bn_lrelu_kernel,
        out_shape=jax.ShapeDtypeStruct((M, C), jnp.bfloat16),
        grid_spec=pltpu.PrefetchScalarGridSpec(
            num_scalar_prefetch=0,
            grid=grid,
            in_specs=[
                pl.BlockSpec((M, tk), lambda j, k: (0, k)),   # A
                pl.BlockSpec((tk, tn), lambda j, k: (k, j)),  # W
                pl.BlockSpec((1, tn), lambda j, k: (0, j)),   # gamma
                pl.BlockSpec((1, tn), lambda j, k: (0, j)),   # beta
            ],
            out_specs=pl.BlockSpec((M, tn), lambda j, k: (0, j)),
            scratch_shapes=[pltpu.VMEM((M, tn), jnp.float32)],
        ),
        compiler_params=pltpu.CompilerParams(
            dimension_semantics=("parallel", "arbitrary")),
    )(a, w, gamma2d, beta2d)


# ----------------------------------------------------------------------------
# Kernel 3: conv5 (cout=1) -- VPU multiply + lane-reduce + exact sigmoid
# ----------------------------------------------------------------------------
def _rowdot_sigmoid_kernel(a_ref, w_ref, o_ref):
    prod = a_ref[...].astype(jnp.float32) * w_ref[...].astype(jnp.float32)
    s = jnp.sum(prod, axis=1, keepdims=True)
    o_ref[...] = (1.0 / (1.0 + jnp.exp(-s))).astype(o_ref.dtype)


def rowdot_sigmoid(a, w_row):
    M, K = a.shape
    return pl.pallas_call(
        _rowdot_sigmoid_kernel,
        out_shape=jax.ShapeDtypeStruct((M, 1), jnp.float32),
        grid_spec=pltpu.PrefetchScalarGridSpec(
            num_scalar_prefetch=0,
            grid=(1,),
            in_specs=[
                pl.BlockSpec((M, K), lambda i: (0, 0)),
                pl.BlockSpec((1, K), lambda i: (0, 0)),
            ],
            out_specs=pl.BlockSpec((M, 1), lambda i: (0, 0)),
        ),
        compiler_params=pltpu.CompilerParams(
            dimension_semantics=("arbitrary",)),
    )(a, w_row)


# ----------------------------------------------------------------------------
# Plain-JAX glue: channels-last im2col (runs on bf16 activations under jit)
# ----------------------------------------------------------------------------
def im2col_nhwc(x_nhwc, k, stride, pad):
    N, H, W, C = x_nhwc.shape
    xp = jnp.pad(x_nhwc, ((0, 0), (pad, pad), (pad, pad), (0, 0)))
    Ho = (H + 2 * pad - k) // stride + 1
    Wo = (W + 2 * pad - k) // stride + 1
    cols = []
    for i in range(k):
        for j in range(k):
            cols.append(xp[:, i:i + stride * Ho:stride, j:j + stride * Wo:stride, :])
    p = jnp.stack(cols, axis=3)              # (N, Ho, Wo, k*k, C); K order (kh, kw, cin)
    p = p.reshape(N * Ho * Wo, k * k * C)
    return p, (N, Ho, Wo)


def _weight_matrix(w_oihw):
    cout, cin, kh, kw = w_oihw.shape
    return w_oihw.transpose(2, 3, 1, 0).reshape(kh * kw * cin, cout)  # (K, Cout)


def bake_params(params):
    """Precompute kernel-ready bf16 weight matrices / (1,C) BN params once."""
    baked = {}
    for idx in (1, 2, 3, 4):
        baked[f"w{idx}"] = _weight_matrix(params[f"w{idx}"]).astype(jnp.bfloat16)
    baked["w5row"] = _weight_matrix(params["w5"]).astype(jnp.bfloat16).reshape(1, -1)
    for idx in (2, 3, 4):
        c = params[f"gamma{idx}"].shape[0]
        baked[f"g{idx}"] = params[f"gamma{idx}"].reshape(1, c)
        baked[f"b{idx}"] = params[f"beta{idx}"].reshape(1, c)
    return baked


def discriminator_forward(baked, x_nchw):
    # Single layout change + bf16 cast; activations stay bf16 NHWC afterwards.
    x = x_nchw.transpose(0, 2, 3, 1).astype(jnp.bfloat16)

    # conv1 + LeakyReLU (fused)
    a, (N, Ho, Wo) = im2col_nhwc(x, 4, 2, 1)
    y = matmul_lrelu(a, baked["w1"])
    x = y.reshape(N, Ho, Wo, -1)

    # conv2..4: one fused pallas_call per layer (conv + BN batch stats + LeakyReLU)
    for idx in (2, 3, 4):
        a, (N, Ho, Wo) = im2col_nhwc(x, 4, 2, 1)
        y = matmul_bn_lrelu(a, baked[f"w{idx}"], baked[f"g{idx}"], baked[f"b{idx}"])
        x = y.reshape(N, Ho, Wo, -1)

    # conv5 (4x4 valid, cout=1) + Sigmoid
    # TODO(synk): could be folded into conv4's epilogue, but that conflicts with
    # the Cout-parallel sharding of conv4; kept as a tiny separate kernel.
    a, (N, Ho, Wo) = im2col_nhwc(x, 4, 1, 0)
    y = rowdot_sigmoid(a, baked["w5row"])     # (N, 1)
    return y.reshape(N, 1, Ho, Wo)            # (N, 1, 1, 1), matches NCHW reference


# ----------------------------------------------------------------------------
# Deterministic parameter init (DCGAN-style N(0, 0.02) conv weights)
# ----------------------------------------------------------------------------
def init_params(key):
    ks = jax.random.split(key, 8)

    def w(k, cout, cin):
        return 0.02 * jax.random.normal(k, (cout, cin, 4, 4), jnp.float32)

    return {
        "w1": w(ks[0], NDF, NC),
        "w2": w(ks[1], NDF * 2, NDF),
        "w3": w(ks[2], NDF * 4, NDF * 2),
        "w4": w(ks[3], NDF * 8, NDF * 4),
        "w5": w(ks[4], 1, NDF * 8),
        "gamma2": 1.0 + 0.02 * jax.random.normal(ks[5], (NDF * 2,), jnp.float32),
        "gamma3": 1.0 + 0.02 * jax.random.normal(ks[6], (NDF * 4,), jnp.float32),
        "gamma4": 1.0 + 0.02 * jax.random.normal(ks[7], (NDF * 8,), jnp.float32),
        "beta2": jnp.zeros((NDF * 2,), jnp.float32),
        "beta3": jnp.zeros((NDF * 4,), jnp.float32),
        "beta4": jnp.zeros((NDF * 8,), jnp.float32),
    }


# ----------------------------------------------------------------------------
# Pure-JAX reference (lax.conv) for correctness check
# ----------------------------------------------------------------------------
def reference_forward(params, x):
    def conv(h, w, stride, pad):
        return jax.lax.conv_general_dilated(
            h, w, (stride, stride), [(pad, pad), (pad, pad)],
            dimension_numbers=("NCHW", "OIHW", "NCHW"))

    def lrelu(h):
        return jnp.where(h > 0, h, LRELU_SLOPE * h)

    def bn(h, gamma, beta):
        mean = jnp.mean(h, axis=(0, 2, 3), keepdims=True)
        var = jnp.mean((h - mean) ** 2, axis=(0, 2, 3), keepdims=True)
        return ((h - mean) / jnp.sqrt(var + BN_EPS)
                * gamma[None, :, None, None] + beta[None, :, None, None])

    h = lrelu(conv(x, params["w1"], 2, 1))
    h = lrelu(bn(conv(h, params["w2"], 2, 1), params["gamma2"], params["beta2"]))
    h = lrelu(bn(conv(h, params["w3"], 2, 1), params["gamma3"], params["beta3"]))
    h = lrelu(bn(conv(h, params["w4"], 2, 1), params["gamma4"], params["beta4"]))
    return jax.nn.sigmoid(conv(h, params["w5"], 1, 0))


if __name__ == "__main__":
    key = jax.random.PRNGKey(0)
    pkey, xkey = jax.random.split(key)
    params = init_params(pkey)
    baked = bake_params(params)            # one-time weight relayout/cast

    # DCGAN discriminator topology requires 64x64 spatial input so the final
    # 4x4 valid conv yields a 1x1 map.  batch=2, channels=nc=4.
    x = jax.random.normal(xkey, (2, NC, 64, 64), jnp.float32)

    fwd = jax.jit(discriminator_forward)
    out = jax.block_until_ready(fwd(baked, x))

    assert out.shape == (2, 1, 1, 1), out.shape
    assert bool(jnp.all(jnp.isfinite(out)))

    ref = jax.block_until_ready(reference_forward(params, x))
    max_err = float(jnp.max(jnp.abs(out - ref)))
    assert max_err < 5e-2, f"mismatch vs reference: {max_err}"

    print("KERNEL_OK")
</pallas_src>

<mosaic_0001>
module attributes {stable_mosaic.version = 11 : i64} {
  func.func @_matmul_lrelu_kernel(%arg0: i32, %arg1: memref<256x64xbf16, #tpu.memory_space<vmem>>, %arg2: memref<64x64xbf16, #tpu.memory_space<vmem>>, %arg3: memref<256x64xbf16, #tpu.memory_space<vmem>>) attributes {dimension_semantics = [#tpu.dimension_semantics<parallel>], iteration_bounds = array<i64: 8>, scalar_prefetch = 0 : i64, scratch_operands = 0 : i64, tpu.core_type = #tpu.core_type<tc>, window_params = [{transform_indices = @transform_0, window_bounds = array<i64: 256, 64>}, {pipeline_mode = #tpu.pipeline_mode<synchronous>, transform_indices = @transform_1, window_bounds = array<i64: 64, 64>}, {transform_indices = @transform_2, window_bounds = array<i64: 256, 64>}]} {
    %c0 = arith.constant 0 : index
    %c0_0 = arith.constant 0 : index
    %0 = vector.load %arg1[%c0, %c0_0] : memref<256x64xbf16, #tpu.memory_space<vmem>>, vector<256x64xbf16>
    %c0_1 = arith.constant 0 : index
    %c0_2 = arith.constant 0 : index
    %1 = vector.load %arg2[%c0_1, %c0_2] : memref<64x64xbf16, #tpu.memory_space<vmem>>, vector<64x64xbf16>
    %cst = arith.constant dense<0.000000e+00> : vector<256x64xf32>
    %2 = tpu.matmul %0, %1, %cst {dimension_numbers = #tpu.dot_dimension_numbers<[1], [0], [0], [1], [0, 0, 1, 1], [], []>} : vector<256x64xbf16>, vector<64x64xbf16>, vector<256x64xf32> -> vector<256x64xf32>
    %cst_3 = arith.constant 0.000000e+00 : f32
    %3 = vector.broadcast %cst_3 : f32 to vector<256x64xf32>
    %4 = arith.cmpf ogt, %2, %3 : vector<256x64xf32>
    %cst_4 = arith.constant 2.000000e-01 : f32
    %5 = vector.broadcast %cst_4 : f32 to vector<256x64xf32>
    %6 = arith.mulf %5, %2 : vector<256x64xf32>
    %7 = arith.select %4, %2, %6 : vector<256x64xi1>, vector<256x64xf32>
    %8 = arith.truncf %7 : vector<256x64xf32> to vector<256x64xbf16>
    %c0_5 = arith.constant 0 : index
    %c0_6 = arith.constant 0 : index
    %9 = vector.load %arg3[%c0_5, %c0_6] : memref<256x64xbf16, #tpu.memory_space<vmem>>, vector<256x64xbf16>
    tpu.vector_store %arg3[%c0_5, %c0_6], %8 {strides = array<i32>} : memref<256x64xbf16, #tpu.memory_space<vmem>>, vector<256x64xbf16>,
    return
  }
  func.func @transform_0(%arg0: i32) -> (i32, i32) {
    %c0_i32 = arith.constant 0 : i32
    %c0_i32_0 = arith.constant 0 : i32
    return %arg0, %c0_i32 : i32, i32
  }
  func.func @transform_1(%arg0: i32) -> (i32, i32) {
    %c0_i32 = arith.constant 0 : i32
    %c0_i32_0 = arith.constant 0 : i32
    %c0_i32_1 = arith.constant 0 : i32
    return %c0_i32, %c0_i32_0 : i32, i32
  }
  func.func @transform_2(%arg0: i32) -> (i32, i32) {
    %c0_i32 = arith.constant 0 : i32
    %c0_i32_0 = arith.constant 0 : i32
    return %arg0, %c0_i32 : i32, i32
  }
}

module attributes {stable_mosaic.version = 11 : i64} {
  func.func @_mm_bn_lrelu_kernel(%arg0: i32, %arg1: i32, %arg2: memref<512x1024xbf16, #tpu.memory_space<vmem>>, %arg3: memref<1024x128xbf16, #tpu.memory_space<vmem>>, %arg4: memref<1x128xf32, #tpu.memory_space<vmem>>, %arg5: memref<1x128xf32, #tpu.memory_space<vmem>>, %arg6: memref<512x128xbf16, #tpu.memory_space<vmem>>, %arg7: memref<512x128xf32, #tpu.memory_space<vmem>>) attributes {dimension_semantics = [#tpu.dimension_semantics<parallel>, #tpu.dimension_semantics<arbitrary>], iteration_bounds = array<i64: 1, 1>, scalar_prefetch = 0 : i64, scratch_operands = 1 : i64, tpu.core_type = #tpu.core_type<tc>, window_params = [{transform_indices = @transform_0, window_bounds = array<i64: 512, 1024>}, {transform_indices = @transform_1, window_bounds = array<i64: 1024, 128>}, {transform_indices = @transform_2, window_bounds = array<i64: 1, 128>}, {transform_indices = @transform_3, window_bounds = array<i64: 1, 128>}, {transform_indices = @transform_4, window_bounds = array<i64: 512, 128>}]} {
    %c0_i32 = arith.constant 0 : i32
    %0 = arith.cmpi eq, %arg1, %c0_i32 : i32
    %1 = arith.extui %0 : i1 to i32
    %c0_i32_0 = arith.constant 0 : i32
    %2 = arith.cmpi ne, %1, %c0_i32_0 : i32
    scf.if %2 {
      %cst_10 = arith.constant 0.000000e+00 : f32
      %12 = vector.broadcast %cst_10 : f32 to vector<512x128xf32>
      %c0_11 = arith.constant 0 : index
      %c0_12 = arith.constant 0 : index
      %13 = vector.load %arg7[%c0_11, %c0_12] : memref<512x128xf32, #tpu.memory_space<vmem>>, vector<512x128xf32>
      tpu.vector_store %arg7[%c0_11, %c0_12], %12 {strides = array<i32>} : memref<512x128xf32, #tpu.memory_space<vmem>>, vector<512x128xf32>,
    } else {
    }
    %c0 = arith.constant 0 : index
    %c0_1 = arith.constant 0 : index
    %3 = vector.load %arg7[%c0, %c0_1] : memref<512x128xf32, #tpu.memory_space<vmem>>, vector<512x128xf32>
    %c0_2 = arith.constant 0 : index
    %c0_3 = arith.constant 0 : index
    %4 = vector.load %arg2[%c0_2, %c0_3] : memref<512x1024xbf16, #tpu.memory_space<vmem>>, vector<512x1024xbf16>
    %c0_4 = arith.constant 0 : index
    %c0_5 = arith.constant 0 : index
    %5 = vector.load %arg3[%c0_4, %c0_5] : memref<1024x128xbf16, #tpu.memory_space<vmem>>, vector<1024x128xbf16>
    %cst = arith.constant dense<0.000000e+00> : vector<512x128xf32>
    %6 = tpu.matmul %4, %5, %cst {dimension_numbers = #tpu.dot_dimension_numbers<[1], [0], [0], [1], [0, 0, 1, 1], [], []>} : vector<512x1024xbf16>, vector<1024x128xbf16>, vector<512x128xf32> -> vector<512x128xf32>
    %7 = arith.addf %3, %6 : vector<512x128xf32>
    %c0_6 = arith.constant 0 : index
    %c0_7 = arith.constant 0 : index
    %8 = vector.load %arg7[%c0_6, %c0_7] : memref<512x128xf32, #tpu.memory_space<vmem>>, vector<512x128xf32>
    tpu.vector_store %arg7[%c0_6, %c0_7], %7 {strides = array<i32>} : memref<512x128xf32, #tpu.memory_space<vmem>>, vector<512x128xf32>,
    %c0_i32_8 = arith.constant 0 : i32
    %9 = arith.cmpi eq, %arg1, %c0_i32_8 : i32
    %10 = arith.extui %9 : i1 to i32
    %c0_i32_9 = arith.constant 0 : i32
    %11 = arith.cmpi ne, %10, %c0_i32_9 : i32
    scf.if %11 {
      %c0_10 = arith.constant 0 : index
      %c0_11 = arith.constant 0 : index
      %12 = vector.load %arg7[%c0_10, %c0_11] : memref<512x128xf32, #tpu.memory_space<vmem>>, vector<512x128xf32>
      %cst_12 = arith.constant dense<0.000000e+00> : vector<128xf32>
      %13 = vector.multi_reduction <add>, %12, %cst_12 [0] : vector<512x128xf32> to vector<128xf32>
      %14 = vector.shape_cast %13 : vector<128xf32> to vector<1x128xf32>
      %cst_13 = arith.constant 0.001953125 : f32
      %15 = vector.broadcast %cst_13 : f32 to vector<1x128xf32>
      %16 = arith.mulf %14, %15 : vector<1x128xf32>
      %17 = vector.broadcast %16 : vector<1x128xf32> to vector<512x128xf32>
      %18 = arith.subf %12, %17 : vector<512x128xf32>
      %19 = arith.mulf %18, %18 : vector<512x128xf32>
      %cst_14 = arith.constant dense<0.000000e+00> : vector<128xf32>
      %20 = vector.multi_reduction <add>, %19, %cst_14 [0] : vector<512x128xf32> to vector<128xf32>
      %21 = vector.shape_cast %20 : vector<128xf32> to vector<1x128xf32>
      %cst_15 = arith.constant 0.001953125 : f32
      %22 = vector.broadcast %cst_15 : f32 to vector<1x128xf32>
      %23 = arith.mulf %21, %22 : vector<1x128xf32>
      %c0_16 = arith.constant 0 : index
      %c0_17 = arith.constant 0 : index
      %24 = vector.load %arg4[%c0_16, %c0_17] : memref<1x128xf32, #tpu.memory_space<vmem>>, vector<1x128xf32>
      %cst_18 = arith.constant 9.99999974E-6 : f32
      %25 = vector.broadcast %cst_18 : f32 to vector<1x128xf32>
      %26 = arith.addf %23, %25 : vector<1x128xf32>
      %27 = math.rsqrt %26 : vector<1x128xf32>
      %28 = arith.mulf %24, %27 : vector<1x128xf32>
      %29 = vector.broadcast %28 : vector<1x128xf32> to vector<512x128xf32>
      %30 = arith.mulf %18, %29 : vector<512x128xf32>
      %c0_19 = arith.constant 0 : index
      %c0_20 = arith.constant 0 : index
      %31 = vector.load %arg5[%c0_19, %c0_20] : memref<1x128xf32, #tpu.memory_space<vmem>>, vector<1x128xf32>
      %32 = vector.broadcast %31 : vector<1x128xf32> to vector<512x128xf32>
      %33 = arith.addf %30, %32 : vector<512x128xf32>
      %cst_21 = arith.constant 0.000000e+00 : f32
      %34 = vector.broadcast %cst_21 : f32 to vector<512x128xf32>
      %35 = arith.cmpf ogt, %33, %34 : vector<512x128xf32>
      %cst_22 = arith.constant 2.000000e-01 : f32
      %36 = vector.broadcast %cst_22 : f32 to vector<512x128xf32>
      %37 = arith.mulf %36, %33 : vector<512x128xf32>
      %38 = arith.select %35, %33, %37 : vector<512x128xi1>, vector<512x128xf32>
      %39 = arith.truncf %38 : vector<512x128xf32> to vector<512x128xbf16>
      %c0_23 = arith.constant 0 : index
      %c0_24 = arith.constant 0 : index
      %40 = vector.load %arg6[%c0_23, %c0_24] : memref<512x128xbf16, #tpu.memory_space<vmem>>, vector<512x128xbf16>
      tpu.vector_store %arg6[%c0_23, %c0_24], %39 {strides = array<i32>} : memref<512x128xbf16, #tpu.memory_space<vmem>>, vector<512x128xbf16>,
    } else {
    }
    return
  }
  func.func @transform_0(%arg0: i32, %arg1: i32) -> (i32, i32) {
    %c0_i32 = arith.constant 0 : i32
    %c0_i32_0 = arith.constant 0 : i32
    return %c0_i32, %arg1 : i32, i32
  }
  func.func @transform_1(%arg0: i32, %arg1: i32) -> (i32, i32) {
    %c0_i32 = arith.constant 0 : i32
    return %arg1, %arg0 : i32, i32
  }
  func.func @transform_2(%arg0: i32, %arg1: i32) -> (i32, i32) {
    %c0_i32 = arith.constant 0 : i32
    %c0_i32_0 = arith.constant 0 : i32
    return %c0_i32, %arg0 : i32, i32
  }
  func.func @transform_3(%arg0: i32, %arg1: i32) -> (i32, i32) {
    %c0_i32 = arith.constant 0 : i32
    %c0_i32_0 = arith.constant 0 : i32
    return %c0_i32, %arg0 : i32, i32
  }
  func.func @transform_4(%arg0: i32, %arg1: i32) -> (i32, i32) {
    %c0_i32 = arith.constant 0 : i32
    %c0_i32_0 = arith.constant 0 : i32
    return %c0_i32, %arg0 : i32, i32
  }
}

module attributes {stable_mosaic.version = 11 : i64} {
  func.func @_mm_bn_lrelu_kernel(%arg0: i32, %arg1: i32, %arg2: memref<128x2048xbf16, #tpu.memory_space<vmem>>, %arg3: memref<2048x128xbf16, #tpu.memory_space<vmem>>, %arg4: memref<1x128xf32, #tpu.memory_space<vmem>>, %arg5: memref<1x128xf32, #tpu.memory_space<vmem>>, %arg6: memref<128x128xbf16, #tpu.memory_space<vmem>>, %arg7: memref<128x128xf32, #tpu.memory_space<vmem>>) attributes {dimension_semantics = [#tpu.dimension_semantics<parallel>, #tpu.dimension_semantics<arbitrary>], iteration_bounds = array<i64: 2, 1>, scalar_prefetch = 0 : i64, scratch_operands = 1 : i64, tpu.core_type = #tpu.core_type<tc>, window_params = [{transform_indices = @transform_0, window_bounds = array<i64: 128, 2048>}, {transform_indices = @transform_1, window_bounds = array<i64: 2048, 128>}, {transform_indices = @transform_2, window_bounds = array<i64: 1, 128>}, {transform_indices = @transform_3, window_bounds = array<i64: 1, 128>}, {transform_indices = @transform_4, window_bounds = array<i64: 128, 128>}]} {
    %c0_i32 = arith.constant 0 : i32
    %0 = arith.cmpi eq, %arg1, %c0_i32 : i32
    %1 = arith.extui %0 : i1 to i32
    %c0_i32_0 = arith.constant 0 : i32
    %2 = arith.cmpi ne, %1, %c0_i32_0 : i32
    scf.if %2 {
      %cst_10 = arith.constant 0.000000e+00 : f32
      %12 = vector.broadcast %cst_10 : f32 to vector<128x128xf32>
      %c0_11 = arith.constant 0 : index
      %c0_12 = arith.constant 0 : index
      %13 = vector.load %arg7[%c0_11, %c0_12] : memref<128x128xf32, #tpu.memory_space<vmem>>, vector<128x128xf32>
      tpu.vector_store %arg7[%c0_11, %c0_12], %12 {strides = array<i32>} : memref<128x128xf32, #tpu.memory_space<vmem>>, vector<128x128xf32>,
    } else {
    }
    %c0 = arith.constant 0 : index
    %c0_1 = arith.constant 0 : index
    %3 = vector.load %arg7[%c0, %c0_1] : memref<128x128xf32, #tpu.memory_space<vmem>>, vector<128x128xf32>
    %c0_2 = arith.constant 0 : index
    %c0_3 = arith.constant 0 : index
    %4 = vector.load %arg2[%c0_2, %c0_3] : memref<128x2048xbf16, #tpu.memory_space<vmem>>, vector<128x2048xbf16>
    %c0_4 = arith.constant 0 : index
    %c0_5 = arith.constant 0 : index
    %5 = vector.load %arg3[%c0_4, %c0_5] : memref<2048x128xbf16, #tpu.memory_space<vmem>>, vector<2048x128xbf16>
    %cst = arith.constant dense<0.000000e+00> : vector<128x128xf32>
    %6 = tpu.matmul %4, %5, %cst {dimension_numbers = #tpu.dot_dimension_numbers<[1], [0], [0], [1], [0, 0, 1, 1], [], []>} : vector<128x2048xbf16>, vector<2048x128xbf16>, vector<128x128xf32> -> vector<128x128xf32>
    %7 = arith.addf %3, %6 : vector<128x128xf32>
    %c0_6 = arith.constant 0 : index
    %c0_7 = arith.constant 0 : index
    %8 = vector.load %arg7[%c0_6, %c0_7] : memref<128x128xf32, #tpu.memory_space<vmem>>, vector<128x128xf32>
    tpu.vector_store %arg7[%c0_6, %c0_7], %7 {strides = array<i32>} : memref<128x128xf32, #tpu.memory_space<vmem>>, vector<128x128xf32>,
    %c0_i32_8 = arith.constant 0 : i32
    %9 = arith.cmpi eq, %arg1, %c0_i32_8 : i32
    %10 = arith.extui %9 : i1 to i32
    %c0_i32_9 = arith.constant 0 : i32
    %11 = arith.cmpi ne, %10, %c0_i32_9 : i32
    scf.if %11 {
      %c0_10 = arith.constant 0 : index
      %c0_11 = arith.constant 0 : index
      %12 = vector.load %arg7[%c0_10, %c0_11] : memref<128x128xf32, #tpu.memory_space<vmem>>, vector<128x128xf32>
      %cst_12 = arith.constant dense<0.000000e+00> : vector<128xf32>
      %13 = vector.multi_reduction <add>, %12, %cst_12 [0] : vector<128x128xf32> to vector<128xf32>
      %14 = vector.shape_cast %13 : vector<128xf32> to vector<1x128xf32>
      %cst_13 = arith.constant 7.812500e-03 : f32
      %15 = vector.broadcast %cst_13 : f32 to vector<1x128xf32>
      %16 = arith.mulf %14, %15 : vector<1x128xf32>
      %17 = vector.broadcast %16 : vector<1x128xf32> to vector<128x128xf32>
      %18 = arith.subf %12, %17 : vector<128x128xf32>
      %19 = arith.mulf %18, %18 : vector<128x128xf32>
      %cst_14 = arith.constant dense<0.000000e+00> : vector<128xf32>
      %20 = vector.multi_reduction <add>, %19, %cst_14 [0] : vector<128x128xf32> to vector<128xf32>
      %21 = vector.shape_cast %20 : vector<128xf32> to vector<1x128xf32>
      %cst_15 = arith.constant 7.812500e-03 : f32
      %22 = vector.broadcast %cst_15 : f32 to vector<1x128xf32>
      %23 = arith.mulf %21, %22 : vector<1x128xf32>
      %c0_16 = arith.constant 0 : index
      %c0_17 = arith.constant 0 : index
      %24 = vector.load %arg4[%c0_16, %c0_17] : memref<1x128xf32, #tpu.memory_space<vmem>>, vector<1x128xf32>
      %cst_18 = arith.constant 9.99999974E-6 : f32
      %25 = vector.broadcast %cst_18 : f32 to vector<1x128xf32>
      %26 = arith.addf %23, %25 : vector<1x128xf32>
      %27 = math.rsqrt %26 : vector<1x128xf32>
      %28 = arith.mulf %24, %27 : vector<1x128xf32>
      %29 = vector.broadcast %28 : vector<1x128xf32> to vector<128x128xf32>
      %30 = arith.mulf %18, %29 : vector<128x128xf32>
      %c0_19 = arith.constant 0 : index
      %c0_20 = arith.constant 0 : index
      %31 = vector.load %arg5[%c0_19, %c0_20] : memref<1x128xf32, #tpu.memory_space<vmem>>, vector<1x128xf32>
      %32 = vector.broadcast %31 : vector<1x128xf32> to vector<128x128xf32>
      %33 = arith.addf %30, %32 : vector<128x128xf32>
      %cst_21 = arith.constant 0.000000e+00 : f32
      %34 = vector.broadcast %cst_21 : f32 to vector<128x128xf32>
      %35 = arith.cmpf ogt, %33, %34 : vector<128x128xf32>
      %cst_22 = arith.constant 2.000000e-01 : f32
      %36 = vector.broadcast %cst_22 : f32 to vector<128x128xf32>
      %37 = arith.mulf %36, %33 : vector<128x128xf32>
      %38 = arith.select %35, %33, %37 : vector<128x128xi1>, vector<128x128xf32>
      %39 = arith.truncf %38 : vector<128x128xf32> to vector<128x128xbf16>
      %c0_23 = arith.constant 0 : index
      %c0_24 = arith.constant 0 : index
      %40 = vector.load %arg6[%c0_23, %c0_24] : memref<128x128xbf16, #tpu.memory_space<vmem>>, vector<128x128xbf16>
      tpu.vector_store %arg6[%c0_23, %c0_24], %39 {strides = array<i32>} : memref<128x128xbf16, #tpu.memory_space<vmem>>, vector<128x128xbf16>,
    } else {
    }
    return
  }
  func.func @transform_0(%arg0: i32, %arg1: i32) -> (i32, i32) {
    %c0_i32 = arith.constant 0 : i32
    %c0_i32_0 = arith.constant 0 : i32
    return %c0_i32, %arg1 : i32, i32
  }
  func.func @transform_1(%arg0: i32, %arg1: i32) -> (i32, i32) {
    %c0_i32 = arith.constant 0 : i32
    return %arg1, %arg0 : i32, i32
  }
  func.func @transform_2(%arg0: i32, %arg1: i32) -> (i32, i32) {
    %c0_i32 = arith.constant 0 : i32
    %c0_i32_0 = arith.constant 0 : i32
    return %c0_i32, %arg0 : i32, i32
  }
  func.func @transform_3(%arg0: i32, %arg1: i32) -> (i32, i32) {
    %c0_i32 = arith.constant 0 : i32
    %c0_i32_0 = arith.constant 0 : i32
    return %c0_i32, %arg0 : i32, i32
  }
  func.func @transform_4(%arg0: i32, %arg1: i32) -> (i32, i32) {
    %c0_i32 = arith.constant 0 : i32
    %c0_i32_0 = arith.constant 0 : i32
    return %c0_i32, %arg0 : i32, i32
  }
}

module attributes {stable_mosaic.version = 11 : i64} {
  func.func @_mm_bn_lrelu_kernel(%arg0: i32, %arg1: i32, %arg2: memref<32x2048xbf16, #tpu.memory_space<vmem>>, %arg3: memref<2048x128xbf16, #tpu.memory_space<vmem>>, %arg4: memref<1x128xf32, #tpu.memory_space<vmem>>, %arg5: memref<1x128xf32, #tpu.memory_space<vmem>>, %arg6: memref<32x128xbf16, #tpu.memory_space<vmem>>, %arg7: memref<32x128xf32, #tpu.memory_space<vmem>>) attributes {dimension_semantics = [#tpu.dimension_semantics<parallel>, #tpu.dimension_semantics<arbitrary>], iteration_bounds = array<i64: 4, 2>, scalar_prefetch = 0 : i64, scratch_operands = 1 : i64, tpu.core_type = #tpu.core_type<tc>, window_params = [{transform_indices = @transform_0, window_bounds = array<i64: 32, 2048>}, {transform_indices = @transform_1, window_bounds = array<i64: 2048, 128>}, {transform_indices = @transform_2, window_bounds = array<i64: 1, 128>}, {transform_indices = @transform_3, window_bounds = array<i64: 1, 128>}, {transform_indices = @transform_4, window_bounds = array<i64: 32, 128>}]} {
    %c0_i32 = arith.constant 0 : i32
    %0 = arith.cmpi eq, %arg1, %c0_i32 : i32
    %1 = arith.extui %0 : i1 to i32
    %c0_i32_0 = arith.constant 0 : i32
    %2 = arith.cmpi ne, %1, %c0_i32_0 : i32
    scf.if %2 {
      %cst_9 = arith.constant 0.000000e+00 : f32
      %12 = vector.broadcast %cst_9 : f32 to vector<32x128xf32>
      %c0_10 = arith.constant 0 : index
      %c0_11 = arith.constant 0 : index
      %13 = vector.load %arg7[%c0_10, %c0_11] : memref<32x128xf32, #tpu.memory_space<vmem>>, vector<32x128xf32>
      tpu.vector_store %arg7[%c0_10, %c0_11], %12 {strides = array<i32>} : memref<32x128xf32, #tpu.memory_space<vmem>>, vector<32x128xf32>,
    } else {
    }
    %c0 = arith.constant 0 : index
    %c0_1 = arith.constant 0 : index
    %3 = vector.load %arg7[%c0, %c0_1] : memref<32x128xf32, #tpu.memory_space<vmem>>, vector<32x128xf32>
    %c0_2 = arith.constant 0 : index
    %c0_3 = arith.constant 0 : index
    %4 = vector.load %arg2[%c0_2, %c0_3] : memref<32x2048xbf16, #tpu.memory_space<vmem>>, vector<32x2048xbf16>
    %c0_4 = arith.constant 0 : index
    %c0_5 = arith.constant 0 : index
    %5 = vector.load %arg3[%c0_4, %c0_5] : memref<2048x128xbf16, #tpu.memory_space<vmem>>, vector<2048x128xbf16>
    %cst = arith.constant dense<0.000000e+00> : vector<32x128xf32>
    %6 = tpu.matmul %4, %5, %cst {dimension_numbers = #tpu.dot_dimension_numbers<[1], [0], [0], [1], [0, 0, 1, 1], [], []>} : vector<32x2048xbf16>, vector<2048x128xbf16>, vector<32x128xf32> -> vector<32x128xf32>
    %7 = arith.addf %3, %6 : vector<32x128xf32>
    %c0_6 = arith.constant 0 : index
    %c0_7 = arith.constant 0 : index
    %8 = vector.load %arg7[%c0_6, %c0_7] : memref<32x128xf32, #tpu.memory_space<vmem>>, vector<32x128xf32>
    tpu.vector_store %arg7[%c0_6, %c0_7], %7 {strides = array<i32>} : memref<32x128xf32, #tpu.memory_space<vmem>>, vector<32x128xf32>,
    %c1_i32 = arith.constant 1 : i32
    %9 = arith.cmpi eq, %arg1, %c1_i32 : i32
    %10 = arith.extui %9 : i1 to i32
    %c0_i32_8 = arith.constant 0 : i32
    %11 = arith.cmpi ne, %10, %c0_i32_8 : i32
    scf.if %11 {
      %c0_9 = arith.constant 0 : index
      %c0_10 = arith.constant 0 : index
      %12 = vector.load %arg7[%c0_9, %c0_10] : memref<32x128xf32, #tpu.memory_space<vmem>>, vector<32x128xf32>
      %cst_11 = arith.constant dense<0.000000e+00> : vector<128xf32>
      %13 = vector.multi_reduction <add>, %12, %cst_11 [0] : vector<32x128xf32> to vector<128xf32>
      %14 = vector.shape_cast %13 : vector<128xf32> to vector<1x128xf32>
      %cst_12 = arith.constant 3.125000e-02 : f32
      %15 = vector.broadcast %cst_12 : f32 to vector<1x128xf32>
      %16 = arith.mulf %14, %15 : vector<1x128xf32>
      %17 = vector.broadcast %16 : vector<1x128xf32> to vector<32x128xf32>
      %18 = arith.subf %12, %17 : vector<32x128xf32>
      %19 = arith.mulf %18, %18 : vector<32x128xf32>
      %cst_13 = arith.constant dense<0.000000e+00> : vector<128xf32>
      %20 = vector.multi_reduction <add>, %19, %cst_13 [0] : vector<32x128xf32> to vector<128xf32>
      %21 = vector.shape_cast %20 : vector<128xf32> to vector<1x128xf32>
      %cst_14 = arith.constant 3.125000e-02 : f32
      %22 = vector.broadcast %cst_14 : f32 to vector<1x128xf32>
      %23 = arith.mulf %21, %22 : vector<1x128xf32>
      %c0_15 = arith.constant 0 : index
      %c0_16 = arith.constant 0 : index
      %24 = vector.load %arg4[%c0_15, %c0_16] : memref<1x128xf32, #tpu.memory_space<vmem>>, vector<1x128xf32>
      %cst_17 = arith.constant 9.99999974E-6 : f32
      %25 = vector.broadcast %cst_17 : f32 to vector<1x128xf32>
      %26 = arith.addf %23, %25 : vector<1x128xf32>
      %27 = math.rsqrt %26 : vector<1x128xf32>
      %28 = arith.mulf %24, %27 : vector<1x128xf32>
      %29 = vector.broadcast %28 : vector<1x128xf32> to vector<32x128xf32>
      %30 = arith.mulf %18, %29 : vector<32x128xf32>
      %c0_18 = arith.constant 0 : index
      %c0_19 = arith.constant 0 : index
      %31 = vector.load %arg5[%c0_18, %c0_19] : memref<1x128xf32, #tpu.memory_space<vmem>>, vector<1x128xf32>
      %32 = vector.broadcast %31 : vector<1x128xf32> to vector<32x128xf32>
      %33 = arith.addf %30, %32 : vector<32x128xf32>
      %cst_20 = arith.constant 0.000000e+00 : f32
      %34 = vector.broadcast %cst_20 : f32 to vector<32x128xf32>
      %35 = arith.cmpf ogt, %33, %34 : vector<32x128xf32>
      %cst_21 = arith.constant 2.000000e-01 : f32
      %36 = vector.broadcast %cst_21 : f32 to vector<32x128xf32>
      %37 = arith.mulf %36, %33 : vector<32x128xf32>
      %38 = arith.select %35, %33, %37 : vector<32x128xi1>, vector<32x128xf32>
      %39 = arith.truncf %38 : vector<32x128xf32> to vector<32x128xbf16>
      %c0_22 = arith.constant 0 : index
      %c0_23 = arith.constant 0 : index
      %40 = vector.load %arg6[%c0_22, %c0_23] : memref<32x128xbf16, #tpu.memory_space<vmem>>, vector<32x128xbf16>
      tpu.vector_store %arg6[%c0_22, %c0_23], %39 {strides = array<i32>} : memref<32x128xbf16, #tpu.memory_space<vmem>>, vector<32x128xbf16>,
    } else {
    }
    return
  }
  func.func @transform_0(%arg0: i32, %arg1: i32) -> (i32, i32) {
    %c0_i32 = arith.constant 0 : i32
    %c0_i32_0 = arith.constant 0 : i32
    return %c0_i32, %arg1 : i32, i32
  }
  func.func @transform_1(%arg0: i32, %arg1: i32) -> (i32, i32) {
    %c0_i32 = arith.constant 0 : i32
    return %arg1, %arg0 : i32, i32
  }
  func.func @transform_2(%arg0: i32, %arg1: i32) -> (i32, i32) {
    %c0_i32 = arith.constant 0 : i32
    %c0_i32_0 = arith.constant 0 : i32
    return %c0_i32, %arg0 : i32, i32
  }
  func.func @transform_3(%arg0: i32, %arg1: i32) -> (i32, i32) {
    %c0_i32 = arith.constant 0 : i32
    %c0_i32_0 = arith.constant 0 : i32
    return %c0_i32, %arg0 : i32, i32
  }
  func.func @transform_4(%arg0: i32, %arg1: i32) -> (i32, i32) {
    %c0_i32 = arith.constant 0 : i32
    %c0_i32_0 = arith.constant 0 : i32
    return %c0_i32, %arg0 : i32, i32
  }
}

module attributes {stable_mosaic.version = 11 : i64} {
  func.func @_rowdot_sigmoid_kernel(%arg0: i32, %arg1: memref<2x8192xbf16, #tpu.memory_space<vmem>>, %arg2: memref<1x8192xbf16, #tpu.memory_space<vmem>>, %arg3: memref<2x1xf32, #tpu.memory_space<vmem>>) attributes {dimension_semantics = [#tpu.dimension_semantics<arbitrary>], iteration_bounds = array<i64: 1>, scalar_prefetch = 0 : i64, scratch_operands = 0 : i64, tpu.core_type = #tpu.core_type<tc>, window_params = [{pipeline_mode = #tpu.pipeline_mode<synchronous>, transform_indices = @transform_0, window_bounds = array<i64: 2, 8192>}, {pipeline_mode = #tpu.pipeline_mode<synchronous>, transform_indices = @transform_1, window_bounds = array<i64: 1, 8192>}, {pipeline_mode = #tpu.pipeline_mode<synchronous>, transform_indices = @transform_2, window_bounds = array<i64: 2, 1>}]} {
    %c0 = arith.constant 0 : index
    %c0_0 = arith.constant 0 : index
    %0 = vector.load %arg1[%c0, %c0_0] : memref<2x8192xbf16, #tpu.memory_space<vmem>>, vector<2x8192xbf16>
    %1 = arith.extf %0 : vector<2x8192xbf16> to vector<2x8192xf32>
    %c0_1 = arith.constant 0 : index
    %c0_2 = arith.constant 0 : index
    %2 = vector.load %arg2[%c0_1, %c0_2] : memref<1x8192xbf16, #tpu.memory_space<vmem>>, vector<1x8192xbf16>
    %3 = arith.extf %2 : vector<1x8192xbf16> to vector<1x8192xf32>
    %4 = vector.broadcast %3 : vector<1x8192xf32> to vector<2x8192xf32>
    %5 = arith.mulf %1, %4 : vector<2x8192xf32>
    %cst = arith.constant dense<0.000000e+00> : vector<2xf32>
    %6 = vector.multi_reduction <add>, %5, %cst [1] : vector<2x8192xf32> to vector<2xf32>
    %7 = vector.shape_cast %6 : vector<2xf32> to vector<2x1xf32>
    %cst_3 = arith.constant 0.000000e+00 : f32
    %8 = vector.broadcast %cst_3 : f32 to vector<2x1xf32>
    %9 = arith.subf %8, %7 : vector<2x1xf32>
    %10 = math.exp %9 : vector<2x1xf32>
    %cst_4 = arith.constant 1.000000e+00 : f32
    %11 = vector.broadcast %cst_4 : f32 to vector<2x1xf32>
    %12 = arith.addf %11, %10 : vector<2x1xf32>
    %cst_5 = arith.constant 1.000000e+00 : f32
    %13 = vector.broadcast %cst_5 : f32 to vector<2x1xf32>
    %14 = arith.divf %13, %12 : vector<2x1xf32>
    %c0_6 = arith.constant 0 : index
    %c0_7 = arith.constant 0 : index
    %15 = vector.load %arg3[%c0_6, %c0_7] : memref<2x1xf32, #tpu.memory_space<vmem>>, vector<2x1xf32>
    tpu.vector_store %arg3[%c0_6, %c0_7], %14 {strides = array<i32>} : memref<2x1xf32, #tpu.memory_space<vmem>>, vector<2x1xf32>,
    return
  }
  func.func @transform_0(%arg0: i32) -> (i32, i32) {
    %c0_i32 = arith.constant 0 : i32
    %c0_i32_0 = arith.constant 0 : i32
    %c0_i32_1 = arith.constant 0 : i32
    return %c0_i32, %c0_i32_0 : i32, i32
  }
  func.func @transform_1(%arg0: i32) -> (i32, i32) {
    %c0_i32 = arith.constant 0 : i32
    %c0_i32_0 = arith.constant 0 : i32
    %c0_i32_1 = arith.constant 0 : i32
    return %c0_i32, %c0_i32_0 : i32, i32
  }
  func.func @transform_2(%arg0: i32) -> (i32, i32) {
    %c0_i32 = arith.constant 0 : i32
    %c0_i32_0 = arith.constant 0 : i32
    %c0_i32_1 = arith.constant 0 : i32
    return %c0_i32, %c0_i32_0 : i32, i32
  }
}

</mosaic_0001>

<bundles_post_ra>
// kernel: discriminator_forward.5
= control target key start
LH: loop header
LB: loop body
LE: loop exit
PB: predicated region body
PF: predicated region fallthrough
CT: control target
= control target key end

     0   :  { %s817_s9 = smov 0   ;;  %s953_s0 = inlined_call_operand.vmem [shape: bf16[2048,64], index: 0, kind: input, shape index: {}]   ;;  %s954_s1 = inlined_call_operand.vmem [shape: bf16[64,64], index: 1, kind: input, shape index: {}]   ;;  %s955_s2 = inlined_call_operand.vmem [shape: bf16[2048,64], index: 2, kind: output, shape index: {}]  }
   0x1 LB: > { %s647_s10 = sadd.s32 4294967295, %s800_s9   ;;  %p651_p0 = scmp.ge.s32.totalorder %s800_s9, 1  ;;  %s800_s9 = sphi %s817_s9, %s12_s9  }
   0x2   : > { %p113_p1 = scmp.lt.s32.totalorder %s800_s9, 9 }
   0x4   : > { %p114_p2 = pnand %p651_p0, %p113_p1 }
   0x5   : > { %s652_s13 = sshll.u32 (!%p114_p2), %s647_s10, 5 }
   0x6   : > { %117 = sbr.rel (%p114_p2) target bundleno = 223 (0xdf), region = 28  ;;  %p136_p3 = scmp.lt.s32.totalorder (!%p114_p2), %s652_s13, 255 }
   0xb   : > { %v773_v0 = vld [vmem:[%s954_s1 + $0x18] sm:$0xff]  ;;  %v772_v1 = vld [vmem:[%s954_s1 + $0x10] sm:$0xff]  ;;  %s957_s13 = smov (!%p136_p3, %s652_s13), 255  ;;  %v771_v2 = vld [vmem:[%s954_s1 + $0x8] sm:$0xff]  ;;  %vm292_vm0 = vcmask 523264   ;;  %vm558_vm3 = vcmask 519168  }
   0xc   : > { %345 = vmatpush.bf16.msra.mxu0 %v773_v0  ;;  %774 = vmatpush.bf16.msra.mxu1 %v773_v0  ;;  %s653_s18 = sshll.u32 %s957_s13, 2  ;;  %v770_v3 = vld [vmem:[%s954_s1] sm:$0xff] }
   0xd   : > { %775 = vmatpush.bf16.msra.mxu2 %v773_v0  ;;  %776 = vmatpush.bf16.msra.mxu3 %v773_v0  ;;  %s845_s23 = scalar_lea.vmem %s953_s0, %s653_s18  ;;  %s884_s26 = scalar_lea.vmem %s955_s2, %s653_s18 }
   0xe   : > { %v754_v4 = vld [vmem:[%s845_s23] sm:$0xff]  ;;  %v755_v8 = vld [vmem:[%s845_s23 + $0x8] sm:$0xff]  ;;  %v756_v12 = vld [vmem:[%s845_s23 + $0x10] sm:$0xff] }
   0xf   : > { %v758_v5 = vld [vmem:[%s845_s23 + $0x20] sm:$0xff]  ;;  %v759_v9 = vld [vmem:[%s845_s23 + $0x28] sm:$0xff]  ;;  %v760_v13 = vld [vmem:[%s845_s23 + $0x30] sm:$0xff] }
  0x10   : > { %346 = vmatpush.bf16.msra.mxu0 %v772_v1  ;;  %777 = vmatpush.bf16.msra.mxu1 %v772_v1  ;;  %v762_v6 = vld [vmem:[%s845_s23 + $0x40] sm:$0xff]  ;;  %v763_v10 = vld [vmem:[%s845_s23 + $0x48] sm:$0xff]  ;;  %v764_v14 = vld [vmem:[%s845_s23 + $0x50] sm:$0xff] }
  0x11   : > { %778 = vmatpush.bf16.msra.mxu2 %v772_v1  ;;  %779 = vmatpush.bf16.msra.mxu3 %v772_v1  ;;  %v766_v7 = vld [vmem:[%s845_s23 + $0x60] sm:$0xff]  ;;  %v767_v11 = vld [vmem:[%s845_s23 + $0x68] sm:$0xff]  ;;  %v768_v15 = vld [vmem:[%s845_s23 + $0x70] sm:$0xff] }
  0x12   : > { %v757_v16 = vld [vmem:[%s845_s23 + $0x18] sm:$0xff] }
  0x13   : > { %v761_v17 = vld [vmem:[%s845_s23 + $0x38] sm:$0xff] }
  0x14   : > { %347 = vmatpush.bf16.msra.mxu0 %v771_v2  ;;  %780 = vmatpush.bf16.msra.mxu1 %v771_v2  ;;  %v765_v18 = vld [vmem:[%s845_s23 + $0x58] sm:$0xff] }
  0x15   : > { %781 = vmatpush.bf16.msra.mxu2 %v771_v2  ;;  %782 = vmatpush.bf16.msra.mxu3 %v771_v2  ;;  %v769_v19 = vld [vmem:[%s845_s23 + $0x78] sm:$0xff] }
  0x18   : > { %348 = vmatpush.bf16.msra.mxu0 %v770_v3  ;;  %783 = vmatpush.bf16.msra.mxu1 %v770_v3 }
  0x19   : > { %784 = vmatpush.bf16.msra.mxu2 %v770_v3  ;;  %785 = vmatpush.bf16.msra.mxu3 %v770_v3 }
  0x1b   : > { %736 = vmatmul.msk.bf16.vlgmr.msra.gmra.mxu0 %vm292_vm0, %v754_v4  ;;  %740 = vmatmul.msk.bf16.vlgmr.msra.gmra.mxu1 %vm292_vm0, %v758_v5 }
  0x1c   : > { %744 = vmatmul.msk.bf16.vlgmr.msra.gmra.mxu2 %vm292_vm0, %v762_v6  ;;  %748 = vmatmul.msk.bf16.vlgmr.msra.gmra.mxu3 %vm292_vm0, %v766_v7 }
  0x2b   : > { %737 = vmatmul.msk.bf16.gmra.mxu0 %vm292_vm0, %v755_v8  ;;  %741 = vmatmul.msk.bf16.gmra.mxu1 %vm292_vm0, %v759_v9 }
  0x2c   : > { %745 = vmatmul.msk.bf16.gmra.mxu2 %vm292_vm0, %v763_v10  ;;  %749 = vmatmul.msk.bf16.gmra.mxu3 %vm292_vm0, %v767_v11 }
  0x3b   : > { %738 = vmatmul.msk.bf16.gmra.mxu0 %vm292_vm0, %v756_v12  ;;  %742 = vmatmul.msk.bf16.gmra.mxu1 %vm292_vm0, %v760_v13 }
  0x3c   : > { %746 = vmatmul.msk.bf16.gmra.mxu2 %vm292_vm0, %v764_v14  ;;  %750 = vmatmul.msk.bf16.gmra.mxu3 %vm292_vm0, %v768_v15 }
  0x4b   : > { %739 = vmatmul.msk.bf16.gmra.mxu0 %vm292_vm0, %v757_v16  ;;  %743 = vmatmul.msk.bf16.gmra.mxu1 %vm292_vm0, %v761_v17 }
  0x4c   : > { %747 = vmatmul.msk.bf16.gmra.mxu2 %vm292_vm0, %v765_v18  ;;  %751 = vmatmul.msk.bf16.gmra.mxu3 %vm292_vm0, %v769_v19 }
  0x98   : > { %v350_v20 = vpop.f32.mrf.mxu0  ;;  %v370_v21 = vpop.f32.mrf.mxu1 }
  0x99   : > { %vm430_vm1 = vcmp.gt.f32.partialorder %v350_v20, 0.0  ;;  %v462_v22 = vmul.f32 0.2, %v350_v20  ;;  %vm438_vm2 = vcmp.gt.f32.partialorder %v370_v21, 0.0  ;;  %v470_v23 = vmul.f32 0.2, %v370_v21 }
  0x9b   : > { %v494_v24 = vsel %vm430_vm1, %v350_v20, %v462_v22  ;;  %v502_v25 = vsel %vm438_vm2, %v370_v21, %v470_v23 }
  0x9c   : > { %v526_v26 = vpack.c.bf16 %v494_v24, %v494_v24  ;;  %v534_v27 = vpack.c.bf16 %v502_v25, %v502_v25 }
  0x9e   : > { %559 = vst.msk [vmem:[%s884_s26] sm:$0xf] %vm558_vm3, %v526_v26 }
  0x9f   : > { %567 = vst.msk [vmem:[%s884_s26 + $0x20] sm:$0xf] %vm558_vm3, %v534_v27  ;;  %v390_v28 = vpop.f32.mrf.mxu2  ;;  %v410_v29 = vpop.f32.mrf.mxu3 }
  0xa0   : > { %vm446_vm4 = vcmp.gt.f32.partialorder %v390_v28, 0.0  ;;  %v478_v30 = vmul.f32 0.2, %v390_v28  ;;  %vm454_vm5 = vcmp.gt.f32.partialorder %v410_v29, 0.0  ;;  %v486_v31 = vmul.f32 0.2, %v410_v29  ;;  %v352_v32 = vpop.f32.mrf.mxu0  ;;  %v372_v33 = vpop.f32.mrf.mxu1 }
  0xa1   : > { %vm431_vm6 = vcmp.gt.f32.partialorder %v352_v32, 0.0  ;;  %v463_v34 = vmul.f32 0.2, %v352_v32  ;;  %vm439_vm7 = vcmp.gt.f32.partialorder %v372_v33, 0.0  ;;  %v471_v35 = vmul.f32 0.2, %v372_v33 }
  0xa2   : > { %v510_v36 = vsel %vm446_vm4, %v390_v28, %v478_v30  ;;  %v518_v37 = vsel %vm454_vm5, %v410_v29, %v486_v31 }
  0xa3   : > { %v542_v38 = vpack.c.bf16 %v510_v36, %v510_v36  ;;  %v550_v39 = vpack.c.bf16 %v518_v37, %v518_v37  ;;  %v495_v40 = vsel %vm431_vm6, %v352_v32, %v463_v34  ;;  %v503_v41 = vsel %vm439_vm7, %v372_v33, %v471_v35 }
  0xa4   : > { %v527_v42 = vpack.c.bf16 %v495_v40, %v495_v40  ;;  %v535_v43 = vpack.c.bf16 %v503_v41, %v503_v41 }
  0xa5   : > { %575 = vst.msk [vmem:[%s884_s26 + $0x40] sm:$0xf] %vm558_vm3, %v542_v38 }
  0xa6   : > { %583 = vst.msk [vmem:[%s884_s26 + $0x60] sm:$0xf] %vm558_vm3, %v550_v39 }
  0xa7   : > { %560 = vst.msk [vmem:[%s884_s26 + $0x4] sm:$0xf] %vm558_vm3, %v527_v42  ;;  %v392_v44 = vpop.f32.mrf.mxu2  ;;  %v412_v45 = vpop.f32.mrf.mxu3 }
  0xa8   : > { %568 = vst.msk [vmem:[%s884_s26 + $0x24] sm:$0xf] %vm558_vm3, %v535_v43  ;;  %vm447_vm8 = vcmp.gt.f32.partialorder %v392_v44, 0.0  ;;  %v479_v46 = vmul.f32 0.2, %v392_v44  ;;  %vm455_vm9 = vcmp.gt.f32.partialorder %v412_v45, 0.0  ;;  %v355_v47 = vpop.f32.mrf.mxu0  ;;  %v375_v48 = vpop.f32.mrf.mxu1 }
  0xa9   : > { %v487_v49 = vmul.f32 0.2, %v412_v45  ;;  %vm432_vm10 = vcmp.gt.f32.partialorder %v355_v47, 0.0  ;;  %v464_v50 = vmul.f32 0.2, %v355_v47  ;;  %vm440_vm11 = vcmp.gt.f32.partialorder %v375_v48, 0.0 }
  0xaa   : > { %v511_v51 = vsel %vm447_vm8, %v392_v44, %v479_v46  ;;  %v472_v52 = vmul.f32 0.2, %v375_v48 }
  0xab   : > { %v543_v53 = vpack.c.bf16 %v511_v51, %v511_v51  ;;  %v519_v54 = vsel %vm455_vm9, %v412_v45, %v487_v49  ;;  %v496_v55 = vsel %vm432_vm10, %v355_v47, %v464_v50 }
  0xac   : > { %v551_v56 = vpack.c.bf16 %v519_v54, %v519_v54  ;;  %v528_v57 = vpack.c.bf16 %v496_v55, %v496_v55  ;;  %v504_v58 = vsel %vm440_vm11, %v375_v48, %v472_v52 }
  0xad   : > { %576 = vst.msk [vmem:[%s884_s26 + $0x44] sm:$0xf] %vm558_vm3, %v543_v53  ;;  %v536_v59 = vpack.c.bf16 %v504_v58, %v504_v58 }
  0xae   : > { %584 = vst.msk [vmem:[%s884_s26 + $0x64] sm:$0xf] %vm558_vm3, %v551_v56 }
  0xaf   : > { %561 = vst.msk [vmem:[%s884_s26 + $0x8] sm:$0xf] %vm558_vm3, %v528_v57  ;;  %v395_v60 = vpop.f32.mrf.mxu2  ;;  %v415_v61 = vpop.f32.mrf.mxu3 }
  0xb0   : > { %569 = vst.msk [vmem:[%s884_s26 + $0x28] sm:$0xf] %vm558_vm3, %v536_v59  ;;  %vm448_vm12 = vcmp.gt.f32.partialorder %v395_v60, 0.0  ;;  %v480_v62 = vmul.f32 0.2, %v395_v60  ;;  %vm456_vm13 = vcmp.gt.f32.partialorder %v415_v61, 0.0  ;;  %v357_v63 = vpop.f32.mrf.mxu0  ;;  %v377_v0 = vpop.f32.mrf.mxu1 }
  0xb1   : > { %v488_v1 = vmul.f32 0.2, %v415_v61  ;;  %vm433_vm14 = vcmp.gt.f32.partialorder %v357_v63, 0.0  ;;  %v465_v2 = vmul.f32 0.2, %v357_v63  ;;  %vm441_vm15 = vcmp.gt.f32.partialorder %v377_v0, 0.0 }
  0xb2   : > { %v512_v3 = vsel %vm448_vm12, %v395_v60, %v480_v62  ;;  %v473_v4 = vmul.f32 0.2, %v377_v0 }
  0xb3   : > { %v544_v5 = vpack.c.bf16 %v512_v3, %v512_v3  ;;  %v520_v6 = vsel %vm456_vm13, %v415_v61, %v488_v1  ;;  %v497_v7 = vsel %vm433_vm14, %v357_v63, %v465_v2 }
  0xb4   : > { %v552_v8 = vpack.c.bf16 %v520_v6, %v520_v6  ;;  %v529_v9 = vpack.c.bf16 %v497_v7, %v497_v7  ;;  %v505_v10 = vsel %vm441_vm15, %v377_v0, %v473_v4 }
  0xb5   : > { %577 = vst.msk [vmem:[%s884_s26 + $0x48] sm:$0xf] %vm558_vm3, %v544_v5  ;;  %v537_v11 = vpack.c.bf16 %v505_v10, %v505_v10 }
  0xb6   : > { %585 = vst.msk [vmem:[%s884_s26 + $0x68] sm:$0xf] %vm558_vm3, %v552_v8 }
  0xb7   : > { %562 = vst.msk [vmem:[%s884_s26 + $0xc] sm:$0xf] %vm558_vm3, %v529_v9  ;;  %v397_v12 = vpop.f32.mrf.mxu2  ;;  %v417_v13 = vpop.f32.mrf.mxu3 }
  0xb8   : > { %570 = vst.msk [vmem:[%s884_s26 + $0x2c] sm:$0xf] %vm558_vm3, %v537_v11  ;;  %vm449_vm0 = vcmp.gt.f32.partialorder %v397_v12, 0.0  ;;  %v481_v14 = vmul.f32 0.2, %v397_v12  ;;  %vm457_vm1 = vcmp.gt.f32.partialorder %v417_v13, 0.0  ;;  %v360_v15 = vpop.f32.mrf.mxu0  ;;  %v380_v16 = vpop.f32.mrf.mxu1 }
  0xb9   : > { %v489_v17 = vmul.f32 0.2, %v417_v13  ;;  %vm434_vm2 = vcmp.gt.f32.partialorder %v360_v15, 0.0  ;;  %v466_v18 = vmul.f32 0.2, %v360_v15  ;;  %vm442_vm4 = vcmp.gt.f32.partialorder %v380_v16, 0.0 }
  0xba   : > { %v513_v19 = vsel %vm449_vm0, %v397_v12, %v481_v14  ;;  %v474_v20 = vmul.f32 0.2, %v380_v16 }
  0xbb   : > { %v545_v21 = vpack.c.bf16 %v513_v19, %v513_v19  ;;  %v521_v22 = vsel %vm457_vm1, %v417_v13, %v489_v17  ;;  %v498_v23 = vsel %vm434_vm2, %v360_v15, %v466_v18 }
  0xbc   : > { %v553_v24 = vpack.c.bf16 %v521_v22, %v521_v22  ;;  %v530_v25 = vpack.c.bf16 %v498_v23, %v498_v23  ;;  %v506_v26 = vsel %vm442_vm4, %v380_v16, %v474_v20 }
  0xbd   : > { %578 = vst.msk [vmem:[%s884_s26 + $0x4c] sm:$0xf] %vm558_vm3, %v545_v21  ;;  %v538_v27 = vpack.c.bf16 %v506_v26, %v506_v26 }
  0xbe   : > { %586 = vst.msk [vmem:[%s884_s26 + $0x6c] sm:$0xf] %vm558_vm3, %v553_v24 }
  0xbf   : > { %563 = vst.msk [vmem:[%s884_s26 + $0x10] sm:$0xf] %vm558_vm3, %v530_v25  ;;  %v400_v28 = vpop.f32.mrf.mxu2  ;;  %v420_v29 = vpop.f32.mrf.mxu3 }
  0xc0   : > { %571 = vst.msk [vmem:[%s884_s26 + $0x30] sm:$0xf] %vm558_vm3, %v538_v27  ;;  %vm450_vm5 = vcmp.gt.f32.partialorder %v400_v28, 0.0  ;;  %v482_v30 = vmul.f32 0.2, %v400_v28  ;;  %vm458_vm6 = vcmp.gt.f32.partialorder %v420_v29, 0.0  ;;  %v362_v31 = vpop.f32.mrf.mxu0  ;;  %v382_v32 = vpop.f32.mrf.mxu1 }
  0xc1   : > { %v490_v33 = vmul.f32 0.2, %v420_v29  ;;  %vm435_vm7 = vcmp.gt.f32.partialorder %v362_v31, 0.0  ;;  %v467_v34 = vmul.f32 0.2, %v362_v31  ;;  %vm443_vm8 = vcmp.gt.f32.partialorder %v382_v32, 0.0 }
  0xc2   : > { %v514_v35 = vsel %vm450_vm5, %v400_v28, %v482_v30  ;;  %v475_v36 = vmul.f32 0.2, %v382_v32 }
  0xc3   : > { %v546_v37 = vpack.c.bf16 %v514_v35, %v514_v35  ;;  %v522_v38 = vsel %vm458_vm6, %v420_v29, %v490_v33  ;;  %v499_v39 = vsel %vm435_vm7, %v362_v31, %v467_v34 }
  0xc4   : > { %v554_v40 = vpack.c.bf16 %v522_v38, %v522_v38  ;;  %v531_v41 = vpack.c.bf16 %v499_v39, %v499_v39  ;;  %v507_v42 = vsel %vm443_vm8, %v382_v32, %v475_v36 }
  0xc5   : > { %579 = vst.msk [vmem:[%s884_s26 + $0x50] sm:$0xf] %vm558_vm3, %v546_v37  ;;  %v539_v43 = vpack.c.bf16 %v507_v42, %v507_v42 }
  0xc6   : > { %587 = vst.msk [vmem:[%s884_s26 + $0x70] sm:$0xf] %vm558_vm3, %v554_v40 }
  0xc7   : > { %564 = vst.msk [vmem:[%s884_s26 + $0x14] sm:$0xf] %vm558_vm3, %v531_v41  ;;  %v402_v44 = vpop.f32.mrf.mxu2  ;;  %v422_v45 = vpop.f32.mrf.mxu3 }
  0xc8   : > { %572 = vst.msk [vmem:[%s884_s26 + $0x34] sm:$0xf] %vm558_vm3, %v539_v43  ;;  %vm451_vm9 = vcmp.gt.f32.partialorder %v402_v44, 0.0  ;;  %v483_v46 = vmul.f32 0.2, %v402_v44  ;;  %vm459_vm10 = vcmp.gt.f32.partialorder %v422_v45, 0.0  ;;  %v365_v47 = vpop.f32.mrf.mxu0  ;;  %v385_v48 = vpop.f32.mrf.mxu1 }
  0xc9   : > { %v491_v49 = vmul.f32 0.2, %v422_v45  ;;  %vm436_vm11 = vcmp.gt.f32.partialorder %v365_v47, 0.0  ;;  %v468_v50 = vmul.f32 0.2, %v365_v47  ;;  %vm444_vm12 = vcmp.gt.f32.partialorder %v385_v48, 0.0 }
  0xca   : > { %v515_v51 = vsel %vm451_vm9, %v402_v44, %v483_v46  ;;  %v476_v52 = vmul.f32 0.2, %v385_v48 }
  0xcb   : > { %v547_v53 = vpack.c.bf16 %v515_v51, %v515_v51  ;;  %v523_v54 = vsel %vm459_vm10, %v422_v45, %v491_v49  ;;  %v500_v55 = vsel %vm436_vm11, %v365_v47, %v468_v50 }
  0xcc   : > { %v555_v56 = vpack.c.bf16 %v523_v54, %v523_v54  ;;  %v532_v57 = vpack.c.bf16 %v500_v55, %v500_v55  ;;  %v508_v58 = vsel %vm444_vm12, %v385_v48, %v476_v52 }
  0xcd   : > { %580 = vst.msk [vmem:[%s884_s26 + $0x54] sm:$0xf] %vm558_vm3, %v547_v53  ;;  %v540_v59 = vpack.c.bf16 %v508_v58, %v508_v58 }
  0xce   : > { %588 = vst.msk [vmem:[%s884_s26 + $0x74] sm:$0xf] %vm558_vm3, %v555_v56 }
  0xcf   : > { %565 = vst.msk [vmem:[%s884_s26 + $0x18] sm:$0xf] %vm558_vm3, %v532_v57  ;;  %v405_v60 = vpop.f32.mrf.mxu2  ;;  %v425_v61 = vpop.f32.mrf.mxu3 }
  0xd0   : > { %573 = vst.msk [vmem:[%s884_s26 + $0x38] sm:$0xf] %vm558_vm3, %v540_v59  ;;  %vm452_vm13 = vcmp.gt.f32.partialorder %v405_v60, 0.0  ;;  %v484_v62 = vmul.f32 0.2, %v405_v60  ;;  %vm460_vm14 = vcmp.gt.f32.partialorder %v425_v61, 0.0  ;;  %v367_v63 = vpop.f32.mrf.mxu0  ;;  %v387_v0 = vpop.f32.mrf.mxu1 }
  0xd1   : > { %v492_v1 = vmul.f32 0.2, %v425_v61  ;;  %vm437_vm15 = vcmp.gt.f32.partialorder %v367_v63, 0.0  ;;  %v469_v2 = vmul.f32 0.2, %v367_v63  ;;  %vm445_vm0 = vcmp.gt.f32.partialorder %v387_v0, 0.0 }
  0xd2   : > { %v516_v3 = vsel %vm452_vm13, %v405_v60, %v484_v62  ;;  %v477_v4 = vmul.f32 0.2, %v387_v0 }
  0xd3   : > { %v548_v5 = vpack.c.bf16 %v516_v3, %v516_v3  ;;  %v524_v6 = vsel %vm460_vm14, %v425_v61, %v492_v1  ;;  %v501_v7 = vsel %vm437_vm15, %v367_v63, %v469_v2 }
  0xd4   : > { %v556_v8 = vpack.c.bf16 %v524_v6, %v524_v6  ;;  %v533_v9 = vpack.c.bf16 %v501_v7, %v501_v7  ;;  %v509_v10 = vsel %vm445_vm0, %v387_v0, %v477_v4 }
  0xd5   : > { %581 = vst.msk [vmem:[%s884_s26 + $0x58] sm:$0xf] %vm558_vm3, %v548_v5  ;;  %v541_v11 = vpack.c.bf16 %v509_v10, %v509_v10 }
  0xd6   : > { %589 = vst.msk [vmem:[%s884_s26 + $0x78] sm:$0xf] %vm558_vm3, %v556_v8 }
  0xd7   : > { %566 = vst.msk [vmem:[%s884_s26 + $0x1c] sm:$0xf] %vm558_vm3, %v533_v9  ;;  %v407_v12 = vpop.f32.mrf.mxu2  ;;  %v427_v13 = vpop.f32.mrf.mxu3 }
  0xd8   : > { %574 = vst.msk [vmem:[%s884_s26 + $0x3c] sm:$0xf] %vm558_vm3, %v541_v11  ;;  %vm453_vm1 = vcmp.gt.f32.partialorder %v407_v12, 0.0  ;;  %v485_v14 = vmul.f32 0.2, %v407_v12  ;;  %vm461_vm2 = vcmp.gt.f32.partialorder %v427_v13, 0.0 }
  0xd9   : > { %v493_v15 = vmul.f32 0.2, %v427_v13 }
  0xda   : > { %v517_v16 = vsel %vm453_vm1, %v407_v12, %v485_v14 }
  0xdb   : > { %v549_v17 = vpack.c.bf16 %v517_v16, %v517_v16  ;;  %v525_v18 = vsel %vm461_vm2, %v427_v13, %v493_v15 }
  0xdc   : > { %v557_v19 = vpack.c.bf16 %v525_v18, %v525_v18 }
  0xdd   : > { %582 = vst.msk [vmem:[%s884_s26 + $0x5c] sm:$0xf] %vm558_vm3, %v549_v17 }
  0xde   : > { %590 = vst.msk [vmem:[%s884_s26 + $0x7c] sm:$0xf] %vm558_vm3, %v557_v19 }
  0xdf PF: > { %s12_s9 = sadd.s32 1, %s800_s9  }
  0xe0   : > { %p9_p4 = scmp.ge.s32.totalorder %s12_s9, 10  }
  0xe2   :  { %11 = sbr.rel (!%p9_p4) target bundleno = 1 (0x1), region = 58 }

// kernel: discriminator_forward.6
= control target key start
LH: loop header
LB: loop body
LE: loop exit
PB: predicated region body
PF: predicated region fallthrough
CT: control target
= control target key end

     0   :  { %s9861_s1 = inlined_call_operand.vmem [shape: bf16[1024,128], index: 1, kind: input, shape index: {}]   ;;  %s9862_s0 = inlined_call_operand.vmem [shape: bf16[512,1024], index: 0, kind: input, shape index: {}]   ;;  %s9863_s3 = inlined_call_operand.vmem [shape: f32[1,128], index: 3, kind: input, shape index: {}]   ;;  %s9864_s2 = inlined_call_operand.vmem [shape: f32[1,128], index: 2, kind: input, shape index: {}]   ;;  %s9865_s4 = inlined_call_operand.vmem [shape: bf16[512,128], index: 4, kind: output, shape index: {}]  }
   0x1   :  { %v6027_v0 = vld [vmem:[%s9861_s1 + $0x38] sm:$0xff]  ;;  %v6026_v4 = vld [vmem:[%s9861_s1 + $0x30] sm:$0xff]  ;;  %v6025_v8 = vld [vmem:[%s9861_s1 + $0x28] sm:$0xff] }
   0x2   :  { %v6035_v1 = vld [vmem:[%s9861_s1 + $0x78] sm:$0xff]  ;;  %2197 = vmatpush.bf16.msra.mxu0 %v6027_v0  ;;  %v6034_v5 = vld [vmem:[%s9861_s1 + $0x70] sm:$0xff]  ;;  %v6033_v9 = vld [vmem:[%s9861_s1 + $0x68] sm:$0xff] }
   0x3   :  { %v6043_v2 = vld [vmem:[%s9861_s1 + $0xb8] sm:$0xff]  ;;  %2366 = vmatpush.bf16.msra.mxu1 %v6035_v1  ;;  %v6042_v6 = vld [vmem:[%s9861_s1 + $0xb0] sm:$0xff]  ;;  %v6041_v10 = vld [vmem:[%s9861_s1 + $0xa8] sm:$0xff] }
   0x4   :  { %v6051_v3 = vld [vmem:[%s9861_s1 + $0xf8] sm:$0xff]  ;;  %2535 = vmatpush.bf16.msra.mxu2 %v6043_v2  ;;  %v6050_v7 = vld [vmem:[%s9861_s1 + $0xf0] sm:$0xff]  ;;  %v6049_v11 = vld [vmem:[%s9861_s1 + $0xe8] sm:$0xff] }
   0x5   :  { %2704 = vmatpush.bf16.msra.mxu3 %v6051_v3  ;;  %v6024_v12 = vld [vmem:[%s9861_s1 + $0x20] sm:$0xff]  ;;  %v6023_v16 = vld [vmem:[%s9861_s1 + $0x18] sm:$0xff]  ;;  %v6022_v20 = vld [vmem:[%s9861_s1 + $0x10] sm:$0xff] }
   0x6   :  { %2198 = vmatpush.bf16.msra.mxu0 %v6026_v4  ;;  %v6032_v13 = vld [vmem:[%s9861_s1 + $0x60] sm:$0xff]  ;;  %v6031_v17 = vld [vmem:[%s9861_s1 + $0x58] sm:$0xff]  ;;  %v6030_v21 = vld [vmem:[%s9861_s1 + $0x50] sm:$0xff] }
   0x7   :  { %2367 = vmatpush.bf16.msra.mxu1 %v6034_v5  ;;  %v6040_v14 = vld [vmem:[%s9861_s1 + $0xa0] sm:$0xff]  ;;  %v6039_v18 = vld [vmem:[%s9861_s1 + $0x98] sm:$0xff]  ;;  %v6038_v22 = vld [vmem:[%s9861_s1 + $0x90] sm:$0xff] }
   0x8   :  { %2536 = vmatpush.bf16.msra.mxu2 %v6042_v6  ;;  %v6048_v15 = vld [vmem:[%s9861_s1 + $0xe0] sm:$0xff]  ;;  %v6047_v19 = vld [vmem:[%s9861_s1 + $0xd8] sm:$0xff]  ;;  %v6046_v23 = vld [vmem:[%s9861_s1 + $0xd0] sm:$0xff] }
   0x9   :  { %2705 = vmatpush.bf16.msra.mxu3 %v6050_v7  ;;  %v6021_v24 = vld [vmem:[%s9861_s1 + $0x8] sm:$0xff]  ;;  %v6020_v28 = vld [vmem:[%s9861_s1] sm:$0xff]  ;;  %v6075_v40 = vld [vmem:[%s9861_s1 + $0x1b8] sm:$0xff] }
   0xa   :  { %2199 = vmatpush.bf16.msra.mxu0 %v6025_v8  ;;  %v6029_v25 = vld [vmem:[%s9861_s1 + $0x48] sm:$0xff]  ;;  %v6028_v29 = vld [vmem:[%s9861_s1 + $0x40] sm:$0xff]  ;;  %v6059_v41 = vld [vmem:[%s9861_s1 + $0x138] sm:$0xff] }
   0xb   :  { %2368 = vmatpush.bf16.msra.mxu1 %v6033_v9  ;;  %v6037_v26 = vld [vmem:[%s9861_s1 + $0x88] sm:$0xff]  ;;  %v6036_v30 = vld [vmem:[%s9861_s1 + $0x80] sm:$0xff]  ;;  %v6083_v46 = vld [vmem:[%s9861_s1 + $0x1f8] sm:$0xff] }
   0xc   :  { %2537 = vmatpush.bf16.msra.mxu2 %v6041_v10  ;;  %v6045_v27 = vld [vmem:[%s9861_s1 + $0xc8] sm:$0xff]  ;;  %v6044_v31 = vld [vmem:[%s9861_s1 + $0xc0] sm:$0xff]  ;;  %v6067_v47 = vld [vmem:[%s9861_s1 + $0x178] sm:$0xff] }
   0xd   :  { %2706 = vmatpush.bf16.msra.mxu3 %v6049_v11  ;;  %v4486_v32 = vld [vmem:[%s9862_s0] sm:$0xf]  ;;  %v5764_v34 = vld [vmem:[%s9862_s0 + $0x4] sm:$0xf]  ;;  %v4494_v36 = vld [vmem:[%s9862_s0 + $0x8] sm:$0xf] }
   0xe   :  { %2200 = vmatpush.bf16.msra.mxu0 %v6024_v12  ;;  %v5768_v33 = vld [vmem:[%s9862_s0 + $0x1c] sm:$0xf0]  ;;  %v4488_v35 = vld [vmem:[%s9862_s0 + $0x20] sm:$0xf0]  ;;  %v5769_v37 = vld [vmem:[%s9862_s0 + $0x24] sm:$0xf0] }
   0xf   :  { %2369 = vmatpush.bf16.msra.mxu1 %v6032_v13  ;;  %v5765_v38 = vld [vmem:[%s9862_s0 + $0xc] sm:$0xf]  ;;  %v4487_v42 = vor.u32 %v5768_v33, %v4486_v32  ;;  %v4491_v43 = vor.u32 %v5764_v34, %v4488_v35  ;;  %v4495_v44 = vor.u32 %v5769_v37, %v4494_v36  ;;  %v4518_v48 = vld [vmem:[%s9862_s0 + $0x40] sm:$0xf]  ;;  %v5772_v50 = vld [vmem:[%s9862_s0 + $0x44] sm:$0xf] }
  0x10   :  { %2538 = vmatpush.bf16.msra.mxu2 %v6040_v14  ;;  %v4496_v39 = vld [vmem:[%s9862_s0 + $0x28] sm:$0xf0]  ;;  %v5776_v49 = vld [vmem:[%s9862_s0 + $0x5c] sm:$0xf0]  ;;  %v4520_v51 = vld [vmem:[%s9862_s0 + $0x60] sm:$0xf0] }
  0x11   :  { %2707 = vmatpush.bf16.msra.mxu3 %v6048_v15  ;;  %v4499_v45 = vor.u32 %v5765_v38, %v4496_v39  ;;  %v4526_v52 = vld [vmem:[%s9862_s0 + $0x48] sm:$0xf]  ;;  %v5773_v54 = vld [vmem:[%s9862_s0 + $0x4c] sm:$0xf]  ;;  %v4519_v56 = vor.u32 %v5776_v49, %v4518_v48  ;;  %v4523_v57 = vor.u32 %v5772_v50, %v4520_v51  ;;  %v4550_v60 = vld [vmem:[%s9862_s0 + $0x80] sm:$0xf] }
  0x12   :  { %2201 = vmatpush.bf16.msra.mxu0 %v6023_v16  ;;  %v5777_v53 = vld [vmem:[%s9862_s0 + $0x64] sm:$0xf0]  ;;  %v4528_v55 = vld [vmem:[%s9862_s0 + $0x68] sm:$0xf0]  ;;  %v5784_v61 = vld [vmem:[%s9862_s0 + $0x9c] sm:$0xf0] }
  0x13   :  { %2370 = vmatpush.bf16.msra.mxu1 %v6031_v17  ;;  %v4527_v58 = vor.u32 %v5777_v53, %v4526_v52  ;;  %v4531_v59 = vor.u32 %v5773_v54, %v4528_v55  ;;  %v5780_v62 = vld [vmem:[%s9862_s0 + $0x84] sm:$0xf]  ;;  %v4558_v0 = vld [vmem:[%s9862_s0 + $0x88] sm:$0xf]  ;;  %v5781_v2 = vld [vmem:[%s9862_s0 + $0x8c] sm:$0xf]  ;;  %v4551_v4 = vor.u32 %v5784_v61, %v4550_v60 }
  0x14   :  { %2539 = vmatpush.bf16.msra.mxu2 %v6039_v18  ;;  %v4552_v63 = vld [vmem:[%s9862_s0 + $0xa0] sm:$0xf0]  ;;  %v5785_v1 = vld [vmem:[%s9862_s0 + $0xa4] sm:$0xf0]  ;;  %v4560_v3 = vld [vmem:[%s9862_s0 + $0xa8] sm:$0xf0] }
  0x15   :  { %2708 = vmatpush.bf16.msra.mxu3 %v6047_v19  ;;  %v4555_v5 = vor.u32 %v5780_v62, %v4552_v63  ;;  %v4559_v6 = vor.u32 %v5785_v1, %v4558_v0  ;;  %v4563_v7 = vor.u32 %v5781_v2, %v4560_v3  ;;  %v6074_v8 = vld [vmem:[%s9861_s1 + $0x1b0] sm:$0xff]  ;;  %v4582_v12 = vld [vmem:[%s9862_s0 + $0xc0] sm:$0xf]  ;;  %v5788_v14 = vld [vmem:[%s9862_s0 + $0xc4] sm:$0xf] }
  0x16   :  { %2202 = vmatpush.bf16.msra.mxu0 %v6022_v20  ;;  %v6058_v9 = vld [vmem:[%s9861_s1 + $0x130] sm:$0xff]  ;;  %v5792_v13 = vld [vmem:[%s9862_s0 + $0xdc] sm:$0xf0]  ;;  %v4584_v15 = vld [vmem:[%s9862_s0 + $0xe0] sm:$0xf0] }
  0x17   :  { %2371 = vmatpush.bf16.msra.mxu1 %v6030_v21  ;;  %v6082_v10 = vld [vmem:[%s9861_s1 + $0x1f0] sm:$0xff]  ;;  %v4590_v16 = vld [vmem:[%s9862_s0 + $0xc8] sm:$0xf]  ;;  %v5789_v18 = vld [vmem:[%s9862_s0 + $0xcc] sm:$0xf]  ;;  %v4583_v20 = vor.u32 %v5792_v13, %v4582_v12  ;;  %v4587_v21 = vor.u32 %v5788_v14, %v4584_v15 }
  0x18   :  { %2540 = vmatpush.bf16.msra.mxu2 %v6038_v22  ;;  %v6066_v11 = vld [vmem:[%s9861_s1 + $0x170] sm:$0xff]  ;;  %v5793_v17 = vld [vmem:[%s9862_s0 + $0xe4] sm:$0xf0]  ;;  %v4592_v19 = vld [vmem:[%s9862_s0 + $0xe8] sm:$0xf0] }
  0x19   :  { %2709 = vmatpush.bf16.msra.mxu3 %v6046_v23  ;;  %v4591_v22 = vor.u32 %v5793_v17, %v4590_v16  ;;  %v4595_v23 = vor.u32 %v5789_v18, %v4592_v19  ;;  %v4646_v36 = vld [vmem:[%s9862_s0 + $0x140] sm:$0xf]  ;;  %v5804_v38 = vld [vmem:[%s9862_s0 + $0x144] sm:$0xf]  ;;  %v4686_v52 = vld [vmem:[%s9862_s0 + $0x188] sm:$0xf] }
  0x1a   :  { %2203 = vmatpush.bf16.msra.mxu0 %v6021_v24  ;;  %v4614_v24 = vld [vmem:[%s9862_s0 + $0x100] sm:$0xf]  ;;  %v4648_v39 = vld [vmem:[%s9862_s0 + $0x160] sm:$0xf0]  ;;  %v5817_v53 = vld [vmem:[%s9862_s0 + $0x1a4] sm:$0xf0] }
  0x1b   :  { %2372 = vmatpush.bf16.msra.mxu1 %v6029_v25  ;;  %v5800_v25 = vld [vmem:[%s9862_s0 + $0x11c] sm:$0xf0]  ;;  %v5812_v50 = vld [vmem:[%s9862_s0 + $0x184] sm:$0xf]  ;;  %v5813_v54 = vld [vmem:[%s9862_s0 + $0x18c] sm:$0xf] }
  0x1c   :  { %2541 = vmatpush.bf16.msra.mxu2 %v6037_v26  ;;  %v5796_v26 = vld [vmem:[%s9862_s0 + $0x104] sm:$0xf]  ;;  %v4615_v32 = vor.u32 %v5800_v25, %v4614_v24  ;;  %v5808_v37 = vld [vmem:[%s9862_s0 + $0x15c] sm:$0xf0]  ;;  %v4688_v55 = vld [vmem:[%s9862_s0 + $0x1a8] sm:$0xf0] }
  0x1d   :  { %2710 = vmatpush.bf16.msra.mxu3 %v6045_v27  ;;  %v4616_v27 = vld [vmem:[%s9862_s0 + $0x120] sm:$0xf0]  ;;  %v4678_v48 = vld [vmem:[%s9862_s0 + $0x180] sm:$0xf]  ;;  %v6073_v60 = vld [vmem:[%s9861_s1 + $0x1a8] sm:$0xff] }
  0x1e   :  { %2204 = vmatpush.bf16.msra.mxu0 %v6020_v28  ;;  %v4622_v28 = vld [vmem:[%s9862_s0 + $0x108] sm:$0xf]  ;;  %v4619_v33 = vor.u32 %v5796_v26, %v4616_v27  ;;  %v5816_v49 = vld [vmem:[%s9862_s0 + $0x19c] sm:$0xf0]  ;;  %v4680_v51 = vld [vmem:[%s9862_s0 + $0x1a0] sm:$0xf0] }
  0x1f   :  { %2373 = vmatpush.bf16.msra.mxu1 %v6028_v29  ;;  %v5801_v29 = vld [vmem:[%s9862_s0 + $0x124] sm:$0xf0]  ;;  %v4710_v0 = vld [vmem:[%s9862_s0 + $0x1c0] sm:$0xf]  ;;  %v5820_v2 = vld [vmem:[%s9862_s0 + $0x1c4] sm:$0xf] }
  0x20   :  { %2542 = vmatpush.bf16.msra.mxu2 %v6036_v30  ;;  %v5797_v30 = vld [vmem:[%s9862_s0 + $0x10c] sm:$0xf]  ;;  %v4623_v34 = vor.u32 %v5801_v29, %v4622_v28  ;;  %v5824_v1 = vld [vmem:[%s9862_s0 + $0x1dc] sm:$0xf0]  ;;  %v4712_v3 = vld [vmem:[%s9862_s0 + $0x1e0] sm:$0xf0] }
  0x21   :  { %2711 = vmatpush.bf16.msra.mxu3 %v6044_v31  ;;  %2205 = vmatmul.bf16.vlgmr.msra.gmra.mxu0 %v4487_v42  ;;  %v4624_v31 = vld [vmem:[%s9862_s0 + $0x128] sm:$0xf0]  ;;  %v4742_v12 = vld [vmem:[%s9862_s0 + $0x200] sm:$0xf]  ;;  %v5828_v14 = vld [vmem:[%s9862_s0 + $0x204] sm:$0xf] }
  0x22   :  { %2873 = vmatpush.bf16.msrb.mxu0 %v6059_v41  ;;  %2374 = vmatmul.bf16.vlgmr.msra.gmra.mxu1 %v4491_v43  ;;  %v4627_v35 = vor.u32 %v5797_v30, %v4624_v31  ;;  %v5809_v41 = vld [vmem:[%s9862_s0 + $0x164] sm:$0xf0]  ;;  %v5805_v42 = vld [vmem:[%s9862_s0 + $0x14c] sm:$0xf]  ;;  %v5832_v13 = vld [vmem:[%s9862_s0 + $0x21c] sm:$0xf0] }
  0x23   :  { %2543 = vmatmul.bf16.vlgmr.msra.gmra.mxu2 %v4495_v44  ;;  %3042 = vmatpush.bf16.msrb.mxu1 %v6067_v47  ;;  %v4656_v43 = vld [vmem:[%s9862_s0 + $0x168] sm:$0xf0]  ;;  %v4647_v44 = vor.u32 %v5808_v37, %v4646_v36  ;;  %v4744_v15 = vld [vmem:[%s9862_s0 + $0x220] sm:$0xf0]  ;;  %v4750_v16 = vld [vmem:[%s9862_s0 + $0x208] sm:$0xf] }
  0x24   :  { %3211 = vmatpush.bf16.msrb.mxu2 %v6075_v40  ;;  %2712 = vmatmul.bf16.vlgmr.msra.gmra.mxu3 %v4499_v45  ;;  %v4654_v40 = vld [vmem:[%s9862_s0 + $0x148] sm:$0xf]  ;;  %v4651_v45 = vor.u32 %v5804_v38, %v4648_v39  ;;  %v4659_v47 = vor.u32 %v5805_v42, %v4656_v43  ;;  %v5829_v18 = vld [vmem:[%s9862_s0 + $0x20c] sm:$0xf]  ;;  %v5836_v36 = vld [vmem:[%s9862_s0 + $0x244] sm:$0xf] }
  0x25   :  { %3380 = vmatpush.bf16.msrb.mxu3 %v6083_v46  ;;  %v4655_v46 = vor.u32 %v5809_v41, %v4654_v40  ;;  %v6057_v61 = vld [vmem:[%s9861_s1 + $0x128] sm:$0xff]  ;;  %v4776_v37 = vld [vmem:[%s9862_s0 + $0x260] sm:$0xf0] }
  0x26   :  { %2874 = vmatpush.bf16.msrb.mxu0 %v6058_v9  ;;  %v6081_v62 = vld [vmem:[%s9861_s1 + $0x1e8] sm:$0xff]  ;;  %v4715_v9 = vor.u32 %v5820_v2, %v4712_v3 }
  0x27   :  { %3043 = vmatpush.bf16.msrb.mxu1 %v6066_v11  ;;  %v6065_v63 = vld [vmem:[%s9861_s1 + $0x168] sm:$0xff] }
  0x28   :  { %3212 = vmatpush.bf16.msrb.mxu2 %v6074_v8  ;;  %v4711_v8 = vor.u32 %v5824_v1, %v4710_v0  ;;  %v5833_v17 = vld [vmem:[%s9862_s0 + $0x224] sm:$0xf0]  ;;  %v4752_v19 = vld [vmem:[%s9862_s0 + $0x228] sm:$0xf0] }
  0x29   :  { %3381 = vmatpush.bf16.msrb.mxu3 %v6082_v10  ;;  %v4751_v24 = vor.u32 %v5833_v17, %v4750_v16  ;;  %v4755_v25 = vor.u32 %v5829_v18, %v4752_v19  ;;  %v4782_v38 = vld [vmem:[%s9862_s0 + $0x248] sm:$0xf]  ;;  %v5837_v40 = vld [vmem:[%s9862_s0 + $0x24c] sm:$0xf]  ;;  %v6056_v16 = vld [vmem:[%s9861_s1 + $0x120] sm:$0xff] }
  0x2a   :  { %2875 = vmatpush.bf16.msrb.mxu0 %v6057_v61  ;;  %v5841_v39 = vld [vmem:[%s9862_s0 + $0x264] sm:$0xf0]  ;;  %v4784_v41 = vld [vmem:[%s9862_s0 + $0x268] sm:$0xf0]  ;;  %v5848_v61 = vld [vmem:[%s9862_s0 + $0x29c] sm:$0xf0] }
  0x2b   :  { %3044 = vmatpush.bf16.msrb.mxu1 %v6065_v63  ;;  %v4808_v63 = vld [vmem:[%s9862_s0 + $0x2a0] sm:$0xf0]  ;;  %v4814_v0 = vld [vmem:[%s9862_s0 + $0x288] sm:$0xf]  ;;  %v5845_v2 = vld [vmem:[%s9862_s0 + $0x28c] sm:$0xf] }
  0x2c   :  { %3213 = vmatpush.bf16.msrb.mxu2 %v6073_v60  ;;  %v4806_v60 = vld [vmem:[%s9862_s0 + $0x280] sm:$0xf]  ;;  %v5849_v1 = vld [vmem:[%s9862_s0 + $0x2a4] sm:$0xf0]  ;;  %v4816_v3 = vld [vmem:[%s9862_s0 + $0x2a8] sm:$0xf0] }
  0x2d   :  { %3382 = vmatpush.bf16.msrb.mxu3 %v6081_v62  ;;  %v5844_v62 = vld [vmem:[%s9862_s0 + $0x284] sm:$0xf] }
  0x2e   :  { %v6080_v17 = vld [vmem:[%s9861_s1 + $0x1e0] sm:$0xff]  ;;  %2876 = vmatpush.bf16.msrb.mxu0 %v6056_v16 }
  0x31   :  { %2210 = vmatmul.bf16.gmra.mxu0 %v4519_v56  ;;  %v4679_v56 = vor.u32 %v5816_v49, %v4678_v48  ;;  %v4783_v49 = vor.u32 %v5841_v39, %v4782_v38  ;;  %3383 = vmatpush.bf16.msrb.mxu3 %v6080_v17 }
  0x32   :  { %2379 = vmatmul.bf16.gmra.mxu1 %v4523_v57  ;;  %v4683_v57 = vor.u32 %v5812_v50, %v4680_v51  ;;  %v4787_v50 = vor.u32 %v5837_v40, %v4784_v41 }
  0x33   :  { %2548 = vmatmul.bf16.gmra.mxu2 %v4527_v58  ;;  %v4687_v58 = vor.u32 %v5817_v53, %v4686_v52 }
  0x34   :  { %2717 = vmatmul.bf16.gmra.mxu3 %v4531_v59  ;;  %v4691_v59 = vor.u32 %v5813_v54, %v4688_v55 }
  0x41   :  { %2215 = vmatmul.bf16.gmra.mxu0 %v4551_v4  ;;  %v4718_v4 = vld [vmem:[%s9862_s0 + $0x1c8] sm:$0xf] }
  0x42   :  { %2384 = vmatmul.bf16.gmra.mxu1 %v4555_v5  ;;  %v5825_v5 = vld [vmem:[%s9862_s0 + $0x1e4] sm:$0xf0] }
  0x43   :  { %2553 = vmatmul.bf16.gmra.mxu2 %v4559_v6  ;;  %v5821_v6 = vld [vmem:[%s9862_s0 + $0x1cc] sm:$0xf]  ;;  %v4719_v10 = vor.u32 %v5825_v5, %v4718_v4 }
  0x44   :  { %2722 = vmatmul.bf16.gmra.mxu3 %v4563_v7  ;;  %v4720_v7 = vld [vmem:[%s9862_s0 + $0x1e8] sm:$0xf0] }
  0x45   :  { %v4723_v11 = vor.u32 %v5821_v6, %v4720_v7  ;;  %v4807_v6 = vor.u32 %v5848_v61, %v4806_v60  ;;  %v4811_v7 = vor.u32 %v5844_v62, %v4808_v63  ;;  %v5865_v60 = vld [vmem:[%s9862_s0 + $0x324] sm:$0xf0]  ;;  %v5861_v61 = vld [vmem:[%s9862_s0 + $0x30c] sm:$0xf] }
  0x46   :  { %v4880_v62 = vld [vmem:[%s9862_s0 + $0x328] sm:$0xf0] }
  0x51   :  { %2220 = vmatmul.bf16.gmra.mxu0 %v4583_v20  ;;  %v4743_v20 = vor.u32 %v5832_v13, %v4742_v12  ;;  %v4819_v12 = vor.u32 %v5845_v2, %v4816_v3 }
  0x52   :  { %2389 = vmatmul.bf16.gmra.mxu1 %v4587_v21  ;;  %v4747_v21 = vor.u32 %v5828_v14, %v4744_v15  ;;  %v6072_v15 = vld [vmem:[%s9861_s1 + $0x1a0] sm:$0xff] }
  0x53   :  { %2558 = vmatmul.bf16.gmra.mxu2 %v4591_v22 }
  0x54   :  { %2727 = vmatmul.bf16.gmra.mxu3 %v4595_v23  ;;  %3214 = vmatpush.bf16.msrb.mxu2 %v6072_v15 }
  0x61   :  { %2225 = vmatmul.bf16.gmra.mxu0 %v4615_v32 }
  0x62   :  { %2394 = vmatmul.bf16.gmra.mxu1 %v4619_v33 }
  0x63   :  { %2563 = vmatmul.bf16.gmra.mxu2 %v4623_v34  ;;  %v4774_v34 = vld [vmem:[%s9862_s0 + $0x240] sm:$0xf] }
  0x64   :  { %2732 = vmatmul.bf16.gmra.mxu3 %v4627_v35  ;;  %v5840_v35 = vld [vmem:[%s9862_s0 + $0x25c] sm:$0xf0] }
  0x71   :  { %2230 = vmatmul.bf16.gmra.mxu0 %v4647_v44  ;;  %v4775_v44 = vor.u32 %v5840_v35, %v4774_v34  ;;  %v4848_v34 = vld [vmem:[%s9862_s0 + $0x2e8] sm:$0xf0] }
  0x72   :  { %2399 = vmatmul.bf16.gmra.mxu1 %v4651_v45  ;;  %v4779_v45 = vor.u32 %v5836_v36, %v4776_v37 }
  0x73   :  { %2568 = vmatmul.bf16.gmra.mxu2 %v4655_v46 }
  0x74   :  { %2737 = vmatmul.bf16.gmra.mxu3 %v4659_v47 }
  0x81   :  { %2235 = vmatmul.bf16.gmra.mxu0 %v4679_v56 }
  0x82   :  { %2404 = vmatmul.bf16.gmra.mxu1 %v4683_v57 }
  0x83   :  { %2573 = vmatmul.bf16.gmra.mxu2 %v4687_v58 }
  0x84   :  { %2742 = vmatmul.bf16.gmra.mxu3 %v4691_v59 }
  0x91   :  { %2240 = vmatmul.bf16.gmra.mxu0 %v4711_v8 }
  0x92   :  { %2409 = vmatmul.bf16.gmra.mxu1 %v4715_v9 }
  0x93   :  { %2578 = vmatmul.bf16.gmra.mxu2 %v4719_v10 }
  0x94   :  { %2747 = vmatmul.bf16.gmra.mxu3 %v4723_v11  ;;  %v4815_v11 = vor.u32 %v5849_v1, %v4814_v0 }
  0x9e   :  { %v2206_v22 = vpop.f32.mrf.mxu0 }
  0x9f   :  { %v2375_v23 = vpop.f32.mrf.mxu1 }
  0xa0   :  { %v2376_v26 = vadd.f32 %v2375_v23, %v2206_v22 }
  0xa1   :  { %2245 = vmatmul.bf16.gmra.mxu0 %v4743_v20 }
  0xa2   :  { %2414 = vmatmul.bf16.gmra.mxu1 %v4747_v21 }
  0xa3   :  { %2583 = vmatmul.bf16.gmra.mxu2 %v4751_v24 }
  0xa4   :  { %2752 = vmatmul.bf16.gmra.mxu3 %v4755_v25  ;;  %v6064_v25 = vld [vmem:[%s9861_s1 + $0x160] sm:$0xff] }
  0xa5   :  { %3045 = vmatpush.bf16.msrb.mxu1 %v6064_v25  ;;  %v5869_v25 = vld [vmem:[%s9862_s0 + $0x34c] sm:$0xf] }
  0xa6   :  { %v2544_v27 = vpop.f32.mrf.mxu2  ;;  %v2208_v30 = vpop.f32.mrf.mxu0 }
  0xa7   :  { %v2713_v28 = vpop.f32.mrf.mxu3  ;;  %v2545_v29 = vadd.f32 %v2544_v27, %v2376_v26  ;;  %v2377_v31 = vpop.f32.mrf.mxu1  ;;  %v4838_v26 = vld [vmem:[%s9862_s0 + $0x2c0] sm:$0xf] }
  0xa8   :  { %v2378_v32 = vadd.f32 %v2377_v31, %v2208_v30  ;;  %v5856_v27 = vld [vmem:[%s9862_s0 + $0x2dc] sm:$0xf0]  ;;  %v4846_v30 = vld [vmem:[%s9862_s0 + $0x2c8] sm:$0xf] }
  0xa9   :  { %v6651_v33 = vadd.f32 %v2713_v28, %v2545_v29  ;;  %v5852_v28 = vld [vmem:[%s9862_s0 + $0x2c4] sm:$0xf]  ;;  %v5857_v31 = vld [vmem:[%s9862_s0 + $0x2e4] sm:$0xf0]  ;;  %v4839_v37 = vor.u32 %v5856_v27, %v4838_v26  ;;  %v4912_v26 = vld [vmem:[%s9862_s0 + $0x368] sm:$0xf0] }
  0xaa   :  { %v4840_v29 = vld [vmem:[%s9862_s0 + $0x2e0] sm:$0xf0] }
  0xab   :  { %v4843_v38 = vor.u32 %v5852_v28, %v4840_v29 }
  0xae   :  { %v2546_v42 = vpop.f32.mrf.mxu2  ;;  %v2211_v47 = vpop.f32.mrf.mxu0 }
  0xaf   :  { %v2715_v43 = vpop.f32.mrf.mxu3  ;;  %v2547_v46 = vadd.f32 %v2546_v42, %v2378_v32  ;;  %v2380_v48 = vpop.f32.mrf.mxu1  ;;  %v5853_v32 = vld [vmem:[%s9862_s0 + $0x2cc] sm:$0xf]  ;;  %v4847_v42 = vor.u32 %v5857_v31, %v4846_v30 }
  0xb0   :  { %v2381_v51 = vadd.f32 %v2380_v48, %v2211_v47 }
  0xb1   :  { %v6677_v52 = vadd.f32 %v2715_v43, %v2547_v46  ;;  %2250 = vmatmul.bf16.gmra.mxu0 %v4775_v44  ;;  %v4851_v43 = vor.u32 %v5853_v32, %v4848_v34 }
  0xb2   :  { %2419 = vmatmul.bf16.gmra.mxu1 %v4779_v45 }
  0xb3   :  { %2588 = vmatmul.bf16.gmra.mxu2 %v4783_v49 }
  0xb4   :  { %2757 = vmatmul.bf16.gmra.mxu3 %v4787_v50 }
  0xb6   :  { %v2549_v53 = vpop.f32.mrf.mxu2  ;;  %v2213_v56 = vpop.f32.mrf.mxu0 }
  0xb7   :  { %v2718_v54 = vpop.f32.mrf.mxu3  ;;  %v2550_v55 = vadd.f32 %v2549_v53, %v2381_v51  ;;  %v2382_v57 = vpop.f32.mrf.mxu1 }
  0xb8   :  { %v2383_v58 = vadd.f32 %v2382_v57, %v2213_v56  ;;  %v5860_v56 = vld [vmem:[%s9862_s0 + $0x304] sm:$0xf] }
  0xb9   :  { %v6679_v59 = vadd.f32 %v2718_v54, %v2550_v55  ;;  %v4870_v54 = vld [vmem:[%s9862_s0 + $0x300] sm:$0xf]  ;;  %v4872_v57 = vld [vmem:[%s9862_s0 + $0x320] sm:$0xf0] }
  0xba   :  { %v5864_v55 = vld [vmem:[%s9862_s0 + $0x31c] sm:$0xf0]  ;;  %v4875_v2 = vor.u32 %v5860_v56, %v4872_v57  ;;  %v4944_v56 = vld [vmem:[%s9862_s0 + $0x3a8] sm:$0xf0] }
  0xbb   :  { %v4871_v1 = vor.u32 %v5864_v55, %v4870_v54  ;;  %v5881_v54 = vld [vmem:[%s9862_s0 + $0x3a4] sm:$0xf0]  ;;  %v5877_v55 = vld [vmem:[%s9862_s0 + $0x38c] sm:$0xf] }
  0xbe   :  { %v2551_v4 = vpop.f32.mrf.mxu2  ;;  %v2216_v9 = vpop.f32.mrf.mxu0 }
  0xbf   :  { %v2720_v5 = vpop.f32.mrf.mxu3  ;;  %v2552_v8 = vadd.f32 %v2551_v4, %v2383_v58  ;;  %v2385_v10 = vpop.f32.mrf.mxu1  ;;  %v4878_v58 = vld [vmem:[%s9862_s0 + $0x308] sm:$0xf] }
  0xc0   :  { %v2386_v13 = vadd.f32 %v2385_v10, %v2216_v9 }
  0xc1   :  { %v6705_v14 = vadd.f32 %v2720_v5, %v2552_v8  ;;  %2255 = vmatmul.bf16.gmra.mxu0 %v4807_v6  ;;  %v4879_v6 = vor.u32 %v5865_v60, %v4878_v58 }
  0xc2   :  { %2424 = vmatmul.bf16.gmra.mxu1 %v4811_v7  ;;  %v4883_v7 = vor.u32 %v5861_v61, %v4880_v62 }
  0xc3   :  { %2593 = vmatmul.bf16.gmra.mxu2 %v4815_v11 }
  0xc4   :  { %2762 = vmatmul.bf16.gmra.mxu3 %v4819_v12 }
  0xc6   :  { %v2554_v18 = vpop.f32.mrf.mxu2  ;;  %v2218_v21 = vpop.f32.mrf.mxu0 }
  0xc7   :  { %v2723_v19 = vpop.f32.mrf.mxu3  ;;  %v2555_v20 = vadd.f32 %v2554_v18, %v2386_v13  ;;  %v2387_v22 = vpop.f32.mrf.mxu1  ;;  %v4902_v18 = vld [vmem:[%s9862_s0 + $0x340] sm:$0xf] }
  0xc8   :  { %v2388_v23 = vadd.f32 %v2387_v22, %v2218_v21  ;;  %v4904_v21 = vld [vmem:[%s9862_s0 + $0x360] sm:$0xf0]  ;;  %v4910_v22 = vld [vmem:[%s9862_s0 + $0x348] sm:$0xf] }
  0xc9   :  { %v6716_v24 = vadd.f32 %v2723_v19, %v2555_v20  ;;  %v5872_v19 = vld [vmem:[%s9862_s0 + $0x35c] sm:$0xf0]  ;;  %v5868_v20 = vld [vmem:[%s9862_s0 + $0x344] sm:$0xf] }
  0xca   :  { %v4903_v29 = vor.u32 %v5872_v19, %v4902_v18  ;;  %v4907_v30 = vor.u32 %v5868_v20, %v4904_v21  ;;  %v6063_v18 = vld [vmem:[%s9861_s1 + $0x158] sm:$0xff]  ;;  %v4966_v19 = vld [vmem:[%s9862_s0 + $0x3c0] sm:$0xf]  ;;  %v5884_v21 = vld [vmem:[%s9862_s0 + $0x3c4] sm:$0xf] }
  0xcb   :  { %v5888_v20 = vld [vmem:[%s9862_s0 + $0x3dc] sm:$0xf0]  ;;  %3046 = vmatpush.bf16.msrb.mxu1 %v6063_v18 }
  0xce   :  { %v2556_v35 = vpop.f32.mrf.mxu2  ;;  %v2221_v40 = vpop.f32.mrf.mxu0 }
  0xcf   :  { %v2725_v36 = vpop.f32.mrf.mxu3  ;;  %v2557_v39 = vadd.f32 %v2556_v35, %v2388_v23  ;;  %v2390_v41 = vpop.f32.mrf.mxu1  ;;  %v5873_v23 = vld [vmem:[%s9862_s0 + $0x364] sm:$0xf0] }
  0xd0   :  { %v2391_v44 = vadd.f32 %v2390_v41, %v2221_v40  ;;  %v4911_v35 = vor.u32 %v5873_v23, %v4910_v22  ;;  %v4968_v22 = vld [vmem:[%s9862_s0 + $0x3e0] sm:$0xf0]  ;;  %v4974_v23 = vld [vmem:[%s9862_s0 + $0x3c8] sm:$0xf] }
  0xd1   :  { %v6745_v45 = vadd.f32 %v2725_v36, %v2557_v39  ;;  %2260 = vmatmul.bf16.gmra.mxu0 %v4839_v37  ;;  %v4915_v36 = vor.u32 %v5869_v25, %v4912_v26  ;;  %v5889_v25 = vld [vmem:[%s9862_s0 + $0x3e4] sm:$0xf0]  ;;  %v5885_v26 = vld [vmem:[%s9862_s0 + $0x3cc] sm:$0xf] }
  0xd2   :  { %2429 = vmatmul.bf16.gmra.mxu1 %v4843_v38 }
  0xd3   :  { %2598 = vmatmul.bf16.gmra.mxu2 %v4847_v42 }
  0xd4   :  { %2767 = vmatmul.bf16.gmra.mxu3 %v4851_v43 }
  0xd6   :  { %v2559_v46 = vpop.f32.mrf.mxu2  ;;  %v2223_v49 = vpop.f32.mrf.mxu0 }
  0xd7   :  { %v2728_v47 = vpop.f32.mrf.mxu3  ;;  %v2560_v48 = vadd.f32 %v2559_v46, %v2391_v44  ;;  %v2392_v50 = vpop.f32.mrf.mxu1 }
  0xd8   :  { %v2393_v51 = vadd.f32 %v2392_v50, %v2223_v49  ;;  %v5876_v49 = vld [vmem:[%s9862_s0 + $0x384] sm:$0xf] }
  0xd9   :  { %v6747_v53 = vadd.f32 %v2728_v47, %v2560_v48  ;;  %v4934_v47 = vld [vmem:[%s9862_s0 + $0x380] sm:$0xf]  ;;  %v4936_v50 = vld [vmem:[%s9862_s0 + $0x3a0] sm:$0xf0] }
  0xda   :  { %v5880_v48 = vld [vmem:[%s9862_s0 + $0x39c] sm:$0xf0]  ;;  %v4939_v61 = vor.u32 %v5876_v49, %v4936_v50 }
  0xdb   :  { %v4935_v60 = vor.u32 %v5880_v48, %v4934_v47  ;;  %v4998_v50 = vld [vmem:[%s9862_s0 + $0x400] sm:$0xf] }
  0xde   :  { %v2561_v63 = vpop.f32.mrf.mxu2  ;;  %v2226_v4 = vpop.f32.mrf.mxu0 }
  0xdf   :  { %v2730_v0 = vpop.f32.mrf.mxu3  ;;  %v2562_v3 = vadd.f32 %v2561_v63, %v2393_v51  ;;  %v2395_v5 = vpop.f32.mrf.mxu1  ;;  %v4942_v51 = vld [vmem:[%s9862_s0 + $0x388] sm:$0xf] }
  0xe0   :  { %v2396_v8 = vadd.f32 %v2395_v5, %v2226_v4  ;;  %v6071_v5 = vld [vmem:[%s9861_s1 + $0x198] sm:$0xff] }
  0xe1   :  { %v6773_v9 = vadd.f32 %v2730_v0, %v2562_v3  ;;  %2265 = vmatmul.bf16.gmra.mxu0 %v4871_v1  ;;  %v4943_v1 = vor.u32 %v5881_v54, %v4942_v51  ;;  %3215 = vmatpush.bf16.msrb.mxu2 %v6071_v5  ;;  %v5896_v51 = vld [vmem:[%s9862_s0 + $0x41c] sm:$0xf0]  ;;  %v5892_v54 = vld [vmem:[%s9862_s0 + $0x404] sm:$0xf] }
  0xe2   :  { %2434 = vmatmul.bf16.gmra.mxu1 %v4875_v2  ;;  %v4947_v2 = vor.u32 %v5877_v55, %v4944_v56  ;;  %v5000_v55 = vld [vmem:[%s9862_s0 + $0x420] sm:$0xf0]  ;;  %v5006_v56 = vld [vmem:[%s9862_s0 + $0x408] sm:$0xf] }
  0xe3   :  { %2603 = vmatmul.bf16.gmra.mxu2 %v4879_v6  ;;  %v6055_v6 = vld [vmem:[%s9861_s1 + $0x118] sm:$0xff] }
  0xe4   :  { %2772 = vmatmul.bf16.gmra.mxu3 %v4883_v7  ;;  %v6079_v7 = vld [vmem:[%s9861_s1 + $0x1d8] sm:$0xff]  ;;  %2877 = vmatpush.bf16.msrb.mxu0 %v6055_v6 }
  0xe5   :  { %3384 = vmatpush.bf16.msrb.mxu3 %v6079_v7 }
  0xe6   :  { %v2564_v10 = vpop.f32.mrf.mxu2  ;;  %v2228_v13 = vpop.f32.mrf.mxu0 }
  0xe7   :  { %v2733_v11 = vpop.f32.mrf.mxu3  ;;  %v2565_v12 = vadd.f32 %v2564_v10, %v2396_v8  ;;  %v2397_v15 = vpop.f32.mrf.mxu1 }
  0xe8   :  { %v2398_v16 = vadd.f32 %v2397_v15, %v2228_v13 }
  0xe9   :  { %v6775_v17 = vadd.f32 %v2733_v11, %v2565_v12 }
  0xee   :  { %v2566_v27 = vpop.f32.mrf.mxu2  ;;  %v2231_v32 = vpop.f32.mrf.mxu0 }
  0xef   :  { %v2735_v28 = vpop.f32.mrf.mxu3  ;;  %v2567_v31 = vadd.f32 %v2566_v27, %v2398_v16  ;;  %v2400_v34 = vpop.f32.mrf.mxu1  ;;  %v4976_v27 = vld [vmem:[%s9862_s0 + $0x3e8] sm:$0xf0] }
  0xf0   :  { %v2401_v37 = vadd.f32 %v2400_v34, %v2231_v32 }
  0xf1   :  { %v6801_v38 = vadd.f32 %v2735_v28, %v2567_v31  ;;  %2270 = vmatmul.bf16.gmra.mxu0 %v4903_v29  ;;  %v4971_v31 = vor.u32 %v5884_v21, %v4968_v22  ;;  %v5904_v21 = vld [vmem:[%s9862_s0 + $0x45c] sm:$0xf0]  ;;  %v5900_v22 = vld [vmem:[%s9862_s0 + $0x444] sm:$0xf] }
  0xf2   :  { %2439 = vmatmul.bf16.gmra.mxu1 %v4907_v30  ;;  %v4967_v30 = vor.u32 %v5888_v20, %v4966_v19  ;;  %v5030_v20 = vld [vmem:[%s9862_s0 + $0x440] sm:$0xf] }
  0xf3   :  { %2608 = vmatmul.bf16.gmra.mxu2 %v4911_v35 }
  0xf4   :  { %2777 = vmatmul.bf16.gmra.mxu3 %v4915_v36  ;;  %v4975_v36 = vor.u32 %v5889_v25, %v4974_v23  ;;  %v5032_v23 = vld [vmem:[%s9862_s0 + $0x460] sm:$0xf0]  ;;  %v5038_v25 = vld [vmem:[%s9862_s0 + $0x448] sm:$0xf] }
  0xf6   :  { %v2569_v39 = vpop.f32.mrf.mxu2  ;;  %v2233_v42 = vpop.f32.mrf.mxu0 }
  0xf7   :  { %v2738_v40 = vpop.f32.mrf.mxu3  ;;  %v2570_v41 = vadd.f32 %v2569_v39, %v2401_v37  ;;  %v2402_v43 = vpop.f32.mrf.mxu1  ;;  %v4979_v37 = vor.u32 %v5885_v26, %v4976_v27  ;;  %v5905_v26 = vld [vmem:[%s9862_s0 + $0x464] sm:$0xf0]  ;;  %v5901_v27 = vld [vmem:[%s9862_s0 + $0x44c] sm:$0xf] }
  0xf8   :  { %v2403_v44 = vadd.f32 %v2402_v43, %v2233_v42 }
  0xf9   :  { %v6803_v46 = vadd.f32 %v2738_v40, %v2570_v41 }
  0xfe   :  { %v2571_v57 = vpop.f32.mrf.mxu2  ;;  %v2236_v63 = vpop.f32.mrf.mxu0 }
  0xff   :  { %v2740_v58 = vpop.f32.mrf.mxu3  ;;  %v2572_v62 = vadd.f32 %v2571_v57, %v2403_v44  ;;  %v2405_v0 = vpop.f32.mrf.mxu1  ;;  %v5897_v57 = vld [vmem:[%s9862_s0 + $0x424] sm:$0xf0] }
 0x100   :  { %v2406_v3 = vadd.f32 %v2405_v0, %v2236_v63  ;;  %v4999_v63 = vor.u32 %v5896_v51, %v4998_v50  ;;  %v5003_v0 = vor.u32 %v5892_v54, %v5000_v55  ;;  %v5007_v5 = vor.u32 %v5897_v57, %v5006_v56  ;;  %v5062_v55 = vld [vmem:[%s9862_s0 + $0x480] sm:$0xf]  ;;  %v5908_v57 = vld [vmem:[%s9862_s0 + $0x484] sm:$0xf] }
 0x101   :  { %v6829_v4 = vadd.f32 %v2740_v58, %v2572_v62  ;;  %2275 = vmatmul.bf16.gmra.mxu0 %v4935_v60  ;;  %v5893_v58 = vld [vmem:[%s9862_s0 + $0x40c] sm:$0xf]  ;;  %v5912_v56 = vld [vmem:[%s9862_s0 + $0x49c] sm:$0xf0] }
 0x102   :  { %2444 = vmatmul.bf16.gmra.mxu1 %v4939_v61  ;;  %v5008_v60 = vld [vmem:[%s9862_s0 + $0x428] sm:$0xf0] }
 0x103   :  { %2613 = vmatmul.bf16.gmra.mxu2 %v4943_v1  ;;  %v5011_v6 = vor.u32 %v5893_v58, %v5008_v60  ;;  %v5064_v58 = vld [vmem:[%s9862_s0 + $0x4a0] sm:$0xf0]  ;;  %v5070_v60 = vld [vmem:[%s9862_s0 + $0x488] sm:$0xf] }
 0x104   :  { %2782 = vmatmul.bf16.gmra.mxu3 %v4947_v2 }
 0x106   :  { %v2574_v8 = vpop.f32.mrf.mxu2  ;;  %v2238_v12 = vpop.f32.mrf.mxu0 }
 0x107   :  { %v2743_v10 = vpop.f32.mrf.mxu3  ;;  %v2575_v11 = vadd.f32 %v2574_v8, %v2406_v3  ;;  %v2407_v13 = vpop.f32.mrf.mxu1 }
 0x108   :  { %v2408_v15 = vadd.f32 %v2407_v13, %v2238_v12 }
 0x109   :  { %v6840_v16 = vadd.f32 %v2743_v10, %v2575_v11 }
 0x10e   :  { %v2576_v28 = vpop.f32.mrf.mxu2  ;;  %v2241_v34 = vpop.f32.mrf.mxu0 }
 0x10f   :  { %v2745_v29 = vpop.f32.mrf.mxu3  ;;  %v2577_v32 = vadd.f32 %v2576_v28, %v2408_v15  ;;  %v2410_v35 = vpop.f32.mrf.mxu1  ;;  %v5040_v28 = vld [vmem:[%s9862_s0 + $0x468] sm:$0xf0] }
 0x110   :  { %v2411_v39 = vadd.f32 %v2410_v35, %v2241_v34 }
 0x111   :  { %v6869_v40 = vadd.f32 %v2745_v29, %v2577_v32  ;;  %2280 = vmatmul.bf16.gmra.mxu0 %v4967_v30  ;;  %v5035_v32 = vor.u32 %v5900_v22, %v5032_v23 }
 0x112   :  { %2449 = vmatmul.bf16.gmra.mxu1 %v4971_v31  ;;  %v5031_v31 = vor.u32 %v5904_v21, %v5030_v20  ;;  %v6078_v20 = vld [vmem:[%s9861_s1 + $0x1d0] sm:$0xff] }
 0x113   :  { %2618 = vmatmul.bf16.gmra.mxu2 %v4975_v36  ;;  %3385 = vmatpush.bf16.msrb.mxu3 %v6078_v20 }
 0x114   :  { %2787 = vmatmul.bf16.gmra.mxu3 %v4979_v37  ;;  %v5039_v37 = vor.u32 %v5905_v26, %v5038_v25 }
 0x116   :  { %v2579_v41 = vpop.f32.mrf.mxu2  ;;  %v2243_v44 = vpop.f32.mrf.mxu0 }
 0x117   :  { %v2748_v42 = vpop.f32.mrf.mxu3  ;;  %v2580_v43 = vadd.f32 %v2579_v41, %v2411_v39  ;;  %v2412_v47 = vpop.f32.mrf.mxu1  ;;  %v5043_v39 = vor.u32 %v5901_v27, %v5040_v28 }
 0x118   :  { %v2413_v48 = vadd.f32 %v2412_v47, %v2243_v44 }
 0x119   :  { %v6871_v49 = vadd.f32 %v2748_v42, %v2580_v43 }
 0x11e   :  { %v2581_v61 = vpop.f32.mrf.mxu2  ;;  %v2246_v2 = vpop.f32.mrf.mxu0 }
 0x11f   :  { %v2750_v62 = vpop.f32.mrf.mxu3  ;;  %v2582_v1 = vadd.f32 %v2581_v61, %v2413_v48  ;;  %v2415_v3 = vpop.f32.mrf.mxu1  ;;  %v5913_v61 = vld [vmem:[%s9862_s0 + $0x4a4] sm:$0xf0] }
 0x120   :  { %v2416_v7 = vadd.f32 %v2415_v3, %v2246_v2  ;;  %v5063_v2 = vor.u32 %v5912_v56, %v5062_v55  ;;  %v5067_v3 = vor.u32 %v5908_v57, %v5064_v58 }
 0x121   :  { %v6897_v8 = vadd.f32 %v2750_v62, %v2582_v1  ;;  %2285 = vmatmul.bf16.gmra.mxu0 %v4999_v63  ;;  %v5909_v62 = vld [vmem:[%s9862_s0 + $0x48c] sm:$0xf] }
 0x122   :  { %2454 = vmatmul.bf16.gmra.mxu1 %v5003_v0  ;;  %v5072_v63 = vld [vmem:[%s9862_s0 + $0x4a8] sm:$0xf0] }
 0x123   :  { %2623 = vmatmul.bf16.gmra.mxu2 %v5007_v5 }
 0x124   :  { %2792 = vmatmul.bf16.gmra.mxu3 %v5011_v6 }
 0x126   :  { %v2584_v10 = vpop.f32.mrf.mxu2  ;;  %v2248_v13 = vpop.f32.mrf.mxu0 }
 0x127   :  { %v2753_v11 = vpop.f32.mrf.mxu3  ;;  %v2585_v12 = vadd.f32 %v2584_v10, %v2416_v7  ;;  %v2417_v15 = vpop.f32.mrf.mxu1  ;;  %v5071_v10 = vor.u32 %v5913_v61, %v5070_v60 }
 0x128   :  { %v2418_v18 = vadd.f32 %v2417_v15, %v2248_v13  ;;  %v6070_v15 = vld [vmem:[%s9861_s1 + $0x190] sm:$0xff] }
 0x129   :  { %v6899_v19 = vadd.f32 %v2753_v11, %v2585_v12  ;;  %v5075_v11 = vor.u32 %v5909_v62, %v5072_v63  ;;  %3216 = vmatpush.bf16.msrb.mxu2 %v6070_v15  ;;  %v5136_v15 = vld [vmem:[%s9862_s0 + $0x528] sm:$0xf0] }
 0x12e   :  { %v2586_v29 = vpop.f32.mrf.mxu2  ;;  %v2251_v35 = vpop.f32.mrf.mxu0 }
 0x12f   :  { %v2755_v30 = vpop.f32.mrf.mxu3  ;;  %v2587_v34 = vadd.f32 %v2586_v29, %v2418_v18  ;;  %v2420_v36 = vpop.f32.mrf.mxu1  ;;  %v6054_v18 = vld [vmem:[%s9861_s1 + $0x110] sm:$0xff] }
 0x130   :  { %v2421_v41 = vadd.f32 %v2420_v36, %v2251_v35  ;;  %2878 = vmatpush.bf16.msrb.mxu0 %v6054_v18  ;;  %v6062_v29 = vld [vmem:[%s9861_s1 + $0x150] sm:$0xff]  ;;  %v5102_v35 = vld [vmem:[%s9862_s0 + $0x4c8] sm:$0xf] }
 0x131   :  { %v6925_v42 = vadd.f32 %v2755_v30, %v2587_v34  ;;  %2290 = vmatmul.bf16.gmra.mxu0 %v5031_v31  ;;  %v5094_v30 = vld [vmem:[%s9862_s0 + $0x4c0] sm:$0xf]  ;;  %v5096_v34 = vld [vmem:[%s9862_s0 + $0x4e0] sm:$0xf0]  ;;  %3047 = vmatpush.bf16.msrb.mxu1 %v6062_v29  ;;  %v5921_v36 = vld [vmem:[%s9862_s0 + $0x4e4] sm:$0xf0] }
 0x132   :  { %2459 = vmatmul.bf16.gmra.mxu1 %v5035_v32  ;;  %v5920_v31 = vld [vmem:[%s9862_s0 + $0x4dc] sm:$0xf0]  ;;  %v5916_v32 = vld [vmem:[%s9862_s0 + $0x4c4] sm:$0xf]  ;;  %v5103_v55 = vor.u32 %v5921_v36, %v5102_v35 }
 0x133   :  { %2628 = vmatmul.bf16.gmra.mxu2 %v5039_v37  ;;  %v5917_v37 = vld [vmem:[%s9862_s0 + $0x4cc] sm:$0xf] }
 0x134   :  { %2797 = vmatmul.bf16.gmra.mxu3 %v5043_v39  ;;  %v5104_v39 = vld [vmem:[%s9862_s0 + $0x4e8] sm:$0xf0] }
 0x135   :  { %v5107_v56 = vor.u32 %v5917_v37, %v5104_v39 }
 0x136   :  { %v2589_v43 = vpop.f32.mrf.mxu2  ;;  %v2253_v48 = vpop.f32.mrf.mxu0 }
 0x137   :  { %v2758_v44 = vpop.f32.mrf.mxu3  ;;  %v2590_v47 = vadd.f32 %v2589_v43, %v2421_v41  ;;  %v2422_v50 = vpop.f32.mrf.mxu1 }
 0x138   :  { %v2423_v51 = vadd.f32 %v2422_v50, %v2253_v48 }
 0x139   :  { %v6927_v54 = vadd.f32 %v2758_v44, %v2590_v47  ;;  %v5095_v44 = vor.u32 %v5920_v31, %v5094_v30  ;;  %v5099_v47 = vor.u32 %v5916_v32, %v5096_v34 }
 0x13e   :  { %v2591_v0 = vpop.f32.mrf.mxu2  ;;  %v2256_v6 = vpop.f32.mrf.mxu0 }
 0x13f   :  { %v2760_v1 = vpop.f32.mrf.mxu3  ;;  %v2592_v5 = vadd.f32 %v2591_v0, %v2423_v51  ;;  %v2425_v7 = vpop.f32.mrf.mxu1 }
 0x140   :  { %v2426_v12 = vadd.f32 %v2425_v7, %v2256_v6  ;;  %v5924_v6 = vld [vmem:[%s9862_s0 + $0x504] sm:$0xf] }
 0x141   :  { %v6953_v13 = vadd.f32 %v2760_v1, %v2592_v5  ;;  %2295 = vmatmul.bf16.gmra.mxu0 %v5063_v2  ;;  %v5928_v5 = vld [vmem:[%s9862_s0 + $0x51c] sm:$0xf0]  ;;  %v5128_v7 = vld [vmem:[%s9862_s0 + $0x520] sm:$0xf0] }
 0x142   :  { %2464 = vmatmul.bf16.gmra.mxu1 %v5067_v3  ;;  %v5126_v3 = vld [vmem:[%s9862_s0 + $0x500] sm:$0xf] }
 0x143   :  { %2633 = vmatmul.bf16.gmra.mxu2 %v5071_v10  ;;  %v5134_v10 = vld [vmem:[%s9862_s0 + $0x508] sm:$0xf] }
 0x144   :  { %2802 = vmatmul.bf16.gmra.mxu3 %v5075_v11  ;;  %v5929_v11 = vld [vmem:[%s9862_s0 + $0x524] sm:$0xf0] }
 0x146   :  { %v2594_v21 = vpop.f32.mrf.mxu2  ;;  %v2258_v25 = vpop.f32.mrf.mxu0 }
 0x147   :  { %v2763_v22 = vpop.f32.mrf.mxu3  ;;  %v2595_v23 = vadd.f32 %v2594_v21, %v2426_v12  ;;  %v2427_v26 = vpop.f32.mrf.mxu1  ;;  %v5925_v12 = vld [vmem:[%s9862_s0 + $0x50c] sm:$0xf]  ;;  %v5127_v21 = vor.u32 %v5928_v5, %v5126_v3 }
 0x148   :  { %v2428_v27 = vadd.f32 %v2427_v26, %v2258_v25  ;;  %v5139_v29 = vor.u32 %v5925_v12, %v5136_v15 }
 0x149   :  { %v6964_v28 = vadd.f32 %v2763_v22, %v2595_v23  ;;  %v5131_v22 = vor.u32 %v5924_v6, %v5128_v7 }
 0x14e   :  { %v2596_v41 = vpop.f32.mrf.mxu2  ;;  %v2261_v50 = vpop.f32.mrf.mxu0 }
 0x14f   :  { %v2765_v43 = vpop.f32.mrf.mxu3  ;;  %v2597_v48 = vadd.f32 %v2596_v41, %v2428_v27  ;;  %v2430_v51 = vpop.f32.mrf.mxu1  ;;  %v5135_v27 = vor.u32 %v5929_v11, %v5134_v10 }
 0x150   :  { %v2431_v57 = vadd.f32 %v2430_v51, %v2261_v50  ;;  %v5166_v50 = vld [vmem:[%s9862_s0 + $0x548] sm:$0xf] }
 0x151   :  { %v6993_v58 = vadd.f32 %v2765_v43, %v2597_v48  ;;  %2300 = vmatmul.bf16.gmra.mxu0 %v5095_v44  ;;  %v5158_v43 = vld [vmem:[%s9862_s0 + $0x540] sm:$0xf]  ;;  %v5160_v48 = vld [vmem:[%s9862_s0 + $0x560] sm:$0xf0]  ;;  %v5937_v51 = vld [vmem:[%s9862_s0 + $0x564] sm:$0xf0] }
 0x152   :  { %2469 = vmatmul.bf16.gmra.mxu1 %v5099_v47  ;;  %v5936_v44 = vld [vmem:[%s9862_s0 + $0x55c] sm:$0xf0]  ;;  %v5932_v47 = vld [vmem:[%s9862_s0 + $0x544] sm:$0xf]  ;;  %v5167_v3 = vor.u32 %v5937_v51, %v5166_v50 }
 0x153   :  { %2638 = vmatmul.bf16.gmra.mxu2 %v5103_v55  ;;  %v5933_v55 = vld [vmem:[%s9862_s0 + $0x54c] sm:$0xf] }
 0x154   :  { %2807 = vmatmul.bf16.gmra.mxu3 %v5107_v56  ;;  %v5168_v56 = vld [vmem:[%s9862_s0 + $0x568] sm:$0xf0] }
 0x155   :  { %v5171_v5 = vor.u32 %v5933_v55, %v5168_v56  ;;  %v6069_v55 = vld [vmem:[%s9861_s1 + $0x188] sm:$0xff] }
 0x156   :  { %v2599_v60 = vpop.f32.mrf.mxu2  ;;  %v2263_v63 = vpop.f32.mrf.mxu0  ;;  %v6053_v56 = vld [vmem:[%s9861_s1 + $0x108] sm:$0xff]  ;;  %3217 = vmatpush.bf16.msrb.mxu2 %v6069_v55 }
 0x157   :  { %v2768_v61 = vpop.f32.mrf.mxu3  ;;  %v2600_v62 = vadd.f32 %v2599_v60, %v2431_v57  ;;  %v2432_v0 = vpop.f32.mrf.mxu1  ;;  %2879 = vmatpush.bf16.msrb.mxu0 %v6053_v56  ;;  %v5254_v56 = vld [vmem:[%s9862_s0 + $0x600] sm:$0xf] }
 0x158   :  { %v2433_v1 = vadd.f32 %v2432_v0, %v2263_v63 }
 0x159   :  { %v6995_v2 = vadd.f32 %v2768_v61, %v2600_v62  ;;  %v5159_v61 = vor.u32 %v5936_v44, %v5158_v43  ;;  %v5163_v62 = vor.u32 %v5932_v47, %v5160_v48 }
 0x15e   :  { %v2601_v18 = vpop.f32.mrf.mxu2  ;;  %v2266_v25 = vpop.f32.mrf.mxu0 }
 0x15f   :  { %v2770_v20 = vpop.f32.mrf.mxu3  ;;  %v2602_v23 = vadd.f32 %v2601_v18, %v2433_v1  ;;  %v2435_v26 = vpop.f32.mrf.mxu1 }
 0x160   :  { %v2436_v30 = vadd.f32 %v2435_v26, %v2266_v25  ;;  %v5940_v25 = vld [vmem:[%s9862_s0 + $0x584] sm:$0xf] }
 0x161   :  { %v7021_v31 = vadd.f32 %v2770_v20, %v2602_v23  ;;  %2305 = vmatmul.bf16.gmra.mxu0 %v5127_v21  ;;  %v5944_v23 = vld [vmem:[%s9862_s0 + $0x59c] sm:$0xf0]  ;;  %v5192_v26 = vld [vmem:[%s9862_s0 + $0x5a0] sm:$0xf0] }
 0x162   :  { %2474 = vmatmul.bf16.gmra.mxu1 %v5131_v22  ;;  %v5190_v22 = vld [vmem:[%s9862_s0 + $0x580] sm:$0xf] }
 0x163   :  { %2643 = vmatmul.bf16.gmra.mxu2 %v5135_v27  ;;  %v5198_v27 = vld [vmem:[%s9862_s0 + $0x588] sm:$0xf] }
 0x164   :  { %2812 = vmatmul.bf16.gmra.mxu3 %v5139_v29  ;;  %v5945_v29 = vld [vmem:[%s9862_s0 + $0x5a4] sm:$0xf0] }
 0x165   :  { %v5199_v47 = vor.u32 %v5945_v29, %v5198_v27 }
 0x166   :  { %v2604_v32 = vpop.f32.mrf.mxu2  ;;  %v2268_v36 = vpop.f32.mrf.mxu0 }
 0x167   :  { %v2773_v34 = vpop.f32.mrf.mxu3  ;;  %v2605_v35 = vadd.f32 %v2604_v32, %v2436_v30  ;;  %v2437_v37 = vpop.f32.mrf.mxu1  ;;  %v5941_v30 = vld [vmem:[%s9862_s0 + $0x58c] sm:$0xf] }
 0x168   :  { %v2438_v39 = vadd.f32 %v2437_v37, %v2268_v36  ;;  %v5200_v32 = vld [vmem:[%s9862_s0 + $0x5a8] sm:$0xf0]  ;;  %v5191_v36 = vor.u32 %v5944_v23, %v5190_v22  ;;  %v5195_v37 = vor.u32 %v5940_v25, %v5192_v26 }
 0x169   :  { %v7023_v41 = vadd.f32 %v2773_v34, %v2605_v35  ;;  %v5203_v48 = vor.u32 %v5941_v30, %v5200_v32  ;;  %v5232_v22 = vld [vmem:[%s9862_s0 + $0x5e8] sm:$0xf0] }
 0x16e   :  { %v2606_v57 = vpop.f32.mrf.mxu2  ;;  %v2271_v0 = vpop.f32.mrf.mxu0 }
 0x16f   :  { %v2775_v60 = vpop.f32.mrf.mxu3  ;;  %v2607_v63 = vadd.f32 %v2606_v57, %v2438_v39  ;;  %v2440_v1 = vpop.f32.mrf.mxu1  ;;  %v6077_v57 = vld [vmem:[%s9861_s1 + $0x1c8] sm:$0xff] }
 0x170   :  { %v2441_v6 = vadd.f32 %v2440_v1, %v2271_v0  ;;  %3386 = vmatpush.bf16.msrb.mxu3 %v6077_v57  ;;  %v5960_v57 = vld [vmem:[%s9862_s0 + $0x61c] sm:$0xf0] }
 0x171   :  { %v7049_v7 = vadd.f32 %v2775_v60, %v2607_v63  ;;  %2310 = vmatmul.bf16.gmra.mxu0 %v5159_v61 }
 0x172   :  { %2479 = vmatmul.bf16.gmra.mxu1 %v5163_v62 }
 0x173   :  { %2648 = vmatmul.bf16.gmra.mxu2 %v5167_v3 }
 0x174   :  { %2817 = vmatmul.bf16.gmra.mxu3 %v5171_v5  ;;  %v6061_v5 = vld [vmem:[%s9861_s1 + $0x148] sm:$0xff] }
 0x175   :  { %3048 = vmatpush.bf16.msrb.mxu1 %v6061_v5 }
 0x176   :  { %v2609_v10 = vpop.f32.mrf.mxu2  ;;  %v2273_v15 = vpop.f32.mrf.mxu0 }
 0x177   :  { %v2778_v11 = vpop.f32.mrf.mxu3  ;;  %v2610_v12 = vadd.f32 %v2609_v10, %v2441_v6  ;;  %v2442_v18 = vpop.f32.mrf.mxu1  ;;  %v5222_v6 = vld [vmem:[%s9862_s0 + $0x5c0] sm:$0xf] }
 0x178   :  { %v2443_v20 = vadd.f32 %v2442_v18, %v2273_v15  ;;  %v5952_v10 = vld [vmem:[%s9862_s0 + $0x5dc] sm:$0xf0]  ;;  %v5230_v15 = vld [vmem:[%s9862_s0 + $0x5c8] sm:$0xf] }
 0x179   :  { %v7051_v21 = vadd.f32 %v2778_v11, %v2610_v12  ;;  %v5948_v11 = vld [vmem:[%s9862_s0 + $0x5c4] sm:$0xf]  ;;  %v5953_v18 = vld [vmem:[%s9862_s0 + $0x5e4] sm:$0xf0]  ;;  %v5223_v26 = vor.u32 %v5952_v10, %v5222_v6  ;;  %v5255_v10 = vor.u32 %v5960_v57, %v5254_v56  ;;  %v5296_v56 = vld [vmem:[%s9862_s0 + $0x668] sm:$0xf0] }
 0x17a   :  { %v5224_v12 = vld [vmem:[%s9862_s0 + $0x5e0] sm:$0xf0] }
 0x17b   :  { %v5227_v27 = vor.u32 %v5948_v11, %v5224_v12 }
 0x17e   :  { %v2611_v34 = vpop.f32.mrf.mxu2  ;;  %v2276_v43 = vpop.f32.mrf.mxu0 }
 0x17f   :  { %v2780_v35 = vpop.f32.mrf.mxu3  ;;  %v2612_v39 = vadd.f32 %v2611_v34, %v2443_v20  ;;  %v2445_v44 = vpop.f32.mrf.mxu1  ;;  %v5949_v20 = vld [vmem:[%s9862_s0 + $0x5cc] sm:$0xf]  ;;  %v5231_v34 = vor.u32 %v5953_v18, %v5230_v15 }
 0x180   :  { %v2446_v50 = vadd.f32 %v2445_v44, %v2276_v43 }
 0x181   :  { %v7077_v51 = vadd.f32 %v2780_v35, %v2612_v39  ;;  %2315 = vmatmul.bf16.gmra.mxu0 %v5191_v36  ;;  %v5235_v35 = vor.u32 %v5949_v20, %v5232_v22 }
 0x182   :  { %2484 = vmatmul.bf16.gmra.mxu1 %v5195_v37 }
 0x183   :  { %2653 = vmatmul.bf16.gmra.mxu2 %v5199_v47 }
 0x184   :  { %2822 = vmatmul.bf16.gmra.mxu3 %v5203_v48 }
 0x186   :  { %v2614_v60 = vpop.f32.mrf.mxu2  ;;  %v2278_v63 = vpop.f32.mrf.mxu0 }
 0x187   :  { %v2783_v61 = vpop.f32.mrf.mxu3  ;;  %v2615_v62 = vadd.f32 %v2614_v60, %v2446_v50  ;;  %v2447_v0 = vpop.f32.mrf.mxu1  ;;  %v5956_v60 = vld [vmem:[%s9862_s0 + $0x604] sm:$0xf] }
 0x188   :  { %v2448_v1 = vadd.f32 %v2447_v0, %v2278_v63  ;;  %v5961_v63 = vld [vmem:[%s9862_s0 + $0x624] sm:$0xf0]  ;;  %v5957_v0 = vld [vmem:[%s9862_s0 + $0x60c] sm:$0xf] }
 0x189   :  { %v7088_v3 = vadd.f32 %v2783_v61, %v2615_v62  ;;  %v5256_v61 = vld [vmem:[%s9862_s0 + $0x620] sm:$0xf0]  ;;  %v5262_v62 = vld [vmem:[%s9862_s0 + $0x608] sm:$0xf] }
 0x18a   :  { %v5259_v11 = vor.u32 %v5956_v60, %v5256_v61  ;;  %v5263_v20 = vor.u32 %v5961_v63, %v5262_v62 }
 0x18e   :  { %v2616_v23 = vpop.f32.mrf.mxu2  ;;  %v2281_v30 = vpop.f32.mrf.mxu0 }
 0x18f   :  { %v2785_v25 = vpop.f32.mrf.mxu3  ;;  %v2617_v29 = vadd.f32 %v2616_v23, %v2448_v1  ;;  %v2450_v32 = vpop.f32.mrf.mxu1  ;;  %v5264_v1 = vld [vmem:[%s9862_s0 + $0x628] sm:$0xf0] }
 0x190   :  { %v2451_v36 = vadd.f32 %v2450_v32, %v2281_v30  ;;  %v5267_v22 = vor.u32 %v5957_v0, %v5264_v1 }
 0x191   :  { %v7117_v37 = vadd.f32 %v2785_v25, %v2617_v29  ;;  %2320 = vmatmul.bf16.gmra.mxu0 %v5223_v26 }
 0x192   :  { %2489 = vmatmul.bf16.gmra.mxu1 %v5227_v27 }
 0x193   :  { %2658 = vmatmul.bf16.gmra.mxu2 %v5231_v34 }
 0x194   :  { %2827 = vmatmul.bf16.gmra.mxu3 %v5235_v35 }
 0x196   :  { %v2619_v39 = vpop.f32.mrf.mxu2  ;;  %v2283_v47 = vpop.f32.mrf.mxu0 }
 0x197   :  { %v2788_v43 = vpop.f32.mrf.mxu3  ;;  %v2620_v44 = vadd.f32 %v2619_v39, %v2451_v36  ;;  %v2452_v48 = vpop.f32.mrf.mxu1  ;;  %v5286_v36 = vld [vmem:[%s9862_s0 + $0x640] sm:$0xf] }
 0x198   :  { %v2453_v50 = vadd.f32 %v2452_v48, %v2283_v47  ;;  %v5968_v39 = vld [vmem:[%s9862_s0 + $0x65c] sm:$0xf0]  ;;  %v5294_v47 = vld [vmem:[%s9862_s0 + $0x648] sm:$0xf] }
 0x199   :  { %v7119_v55 = vadd.f32 %v2788_v43, %v2620_v44  ;;  %v5964_v43 = vld [vmem:[%s9862_s0 + $0x644] sm:$0xf]  ;;  %v5969_v48 = vld [vmem:[%s9862_s0 + $0x664] sm:$0xf0]  ;;  %v5287_v61 = vor.u32 %v5968_v39, %v5286_v36  ;;  %v5973_v39 = vld [vmem:[%s9862_s0 + $0x68c] sm:$0xf] }
 0x19a   :  { %v5288_v44 = vld [vmem:[%s9862_s0 + $0x660] sm:$0xf0]  ;;  %v5977_v36 = vld [vmem:[%s9862_s0 + $0x6a4] sm:$0xf0] }
 0x19b   :  { %v5291_v62 = vor.u32 %v5964_v43, %v5288_v44  ;;  %v5328_v43 = vld [vmem:[%s9862_s0 + $0x6a8] sm:$0xf0] }
 0x19e   :  { %v2621_v5 = vpop.f32.mrf.mxu2  ;;  %v2286_v15 = vpop.f32.mrf.mxu0 }
 0x19f   :  { %v2790_v6 = vpop.f32.mrf.mxu3  ;;  %v2622_v12 = vadd.f32 %v2621_v5, %v2453_v50  ;;  %v2455_v18 = vpop.f32.mrf.mxu1  ;;  %v5965_v50 = vld [vmem:[%s9862_s0 + $0x64c] sm:$0xf]  ;;  %v5295_v5 = vor.u32 %v5969_v48, %v5294_v47 }
 0x1a0   :  { %v2456_v23 = vadd.f32 %v2455_v18, %v2286_v15 }
 0x1a1   :  { %v7145_v25 = vadd.f32 %v2790_v6, %v2622_v12  ;;  %2325 = vmatmul.bf16.gmra.mxu0 %v5255_v10  ;;  %v5299_v6 = vor.u32 %v5965_v50, %v5296_v56 }
 0x1a2   :  { %2494 = vmatmul.bf16.gmra.mxu1 %v5259_v11 }
 0x1a3   :  { %2663 = vmatmul.bf16.gmra.mxu2 %v5263_v20 }
 0x1a4   :  { %2832 = vmatmul.bf16.gmra.mxu3 %v5267_v22 }
 0x1a6   :  { %v2624_v26 = vpop.f32.mrf.mxu2  ;;  %v2288_v30 = vpop.f32.mrf.mxu0 }
 0x1a7   :  { %v2793_v27 = vpop.f32.mrf.mxu3  ;;  %v2625_v29 = vadd.f32 %v2624_v26, %v2456_v23  ;;  %v2457_v32 = vpop.f32.mrf.mxu1 }
 0x1a8   :  { %v2458_v34 = vadd.f32 %v2457_v32, %v2288_v30  ;;  %v5972_v30 = vld [vmem:[%s9862_s0 + $0x684] sm:$0xf] }
 0x1a9   :  { %v7147_v35 = vadd.f32 %v2793_v27, %v2625_v29  ;;  %v5318_v27 = vld [vmem:[%s9862_s0 + $0x680] sm:$0xf]  ;;  %v5320_v32 = vld [vmem:[%s9862_s0 + $0x6a0] sm:$0xf0] }
 0x1aa   :  { %v5976_v29 = vld [vmem:[%s9862_s0 + $0x69c] sm:$0xf0]  ;;  %v5323_v50 = vor.u32 %v5972_v30, %v5320_v32  ;;  %v5980_v32 = vld [vmem:[%s9862_s0 + $0x6c4] sm:$0xf] }
 0x1ab   :  { %v5319_v48 = vor.u32 %v5976_v29, %v5318_v27  ;;  %v6060_v27 = vld [vmem:[%s9861_s1 + $0x140] sm:$0xff] }
 0x1ac   :  { %v5350_v29 = vld [vmem:[%s9862_s0 + $0x6c0] sm:$0xf]  ;;  %3049 = vmatpush.bf16.msrb.mxu1 %v6060_v27 }
 0x1ad   :  { %v5984_v30 = vld [vmem:[%s9862_s0 + $0x6dc] sm:$0xf0] }
 0x1ae   :  { %v2626_v57 = vpop.f32.mrf.mxu2  ;;  %v2291_v0 = vpop.f32.mrf.mxu0 }
 0x1af   :  { %v2795_v60 = vpop.f32.mrf.mxu3  ;;  %v2627_v63 = vadd.f32 %v2626_v57, %v2458_v34  ;;  %v2460_v1 = vpop.f32.mrf.mxu1  ;;  %v5326_v34 = vld [vmem:[%s9862_s0 + $0x688] sm:$0xf] }
 0x1b0   :  { %v2461_v10 = vadd.f32 %v2460_v1, %v2291_v0  ;;  %v6068_v1 = vld [vmem:[%s9861_s1 + $0x180] sm:$0xff] }
 0x1b1   :  { %v7173_v11 = vadd.f32 %v2795_v60, %v2627_v63  ;;  %2330 = vmatmul.bf16.gmra.mxu0 %v5287_v61  ;;  %v5327_v61 = vor.u32 %v5977_v36, %v5326_v34  ;;  %3218 = vmatpush.bf16.msrb.mxu2 %v6068_v1  ;;  %v5352_v34 = vld [vmem:[%s9862_s0 + $0x6e0] sm:$0xf0]  ;;  %v5358_v36 = vld [vmem:[%s9862_s0 + $0x6c8] sm:$0xf] }
 0x1b2   :  { %2499 = vmatmul.bf16.gmra.mxu1 %v5291_v62  ;;  %v5331_v62 = vor.u32 %v5973_v39, %v5328_v43  ;;  %v5985_v39 = vld [vmem:[%s9862_s0 + $0x6e4] sm:$0xf0]  ;;  %v5981_v43 = vld [vmem:[%s9862_s0 + $0x6cc] sm:$0xf] }
 0x1b3   :  { %2668 = vmatmul.bf16.gmra.mxu2 %v5295_v5  ;;  %v6052_v5 = vld [vmem:[%s9861_s1 + $0x100] sm:$0xff] }
 0x1b4   :  { %2837 = vmatmul.bf16.gmra.mxu3 %v5299_v6  ;;  %v6076_v6 = vld [vmem:[%s9861_s1 + $0x1c0] sm:$0xff]  ;;  %2880 = vmatpush.bf16.msrb.mxu0 %v6052_v5 }
 0x1b5   :  { %3387 = vmatpush.bf16.msrb.mxu3 %v6076_v6 }
 0x1b6   :  { %v2629_v12 = vpop.f32.mrf.mxu2  ;;  %v2293_v20 = vpop.f32.mrf.mxu0 }
 0x1b7   :  { %v2798_v15 = vpop.f32.mrf.mxu3  ;;  %v2630_v18 = vadd.f32 %v2629_v12, %v2461_v10  ;;  %v2462_v22 = vpop.f32.mrf.mxu1 }
 0x1b8   :  { %v2463_v23 = vadd.f32 %v2462_v22, %v2293_v20 }
 0x1b9   :  { %v7175_v26 = vadd.f32 %v2798_v15, %v2630_v18 }
 0x1be   :  { %v2631_v44 = vpop.f32.mrf.mxu2  ;;  %v2296_v57 = vpop.f32.mrf.mxu0 }
 0x1bf   :  { %v2800_v47 = vpop.f32.mrf.mxu3  ;;  %v2632_v56 = vadd.f32 %v2631_v44, %v2463_v23  ;;  %v2465_v60 = vpop.f32.mrf.mxu1  ;;  %v5360_v44 = vld [vmem:[%s9862_s0 + $0x6e8] sm:$0xf0] }
 0x1c0   :  { %v2466_v63 = vadd.f32 %v2465_v60, %v2296_v57 }
 0x1c1   :  { %v7201_v0 = vadd.f32 %v2800_v47, %v2632_v56  ;;  %2335 = vmatmul.bf16.gmra.mxu0 %v5319_v48  ;;  %v5355_v56 = vor.u32 %v5980_v32, %v5352_v34  ;;  %v5384_v32 = vld [vmem:[%s9862_s0 + $0x720] sm:$0xf0]  ;;  %v5390_v34 = vld [vmem:[%s9862_s0 + $0x708] sm:$0xf] }
 0x1c2   :  { %2504 = vmatmul.bf16.gmra.mxu1 %v5323_v50  ;;  %v5351_v50 = vor.u32 %v5984_v30, %v5350_v29  ;;  %v5992_v29 = vld [vmem:[%s9862_s0 + $0x71c] sm:$0xf0]  ;;  %v5988_v30 = vld [vmem:[%s9862_s0 + $0x704] sm:$0xf] }
 0x1c3   :  { %2673 = vmatmul.bf16.gmra.mxu2 %v5327_v61 }
 0x1c4   :  { %2842 = vmatmul.bf16.gmra.mxu3 %v5331_v62  ;;  %v5359_v62 = vor.u32 %v5985_v39, %v5358_v36  ;;  %v5993_v36 = vld [vmem:[%s9862_s0 + $0x724] sm:$0xf0]  ;;  %v5989_v39 = vld [vmem:[%s9862_s0 + $0x70c] sm:$0xf] }
 0x1c6   :  { %v2634_v10 = vpop.f32.mrf.mxu2  ;;  %v2298_v18 = vpop.f32.mrf.mxu0 }
 0x1c7   :  { %v2803_v12 = vpop.f32.mrf.mxu3  ;;  %v2635_v15 = vadd.f32 %v2634_v10, %v2466_v63  ;;  %v2467_v20 = vpop.f32.mrf.mxu1  ;;  %v5363_v63 = vor.u32 %v5981_v43, %v5360_v44  ;;  %v5392_v43 = vld [vmem:[%s9862_s0 + $0x728] sm:$0xf0] }
 0x1c8   :  { %v2468_v22 = vadd.f32 %v2467_v20, %v2298_v18 }
 0x1c9   :  { %v7212_v23 = vadd.f32 %v2803_v12, %v2635_v15 }
 0x1ce   :  { %v2636_v47 = vpop.f32.mrf.mxu2  ;;  %v2301_v60 = vpop.f32.mrf.mxu0 }
 0x1cf   :  { %v2805_v48 = vpop.f32.mrf.mxu3  ;;  %v2637_v57 = vadd.f32 %v2636_v47, %v2468_v22  ;;  %v2470_v61 = vpop.f32.mrf.mxu1  ;;  %v5382_v22 = vld [vmem:[%s9862_s0 + $0x700] sm:$0xf] }
 0x1d0   :  { %v2471_v1 = vadd.f32 %v2470_v61, %v2301_v60  ;;  %v5391_v61 = vor.u32 %v5993_v36, %v5390_v34  ;;  %v5422_v34 = vld [vmem:[%s9862_s0 + $0x748] sm:$0xf] }
 0x1d1   :  { %v7241_v5 = vadd.f32 %v2805_v48, %v2637_v57  ;;  %2340 = vmatmul.bf16.gmra.mxu0 %v5351_v50  ;;  %v5383_v48 = vor.u32 %v5992_v29, %v5382_v22  ;;  %v5387_v50 = vor.u32 %v5988_v30, %v5384_v32  ;;  %v6000_v29 = vld [vmem:[%s9862_s0 + $0x75c] sm:$0xf0]  ;;  %v5996_v30 = vld [vmem:[%s9862_s0 + $0x744] sm:$0xf]  ;;  %v6001_v36 = vld [vmem:[%s9862_s0 + $0x764] sm:$0xf0] }
 0x1d2   :  { %2509 = vmatmul.bf16.gmra.mxu1 %v5355_v56  ;;  %v5416_v32 = vld [vmem:[%s9862_s0 + $0x760] sm:$0xf0] }
 0x1d3   :  { %2678 = vmatmul.bf16.gmra.mxu2 %v5359_v62  ;;  %v5395_v62 = vor.u32 %v5989_v39, %v5392_v43  ;;  %v5997_v39 = vld [vmem:[%s9862_s0 + $0x74c] sm:$0xf] }
 0x1d4   :  { %2847 = vmatmul.bf16.gmra.mxu3 %v5363_v63  ;;  %v5424_v43 = vld [vmem:[%s9862_s0 + $0x768] sm:$0xf0] }
 0x1d6   :  { %v2639_v6 = vpop.f32.mrf.mxu2  ;;  %v2303_v15 = vpop.f32.mrf.mxu0 }
 0x1d7   :  { %v2808_v10 = vpop.f32.mrf.mxu3  ;;  %v2640_v12 = vadd.f32 %v2639_v6, %v2471_v1  ;;  %v2472_v18 = vpop.f32.mrf.mxu1 }
 0x1d8   :  { %v2473_v20 = vadd.f32 %v2472_v18, %v2303_v15 }
 0x1d9   :  { %v7243_v27 = vadd.f32 %v2808_v10, %v2640_v12 }
 0x1db   :  { %9935 = vst [vmem:[#allocation3_spill] sm:$0xff] %v7243_v27 }
 0x1de   :  { %v2641_v44 = vpop.f32.mrf.mxu2  ;;  %v2306_v57 = vpop.f32.mrf.mxu0 }
 0x1df   :  { %v2810_v47 = vpop.f32.mrf.mxu3  ;;  %v2642_v56 = vadd.f32 %v2641_v44, %v2473_v20  ;;  %v2475_v60 = vpop.f32.mrf.mxu1  ;;  %v5414_v20 = vld [vmem:[%s9862_s0 + $0x740] sm:$0xf] }
 0x1e0   :  { %v2476_v63 = vadd.f32 %v2475_v60, %v2306_v57 }
 0x1e1   :  { %v7269_v1 = vadd.f32 %v2810_v47, %v2642_v56  ;;  %2345 = vmatmul.bf16.gmra.mxu0 %v5383_v48  ;;  %v5415_v48 = vor.u32 %v6000_v29, %v5414_v20  ;;  %v6008_v29 = vld [vmem:[%s9862_s0 + $0x79c] sm:$0xf0] }
 0x1e2   :  { %2514 = vmatmul.bf16.gmra.mxu1 %v5387_v50  ;;  %v5419_v50 = vor.u32 %v5996_v30, %v5416_v32  ;;  %v6004_v30 = vld [vmem:[%s9862_s0 + $0x784] sm:$0xf] }
 0x1e3   :  { %9936 = vst [vmem:[#allocation4_spill] sm:$0xff] %v7269_v1  ;;  %2683 = vmatmul.bf16.gmra.mxu2 %v5391_v61  ;;  %v5423_v61 = vor.u32 %v6001_v36, %v5422_v34  ;;  %v5448_v32 = vld [vmem:[%s9862_s0 + $0x7a0] sm:$0xf0]  ;;  %v6009_v34 = vld [vmem:[%s9862_s0 + $0x7a4] sm:$0xf0] }
 0x1e4   :  { %2852 = vmatmul.bf16.gmra.mxu3 %v5395_v62  ;;  %v5427_v62 = vor.u32 %v5997_v39, %v5424_v43  ;;  %v6005_v36 = vld [vmem:[%s9862_s0 + $0x78c] sm:$0xf] }
 0x1e5   :  { %v5456_v39 = vld [vmem:[%s9862_s0 + $0x7a8] sm:$0xf0] }
 0x1e6   :  { %v2644_v6 = vpop.f32.mrf.mxu2  ;;  %v2308_v15 = vpop.f32.mrf.mxu0 }
 0x1e7   :  { %v2813_v10 = vpop.f32.mrf.mxu3  ;;  %v2645_v12 = vadd.f32 %v2644_v6, %v2476_v63  ;;  %v2477_v18 = vpop.f32.mrf.mxu1 }
 0x1e8   :  { %v2478_v27 = vadd.f32 %v2477_v18, %v2308_v15 }
 0x1e9   :  { %v7271_v22 = vadd.f32 %v2813_v10, %v2645_v12 }
 0x1eb   :  { %9937 = vst [vmem:[#allocation5_spill] sm:$0xff] %v7271_v22 }
 0x1ee   :  { %v2646_v44 = vpop.f32.mrf.mxu2  ;;  %v2311_v57 = vpop.f32.mrf.mxu0 }
 0x1ef   :  { %v2815_v47 = vpop.f32.mrf.mxu3  ;;  %v2647_v56 = vadd.f32 %v2646_v44, %v2478_v27  ;;  %v2480_v60 = vpop.f32.mrf.mxu1  ;;  %v5446_v27 = vld [vmem:[%s9862_s0 + $0x780] sm:$0xf] }
 0x1f0   :  { %v2481_v63 = vadd.f32 %v2480_v60, %v2311_v57 }
 0x1f1   :  { %v7297_v6 = vadd.f32 %v2815_v47, %v2647_v56  ;;  %2350 = vmatmul.bf16.gmra.mxu0 %v5415_v48  ;;  %v5447_v47 = vor.u32 %v6008_v29, %v5446_v27  ;;  %v5451_v48 = vor.u32 %v6004_v30, %v5448_v32  ;;  %v6016_v29 = vld [vmem:[%s9862_s0 + $0x7dc] sm:$0xf0]  ;;  %v6012_v30 = vld [vmem:[%s9862_s0 + $0x7c4] sm:$0xf] }
 0x1f2   :  { %2519 = vmatmul.bf16.gmra.mxu1 %v5419_v50  ;;  %v5480_v32 = vld [vmem:[%s9862_s0 + $0x7e0] sm:$0xf0] }
 0x1f3   :  { %9938 = vst [vmem:[#allocation6_spill] sm:$0xff] %v7297_v6  ;;  %2688 = vmatmul.bf16.gmra.mxu2 %v5423_v61  ;;  %v5459_v61 = vor.u32 %v6005_v36, %v5456_v39  ;;  %v5488_v36 = vld [vmem:[%s9862_s0 + $0x7e8] sm:$0xf0] }
 0x1f4   :  { %2857 = vmatmul.bf16.gmra.mxu3 %v5427_v62 }
 0x1f6   :  { %v2649_v10 = vpop.f32.mrf.mxu2  ;;  %v2313_v18 = vpop.f32.mrf.mxu0 }
 0x1f7   :  { %v2818_v12 = vpop.f32.mrf.mxu3  ;;  %v2650_v15 = vadd.f32 %v2649_v10, %v2481_v63  ;;  %v2482_v22 = vpop.f32.mrf.mxu1 }
 0x1f8   :  { %v2483_v1 = vadd.f32 %v2482_v22, %v2313_v18  ;;  %v5454_v22 = vld [vmem:[%s9862_s0 + $0x788] sm:$0xf] }
 0x1f9   :  { %v7299_v20 = vadd.f32 %v2818_v12, %v2650_v15  ;;  %v5455_v60 = vor.u32 %v6009_v34, %v5454_v22  ;;  %v6017_v22 = vld [vmem:[%s9862_s0 + $0x7e4] sm:$0xf0]  ;;  %v6013_v34 = vld [vmem:[%s9862_s0 + $0x7cc] sm:$0xf] }
 0x1fb   :  { %9939 = vst [vmem:[#allocation7_spill] sm:$0xff] %v7299_v20 }
 0x1fe   :  { %v2651_v43 = vpop.f32.mrf.mxu2  ;;  %v2316_v56 = vpop.f32.mrf.mxu0 }
 0x1ff   :  { %v2820_v44 = vpop.f32.mrf.mxu3  ;;  %v2652_v50 = vadd.f32 %v2651_v43, %v2483_v1  ;;  %v2485_v57 = vpop.f32.mrf.mxu1  ;;  %v5478_v1 = vld [vmem:[%s9862_s0 + $0x7c0] sm:$0xf] }
 0x200   :  { %v2486_v62 = vadd.f32 %v2485_v57, %v2316_v56 }
 0x201   :  { %v7325_v63 = vadd.f32 %v2820_v44, %v2652_v50  ;;  %2355 = vmatmul.bf16.gmra.mxu0 %v5447_v47  ;;  %v5479_v44 = vor.u32 %v6016_v29, %v5478_v1  ;;  %v5483_v47 = vor.u32 %v6012_v30, %v5480_v32  ;;  %v5770_v29 = vld [vmem:[%s9862_s0 + $0x2c] sm:$0xf0]  ;;  %v5766_v30 = vld [vmem:[%s9862_s0 + $0x14] sm:$0xf] }
 0x202   :  { %2524 = vmatmul.bf16.gmra.mxu1 %v5451_v48  ;;  %v4504_v32 = vld [vmem:[%s9862_s0 + $0x30] sm:$0xf0] }
 0x203   :  { %9940 = vst [vmem:[#allocation8_spill] sm:$0xff] %v7325_v63  ;;  %2693 = vmatmul.bf16.gmra.mxu2 %v5455_v60  ;;  %v5491_v60 = vor.u32 %v6013_v34, %v5488_v36  ;;  %v4512_v34 = vld [vmem:[%s9862_s0 + $0x38] sm:$0xf0] }
 0x204   :  { %2862 = vmatmul.bf16.gmra.mxu3 %v5459_v61 }
 0x206   :  { %v2654_v10 = vpop.f32.mrf.mxu2  ;;  %v2318_v18 = vpop.f32.mrf.mxu0 }
 0x207   :  { %v2823_v12 = vpop.f32.mrf.mxu3  ;;  %v2655_v15 = vadd.f32 %v2654_v10, %v2486_v62  ;;  %v2487_v20 = vpop.f32.mrf.mxu1 }
 0x208   :  { %v2488_v6 = vadd.f32 %v2487_v20, %v2318_v18  ;;  %v5486_v20 = vld [vmem:[%s9862_s0 + $0x7c8] sm:$0xf] }
 0x209   :  { %v7327_v27 = vadd.f32 %v2823_v12, %v2655_v15  ;;  %v5487_v57 = vor.u32 %v6017_v22, %v5486_v20  ;;  %v5771_v20 = vld [vmem:[%s9862_s0 + $0x34] sm:$0xf0]  ;;  %v5767_v22 = vld [vmem:[%s9862_s0 + $0x1c] sm:$0xf] }
 0x20b   :  { %9941 = vst [vmem:[#allocation9_spill] sm:$0xff] %v7327_v27 }
 0x20e   :  { %v2656_v39 = vpop.f32.mrf.mxu2  ;;  %v2321_v50 = vpop.f32.mrf.mxu0 }
 0x20f   :  { %v2825_v43 = vpop.f32.mrf.mxu3  ;;  %v2657_v48 = vadd.f32 %v2656_v39, %v2488_v6  ;;  %v2490_v56 = vpop.f32.mrf.mxu1  ;;  %v4502_v6 = vld [vmem:[%s9862_s0 + $0x10] sm:$0xf] }
 0x210   :  { %v2491_v61 = vadd.f32 %v2490_v56, %v2321_v50 }
 0x211   :  { %v7353_v62 = vadd.f32 %v2825_v43, %v2657_v48  ;;  %2360 = vmatmul.bf16.gmra.mxu0 %v5479_v44  ;;  %v4503_v43 = vor.u32 %v5770_v29, %v4502_v6  ;;  %v4507_v44 = vor.u32 %v5766_v30, %v4504_v32  ;;  %v5778_v29 = vld [vmem:[%s9862_s0 + $0x6c] sm:$0xf0]  ;;  %v5774_v30 = vld [vmem:[%s9862_s0 + $0x54] sm:$0xf] }
 0x212   :  { %2529 = vmatmul.bf16.gmra.mxu1 %v5483_v47  ;;  %v4536_v32 = vld [vmem:[%s9862_s0 + $0x70] sm:$0xf0] }
 0x213   :  { %9942 = vst [vmem:[#allocation10_spill] sm:$0xff] %v7353_v62  ;;  %2698 = vmatmul.bf16.gmra.mxu2 %v5487_v57  ;;  %v4515_v57 = vor.u32 %v5767_v22, %v4512_v34  ;;  %v4544_v22 = vld [vmem:[%s9862_s0 + $0x78] sm:$0xf0] }
 0x214   :  { %2867 = vmatmul.bf16.gmra.mxu3 %v5491_v60 }
 0x216   :  { %v2659_v10 = vpop.f32.mrf.mxu2  ;;  %v2323_v18 = vpop.f32.mrf.mxu0 }
 0x217   :  { %v2828_v12 = vpop.f32.mrf.mxu3  ;;  %v2660_v15 = vadd.f32 %v2659_v10, %v2491_v61  ;;  %v2492_v27 = vpop.f32.mrf.mxu1 }
 0x218   :  { %v2493_v63 = vadd.f32 %v2492_v27, %v2323_v18  ;;  %v4510_v27 = vld [vmem:[%s9862_s0 + $0x18] sm:$0xf] }
 0x219   :  { %v7355_v1 = vadd.f32 %v2828_v12, %v2660_v15  ;;  %v4511_v56 = vor.u32 %v5771_v20, %v4510_v27  ;;  %v5779_v27 = vld [vmem:[%s9862_s0 + $0x74] sm:$0xf0]  ;;  %v5775_v20 = vld [vmem:[%s9862_s0 + $0x5c] sm:$0xf] }
 0x21b   :  { %9943 = vst [vmem:[#allocation11_spill] sm:$0xff] %v7355_v1 }
 0x21e   :  { %v2661_v36 = vpop.f32.mrf.mxu2  ;;  %v2326_v48 = vpop.f32.mrf.mxu0 }
 0x21f   :  { %v2830_v39 = vpop.f32.mrf.mxu3  ;;  %v2662_v47 = vadd.f32 %v2661_v36, %v2493_v63  ;;  %v2495_v50 = vpop.f32.mrf.mxu1  ;;  %v4534_v63 = vld [vmem:[%s9862_s0 + $0x50] sm:$0xf] }
 0x220   :  { %v2496_v60 = vadd.f32 %v2495_v50, %v2326_v48 }
 0x221   :  { %v7381_v61 = vadd.f32 %v2830_v39, %v2662_v47  ;;  %2881 = vmatmul.bf16.vlgmr.msrb.gmra.mxu0 %v4503_v43  ;;  %v4535_v39 = vor.u32 %v5778_v29, %v4534_v63  ;;  %v4539_v43 = vor.u32 %v5774_v30, %v4536_v32  ;;  %v5786_v29 = vld [vmem:[%s9862_s0 + $0xac] sm:$0xf0]  ;;  %v5782_v30 = vld [vmem:[%s9862_s0 + $0x94] sm:$0xf] }
 0x222   :  { %3050 = vmatmul.bf16.vlgmr.msrb.gmra.mxu1 %v4507_v44  ;;  %v4568_v32 = vld [vmem:[%s9862_s0 + $0xb0] sm:$0xf0] }
 0x223   :  { %9944 = vst [vmem:[#allocation12_spill] sm:$0xff] %v7381_v61  ;;  %3219 = vmatmul.bf16.vlgmr.msrb.gmra.mxu2 %v4511_v56  ;;  %v4547_v56 = vor.u32 %v5775_v20, %v4544_v22  ;;  %v4576_v20 = vld [vmem:[%s9862_s0 + $0xb8] sm:$0xf0] }
 0x224   :  { %3388 = vmatmul.bf16.vlgmr.msrb.gmra.mxu3 %v4515_v57 }
 0x226   :  { %v2664_v10 = vpop.f32.mrf.mxu2  ;;  %v2328_v18 = vpop.f32.mrf.mxu0 }
 0x227   :  { %v2833_v12 = vpop.f32.mrf.mxu3  ;;  %v2665_v15 = vadd.f32 %v2664_v10, %v2496_v60  ;;  %v2497_v1 = vpop.f32.mrf.mxu1 }
 0x228   :  { %v2498_v62 = vadd.f32 %v2497_v1, %v2328_v18  ;;  %v4542_v1 = vld [vmem:[%s9862_s0 + $0x58] sm:$0xf] }
 0x229   :  { %v7383_v6 = vadd.f32 %v2833_v12, %v2665_v15  ;;  %v4543_v50 = vor.u32 %v5779_v27, %v4542_v1  ;;  %v5787_v1 = vld [vmem:[%s9862_s0 + $0xb4] sm:$0xf0]  ;;  %v5783_v27 = vld [vmem:[%s9862_s0 + $0x9c] sm:$0xf] }
 0x22b   :  { %9945 = vst [vmem:[#allocation13_spill] sm:$0xff] %v7383_v6 }
 0x22e   :  { %v2666_v34 = vpop.f32.mrf.mxu2  ;;  %v2331_v47 = vpop.f32.mrf.mxu0 }
 0x22f   :  { %v2835_v36 = vpop.f32.mrf.mxu3  ;;  %v2667_v44 = vadd.f32 %v2666_v34, %v2498_v62  ;;  %v2500_v48 = vpop.f32.mrf.mxu1  ;;  %v4566_v62 = vld [vmem:[%s9862_s0 + $0x90] sm:$0xf] }
 0x230   :  { %v2501_v57 = vadd.f32 %v2500_v48, %v2331_v47 }
 0x231   :  { %v7409_v60 = vadd.f32 %v2835_v36, %v2667_v44  ;;  %2886 = vmatmul.bf16.gmra.mxu0 %v4535_v39  ;;  %v4567_v36 = vor.u32 %v5786_v29, %v4566_v62  ;;  %v4571_v39 = vor.u32 %v5782_v30, %v4568_v32  ;;  %v5794_v29 = vld [vmem:[%s9862_s0 + $0xec] sm:$0xf0]  ;;  %v5790_v30 = vld [vmem:[%s9862_s0 + $0xd4] sm:$0xf] }
 0x232   :  { %3055 = vmatmul.bf16.gmra.mxu1 %v4539_v43  ;;  %v4600_v32 = vld [vmem:[%s9862_s0 + $0xf0] sm:$0xf0] }
 0x233   :  { %9946 = vst [vmem:[#allocation14_spill] sm:$0xff] %v7409_v60  ;;  %3224 = vmatmul.bf16.gmra.mxu2 %v4543_v50  ;;  %v4579_v50 = vor.u32 %v5783_v27, %v4576_v20  ;;  %v4608_v27 = vld [vmem:[%s9862_s0 + $0xf8] sm:$0xf0] }
 0x234   :  { %3393 = vmatmul.bf16.gmra.mxu3 %v4547_v56 }
 0x236   :  { %v2669_v10 = vpop.f32.mrf.mxu2  ;;  %v2333_v18 = vpop.f32.mrf.mxu0 }
 0x237   :  { %v2838_v12 = vpop.f32.mrf.mxu3  ;;  %v2670_v15 = vadd.f32 %v2669_v10, %v2501_v57  ;;  %v2502_v6 = vpop.f32.mrf.mxu1 }
 0x238   :  { %v2503_v61 = vadd.f32 %v2502_v6, %v2333_v18  ;;  %v4574_v6 = vld [vmem:[%s9862_s0 + $0x98] sm:$0xf] }
 0x239   :  { %v7411_v63 = vadd.f32 %v2838_v12, %v2670_v15  ;;  %v4575_v48 = vor.u32 %v5787_v1, %v4574_v6  ;;  %v5795_v6 = vld [vmem:[%s9862_s0 + $0xf4] sm:$0xf0]  ;;  %v5791_v1 = vld [vmem:[%s9862_s0 + $0xdc] sm:$0xf] }
 0x23b   :  { %9947 = vst [vmem:[#allocation15_spill] sm:$0xff] %v7411_v63 }
 0x23e   :  { %v2671_v22 = vpop.f32.mrf.mxu2  ;;  %v2336_v44 = vpop.f32.mrf.mxu0 }
 0x23f   :  { %v2840_v34 = vpop.f32.mrf.mxu3  ;;  %v2672_v43 = vadd.f32 %v2671_v22, %v2503_v61  ;;  %v2505_v47 = vpop.f32.mrf.mxu1  ;;  %v4598_v61 = vld [vmem:[%s9862_s0 + $0xd0] sm:$0xf] }
 0x240   :  { %v2506_v56 = vadd.f32 %v2505_v47, %v2336_v44 }
 0x241   :  { %v7437_v57 = vadd.f32 %v2840_v34, %v2672_v43  ;;  %2891 = vmatmul.bf16.gmra.mxu0 %v4567_v36  ;;  %v4599_v34 = vor.u32 %v5794_v29, %v4598_v61  ;;  %v4603_v36 = vor.u32 %v5790_v30, %v4600_v32  ;;  %v5802_v29 = vld [vmem:[%s9862_s0 + $0x12c] sm:$0xf0]  ;;  %v5798_v30 = vld [vmem:[%s9862_s0 + $0x114] sm:$0xf] }
 0x242   :  { %3060 = vmatmul.bf16.gmra.mxu1 %v4571_v39  ;;  %v4632_v32 = vld [vmem:[%s9862_s0 + $0x130] sm:$0xf0] }
 0x243   :  { %9948 = vst [vmem:[#allocation16_spill] sm:$0xff] %v7437_v57  ;;  %3229 = vmatmul.bf16.gmra.mxu2 %v4575_v48  ;;  %v4611_v48 = vor.u32 %v5791_v1, %v4608_v27  ;;  %v4640_v1 = vld [vmem:[%s9862_s0 + $0x138] sm:$0xf0] }
 0x244   :  { %3398 = vmatmul.bf16.gmra.mxu3 %v4579_v50 }
 0x246   :  { %v2674_v10 = vpop.f32.mrf.mxu2  ;;  %v2338_v18 = vpop.f32.mrf.mxu0 }
 0x247   :  { %v2843_v12 = vpop.f32.mrf.mxu3  ;;  %v2675_v15 = vadd.f32 %v2674_v10, %v2506_v56  ;;  %v2507_v63 = vpop.f32.mrf.mxu1 }
 0x248   :  { %v2508_v60 = vadd.f32 %v2507_v63, %v2338_v18  ;;  %v4606_v63 = vld [vmem:[%s9862_s0 + $0xd8] sm:$0xf] }
 0x249   :  { %v7439_v62 = vadd.f32 %v2843_v12, %v2675_v15  ;;  %v4607_v47 = vor.u32 %v5795_v6, %v4606_v63  ;;  %v5803_v63 = vld [vmem:[%s9862_s0 + $0x134] sm:$0xf0]  ;;  %v5799_v6 = vld [vmem:[%s9862_s0 + $0x11c] sm:$0xf] }
 0x24b   :  { %9949 = vst [vmem:[#allocation17_spill] sm:$0xff] %v7439_v62 }
 0x24e   :  { %v2676_v20 = vpop.f32.mrf.mxu2  ;;  %v2341_v43 = vpop.f32.mrf.mxu0 }
 0x24f   :  { %v2845_v22 = vpop.f32.mrf.mxu3  ;;  %v2677_v39 = vadd.f32 %v2676_v20, %v2508_v60  ;;  %v2510_v44 = vpop.f32.mrf.mxu1  ;;  %v4630_v60 = vld [vmem:[%s9862_s0 + $0x110] sm:$0xf] }
 0x250   :  { %v2511_v50 = vadd.f32 %v2510_v44, %v2341_v43 }
 0x251   :  { %v7465_v56 = vadd.f32 %v2845_v22, %v2677_v39  ;;  %2896 = vmatmul.bf16.gmra.mxu0 %v4599_v34  ;;  %v4631_v22 = vor.u32 %v5802_v29, %v4630_v60  ;;  %v4635_v34 = vor.u32 %v5798_v30, %v4632_v32  ;;  %v5810_v29 = vld [vmem:[%s9862_s0 + $0x16c] sm:$0xf0]  ;;  %v5806_v30 = vld [vmem:[%s9862_s0 + $0x154] sm:$0xf] }
 0x252   :  { %3065 = vmatmul.bf16.gmra.mxu1 %v4603_v36  ;;  %v4664_v32 = vld [vmem:[%s9862_s0 + $0x170] sm:$0xf0] }
 0x253   :  { %9950 = vst [vmem:[#allocation18_spill] sm:$0xff] %v7465_v56  ;;  %3234 = vmatmul.bf16.gmra.mxu2 %v4607_v47  ;;  %v4643_v47 = vor.u32 %v5799_v6, %v4640_v1  ;;  %v4672_v6 = vld [vmem:[%s9862_s0 + $0x178] sm:$0xf0] }
 0x254   :  { %3403 = vmatmul.bf16.gmra.mxu3 %v4611_v48 }
 0x256   :  { %v2679_v10 = vpop.f32.mrf.mxu2  ;;  %v2343_v18 = vpop.f32.mrf.mxu0 }
 0x257   :  { %v2848_v12 = vpop.f32.mrf.mxu3  ;;  %v2680_v15 = vadd.f32 %v2679_v10, %v2511_v50  ;;  %v2512_v62 = vpop.f32.mrf.mxu1 }
 0x258   :  { %v2513_v57 = vadd.f32 %v2512_v62, %v2343_v18  ;;  %v4638_v62 = vld [vmem:[%s9862_s0 + $0x118] sm:$0xf] }
 0x259   :  { %v7467_v61 = vadd.f32 %v2848_v12, %v2680_v15  ;;  %v4639_v44 = vor.u32 %v5803_v63, %v4638_v62  ;;  %v5811_v62 = vld [vmem:[%s9862_s0 + $0x174] sm:$0xf0]  ;;  %v5807_v63 = vld [vmem:[%s9862_s0 + $0x15c] sm:$0xf] }
 0x25b   :  { %9951 = vst [vmem:[#allocation19_spill] sm:$0xff] %v7467_v61 }
 0x25e   :  { %v2681_v27 = vpop.f32.mrf.mxu2  ;;  %v2346_v39 = vpop.f32.mrf.mxu0 }
 0x25f   :  { %v2850_v20 = vpop.f32.mrf.mxu3  ;;  %v2682_v36 = vadd.f32 %v2681_v27, %v2513_v57  ;;  %v2515_v43 = vpop.f32.mrf.mxu1  ;;  %v4662_v57 = vld [vmem:[%s9862_s0 + $0x150] sm:$0xf] }
 0x260   :  { %v2516_v48 = vadd.f32 %v2515_v43, %v2346_v39 }
 0x261   :  { %v7493_v50 = vadd.f32 %v2850_v20, %v2682_v36  ;;  %2901 = vmatmul.bf16.gmra.mxu0 %v4631_v22  ;;  %v4663_v20 = vor.u32 %v5810_v29, %v4662_v57  ;;  %v4667_v22 = vor.u32 %v5806_v30, %v4664_v32  ;;  %v5818_v29 = vld [vmem:[%s9862_s0 + $0x1ac] sm:$0xf0]  ;;  %v5814_v30 = vld [vmem:[%s9862_s0 + $0x194] sm:$0xf] }
 0x262   :  { %3070 = vmatmul.bf16.gmra.mxu1 %v4635_v34  ;;  %v4696_v32 = vld [vmem:[%s9862_s0 + $0x1b0] sm:$0xf0] }
 0x263   :  { %9952 = vst [vmem:[#allocation20_spill] sm:$0xff] %v7493_v50  ;;  %3239 = vmatmul.bf16.gmra.mxu2 %v4639_v44  ;;  %v4675_v44 = vor.u32 %v5807_v63, %v4672_v6  ;;  %v4704_v63 = vld [vmem:[%s9862_s0 + $0x1b8] sm:$0xf0] }
 0x264   :  { %3408 = vmatmul.bf16.gmra.mxu3 %v4643_v47 }
 0x266   :  { %v2684_v10 = vpop.f32.mrf.mxu2  ;;  %v2348_v18 = vpop.f32.mrf.mxu0 }
 0x267   :  { %v2853_v12 = vpop.f32.mrf.mxu3  ;;  %v2685_v15 = vadd.f32 %v2684_v10, %v2516_v48  ;;  %v2517_v61 = vpop.f32.mrf.mxu1 }
 0x268   :  { %v2518_v56 = vadd.f32 %v2517_v61, %v2348_v18  ;;  %v4670_v61 = vld [vmem:[%s9862_s0 + $0x158] sm:$0xf] }
 0x269   :  { %v7495_v60 = vadd.f32 %v2853_v12, %v2685_v15  ;;  %v4671_v43 = vor.u32 %v5811_v62, %v4670_v61  ;;  %v5819_v61 = vld [vmem:[%s9862_s0 + $0x1b4] sm:$0xf0]  ;;  %v5815_v62 = vld [vmem:[%s9862_s0 + $0x19c] sm:$0xf] }
 0x26b   :  { %9953 = vst [vmem:[#allocation21_spill] sm:$0xff] %v7495_v60 }
 0x26e   :  { %v2686_v1 = vpop.f32.mrf.mxu2  ;;  %v2351_v36 = vpop.f32.mrf.mxu0 }
 0x26f   :  { %v2855_v27 = vpop.f32.mrf.mxu3  ;;  %v2687_v34 = vadd.f32 %v2686_v1, %v2518_v56  ;;  %v2520_v39 = vpop.f32.mrf.mxu1  ;;  %v4694_v56 = vld [vmem:[%s9862_s0 + $0x190] sm:$0xf] }
 0x270   :  { %v2521_v47 = vadd.f32 %v2520_v39, %v2351_v36 }
 0x271   :  { %v7521_v48 = vadd.f32 %v2855_v27, %v2687_v34  ;;  %2906 = vmatmul.bf16.gmra.mxu0 %v4663_v20  ;;  %v4695_v27 = vor.u32 %v5818_v29, %v4694_v56  ;;  %v4699_v20 = vor.u32 %v5814_v30, %v4696_v32  ;;  %v5826_v29 = vld [vmem:[%s9862_s0 + $0x1ec] sm:$0xf0]  ;;  %v5822_v30 = vld [vmem:[%s9862_s0 + $0x1d4] sm:$0xf] }
 0x272   :  { %3075 = vmatmul.bf16.gmra.mxu1 %v4667_v22  ;;  %v4728_v32 = vld [vmem:[%s9862_s0 + $0x1f0] sm:$0xf0] }
 0x273   :  { %9954 = vst [vmem:[#allocation22_spill] sm:$0xff] %v7521_v48  ;;  %3244 = vmatmul.bf16.gmra.mxu2 %v4671_v43  ;;  %v4707_v43 = vor.u32 %v5815_v62, %v4704_v63  ;;  %v4736_v62 = vld [vmem:[%s9862_s0 + $0x1f8] sm:$0xf0] }
 0x274   :  { %3413 = vmatmul.bf16.gmra.mxu3 %v4675_v44 }
 0x276   :  { %v2689_v10 = vpop.f32.mrf.mxu2  ;;  %v2353_v18 = vpop.f32.mrf.mxu0 }
 0x277   :  { %v2858_v12 = vpop.f32.mrf.mxu3  ;;  %v2690_v15 = vadd.f32 %v2689_v10, %v2521_v47  ;;  %v2522_v60 = vpop.f32.mrf.mxu1 }
 0x278   :  { %v2523_v50 = vadd.f32 %v2522_v60, %v2353_v18  ;;  %v4702_v60 = vld [vmem:[%s9862_s0 + $0x198] sm:$0xf] }
 0x279   :  { %v7523_v57 = vadd.f32 %v2858_v12, %v2690_v15  ;;  %v4703_v39 = vor.u32 %v5819_v61, %v4702_v60  ;;  %v5827_v60 = vld [vmem:[%s9862_s0 + $0x1f4] sm:$0xf0]  ;;  %v5823_v61 = vld [vmem:[%s9862_s0 + $0x1dc] sm:$0xf] }
 0x27b   :  { %9955 = vst [vmem:[#allocation23_spill] sm:$0xff] %v7523_v57 }
 0x27e   :  { %v2691_v6 = vpop.f32.mrf.mxu2  ;;  %v2356_v34 = vpop.f32.mrf.mxu0 }
 0x27f   :  { %v2860_v1 = vpop.f32.mrf.mxu3  ;;  %v2692_v22 = vadd.f32 %v2691_v6, %v2523_v50  ;;  %v2525_v36 = vpop.f32.mrf.mxu1  ;;  %v4726_v50 = vld [vmem:[%s9862_s0 + $0x1d0] sm:$0xf] }
 0x280   :  { %v2526_v44 = vadd.f32 %v2525_v36, %v2356_v34 }
 0x281   :  { %v7549_v47 = vadd.f32 %v2860_v1, %v2692_v22  ;;  %2911 = vmatmul.bf16.gmra.mxu0 %v4695_v27  ;;  %v4727_v1 = vor.u32 %v5826_v29, %v4726_v50  ;;  %v4731_v27 = vor.u32 %v5822_v30, %v4728_v32  ;;  %v5834_v29 = vld [vmem:[%s9862_s0 + $0x22c] sm:$0xf0]  ;;  %v5830_v30 = vld [vmem:[%s9862_s0 + $0x214] sm:$0xf] }
 0x282   :  { %3080 = vmatmul.bf16.gmra.mxu1 %v4699_v20  ;;  %v4760_v32 = vld [vmem:[%s9862_s0 + $0x230] sm:$0xf0] }
 0x283   :  { %9956 = vst [vmem:[#allocation24_spill] sm:$0xff] %v7549_v47  ;;  %3249 = vmatmul.bf16.gmra.mxu2 %v4703_v39  ;;  %v4739_v39 = vor.u32 %v5823_v61, %v4736_v62  ;;  %v4768_v61 = vld [vmem:[%s9862_s0 + $0x238] sm:$0xf0] }
 0x284   :  { %3418 = vmatmul.bf16.gmra.mxu3 %v4707_v43 }
 0x286   :  { %v2694_v10 = vpop.f32.mrf.mxu2  ;;  %v2358_v18 = vpop.f32.mrf.mxu0 }
 0x287   :  { %v2863_v12 = vpop.f32.mrf.mxu3  ;;  %v2695_v15 = vadd.f32 %v2694_v10, %v2526_v44  ;;  %v2527_v57 = vpop.f32.mrf.mxu1 }
 0x288   :  { %v2528_v48 = vadd.f32 %v2527_v57, %v2358_v18  ;;  %v4734_v57 = vld [vmem:[%s9862_s0 + $0x1d8] sm:$0xf] }
 0x289   :  { %v7551_v56 = vadd.f32 %v2863_v12, %v2695_v15  ;;  %v4735_v36 = vor.u32 %v5827_v60, %v4734_v57  ;;  %v5835_v57 = vld [vmem:[%s9862_s0 + $0x234] sm:$0xf0]  ;;  %v5831_v60 = vld [vmem:[%s9862_s0 + $0x21c] sm:$0xf] }
 0x28b   :  { %9957 = vst [vmem:[#allocation25_spill] sm:$0xff] %v7551_v56 }
 0x28e   :  { %v2696_v63 = vpop.f32.mrf.mxu2  ;;  %v2361_v22 = vpop.f32.mrf.mxu0 }
 0x28f   :  { %v2865_v6 = vpop.f32.mrf.mxu3  ;;  %v2697_v20 = vadd.f32 %v2696_v63, %v2528_v48  ;;  %v2530_v34 = vpop.f32.mrf.mxu1  ;;  %v4758_v48 = vld [vmem:[%s9862_s0 + $0x210] sm:$0xf] }
 0x290   :  { %v2531_v43 = vadd.f32 %v2530_v34, %v2361_v22 }
 0x291   :  { %v7577_v44 = vadd.f32 %v2865_v6, %v2697_v20  ;;  %2916 = vmatmul.bf16.gmra.mxu0 %v4727_v1  ;;  %v4759_v6 = vor.u32 %v5834_v29, %v4758_v48  ;;  %v4763_v1 = vor.u32 %v5830_v30, %v4760_v32  ;;  %v5842_v32 = vld [vmem:[%s9862_s0 + $0x26c] sm:$0xf0] }
 0x292   :  { %3085 = vmatmul.bf16.gmra.mxu1 %v4731_v27 }
 0x293   :  { %9958 = vst [vmem:[#allocation26_spill] sm:$0xff] %v7577_v44  ;;  %3254 = vmatmul.bf16.gmra.mxu2 %v4735_v36  ;;  %v4771_v36 = vor.u32 %v5831_v60, %v4768_v61  ;;  %v5839_v60 = vld [vmem:[%s9862_s0 + $0x25c] sm:$0xf] }
 0x294   :  { %3423 = vmatmul.bf16.gmra.mxu3 %v4739_v39  ;;  %v4800_v61 = vld [vmem:[%s9862_s0 + $0x278] sm:$0xf0] }
 0x296   :  { %v2699_v10 = vpop.f32.mrf.mxu2  ;;  %v2363_v18 = vpop.f32.mrf.mxu0 }
 0x297   :  { %v2868_v12 = vpop.f32.mrf.mxu3  ;;  %v2700_v15 = vadd.f32 %v2699_v10, %v2531_v43  ;;  %v2532_v56 = vpop.f32.mrf.mxu1 }
 0x298   :  { %v2533_v47 = vadd.f32 %v2532_v56, %v2363_v18  ;;  %v4766_v56 = vld [vmem:[%s9862_s0 + $0x218] sm:$0xf] }
 0x299   :  { %v7579_v50 = vadd.f32 %v2868_v12, %v2700_v15  ;;  %v4767_v34 = vor.u32 %v5835_v57, %v4766_v56  ;;  %v5838_v56 = vld [vmem:[%s9862_s0 + $0x254] sm:$0xf] }
 0x29a   :  { %v4792_v57 = vld [vmem:[%s9862_s0 + $0x270] sm:$0xf0] }
 0x29b   :  { %9959 = vst [vmem:[#allocation27_spill] sm:$0xff] %v7579_v50 }
 0x29e   :  { %v2701_v62 = vpop.f32.mrf.mxu2  ;;  %v2882_v20 = vpop.f32.mrf.mxu0 }
 0x29f   :  { %v2870_v63 = vpop.f32.mrf.mxu3  ;;  %v2702_v27 = vadd.f32 %v2701_v62, %v2533_v47  ;;  %v3051_v22 = vpop.f32.mrf.mxu1  ;;  %v2883_v39 = vadd.f32 %v2882_v20, %v6651_v33  ;;  %v4790_v33 = vld [vmem:[%s9862_s0 + $0x250] sm:$0xf] }
 0x2a1   :  { %v7606_v43 = vadd.f32 %v2870_v63, %v2702_v27  ;;  %v3052_v10 = vadd.f32 %v3051_v22, %v2883_v39  ;;  %2921 = vmatmul.bf16.gmra.mxu0 %v4759_v6  ;;  %v4791_v6 = vor.u32 %v5842_v32, %v4790_v33 }
 0x2a2   :  { %3090 = vmatmul.bf16.gmra.mxu1 %v4763_v1  ;;  %v4795_v1 = vor.u32 %v5838_v56, %v4792_v57  ;;  %v5850_v57 = vld [vmem:[%s9862_s0 + $0x2ac] sm:$0xf0] }
 0x2a3   :  { %9960 = vst [vmem:[#allocation28_spill] sm:$0xff] %v7606_v43  ;;  %3259 = vmatmul.bf16.gmra.mxu2 %v4767_v34 }
 0x2a4   :  { %3428 = vmatmul.bf16.gmra.mxu3 %v4771_v36  ;;  %v4803_v36 = vor.u32 %v5839_v60, %v4800_v61  ;;  %v5851_v60 = vld [vmem:[%s9862_s0 + $0x2b4] sm:$0xf0]  ;;  %v5847_v61 = vld [vmem:[%s9862_s0 + $0x29c] sm:$0xf] }
 0x2a6   :  { %v3220_v12 = vpop.f32.mrf.mxu2  ;;  %v2884_v50 = vpop.f32.mrf.mxu0 }
 0x2a7   :  { %v3389_v15 = vpop.f32.mrf.mxu3  ;;  %v3221_v18 = vadd.f32 %v3220_v12, %v3052_v10  ;;  %v3053_v48 = vpop.f32.mrf.mxu1  ;;  %v2885_v47 = vadd.f32 %v2884_v50, %v6677_v52  ;;  %v4798_v52 = vld [vmem:[%s9862_s0 + $0x258] sm:$0xf] }
 0x2a8   :  { %v5843_v50 = vld [vmem:[%s9862_s0 + $0x274] sm:$0xf0] }
 0x2a9   :  { %v7609_v29 = vadd.f32 %v3389_v15, %v3221_v18  ;;  %v3054_v30 = vadd.f32 %v3053_v48, %v2885_v47  ;;  %v4799_v34 = vor.u32 %v5843_v50, %v4798_v52  ;;  %v5846_v52 = vld [vmem:[%s9862_s0 + $0x294] sm:$0xf] }
 0x2aa   :  { %v4824_v50 = vld [vmem:[%s9862_s0 + $0x2b0] sm:$0xf0] }
 0x2ae   :  { %v3222_v62 = vpop.f32.mrf.mxu2  ;;  %v2887_v20 = vpop.f32.mrf.mxu0 }
 0x2af   :  { %v3391_v63 = vpop.f32.mrf.mxu3  ;;  %v3223_v27 = vadd.f32 %v3222_v62, %v3054_v30  ;;  %v3056_v22 = vpop.f32.mrf.mxu1  ;;  %v2888_v39 = vadd.f32 %v2887_v20, %v6679_v59  ;;  %v4822_v59 = vld [vmem:[%s9862_s0 + $0x290] sm:$0xf]  ;;  %v4832_v62 = vld [vmem:[%s9862_s0 + $0x2b8] sm:$0xf0] }
 0x2b1   :  { %v7636_v10 = vadd.f32 %v3391_v63, %v3223_v27  ;;  %v3057_v12 = vadd.f32 %v3056_v22, %v2888_v39  ;;  %2926 = vmatmul.bf16.gmra.mxu0 %v4791_v6  ;;  %v4827_v27 = vor.u32 %v5846_v52, %v4824_v50  ;;  %v4835_v39 = vor.u32 %v5847_v61, %v4832_v62  ;;  %v5858_v50 = vld [vmem:[%s9862_s0 + $0x2ec] sm:$0xf0]  ;;  %v5859_v61 = vld [vmem:[%s9862_s0 + $0x2f4] sm:$0xf0]  ;;  %v5855_v62 = vld [vmem:[%s9862_s0 + $0x2dc] sm:$0xf] }
 0x2b2   :  { %3095 = vmatmul.bf16.gmra.mxu1 %v4795_v1  ;;  %v4823_v1 = vor.u32 %v5850_v57, %v4822_v59 }
 0x2b3   :  { %3264 = vmatmul.bf16.gmra.mxu2 %v4799_v34 }
 0x2b4   :  { %3433 = vmatmul.bf16.gmra.mxu3 %v4803_v36 }
 0x2b6   :  { %v3225_v15 = vpop.f32.mrf.mxu2  ;;  %v2889_v47 = vpop.f32.mrf.mxu0 }
 0x2b7   :  { %v3394_v18 = vpop.f32.mrf.mxu3  ;;  %v3226_v48 = vadd.f32 %v3225_v15, %v3057_v12  ;;  %v3058_v33 = vpop.f32.mrf.mxu1  ;;  %v2890_v30 = vadd.f32 %v2889_v47, %v6705_v14  ;;  %v4830_v14 = vld [vmem:[%s9862_s0 + $0x298] sm:$0xf] }
 0x2b8   :  { %v4831_v36 = vor.u32 %v5851_v60, %v4830_v14  ;;  %v5854_v14 = vld [vmem:[%s9862_s0 + $0x2d4] sm:$0xf] }
 0x2b9   :  { %v7639_v32 = vadd.f32 %v3394_v18, %v3226_v48  ;;  %v3059_v56 = vadd.f32 %v3058_v33, %v2890_v30  ;;  %v4856_v60 = vld [vmem:[%s9862_s0 + $0x2f0] sm:$0xf0] }
 0x2be   :  { %v3227_v63 = vpop.f32.mrf.mxu2  ;;  %v2892_v22 = vpop.f32.mrf.mxu0 }
 0x2bf   :  { %v3396_v6 = vpop.f32.mrf.mxu3  ;;  %v3228_v20 = vadd.f32 %v3227_v63, %v3059_v56  ;;  %v3061_v34 = vpop.f32.mrf.mxu1  ;;  %v2893_v12 = vadd.f32 %v2892_v22, %v6716_v24  ;;  %v4854_v24 = vld [vmem:[%s9862_s0 + $0x2d0] sm:$0xf]  ;;  %v4864_v63 = vld [vmem:[%s9862_s0 + $0x2f8] sm:$0xf0] }
 0x2c1   :  { %v7666_v15 = vadd.f32 %v3396_v6, %v3228_v20  ;;  %v3062_v18 = vadd.f32 %v3061_v34, %v2893_v12  ;;  %2931 = vmatmul.bf16.gmra.mxu0 %v4823_v1  ;;  %v4859_v20 = vor.u32 %v5854_v14, %v4856_v60  ;;  %v4867_v12 = vor.u32 %v5855_v62, %v4864_v63  ;;  %v5866_v60 = vld [vmem:[%s9862_s0 + $0x32c] sm:$0xf0]  ;;  %v5867_v62 = vld [vmem:[%s9862_s0 + $0x334] sm:$0xf0]  ;;  %v5863_v63 = vld [vmem:[%s9862_s0 + $0x31c] sm:$0xf] }
 0x2c2   :  { %3100 = vmatmul.bf16.gmra.mxu1 %v4827_v27  ;;  %v4855_v27 = vor.u32 %v5858_v50, %v4854_v24 }
 0x2c3   :  { %3269 = vmatmul.bf16.gmra.mxu2 %v4831_v36 }
 0x2c4   :  { %3438 = vmatmul.bf16.gmra.mxu3 %v4835_v39 }
 0x2c6   :  { %v3230_v48 = vpop.f32.mrf.mxu2  ;;  %v2894_v30 = vpop.f32.mrf.mxu0 }
 0x2c7   :  { %v3399_v47 = vpop.f32.mrf.mxu3  ;;  %v3231_v33 = vadd.f32 %v3230_v48, %v3062_v18  ;;  %v3063_v59 = vpop.f32.mrf.mxu1  ;;  %v2895_v56 = vadd.f32 %v2894_v30, %v6745_v45  ;;  %v4862_v45 = vld [vmem:[%s9862_s0 + $0x2d8] sm:$0xf] }
 0x2c8   :  { %v4863_v39 = vor.u32 %v5859_v61, %v4862_v45  ;;  %v5862_v45 = vld [vmem:[%s9862_s0 + $0x314] sm:$0xf] }
 0x2c9   :  { %v7669_v57 = vadd.f32 %v3399_v47, %v3231_v33  ;;  %v3064_v52 = vadd.f32 %v3063_v59, %v2895_v56  ;;  %v4888_v61 = vld [vmem:[%s9862_s0 + $0x330] sm:$0xf0] }
 0x2ce   :  { %v3232_v6 = vpop.f32.mrf.mxu2  ;;  %v2897_v34 = vpop.f32.mrf.mxu0 }
 0x2cf   :  { %v3401_v1 = vpop.f32.mrf.mxu3  ;;  %v3233_v22 = vadd.f32 %v3232_v6, %v3064_v52  ;;  %v3066_v36 = vpop.f32.mrf.mxu1  ;;  %v2898_v18 = vadd.f32 %v2897_v34, %v6747_v53  ;;  %v4886_v53 = vld [vmem:[%s9862_s0 + $0x310] sm:$0xf]  ;;  %v4896_v6 = vld [vmem:[%s9862_s0 + $0x338] sm:$0xf0] }
 0x2d1   :  { %v7696_v48 = vadd.f32 %v3401_v1, %v3233_v22  ;;  %v3067_v47 = vadd.f32 %v3066_v36, %v2898_v18  ;;  %2936 = vmatmul.bf16.gmra.mxu0 %v4855_v27  ;;  %v4891_v22 = vor.u32 %v5862_v45, %v4888_v61  ;;  %v4899_v18 = vor.u32 %v5863_v63, %v4896_v6  ;;  %v5874_v61 = vld [vmem:[%s9862_s0 + $0x36c] sm:$0xf0]  ;;  %v5875_v63 = vld [vmem:[%s9862_s0 + $0x374] sm:$0xf0]  ;;  %v5871_v6 = vld [vmem:[%s9862_s0 + $0x35c] sm:$0xf] }
 0x2d2   :  { %3105 = vmatmul.bf16.gmra.mxu1 %v4859_v20  ;;  %v4887_v20 = vor.u32 %v5866_v60, %v4886_v53 }
 0x2d3   :  { %3274 = vmatmul.bf16.gmra.mxu2 %v4863_v39 }
 0x2d4   :  { %3443 = vmatmul.bf16.gmra.mxu3 %v4867_v12 }
 0x2d6   :  { %v3235_v33 = vpop.f32.mrf.mxu2  ;;  %v2899_v56 = vpop.f32.mrf.mxu0 }
 0x2d7   :  { %v3404_v30 = vpop.f32.mrf.mxu3  ;;  %v3236_v59 = vadd.f32 %v3235_v33, %v3067_v47  ;;  %v3068_v24 = vpop.f32.mrf.mxu1  ;;  %v2900_v52 = vadd.f32 %v2899_v56, %v6773_v9  ;;  %v4894_v9 = vld [vmem:[%s9862_s0 + $0x318] sm:$0xf] }
 0x2d8   :  { %v4895_v12 = vor.u32 %v5867_v62, %v4894_v9  ;;  %v5870_v9 = vld [vmem:[%s9862_s0 + $0x354] sm:$0xf] }
 0x2d9   :  { %v7699_v50 = vadd.f32 %v3404_v30, %v3236_v59  ;;  %v3069_v14 = vadd.f32 %v3068_v24, %v2900_v52  ;;  %v4920_v62 = vld [vmem:[%s9862_s0 + $0x370] sm:$0xf0] }
 0x2de   :  { %v3237_v1 = vpop.f32.mrf.mxu2  ;;  %v2902_v36 = vpop.f32.mrf.mxu0 }
 0x2df   :  { %v3406_v27 = vpop.f32.mrf.mxu3  ;;  %v3238_v34 = vadd.f32 %v3237_v1, %v3069_v14  ;;  %v3071_v39 = vpop.f32.mrf.mxu1  ;;  %v2903_v47 = vadd.f32 %v2902_v36, %v6775_v17  ;;  %v4918_v17 = vld [vmem:[%s9862_s0 + $0x350] sm:$0xf]  ;;  %v4928_v1 = vld [vmem:[%s9862_s0 + $0x378] sm:$0xf0] }
 0x2e1   :  { %v7726_v33 = vadd.f32 %v3406_v27, %v3238_v34  ;;  %v3072_v30 = vadd.f32 %v3071_v39, %v2903_v47  ;;  %2941 = vmatmul.bf16.gmra.mxu0 %v4887_v20  ;;  %v4923_v34 = vor.u32 %v5870_v9, %v4920_v62  ;;  %v4931_v47 = vor.u32 %v5871_v6, %v4928_v1  ;;  %v5882_v62 = vld [vmem:[%s9862_s0 + $0x3ac] sm:$0xf0]  ;;  %v5883_v6 = vld [vmem:[%s9862_s0 + $0x3b4] sm:$0xf0]  ;;  %v5879_v1 = vld [vmem:[%s9862_s0 + $0x39c] sm:$0xf] }
 0x2e2   :  { %3110 = vmatmul.bf16.gmra.mxu1 %v4891_v22  ;;  %v4919_v22 = vor.u32 %v5874_v61, %v4918_v17 }
 0x2e3   :  { %3279 = vmatmul.bf16.gmra.mxu2 %v4895_v12 }
 0x2e4   :  { %3448 = vmatmul.bf16.gmra.mxu3 %v4899_v18 }
 0x2e6   :  { %v3240_v59 = vpop.f32.mrf.mxu2  ;;  %v2904_v52 = vpop.f32.mrf.mxu0 }
 0x2e7   :  { %v3409_v56 = vpop.f32.mrf.mxu3  ;;  %v3241_v24 = vadd.f32 %v3240_v59, %v3072_v30  ;;  %v3073_v53 = vpop.f32.mrf.mxu1  ;;  %v2905_v14 = vadd.f32 %v2904_v52, %v6801_v38  ;;  %v4926_v38 = vld [vmem:[%s9862_s0 + $0x358] sm:$0xf] }
 0x2e8   :  { %v4927_v18 = vor.u32 %v5875_v63, %v4926_v38  ;;  %v5878_v38 = vld [vmem:[%s9862_s0 + $0x394] sm:$0xf] }
 0x2e9   :  { %v7729_v60 = vadd.f32 %v3409_v56, %v3241_v24  ;;  %v3074_v45 = vadd.f32 %v3073_v53, %v2905_v14  ;;  %v4952_v63 = vld [vmem:[%s9862_s0 + $0x3b0] sm:$0xf0] }
 0x2ee   :  { %v3242_v27 = vpop.f32.mrf.mxu2  ;;  %v2907_v39 = vpop.f32.mrf.mxu0 }
 0x2ef   :  { %v3411_v20 = vpop.f32.mrf.mxu3  ;;  %v3243_v36 = vadd.f32 %v3242_v27, %v3074_v45  ;;  %v3076_v12 = vpop.f32.mrf.mxu1  ;;  %v2908_v30 = vadd.f32 %v2907_v39, %v6803_v46  ;;  %v4950_v46 = vld [vmem:[%s9862_s0 + $0x390] sm:$0xf]  ;;  %v4960_v27 = vld [vmem:[%s9862_s0 + $0x3b8] sm:$0xf0] }
 0x2f1   :  { %v7756_v59 = vadd.f32 %v3411_v20, %v3243_v36  ;;  %v3077_v56 = vadd.f32 %v3076_v12, %v2908_v30  ;;  %2946 = vmatmul.bf16.gmra.mxu0 %v4919_v22  ;;  %v4955_v36 = vor.u32 %v5878_v38, %v4952_v63  ;;  %v4963_v30 = vor.u32 %v5879_v1, %v4960_v27  ;;  %v5890_v63 = vld [vmem:[%s9862_s0 + $0x3ec] sm:$0xf0]  ;;  %v5891_v1 = vld [vmem:[%s9862_s0 + $0x3f4] sm:$0xf0]  ;;  %v5887_v27 = vld [vmem:[%s9862_s0 + $0x3dc] sm:$0xf] }
 0x2f2   :  { %3115 = vmatmul.bf16.gmra.mxu1 %v4923_v34  ;;  %v4951_v34 = vor.u32 %v5882_v62, %v4950_v46 }
 0x2f3   :  { %3284 = vmatmul.bf16.gmra.mxu2 %v4927_v18 }
 0x2f4   :  { %3453 = vmatmul.bf16.gmra.mxu3 %v4931_v47 }
 0x2f6   :  { %v3245_v24 = vpop.f32.mrf.mxu2  ;;  %v2909_v14 = vpop.f32.mrf.mxu0 }
 0x2f7   :  { %v3414_v52 = vpop.f32.mrf.mxu3  ;;  %v3246_v53 = vadd.f32 %v3245_v24, %v3077_v56  ;;  %v3078_v17 = vpop.f32.mrf.mxu1  ;;  %v2910_v45 = vadd.f32 %v2909_v14, %v6829_v4  ;;  %v4958_v4 = vld [vmem:[%s9862_s0 + $0x398] sm:$0xf] }
 0x2f8   :  { %v4959_v47 = vor.u32 %v5883_v6, %v4958_v4  ;;  %v5886_v4 = vld [vmem:[%s9862_s0 + $0x3d4] sm:$0xf] }
 0x2f9   :  { %v7759_v61 = vadd.f32 %v3414_v52, %v3246_v53  ;;  %v3079_v9 = vadd.f32 %v3078_v17, %v2910_v45  ;;  %v4984_v6 = vld [vmem:[%s9862_s0 + $0x3f0] sm:$0xf0] }
 0x2fe   :  { %v3247_v20 = vpop.f32.mrf.mxu2  ;;  %v2912_v12 = vpop.f32.mrf.mxu0 }
 0x2ff   :  { %v3416_v22 = vpop.f32.mrf.mxu3  ;;  %v3248_v39 = vadd.f32 %v3247_v20, %v3079_v9  ;;  %v3081_v18 = vpop.f32.mrf.mxu1  ;;  %v2913_v56 = vadd.f32 %v2912_v12, %v6840_v16  ;;  %v4982_v16 = vld [vmem:[%s9862_s0 + $0x3d0] sm:$0xf]  ;;  %v4992_v20 = vld [vmem:[%s9862_s0 + $0x3f8] sm:$0xf0] }
 0x301   :  { %v7786_v24 = vadd.f32 %v3416_v22, %v3248_v39  ;;  %v3082_v52 = vadd.f32 %v3081_v18, %v2913_v56  ;;  %2951 = vmatmul.bf16.gmra.mxu0 %v4951_v34  ;;  %v4987_v39 = vor.u32 %v5886_v4, %v4984_v6  ;;  %v4995_v56 = vor.u32 %v5887_v27, %v4992_v20  ;;  %v5898_v6 = vld [vmem:[%s9862_s0 + $0x42c] sm:$0xf0]  ;;  %v5899_v27 = vld [vmem:[%s9862_s0 + $0x434] sm:$0xf0]  ;;  %v5895_v20 = vld [vmem:[%s9862_s0 + $0x41c] sm:$0xf] }
 0x302   :  { %3120 = vmatmul.bf16.gmra.mxu1 %v4955_v36  ;;  %v4983_v36 = vor.u32 %v5890_v63, %v4982_v16 }
 0x303   :  { %3289 = vmatmul.bf16.gmra.mxu2 %v4959_v47 }
 0x304   :  { %3458 = vmatmul.bf16.gmra.mxu3 %v4963_v30 }
 0x306   :  { %v3250_v53 = vpop.f32.mrf.mxu2  ;;  %v2914_v45 = vpop.f32.mrf.mxu0 }
 0x307   :  { %v3419_v14 = vpop.f32.mrf.mxu3  ;;  %v3251_v17 = vadd.f32 %v3250_v53, %v3082_v52  ;;  %v3083_v46 = vpop.f32.mrf.mxu1  ;;  %v2915_v9 = vadd.f32 %v2914_v45, %v6869_v40  ;;  %v4990_v40 = vld [vmem:[%s9862_s0 + $0x3d8] sm:$0xf] }
 0x308   :  { %v4991_v30 = vor.u32 %v5891_v1, %v4990_v40  ;;  %v5894_v40 = vld [vmem:[%s9862_s0 + $0x414] sm:$0xf] }
 0x309   :  { %v7789_v62 = vadd.f32 %v3419_v14, %v3251_v17  ;;  %v3084_v38 = vadd.f32 %v3083_v46, %v2915_v9  ;;  %v5016_v1 = vld [vmem:[%s9862_s0 + $0x430] sm:$0xf0] }
 0x30e   :  { %v3252_v22 = vpop.f32.mrf.mxu2  ;;  %v2917_v18 = vpop.f32.mrf.mxu0 }
 0x30f   :  { %v3421_v34 = vpop.f32.mrf.mxu3  ;;  %v3253_v12 = vadd.f32 %v3252_v22, %v3084_v38  ;;  %v3086_v47 = vpop.f32.mrf.mxu1  ;;  %v2918_v52 = vadd.f32 %v2917_v18, %v6871_v49  ;;  %v5014_v49 = vld [vmem:[%s9862_s0 + $0x410] sm:$0xf]  ;;  %v5024_v22 = vld [vmem:[%s9862_s0 + $0x438] sm:$0xf0] }
 0x311   :  { %v7816_v53 = vadd.f32 %v3421_v34, %v3253_v12  ;;  %v3087_v14 = vadd.f32 %v3086_v47, %v2918_v52  ;;  %2956 = vmatmul.bf16.gmra.mxu0 %v4983_v36  ;;  %v5019_v12 = vor.u32 %v5894_v40, %v5016_v1  ;;  %v5027_v52 = vor.u32 %v5895_v20, %v5024_v22  ;;  %v5906_v1 = vld [vmem:[%s9862_s0 + $0x46c] sm:$0xf0]  ;;  %v5907_v20 = vld [vmem:[%s9862_s0 + $0x474] sm:$0xf0]  ;;  %v5903_v22 = vld [vmem:[%s9862_s0 + $0x45c] sm:$0xf] }
 0x312   :  { %3125 = vmatmul.bf16.gmra.mxu1 %v4987_v39  ;;  %v5015_v39 = vor.u32 %v5898_v6, %v5014_v49 }
 0x313   :  { %3294 = vmatmul.bf16.gmra.mxu2 %v4991_v30 }
 0x314   :  { %3463 = vmatmul.bf16.gmra.mxu3 %v4995_v56 }
 0x316   :  { %v3255_v17 = vpop.f32.mrf.mxu2  ;;  %v2919_v9 = vpop.f32.mrf.mxu0 }
 0x317   :  { %v3424_v45 = vpop.f32.mrf.mxu3  ;;  %v3256_v46 = vadd.f32 %v3255_v17, %v3087_v14  ;;  %v3088_v16 = vpop.f32.mrf.mxu1  ;;  %v2920_v38 = vadd.f32 %v2919_v9, %v6897_v8  ;;  %v5022_v8 = vld [vmem:[%s9862_s0 + $0x418] sm:$0xf] }
 0x318   :  { %v5023_v56 = vor.u32 %v5899_v27, %v5022_v8  ;;  %v5902_v8 = vld [vmem:[%s9862_s0 + $0x454] sm:$0xf] }
 0x319   :  { %v7819_v63 = vadd.f32 %v3424_v45, %v3256_v46  ;;  %v3089_v4 = vadd.f32 %v3088_v16, %v2920_v38  ;;  %v5048_v27 = vld [vmem:[%s9862_s0 + $0x470] sm:$0xf0] }
 0x31e   :  { %v3257_v34 = vpop.f32.mrf.mxu2  ;;  %v2922_v47 = vpop.f32.mrf.mxu0 }
 0x31f   :  { %v3426_v36 = vpop.f32.mrf.mxu3  ;;  %v3258_v18 = vadd.f32 %v3257_v34, %v3089_v4  ;;  %v3091_v30 = vpop.f32.mrf.mxu1  ;;  %v2923_v14 = vadd.f32 %v2922_v47, %v6899_v19  ;;  %v5046_v19 = vld [vmem:[%s9862_s0 + $0x450] sm:$0xf]  ;;  %v5056_v34 = vld [vmem:[%s9862_s0 + $0x478] sm:$0xf0] }
 0x321   :  { %v7846_v17 = vadd.f32 %v3426_v36, %v3258_v18  ;;  %v3092_v45 = vadd.f32 %v3091_v30, %v2923_v14  ;;  %2961 = vmatmul.bf16.gmra.mxu0 %v5015_v39  ;;  %v5051_v18 = vor.u32 %v5902_v8, %v5048_v27  ;;  %v5059_v14 = vor.u32 %v5903_v22, %v5056_v34  ;;  %v5914_v27 = vld [vmem:[%s9862_s0 + $0x4ac] sm:$0xf0]  ;;  %v5915_v22 = vld [vmem:[%s9862_s0 + $0x4b4] sm:$0xf0]  ;;  %v5911_v34 = vld [vmem:[%s9862_s0 + $0x49c] sm:$0xf] }
 0x322   :  { %3130 = vmatmul.bf16.gmra.mxu1 %v5019_v12  ;;  %v5047_v12 = vor.u32 %v5906_v1, %v5046_v19 }
 0x323   :  { %9961 = vst [vmem:[#allocation29_spill] sm:$0xff] %v7846_v17  ;;  %3299 = vmatmul.bf16.gmra.mxu2 %v5023_v56 }
 0x324   :  { %3468 = vmatmul.bf16.gmra.mxu3 %v5027_v52 }
 0x326   :  { %v3260_v46 = vpop.f32.mrf.mxu2  ;;  %v2924_v38 = vpop.f32.mrf.mxu0 }
 0x327   :  { %v3429_v9 = vpop.f32.mrf.mxu3  ;;  %v3261_v16 = vadd.f32 %v3260_v46, %v3092_v45  ;;  %v3093_v49 = vpop.f32.mrf.mxu1  ;;  %v2925_v4 = vadd.f32 %v2924_v38, %v6925_v42  ;;  %v5054_v42 = vld [vmem:[%s9862_s0 + $0x458] sm:$0xf] }
 0x328   :  { %v5055_v52 = vor.u32 %v5907_v20, %v5054_v42  ;;  %v5910_v42 = vld [vmem:[%s9862_s0 + $0x494] sm:$0xf] }
 0x329   :  { %v7849_v6 = vadd.f32 %v3429_v9, %v3261_v16  ;;  %v3094_v40 = vadd.f32 %v3093_v49, %v2925_v4  ;;  %v5080_v20 = vld [vmem:[%s9862_s0 + $0x4b0] sm:$0xf0] }
 0x32e   :  { %v3262_v36 = vpop.f32.mrf.mxu2  ;;  %v2927_v30 = vpop.f32.mrf.mxu0 }
 0x32f   :  { %v3431_v39 = vpop.f32.mrf.mxu3  ;;  %v3263_v47 = vadd.f32 %v3262_v36, %v3094_v40  ;;  %v3096_v56 = vpop.f32.mrf.mxu1  ;;  %v2928_v45 = vadd.f32 %v2927_v30, %v6927_v54  ;;  %v5078_v54 = vld [vmem:[%s9862_s0 + $0x490] sm:$0xf]  ;;  %v5088_v36 = vld [vmem:[%s9862_s0 + $0x4b8] sm:$0xf0] }
 0x331   :  { %v7876_v46 = vadd.f32 %v3431_v39, %v3263_v47  ;;  %v3097_v9 = vadd.f32 %v3096_v56, %v2928_v45  ;;  %2966 = vmatmul.bf16.gmra.mxu0 %v5047_v12  ;;  %v5083_v47 = vor.u32 %v5910_v42, %v5080_v20  ;;  %v5091_v45 = vor.u32 %v5911_v34, %v5088_v36  ;;  %v5922_v20 = vld [vmem:[%s9862_s0 + $0x4ec] sm:$0xf0]  ;;  %v5923_v34 = vld [vmem:[%s9862_s0 + $0x4f4] sm:$0xf0]  ;;  %v5919_v36 = vld [vmem:[%s9862_s0 + $0x4dc] sm:$0xf] }
 0x332   :  { %3135 = vmatmul.bf16.gmra.mxu1 %v5051_v18  ;;  %v5079_v18 = vor.u32 %v5914_v27, %v5078_v54 }
 0x333   :  { %3304 = vmatmul.bf16.gmra.mxu2 %v5055_v52 }
 0x334   :  { %3473 = vmatmul.bf16.gmra.mxu3 %v5059_v14 }
 0x336   :  { %v3265_v16 = vpop.f32.mrf.mxu2  ;;  %v2929_v4 = vpop.f32.mrf.mxu0 }
 0x337   :  { %v3434_v38 = vpop.f32.mrf.mxu3  ;;  %v3266_v49 = vadd.f32 %v3265_v16, %v3097_v9  ;;  %v3098_v19 = vpop.f32.mrf.mxu1  ;;  %v2930_v40 = vadd.f32 %v2929_v4, %v6953_v13  ;;  %v5086_v13 = vld [vmem:[%s9862_s0 + $0x498] sm:$0xf] }
 0x338   :  { %v5087_v14 = vor.u32 %v5915_v22, %v5086_v13  ;;  %v5918_v13 = vld [vmem:[%s9862_s0 + $0x4d4] sm:$0xf] }
 0x339   :  { %v7879_v1 = vadd.f32 %v3434_v38, %v3266_v49  ;;  %v3099_v8 = vadd.f32 %v3098_v19, %v2930_v40  ;;  %v5112_v22 = vld [vmem:[%s9862_s0 + $0x4f0] sm:$0xf0] }
 0x33e   :  { %v3267_v39 = vpop.f32.mrf.mxu2  ;;  %v2932_v56 = vpop.f32.mrf.mxu0 }
 0x33f   :  { %v3436_v12 = vpop.f32.mrf.mxu3  ;;  %v3268_v30 = vadd.f32 %v3267_v39, %v3099_v8  ;;  %v3101_v52 = vpop.f32.mrf.mxu1  ;;  %v2933_v9 = vadd.f32 %v2932_v56, %v6964_v28  ;;  %v5110_v28 = vld [vmem:[%s9862_s0 + $0x4d0] sm:$0xf]  ;;  %v5120_v39 = vld [vmem:[%s9862_s0 + $0x4f8] sm:$0xf0] }
 0x341   :  { %v7906_v16 = vadd.f32 %v3436_v12, %v3268_v30  ;;  %v3102_v38 = vadd.f32 %v3101_v52, %v2933_v9  ;;  %2971 = vmatmul.bf16.gmra.mxu0 %v5079_v18  ;;  %v5115_v30 = vor.u32 %v5918_v13, %v5112_v22  ;;  %v5123_v9 = vor.u32 %v5919_v36, %v5120_v39  ;;  %v5930_v22 = vld [vmem:[%s9862_s0 + $0x52c] sm:$0xf0]  ;;  %v5931_v36 = vld [vmem:[%s9862_s0 + $0x534] sm:$0xf0]  ;;  %v5927_v39 = vld [vmem:[%s9862_s0 + $0x51c] sm:$0xf] }
 0x342   :  { %3140 = vmatmul.bf16.gmra.mxu1 %v5083_v47  ;;  %v5111_v47 = vor.u32 %v5922_v20, %v5110_v28 }
 0x343   :  { %9962 = vst [vmem:[#allocation30_spill] sm:$0xff] %v7906_v16  ;;  %3309 = vmatmul.bf16.gmra.mxu2 %v5087_v14 }
 0x344   :  { %3478 = vmatmul.bf16.gmra.mxu3 %v5091_v45 }
 0x346   :  { %v3270_v49 = vpop.f32.mrf.mxu2  ;;  %v2934_v40 = vpop.f32.mrf.mxu0 }
 0x347   :  { %v3439_v4 = vpop.f32.mrf.mxu3  ;;  %v3271_v19 = vadd.f32 %v3270_v49, %v3102_v38  ;;  %v3103_v54 = vpop.f32.mrf.mxu1  ;;  %v2935_v8 = vadd.f32 %v2934_v40, %v6993_v58  ;;  %v5118_v58 = vld [vmem:[%s9862_s0 + $0x4d8] sm:$0xf] }
 0x348   :  { %v5119_v45 = vor.u32 %v5923_v34, %v5118_v58  ;;  %v5926_v58 = vld [vmem:[%s9862_s0 + $0x514] sm:$0xf] }
 0x349   :  { %v7909_v27 = vadd.f32 %v3439_v4, %v3271_v19  ;;  %v3104_v42 = vadd.f32 %v3103_v54, %v2935_v8  ;;  %v5144_v34 = vld [vmem:[%s9862_s0 + $0x530] sm:$0xf0] }
 0x34b   :  { %9963 = vst [vmem:[#allocation31_spill] sm:$0xff] %v7909_v27 }
 0x34e   :  { %v3272_v12 = vpop.f32.mrf.mxu2  ;;  %v2937_v52 = vpop.f32.mrf.mxu0 }
 0x34f   :  { %v3441_v18 = vpop.f32.mrf.mxu3  ;;  %v3273_v56 = vadd.f32 %v3272_v12, %v3104_v42  ;;  %v3106_v14 = vpop.f32.mrf.mxu1  ;;  %v2938_v38 = vadd.f32 %v2937_v52, %v6995_v2  ;;  %v5142_v2 = vld [vmem:[%s9862_s0 + $0x510] sm:$0xf]  ;;  %v5152_v12 = vld [vmem:[%s9862_s0 + $0x538] sm:$0xf0] }
 0x351   :  { %v7936_v49 = vadd.f32 %v3441_v18, %v3273_v56  ;;  %v3107_v4 = vadd.f32 %v3106_v14, %v2938_v38  ;;  %2976 = vmatmul.bf16.gmra.mxu0 %v5111_v47  ;;  %v5147_v56 = vor.u32 %v5926_v58, %v5144_v34  ;;  %v5155_v38 = vor.u32 %v5927_v39, %v5152_v12  ;;  %v5938_v34 = vld [vmem:[%s9862_s0 + $0x56c] sm:$0xf0]  ;;  %v5939_v39 = vld [vmem:[%s9862_s0 + $0x574] sm:$0xf0]  ;;  %v5935_v12 = vld [vmem:[%s9862_s0 + $0x55c] sm:$0xf] }
 0x352   :  { %3145 = vmatmul.bf16.gmra.mxu1 %v5115_v30  ;;  %v5143_v30 = vor.u32 %v5930_v22, %v5142_v2 }
 0x353   :  { %9964 = vst [vmem:[#allocation32_spill] sm:$0xff] %v7936_v49  ;;  %3314 = vmatmul.bf16.gmra.mxu2 %v5119_v45 }
 0x354   :  { %3483 = vmatmul.bf16.gmra.mxu3 %v5123_v9 }
 0x356   :  { %v3275_v19 = vpop.f32.mrf.mxu2  ;;  %v2939_v8 = vpop.f32.mrf.mxu0 }
 0x357   :  { %v3444_v40 = vpop.f32.mrf.mxu3  ;;  %v3276_v54 = vadd.f32 %v3275_v19, %v3107_v4  ;;  %v3108_v28 = vpop.f32.mrf.mxu1  ;;  %v2940_v42 = vadd.f32 %v2939_v8, %v7021_v31  ;;  %v5150_v31 = vld [vmem:[%s9862_s0 + $0x518] sm:$0xf] }
 0x358   :  { %v5151_v9 = vor.u32 %v5931_v36, %v5150_v31  ;;  %v5934_v31 = vld [vmem:[%s9862_s0 + $0x554] sm:$0xf] }
 0x359   :  { %v7939_v20 = vadd.f32 %v3444_v40, %v3276_v54  ;;  %v3109_v13 = vadd.f32 %v3108_v28, %v2940_v42  ;;  %v5176_v36 = vld [vmem:[%s9862_s0 + $0x570] sm:$0xf0] }
 0x35b   :  { %9965 = vst [vmem:[#allocation33_spill] sm:$0xff] %v7939_v20 }
 0x35e   :  { %v3277_v18 = vpop.f32.mrf.mxu2  ;;  %v2942_v14 = vpop.f32.mrf.mxu0 }
 0x35f   :  { %v3446_v47 = vpop.f32.mrf.mxu3  ;;  %v3278_v52 = vadd.f32 %v3277_v18, %v3109_v13  ;;  %v3111_v45 = vpop.f32.mrf.mxu1  ;;  %v2943_v4 = vadd.f32 %v2942_v14, %v7023_v41  ;;  %v5174_v41 = vld [vmem:[%s9862_s0 + $0x550] sm:$0xf]  ;;  %v5184_v18 = vld [vmem:[%s9862_s0 + $0x578] sm:$0xf0] }
 0x361   :  { %v7966_v19 = vadd.f32 %v3446_v47, %v3278_v52  ;;  %v3112_v40 = vadd.f32 %v3111_v45, %v2943_v4  ;;  %2981 = vmatmul.bf16.gmra.mxu0 %v5143_v30  ;;  %v5179_v52 = vor.u32 %v5934_v31, %v5176_v36  ;;  %v5187_v4 = vor.u32 %v5935_v12, %v5184_v18  ;;  %v5946_v36 = vld [vmem:[%s9862_s0 + $0x5ac] sm:$0xf0]  ;;  %v5947_v12 = vld [vmem:[%s9862_s0 + $0x5b4] sm:$0xf0]  ;;  %v5943_v18 = vld [vmem:[%s9862_s0 + $0x59c] sm:$0xf] }
 0x362   :  { %3150 = vmatmul.bf16.gmra.mxu1 %v5147_v56  ;;  %v5175_v56 = vor.u32 %v5938_v34, %v5174_v41 }
 0x363   :  { %9966 = vst [vmem:[#allocation34_spill] sm:$0xff] %v7966_v19  ;;  %3319 = vmatmul.bf16.gmra.mxu2 %v5151_v9 }
 0x364   :  { %3488 = vmatmul.bf16.gmra.mxu3 %v5155_v38 }
 0x366   :  { %v3280_v54 = vpop.f32.mrf.mxu2  ;;  %v2944_v42 = vpop.f32.mrf.mxu0 }
 0x367   :  { %v3449_v8 = vpop.f32.mrf.mxu3  ;;  %v3281_v28 = vadd.f32 %v3280_v54, %v3112_v40  ;;  %v3113_v2 = vpop.f32.mrf.mxu1  ;;  %v2945_v13 = vadd.f32 %v2944_v42, %v7049_v7  ;;  %v5182_v7 = vld [vmem:[%s9862_s0 + $0x558] sm:$0xf] }
 0x368   :  { %v5183_v38 = vor.u32 %v5939_v39, %v5182_v7  ;;  %v5942_v7 = vld [vmem:[%s9862_s0 + $0x594] sm:$0xf] }
 0x369   :  { %v7969_v22 = vadd.f32 %v3449_v8, %v3281_v28  ;;  %v3114_v58 = vadd.f32 %v3113_v2, %v2945_v13  ;;  %v5208_v39 = vld [vmem:[%s9862_s0 + $0x5b0] sm:$0xf0] }
 0x36b   :  { %9967 = vst [vmem:[#allocation35_spill] sm:$0xff] %v7969_v22 }
 0x36e   :  { %v3282_v47 = vpop.f32.mrf.mxu2  ;;  %v2947_v45 = vpop.f32.mrf.mxu0 }
 0x36f   :  { %v3451_v30 = vpop.f32.mrf.mxu3  ;;  %v3283_v14 = vadd.f32 %v3282_v47, %v3114_v58  ;;  %v3116_v9 = vpop.f32.mrf.mxu1  ;;  %v2948_v40 = vadd.f32 %v2947_v45, %v7051_v21  ;;  %v5206_v21 = vld [vmem:[%s9862_s0 + $0x590] sm:$0xf]  ;;  %v5216_v47 = vld [vmem:[%s9862_s0 + $0x5b8] sm:$0xf0] }
 0x371   :  { %v7996_v54 = vadd.f32 %v3451_v30, %v3283_v14  ;;  %v3117_v8 = vadd.f32 %v3116_v9, %v2948_v40  ;;  %2986 = vmatmul.bf16.gmra.mxu0 %v5175_v56  ;;  %v5211_v14 = vor.u32 %v5942_v7, %v5208_v39  ;;  %v5219_v40 = vor.u32 %v5943_v18, %v5216_v47  ;;  %v5954_v39 = vld [vmem:[%s9862_s0 + $0x5ec] sm:$0xf0]  ;;  %v5955_v18 = vld [vmem:[%s9862_s0 + $0x5f4] sm:$0xf0]  ;;  %v5951_v47 = vld [vmem:[%s9862_s0 + $0x5dc] sm:$0xf] }
 0x372   :  { %3155 = vmatmul.bf16.gmra.mxu1 %v5179_v52  ;;  %v5207_v52 = vor.u32 %v5946_v36, %v5206_v21 }
 0x373   :  { %9968 = vst [vmem:[#allocation36_spill] sm:$0xff] %v7996_v54  ;;  %3324 = vmatmul.bf16.gmra.mxu2 %v5183_v38 }
 0x374   :  { %3493 = vmatmul.bf16.gmra.mxu3 %v5187_v4 }
 0x376   :  { %v3285_v28 = vpop.f32.mrf.mxu2  ;;  %v2949_v13 = vpop.f32.mrf.mxu0 }
 0x377   :  { %v3454_v42 = vpop.f32.mrf.mxu3  ;;  %v3286_v2 = vadd.f32 %v3285_v28, %v3117_v8  ;;  %v3118_v41 = vpop.f32.mrf.mxu1  ;;  %v2950_v58 = vadd.f32 %v2949_v13, %v7077_v51  ;;  %v5214_v51 = vld [vmem:[%s9862_s0 + $0x598] sm:$0xf] }
 0x378   :  { %v5215_v4 = vor.u32 %v5947_v12, %v5214_v51  ;;  %v5950_v51 = vld [vmem:[%s9862_s0 + $0x5d4] sm:$0xf] }
 0x379   :  { %v7999_v34 = vadd.f32 %v3454_v42, %v3286_v2  ;;  %v3119_v31 = vadd.f32 %v3118_v41, %v2950_v58  ;;  %v5240_v12 = vld [vmem:[%s9862_s0 + $0x5f0] sm:$0xf0] }
 0x37b   :  { %9969 = vst [vmem:[#allocation37_spill] sm:$0xff] %v7999_v34 }
 0x37e   :  { %v3287_v30 = vpop.f32.mrf.mxu2  ;;  %v2952_v9 = vpop.f32.mrf.mxu0 }
 0x37f   :  { %v3456_v56 = vpop.f32.mrf.mxu3  ;;  %v3288_v45 = vadd.f32 %v3287_v30, %v3119_v31  ;;  %v3121_v38 = vpop.f32.mrf.mxu1  ;;  %v2953_v8 = vadd.f32 %v2952_v9, %v7088_v3  ;;  %v5238_v3 = vld [vmem:[%s9862_s0 + $0x5d0] sm:$0xf]  ;;  %v5248_v30 = vld [vmem:[%s9862_s0 + $0x5f8] sm:$0xf0] }
 0x381   :  { %v8026_v28 = vadd.f32 %v3456_v56, %v3288_v45  ;;  %v3122_v42 = vadd.f32 %v3121_v38, %v2953_v8  ;;  %2991 = vmatmul.bf16.gmra.mxu0 %v5207_v52  ;;  %v5243_v45 = vor.u32 %v5950_v51, %v5240_v12  ;;  %v5251_v8 = vor.u32 %v5951_v47, %v5248_v30  ;;  %v5962_v12 = vld [vmem:[%s9862_s0 + $0x62c] sm:$0xf0]  ;;  %v5963_v47 = vld [vmem:[%s9862_s0 + $0x634] sm:$0xf0]  ;;  %v5959_v30 = vld [vmem:[%s9862_s0 + $0x61c] sm:$0xf] }
 0x382   :  { %3160 = vmatmul.bf16.gmra.mxu1 %v5211_v14  ;;  %v5239_v14 = vor.u32 %v5954_v39, %v5238_v3 }
 0x383   :  { %9970 = vst [vmem:[#allocation38_spill] sm:$0xff] %v8026_v28  ;;  %3329 = vmatmul.bf16.gmra.mxu2 %v5215_v4 }
 0x384   :  { %3498 = vmatmul.bf16.gmra.mxu3 %v5219_v40 }
 0x386   :  { %v3290_v2 = vpop.f32.mrf.mxu2  ;;  %v2954_v58 = vpop.f32.mrf.mxu0 }
 0x387   :  { %v3459_v13 = vpop.f32.mrf.mxu3  ;;  %v3291_v41 = vadd.f32 %v3290_v2, %v3122_v42  ;;  %v3123_v21 = vpop.f32.mrf.mxu1  ;;  %v2955_v31 = vadd.f32 %v2954_v58, %v7117_v37  ;;  %v5246_v37 = vld [vmem:[%s9862_s0 + $0x5d8] sm:$0xf] }
 0x388   :  { %v5247_v40 = vor.u32 %v5955_v18, %v5246_v37  ;;  %v5958_v37 = vld [vmem:[%s9862_s0 + $0x614] sm:$0xf] }
 0x389   :  { %v8029_v36 = vadd.f32 %v3459_v13, %v3291_v41  ;;  %v3124_v7 = vadd.f32 %v3123_v21, %v2955_v31  ;;  %v5272_v18 = vld [vmem:[%s9862_s0 + $0x630] sm:$0xf0] }
 0x38b   :  { %9971 = vst [vmem:[#allocation39_spill] sm:$0xff] %v8029_v36 }
 0x38e   :  { %v3292_v56 = vpop.f32.mrf.mxu2  ;;  %v2957_v38 = vpop.f32.mrf.mxu0 }
 0x38f   :  { %v3461_v52 = vpop.f32.mrf.mxu3  ;;  %v3293_v9 = vadd.f32 %v3292_v56, %v3124_v7  ;;  %v3126_v4 = vpop.f32.mrf.mxu1  ;;  %v2958_v42 = vadd.f32 %v2957_v38, %v7119_v55  ;;  %v5270_v55 = vld [vmem:[%s9862_s0 + $0x610] sm:$0xf]  ;;  %v5280_v56 = vld [vmem:[%s9862_s0 + $0x638] sm:$0xf0] }
 0x391   :  { %v8056_v2 = vadd.f32 %v3461_v52, %v3293_v9  ;;  %v3127_v13 = vadd.f32 %v3126_v4, %v2958_v42  ;;  %2996 = vmatmul.bf16.gmra.mxu0 %v5239_v14  ;;  %v5275_v9 = vor.u32 %v5958_v37, %v5272_v18  ;;  %v5283_v42 = vor.u32 %v5959_v30, %v5280_v56  ;;  %v5970_v18 = vld [vmem:[%s9862_s0 + $0x66c] sm:$0xf0]  ;;  %v5971_v30 = vld [vmem:[%s9862_s0 + $0x674] sm:$0xf0]  ;;  %v5967_v56 = vld [vmem:[%s9862_s0 + $0x65c] sm:$0xf] }
 0x392   :  { %3165 = vmatmul.bf16.gmra.mxu1 %v5243_v45  ;;  %v5271_v45 = vor.u32 %v5962_v12, %v5270_v55 }
 0x393   :  { %9972 = vst [vmem:[#allocation40_spill] sm:$0xff] %v8056_v2  ;;  %3334 = vmatmul.bf16.gmra.mxu2 %v5247_v40 }
 0x394   :  { %3503 = vmatmul.bf16.gmra.mxu3 %v5251_v8 }
 0x396   :  { %v3295_v41 = vpop.f32.mrf.mxu2  ;;  %v2959_v31 = vpop.f32.mrf.mxu0 }
 0x397   :  { %v3464_v58 = vpop.f32.mrf.mxu3  ;;  %v3296_v21 = vadd.f32 %v3295_v41, %v3127_v13  ;;  %v3128_v3 = vpop.f32.mrf.mxu1  ;;  %v2960_v7 = vadd.f32 %v2959_v31, %v7145_v25  ;;  %v5278_v25 = vld [vmem:[%s9862_s0 + $0x618] sm:$0xf] }
 0x398   :  { %v5279_v8 = vor.u32 %v5963_v47, %v5278_v25  ;;  %v5966_v25 = vld [vmem:[%s9862_s0 + $0x654] sm:$0xf] }
 0x399   :  { %v8059_v39 = vadd.f32 %v3464_v58, %v3296_v21  ;;  %v3129_v51 = vadd.f32 %v3128_v3, %v2960_v7  ;;  %v5304_v47 = vld [vmem:[%s9862_s0 + $0x670] sm:$0xf0] }
 0x39b   :  { %9973 = vst [vmem:[#allocation41_spill] sm:$0xff] %v8059_v39 }
 0x39e   :  { %v3297_v52 = vpop.f32.mrf.mxu2  ;;  %v2962_v4 = vpop.f32.mrf.mxu0 }
 0x39f   :  { %v3466_v14 = vpop.f32.mrf.mxu3  ;;  %v3298_v38 = vadd.f32 %v3297_v52, %v3129_v51  ;;  %v3131_v40 = vpop.f32.mrf.mxu1  ;;  %v2963_v13 = vadd.f32 %v2962_v4, %v7147_v35  ;;  %v5302_v35 = vld [vmem:[%s9862_s0 + $0x650] sm:$0xf]  ;;  %v5312_v52 = vld [vmem:[%s9862_s0 + $0x678] sm:$0xf0] }
 0x3a1   :  { %v8086_v41 = vadd.f32 %v3466_v14, %v3298_v38  ;;  %v3132_v58 = vadd.f32 %v3131_v40, %v2963_v13  ;;  %3001 = vmatmul.bf16.gmra.mxu0 %v5271_v45  ;;  %v5307_v38 = vor.u32 %v5966_v25, %v5304_v47  ;;  %v5315_v13 = vor.u32 %v5967_v56, %v5312_v52  ;;  %v5978_v47 = vld [vmem:[%s9862_s0 + $0x6ac] sm:$0xf0]  ;;  %v5979_v56 = vld [vmem:[%s9862_s0 + $0x6b4] sm:$0xf0]  ;;  %v5975_v52 = vld [vmem:[%s9862_s0 + $0x69c] sm:$0xf] }
 0x3a2   :  { %3170 = vmatmul.bf16.gmra.mxu1 %v5275_v9  ;;  %v5303_v9 = vor.u32 %v5970_v18, %v5302_v35 }
 0x3a3   :  { %9974 = vst [vmem:[#allocation42_spill] sm:$0xff] %v8086_v41  ;;  %3339 = vmatmul.bf16.gmra.mxu2 %v5279_v8 }
 0x3a4   :  { %3508 = vmatmul.bf16.gmra.mxu3 %v5283_v42 }
 0x3a6   :  { %v3300_v21 = vpop.f32.mrf.mxu2  ;;  %v2964_v7 = vpop.f32.mrf.mxu0 }
 0x3a7   :  { %v3469_v31 = vpop.f32.mrf.mxu3  ;;  %v3301_v3 = vadd.f32 %v3300_v21, %v3132_v58  ;;  %v3133_v55 = vpop.f32.mrf.mxu1  ;;  %v2965_v51 = vadd.f32 %v2964_v7, %v7173_v11  ;;  %v5310_v11 = vld [vmem:[%s9862_s0 + $0x658] sm:$0xf] }
 0x3a8   :  { %v5311_v42 = vor.u32 %v5971_v30, %v5310_v11  ;;  %v5974_v11 = vld [vmem:[%s9862_s0 + $0x694] sm:$0xf] }
 0x3a9   :  { %v8089_v12 = vadd.f32 %v3469_v31, %v3301_v3  ;;  %v3134_v37 = vadd.f32 %v3133_v55, %v2965_v51  ;;  %v5336_v30 = vld [vmem:[%s9862_s0 + $0x6b0] sm:$0xf0] }
 0x3ab   :  { %9975 = vst [vmem:[#allocation43_spill] sm:$0xff] %v8089_v12 }
 0x3ae   :  { %v3302_v14 = vpop.f32.mrf.mxu2  ;;  %v2967_v40 = vpop.f32.mrf.mxu0 }
 0x3af   :  { %v3471_v45 = vpop.f32.mrf.mxu3  ;;  %v3303_v4 = vadd.f32 %v3302_v14, %v3134_v37  ;;  %v3136_v8 = vpop.f32.mrf.mxu1  ;;  %v2968_v58 = vadd.f32 %v2967_v40, %v7175_v26  ;;  %v5334_v26 = vld [vmem:[%s9862_s0 + $0x690] sm:$0xf]  ;;  %v5344_v14 = vld [vmem:[%s9862_s0 + $0x6b8] sm:$0xf0] }
 0x3b1   :  { %v8116_v21 = vadd.f32 %v3471_v45, %v3303_v4  ;;  %v3137_v31 = vadd.f32 %v3136_v8, %v2968_v58  ;;  %3006 = vmatmul.bf16.gmra.mxu0 %v5303_v9  ;;  %v5339_v4 = vor.u32 %v5974_v11, %v5336_v30  ;;  %v5347_v58 = vor.u32 %v5975_v52, %v5344_v14  ;;  %v5986_v30 = vld [vmem:[%s9862_s0 + $0x6ec] sm:$0xf0]  ;;  %v5987_v52 = vld [vmem:[%s9862_s0 + $0x6f4] sm:$0xf0]  ;;  %v5983_v14 = vld [vmem:[%s9862_s0 + $0x6dc] sm:$0xf] }
 0x3b2   :  { %3175 = vmatmul.bf16.gmra.mxu1 %v5307_v38  ;;  %v5335_v38 = vor.u32 %v5978_v47, %v5334_v26 }
 0x3b3   :  { %9976 = vst [vmem:[#allocation44_spill] sm:$0xff] %v8116_v21  ;;  %3344 = vmatmul.bf16.gmra.mxu2 %v5311_v42 }
 0x3b4   :  { %3513 = vmatmul.bf16.gmra.mxu3 %v5315_v13 }
 0x3b6   :  { %v3305_v3 = vpop.f32.mrf.mxu2  ;;  %v2969_v51 = vpop.f32.mrf.mxu0 }
 0x3b7   :  { %v3474_v7 = vpop.f32.mrf.mxu3  ;;  %v3306_v55 = vadd.f32 %v3305_v3, %v3137_v31  ;;  %v3138_v35 = vpop.f32.mrf.mxu1  ;;  %v2970_v37 = vadd.f32 %v2969_v51, %v7201_v0  ;;  %v5342_v0 = vld [vmem:[%s9862_s0 + $0x698] sm:$0xf] }
 0x3b8   :  { %v5343_v13 = vor.u32 %v5979_v56, %v5342_v0  ;;  %v5982_v0 = vld [vmem:[%s9862_s0 + $0x6d4] sm:$0xf] }
 0x3b9   :  { %v8119_v18 = vadd.f32 %v3474_v7, %v3306_v55  ;;  %v3139_v25 = vadd.f32 %v3138_v35, %v2970_v37  ;;  %v5368_v56 = vld [vmem:[%s9862_s0 + $0x6f0] sm:$0xf0] }
 0x3bb   :  { %9977 = vst [vmem:[#allocation45_spill] sm:$0xff] %v8119_v18 }
 0x3be   :  { %v3307_v45 = vpop.f32.mrf.mxu2  ;;  %v2972_v8 = vpop.f32.mrf.mxu0 }
 0x3bf   :  { %v3476_v9 = vpop.f32.mrf.mxu3  ;;  %v3308_v40 = vadd.f32 %v3307_v45, %v3139_v25  ;;  %v3141_v42 = vpop.f32.mrf.mxu1  ;;  %v2973_v31 = vadd.f32 %v2972_v8, %v7212_v23  ;;  %v5366_v23 = vld [vmem:[%s9862_s0 + $0x6d0] sm:$0xf]  ;;  %v5376_v45 = vld [vmem:[%s9862_s0 + $0x6f8] sm:$0xf0] }
 0x3c1   :  { %v8146_v3 = vadd.f32 %v3476_v9, %v3308_v40  ;;  %v3142_v7 = vadd.f32 %v3141_v42, %v2973_v31  ;;  %3011 = vmatmul.bf16.gmra.mxu0 %v5335_v38  ;;  %v5371_v40 = vor.u32 %v5982_v0, %v5368_v56  ;;  %v5379_v31 = vor.u32 %v5983_v14, %v5376_v45  ;;  %v5990_v14 = vld [vmem:[%s9862_s0 + $0x714] sm:$0xf] }
 0x3c2   :  { %3180 = vmatmul.bf16.gmra.mxu1 %v5339_v4  ;;  %v5367_v4 = vor.u32 %v5986_v30, %v5366_v23  ;;  %v9982_v30 = vld [vmem:[#allocation4_spill] sm:$0xff]  ;;  %v5400_v45 = vld [vmem:[%s9862_s0 + $0x730] sm:$0xf0] }
 0x3c3   :  { %9978 = vst [vmem:[#allocation46_spill] sm:$0xff] %v8146_v3  ;;  %3349 = vmatmul.bf16.gmra.mxu2 %v5343_v13 }
 0x3c4   :  { %3518 = vmatmul.bf16.gmra.mxu3 %v5347_v58 }
 0x3c6   :  { %v3310_v55 = vpop.f32.mrf.mxu2  ;;  %v2974_v37 = vpop.f32.mrf.mxu0 }
 0x3c7   :  { %v3479_v51 = vpop.f32.mrf.mxu3  ;;  %v3311_v35 = vadd.f32 %v3310_v55, %v3142_v7  ;;  %v3143_v26 = vpop.f32.mrf.mxu1  ;;  %v2975_v25 = vadd.f32 %v2974_v37, %v7241_v5  ;;  %v5374_v5 = vld [vmem:[%s9862_s0 + $0x6d8] sm:$0xf]  ;;  %v9980_v7 = vld [vmem:[#allocation3_spill] sm:$0xff] }
 0x3c8   :  { %v5375_v58 = vor.u32 %v5987_v52, %v5374_v5  ;;  %v5398_v5 = vld [vmem:[%s9862_s0 + $0x710] sm:$0xf] }
 0x3c9   :  { %v8149_v47 = vadd.f32 %v3479_v51, %v3311_v35  ;;  %v3144_v11 = vadd.f32 %v3143_v26, %v2975_v25  ;;  %v5994_v52 = vld [vmem:[%s9862_s0 + $0x72c] sm:$0xf0] }
 0x3cb   :  { %9979 = vst [vmem:[#allocation47_spill] sm:$0xff] %v8149_v47 }
 0x3ce   :  { %v3312_v9 = vpop.f32.mrf.mxu2  ;;  %v2977_v42 = vpop.f32.mrf.mxu0 }
 0x3cf   :  { %v3481_v38 = vpop.f32.mrf.mxu3  ;;  %v3313_v8 = vadd.f32 %v3312_v9, %v3144_v11  ;;  %v3146_v13 = vpop.f32.mrf.mxu1  ;;  %v2978_v55 = vadd.f32 %v2977_v42, %v9980_v7  ;;  %v5995_v9 = vld [vmem:[%s9862_s0 + $0x734] sm:$0xf0]  ;;  %v5399_v42 = vor.u32 %v5994_v52, %v5398_v5 }
 0x3d0   :  { %v9986_v52 = vld [vmem:[#allocation6_spill] sm:$0xff] }
 0x3d1   :  { %v8176_v51 = vadd.f32 %v3481_v38, %v3313_v8  ;;  %v3147_v35 = vadd.f32 %v3146_v13, %v2978_v55  ;;  %3016 = vmatmul.bf16.gmra.mxu0 %v5367_v4  ;;  %v5991_v38 = vld [vmem:[%s9862_s0 + $0x71c] sm:$0xf]  ;;  %v5403_v13 = vor.u32 %v5990_v14, %v5400_v45 }
 0x3d2   :  { %3185 = vmatmul.bf16.gmra.mxu1 %v5371_v40  ;;  %v5408_v4 = vld [vmem:[%s9862_s0 + $0x738] sm:$0xf0] }
 0x3d3   :  { %9981 = vst [vmem:[#allocation3_spill] sm:$0xff] %v8176_v51  ;;  %3354 = vmatmul.bf16.gmra.mxu2 %v5375_v58 }
 0x3d4   :  { %3523 = vmatmul.bf16.gmra.mxu3 %v5379_v31 }
 0x3d6   :  { %v3315_v37 = vpop.f32.mrf.mxu2  ;;  %v2979_v43 = vpop.f32.mrf.mxu0 }
 0x3d7   :  { %v3484_v26 = vpop.f32.mrf.mxu3  ;;  %v3316_v25 = vadd.f32 %v3315_v37, %v3147_v35  ;;  %v3148_v23 = vpop.f32.mrf.mxu1  ;;  %v2980_v11 = vadd.f32 %v2979_v43, %v9982_v30  ;;  %v5406_v43 = vld [vmem:[%s9862_s0 + $0x718] sm:$0xf]  ;;  %v5411_v35 = vor.u32 %v5991_v38, %v5408_v4  ;;  %v9984_v37 = vld [vmem:[#allocation5_spill] sm:$0xff] }
 0x3d8   :  { %v5407_v55 = vor.u32 %v5995_v9, %v5406_v43  ;;  %v5430_v43 = vld [vmem:[%s9862_s0 + $0x750] sm:$0xf]  ;;  %v5998_v38 = vld [vmem:[%s9862_s0 + $0x754] sm:$0xf] }
 0x3d9   :  { %v8179_v0 = vadd.f32 %v3484_v26, %v3316_v25  ;;  %v3149_v56 = vadd.f32 %v3148_v23, %v2980_v11  ;;  %v6002_v9 = vld [vmem:[%s9862_s0 + $0x76c] sm:$0xf0]  ;;  %v5432_v4 = vld [vmem:[%s9862_s0 + $0x770] sm:$0xf0] }
 0x3db   :  { %9983 = vst [vmem:[#allocation4_spill] sm:$0xff] %v8179_v0 }
 0x3de   :  { %v3317_v40 = vpop.f32.mrf.mxu2  ;;  %v2982_v31 = vpop.f32.mrf.mxu0 }
 0x3df   :  { %v3486_v8 = vpop.f32.mrf.mxu3  ;;  %v3318_v58 = vadd.f32 %v3317_v40, %v3149_v56  ;;  %v3151_v7 = vpop.f32.mrf.mxu1  ;;  %v2983_v26 = vadd.f32 %v2982_v31, %v9984_v37  ;;  %v5999_v40 = vld [vmem:[%s9862_s0 + $0x75c] sm:$0xf]  ;;  %v5435_v31 = vor.u32 %v5998_v38, %v5432_v4 }
 0x3e1   :  { %v8206_v25 = vadd.f32 %v3486_v8, %v3318_v58  ;;  %v3152_v23 = vadd.f32 %v3151_v7, %v2983_v26  ;;  %3021 = vmatmul.bf16.gmra.mxu0 %v5399_v42  ;;  %v5440_v8 = vld [vmem:[%s9862_s0 + $0x778] sm:$0xf0]  ;;  %v5431_v58 = vor.u32 %v6002_v9, %v5430_v43  ;;  %v9990_v9 = vld [vmem:[#allocation8_spill] sm:$0xff] }
 0x3e2   :  { %3190 = vmatmul.bf16.gmra.mxu1 %v5403_v13  ;;  %v5443_v26 = vor.u32 %v5999_v40, %v5440_v8  ;;  %v6006_v40 = vld [vmem:[%s9862_s0 + $0x794] sm:$0xf] }
 0x3e3   :  { %9985 = vst [vmem:[#allocation5_spill] sm:$0xff] %v8206_v25  ;;  %3359 = vmatmul.bf16.gmra.mxu2 %v5407_v55  ;;  %v5464_v8 = vld [vmem:[%s9862_s0 + $0x7b0] sm:$0xf0] }
 0x3e4   :  { %3528 = vmatmul.bf16.gmra.mxu3 %v5411_v35 }
 0x3e6   :  { %v3320_v30 = vpop.f32.mrf.mxu2  ;;  %v2984_v0 = vpop.f32.mrf.mxu0 }
 0x3e7   :  { %v3489_v11 = vpop.f32.mrf.mxu3  ;;  %v3321_v44 = vadd.f32 %v3320_v30, %v3152_v23  ;;  %v3153_v5 = vpop.f32.mrf.mxu1  ;;  %v2985_v56 = vadd.f32 %v2984_v0, %v9986_v52  ;;  %v6003_v0 = vld [vmem:[%s9862_s0 + $0x774] sm:$0xf0]  ;;  %v9988_v23 = vld [vmem:[#allocation7_spill] sm:$0xff] }
 0x3e9   :  { %v8209_v14 = vadd.f32 %v3489_v11, %v3321_v44  ;;  %v3154_v45 = vadd.f32 %v3153_v5, %v2985_v56  ;;  %v5438_v44 = vld [vmem:[%s9862_s0 + $0x758] sm:$0xf] }
 0x3ea   :  { %v5439_v37 = vor.u32 %v6003_v0, %v5438_v44  ;;  %v5462_v44 = vld [vmem:[%s9862_s0 + $0x790] sm:$0xf] }
 0x3eb   :  { %9987 = vst [vmem:[#allocation6_spill] sm:$0xff] %v8209_v14  ;;  %v6010_v0 = vld [vmem:[%s9862_s0 + $0x7ac] sm:$0xf0] }
 0x3ee   :  { %v3322_v42 = vpop.f32.mrf.mxu2  ;;  %v2987_v55 = vpop.f32.mrf.mxu0 }
 0x3ef   :  { %v3491_v13 = vpop.f32.mrf.mxu3  ;;  %v3323_v7 = vadd.f32 %v3322_v42, %v3154_v45  ;;  %v3156_v35 = vpop.f32.mrf.mxu1  ;;  %v2988_v30 = vadd.f32 %v2987_v55, %v9988_v23  ;;  %v6007_v42 = vld [vmem:[%s9862_s0 + $0x79c] sm:$0xf]  ;;  %v5467_v55 = vor.u32 %v6006_v40, %v5464_v8 }
 0x3f1   :  { %v8236_v11 = vadd.f32 %v3491_v13, %v3323_v7  ;;  %v3157_v5 = vadd.f32 %v3156_v35, %v2988_v30  ;;  %3026 = vmatmul.bf16.gmra.mxu0 %v5431_v58  ;;  %v5472_v13 = vld [vmem:[%s9862_s0 + $0x7b8] sm:$0xf0]  ;;  %v5463_v7 = vor.u32 %v6010_v0, %v5462_v44 }
 0x3f2   :  { %3195 = vmatmul.bf16.gmra.mxu1 %v5435_v31  ;;  %v5475_v30 = vor.u32 %v6007_v42, %v5472_v13  ;;  %v9994_v0 = vld [vmem:[#allocation10_spill] sm:$0xff]  ;;  %v6014_v42 = vld [vmem:[%s9862_s0 + $0x7d4] sm:$0xf] }
 0x3f3   :  { %9989 = vst [vmem:[#allocation7_spill] sm:$0xff] %v8236_v11  ;;  %3364 = vmatmul.bf16.gmra.mxu2 %v5439_v37  ;;  %v5496_v13 = vld [vmem:[%s9862_s0 + $0x7f0] sm:$0xf0] }
 0x3f4   :  { %3533 = vmatmul.bf16.gmra.mxu3 %v5443_v26 }
 0x3f6   :  { %v3325_v52 = vpop.f32.mrf.mxu2  ;;  %v2989_v25 = vpop.f32.mrf.mxu0 }
 0x3f7   :  { %v3494_v56 = vpop.f32.mrf.mxu3  ;;  %v3326_v14 = vadd.f32 %v3325_v52, %v3157_v5  ;;  %v3158_v43 = vpop.f32.mrf.mxu1  ;;  %v2990_v45 = vadd.f32 %v2989_v25, %v9990_v9  ;;  %v5470_v25 = vld [vmem:[%s9862_s0 + $0x798] sm:$0xf]  ;;  %v9992_v5 = vld [vmem:[#allocation9_spill] sm:$0xff] }
 0x3f9   :  { %v8239_v38 = vadd.f32 %v3494_v56, %v3326_v14  ;;  %v3159_v4 = vadd.f32 %v3158_v43, %v2990_v45  ;;  %v6011_v14 = vld [vmem:[%s9862_s0 + $0x7b4] sm:$0xf0] }
 0x3fa   :  { %v5471_v23 = vor.u32 %v6011_v14, %v5470_v25  ;;  %v5494_v25 = vld [vmem:[%s9862_s0 + $0x7d0] sm:$0xf] }
 0x3fb   :  { %9991 = vst [vmem:[#allocation8_spill] sm:$0xff] %v8239_v38  ;;  %v6018_v14 = vld [vmem:[%s9862_s0 + $0x7ec] sm:$0xf0] }
 0x3fe   :  { %v3327_v58 = vpop.f32.mrf.mxu2  ;;  %v2992_v37 = vpop.f32.mrf.mxu0 }
 0x3ff   :  { %v3496_v31 = vpop.f32.mrf.mxu3  ;;  %v3328_v35 = vadd.f32 %v3327_v58, %v3159_v4  ;;  %v3161_v26 = vpop.f32.mrf.mxu1  ;;  %v2993_v52 = vadd.f32 %v2992_v37, %v9992_v5  ;;  %v6015_v58 = vld [vmem:[%s9862_s0 + $0x7dc] sm:$0xf]  ;;  %v5499_v37 = vor.u32 %v6014_v42, %v5496_v13 }
 0x401   :  { %v8266_v56 = vadd.f32 %v3496_v31, %v3328_v35  ;;  %v3162_v43 = vadd.f32 %v3161_v26, %v2993_v52  ;;  %3031 = vmatmul.bf16.gmra.mxu0 %v5463_v7  ;;  %v5504_v31 = vld [vmem:[%s9862_s0 + $0x7f8] sm:$0xf0]  ;;  %v5495_v35 = vor.u32 %v6018_v14, %v5494_v25 }
 0x402   :  { %3200 = vmatmul.bf16.gmra.mxu1 %v5467_v55  ;;  %v5507_v52 = vor.u32 %v6015_v58, %v5504_v31 }
 0x403   :  { %9993 = vst [vmem:[#allocation9_spill] sm:$0xff] %v8266_v56  ;;  %3369 = vmatmul.bf16.gmra.mxu2 %v5471_v23 }
 0x404   :  { %3538 = vmatmul.bf16.gmra.mxu3 %v5475_v30 }
 0x406   :  { %v3330_v9 = vpop.f32.mrf.mxu2  ;;  %v2994_v11 = vpop.f32.mrf.mxu0 }
 0x407   :  { %v3499_v45 = vpop.f32.mrf.mxu3  ;;  %v3331_v38 = vadd.f32 %v3330_v9, %v3162_v43  ;;  %v3163_v44 = vpop.f32.mrf.mxu1  ;;  %v2995_v4 = vadd.f32 %v2994_v11, %v9994_v0  ;;  %v5502_v11 = vld [vmem:[%s9862_s0 + $0x7d8] sm:$0xf]  ;;  %v9996_v43 = vld [vmem:[#allocation11_spill] sm:$0xff]  ;;  %v3744_v0 = vadd.f32 %v7636_v10, %v7609_v29 }
 0x409   :  { %v8269_v40 = vadd.f32 %v3499_v45, %v3331_v38  ;;  %v3164_v8 = vadd.f32 %v3163_v44, %v2995_v4  ;;  %v6019_v38 = vld [vmem:[%s9862_s0 + $0x7f4] sm:$0xf0]  ;;  %v3745_v4 = vadd.f32 %v3744_v0, %v7639_v32 }
 0x40a   :  { %v5503_v5 = vor.u32 %v6019_v38, %v5502_v11  ;;  %v9998_v38 = vld [vmem:[#allocation12_spill] sm:$0xff] }
 0x40b   :  { %9995 = vst [vmem:[#allocation10_spill] sm:$0xff] %v8269_v40  ;;  %v3746_v11 = vadd.f32 %v3745_v4, %v7666_v15 }
 0x40e   :  { %v3332_v7 = vpop.f32.mrf.mxu2  ;;  %v2997_v23 = vpop.f32.mrf.mxu0 }
 0x40f   :  { %v3501_v55 = vpop.f32.mrf.mxu3  ;;  %v3333_v26 = vadd.f32 %v3332_v7, %v3164_v8  ;;  %v3166_v30 = vpop.f32.mrf.mxu1  ;;  %v2998_v9 = vadd.f32 %v2997_v23, %v9996_v43  ;;  %v3747_v7 = vadd.f32 %v3746_v11, %v7669_v57 }
 0x411   :  { %v8296_v45 = vadd.f32 %v3501_v55, %v3333_v26  ;;  %v3167_v44 = vadd.f32 %v3166_v30, %v2998_v9  ;;  %3036 = vmatmul.bf16.gmra.mxu0 %v5495_v35  ;;  %v3748_v35 = vadd.f32 %v3747_v7, %v7696_v48  ;;  %v10000_v9 = vld [vmem:[#allocation13_spill] sm:$0xff] }
 0x412   :  { %3205 = vmatmul.bf16.gmra.mxu1 %v5499_v37 }
 0x413   :  { %9997 = vst [vmem:[#allocation11_spill] sm:$0xff] %v8296_v45  ;;  %3374 = vmatmul.bf16.gmra.mxu2 %v5503_v5  ;;  %v3749_v37 = vadd.f32 %v3748_v35, %v7699_v50 }
 0x414   :  { %3543 = vmatmul.bf16.gmra.mxu3 %v5507_v52 }
 0x415   :  { %v3750_v43 = vadd.f32 %v3749_v37, %v7726_v33 }
 0x416   :  { %v3335_v25 = vpop.f32.mrf.mxu2  ;;  %v2999_v42 = vpop.f32.mrf.mxu0 }
 0x417   :  { %v3504_v8 = vpop.f32.mrf.mxu3  ;;  %v3336_v14 = vadd.f32 %v3335_v25, %v3167_v44  ;;  %v3168_v13 = vpop.f32.mrf.mxu1  ;;  %v3000_v58 = vadd.f32 %v2999_v42, %v9998_v38  ;;  %v3751_v4 = vadd.f32 %v3750_v43, %v7729_v60 }
 0x419   :  { %v8303_v31 = vadd.f32 %v3504_v8, %v3336_v14  ;;  %v3169_v55 = vadd.f32 %v3168_v13, %v3000_v58  ;;  %v3752_v8 = vadd.f32 %v3751_v4, %v7756_v59 }
 0x41b   :  { %9999 = vst [vmem:[#allocation12_spill] sm:$0xff] %v8303_v31  ;;  %v3753_v14 = vadd.f32 %v3752_v8, %v7759_v61  ;;  %v10003_v8 = vld [vmem:[#allocation15_spill] sm:$0xff] }
 0x41d   :  { %v3754_v7 = vadd.f32 %v3753_v14, %v7786_v24 }
 0x41e   :  { %v3337_v26 = vpop.f32.mrf.mxu2  ;;  %v3002_v5 = vpop.f32.mrf.mxu0 }
 0x41f   :  { %v3506_v23 = vpop.f32.mrf.mxu3  ;;  %v3338_v30 = vadd.f32 %v3337_v26, %v3169_v55  ;;  %v3171_v52 = vpop.f32.mrf.mxu1  ;;  %v3003_v44 = vadd.f32 %v3002_v5, %v10000_v9  ;;  %v10002_v55 = vld [vmem:[#allocation14_spill] sm:$0xff]  ;;  %v3755_v26 = vadd.f32 %v3754_v7, %v7789_v62 }
 0x421   :  { %v8310_v0 = vadd.f32 %v3506_v23, %v3338_v30  ;;  %v3172_v25 = vadd.f32 %v3171_v52, %v3003_v44  ;;  %v3756_v30 = vadd.f32 %v3755_v26, %v7816_v53 }
 0x423   :  { %10001 = vst [vmem:[#allocation13_spill] sm:$0xff] %v8310_v0  ;;  %v3757_v5 = vadd.f32 %v3756_v30, %v7819_v63 }
 0x426   :  { %v3340_v42 = vpop.f32.mrf.mxu2  ;;  %v3004_v38 = vpop.f32.mrf.mxu0 }
 0x427   :  { %v3509_v13 = vpop.f32.mrf.mxu3  ;;  %v3341_v11 = vadd.f32 %v3340_v42, %v3172_v25  ;;  %v3173_v58 = vpop.f32.mrf.mxu1  ;;  %v3005_v35 = vadd.f32 %v3004_v38, %v10002_v55  ;;  %v3758_v25 = vadd.f32 %v3757_v5, %v7846_v17 }
 0x429   :  { %v8317_v37 = vadd.f32 %v3509_v13, %v3341_v11  ;;  %v3174_v23 = vadd.f32 %v3173_v58, %v3005_v35  ;;  %v3759_v13 = vadd.f32 %v3758_v25, %v7849_v6 }
 0x42b   :  { %v3760_v38 = vadd.f32 %v3759_v13, %v7876_v46 }
 0x42d   :  { %v3761_v58 = vadd.f32 %v3760_v38, %v7879_v1 }
 0x42e   :  { %v3342_v52 = vpop.f32.mrf.mxu2  ;;  %v3007_v44 = vpop.f32.mrf.mxu0 }
 0x42f   :  { %v3511_v43 = vpop.f32.mrf.mxu3  ;;  %v3343_v9 = vadd.f32 %v3342_v52, %v3174_v23  ;;  %v3176_v4 = vpop.f32.mrf.mxu1  ;;  %v3008_v14 = vadd.f32 %v3007_v44, %v10003_v8  ;;  %v3762_v30 = vadd.f32 %v3761_v58, %v7906_v16  ;;  %v10004_v52 = vld [vmem:[#allocation16_spill] sm:$0xff] }
 0x431   :  { %v8324_v42 = vadd.f32 %v3511_v43, %v3343_v9  ;;  %v3177_v11 = vadd.f32 %v3176_v4, %v3008_v14  ;;  %v3763_v43 = vadd.f32 %v3762_v30, %v7909_v27 }
 0x433   :  { %v3764_v44 = vadd.f32 %v3763_v43, %v7936_v49 }
 0x435   :  { %v3765_v4 = vadd.f32 %v3764_v44, %v7939_v20 }
 0x436   :  { %v3345_v7 = vpop.f32.mrf.mxu2  ;;  %v3009_v26 = vpop.f32.mrf.mxu0 }
 0x437   :  { %v3514_v55 = vpop.f32.mrf.mxu3  ;;  %v3346_v35 = vadd.f32 %v3345_v7, %v3177_v11  ;;  %v3178_v23 = vpop.f32.mrf.mxu1  ;;  %v3010_v5 = vadd.f32 %v3009_v26, %v10004_v52  ;;  %v3766_v38 = vadd.f32 %v3765_v4, %v7966_v19  ;;  %v10005_v7 = vld [vmem:[#allocation17_spill] sm:$0xff] }
 0x439   :  { %v8331_v17 = vadd.f32 %v3514_v55, %v3346_v35  ;;  %v3179_v9 = vadd.f32 %v3178_v23, %v3010_v5  ;;  %v3767_v55 = vadd.f32 %v3766_v38, %v7969_v22 }
 0x43b   :  { %v3768_v26 = vadd.f32 %v3767_v55, %v7996_v54 }
 0x43d   :  { %v3769_v23 = vadd.f32 %v3768_v26, %v7999_v34  ;;  %v10010_v34 = vld [vmem:[#allocation8_spill] sm:$0xff] }
 0x43e   :  { %v3347_v25 = vpop.f32.mrf.mxu2  ;;  %v3012_v13 = vpop.f32.mrf.mxu0 }
 0x43f   :  { %v3516_v8 = vpop.f32.mrf.mxu3  ;;  %v3348_v14 = vadd.f32 %v3347_v25, %v3179_v9  ;;  %v3181_v11 = vpop.f32.mrf.mxu1  ;;  %v3013_v58 = vadd.f32 %v3012_v13, %v10005_v7  ;;  %v3770_v44 = vadd.f32 %v3769_v23, %v8026_v28 }
 0x441   :  { %v8338_v16 = vadd.f32 %v3516_v8, %v3348_v14  ;;  %v3182_v35 = vadd.f32 %v3181_v11, %v3013_v58  ;;  %v3771_v4 = vadd.f32 %v3770_v44, %v8029_v36 }
 0x443   :  { %v3772_v8 = vadd.f32 %v3771_v4, %v8056_v2 }
 0x445   :  { %v3773_v14 = vadd.f32 %v3772_v8, %v8059_v39  ;;  %v10006_v39 = vld [vmem:[#allocation4_spill] sm:$0xff] }
 0x446   :  { %v3350_v30 = vpop.f32.mrf.mxu2  ;;  %v3014_v43 = vpop.f32.mrf.mxu0 }
 0x447   :  { %v3519_v52 = vpop.f32.mrf.mxu3  ;;  %v3351_v5 = vadd.f32 %v3350_v30, %v3182_v35  ;;  %v3183_v9 = vpop.f32.mrf.mxu1  ;;  %v3774_v58 = vadd.f32 %v3773_v14, %v8086_v41 }
 0x449   :  { %v8344_v25 = vadd.f32 %v3519_v52, %v3351_v5  ;;  %v3775_v55 = vadd.f32 %v3774_v58, %v8089_v12  ;;  %v10007_v12 = vld [vmem:[#allocation5_spill] sm:$0xff] }
 0x44b   :  { %v3776_v35 = vadd.f32 %v3775_v55, %v8116_v21  ;;  %v10008_v21 = vld [vmem:[#allocation6_spill] sm:$0xff] }
 0x44d   :  { %v3777_v26 = vadd.f32 %v3776_v35, %v8119_v18  ;;  %v10009_v18 = vld [vmem:[#allocation7_spill] sm:$0xff] }
 0x44e   :  { %v3352_v13 = vpop.f32.mrf.mxu2  ;;  %v3017_v38 = vpop.f32.mrf.mxu0 }
 0x44f   :  { %v3521_v11 = vpop.f32.mrf.mxu3  ;;  %v3186_v7 = vpop.f32.mrf.mxu1  ;;  %v3778_v44 = vadd.f32 %v3777_v26, %v8146_v3 }
 0x451   :  { %v3779_v4 = vadd.f32 %v3778_v44, %v8149_v47 }
 0x453   :  { %v3780_v8 = vadd.f32 %v3779_v4, %v8176_v51 }
 0x455   :  { %v3781_v2 = vadd.f32 %v3780_v8, %v10006_v39 }
 0x456   :  { %v3355_v23 = vpop.f32.mrf.mxu2  ;;  %v3019_v52 = vpop.f32.mrf.mxu0 }
 0x457   :  { %v3524_v30 = vpop.f32.mrf.mxu3  ;;  %v3188_v5 = vpop.f32.mrf.mxu1  ;;  %v3782_v55 = vadd.f32 %v3781_v2, %v10007_v12  ;;  %v10011_v12 = vld [vmem:[#allocation18_spill] sm:$0xff] }
 0x459   :  { %v3783_v35 = vadd.f32 %v3782_v55, %v10008_v21  ;;  %v3015_v55 = vadd.f32 %v3014_v43, %v10011_v12 }
 0x45b   :  { %v3784_v28 = vadd.f32 %v3783_v35, %v10009_v18  ;;  %v3184_v20 = vadd.f32 %v3183_v9, %v3015_v55 }
 0x45d   :  { %v3785_v54 = vadd.f32 %v3784_v28, %v10010_v34  ;;  %v10012_v34 = vld [vmem:[#allocation19_spill] sm:$0xff] }
 0x45e   :  { %v3357_v36 = vpop.f32.mrf.mxu2  ;;  %v3022_v41 = vpop.f32.mrf.mxu0  ;;  %v3018_v18 = vadd.f32 %v3017_v38, %v10012_v34 }
 0x45f   :  { %v3526_v14 = vpop.f32.mrf.mxu3  ;;  %v3191_v58 = vpop.f32.mrf.mxu1  ;;  %v3786_v4 = vadd.f32 %v3785_v54, %v8266_v56  ;;  %v10013_v54 = vld [vmem:[#allocation20_spill] sm:$0xff] }
 0x460   :  { %v3020_v56 = vadd.f32 %v3019_v52, %v10013_v54 }
 0x461   :  { %v3787_v8 = vadd.f32 %v3786_v4, %v8269_v40 }
 0x462   :  { %v3189_v27 = vadd.f32 %v3188_v5, %v3020_v56 }
 0x463   :  { %v3788_v39 = vadd.f32 %v3787_v8, %v8296_v45  ;;  %v3353_v8 = vadd.f32 %v3352_v13, %v3184_v20  ;;  %v3187_v45 = vadd.f32 %v3186_v7, %v3018_v18  ;;  %v10016_v20 = vld [vmem:[#allocation23_spill] sm:$0xff] }
 0x464   :  { %v3358_v52 = vadd.f32 %v3357_v36, %v3189_v27 }
 0x465   :  { %v3789_v51 = vadd.f32 %v3788_v39, %v8303_v31  ;;  %v10014_v39 = vld [vmem:[#allocation21_spill] sm:$0xff]  ;;  %v3356_v49 = vadd.f32 %v3355_v23, %v3187_v45  ;;  %v8375_v55 = vadd.f32 %v3521_v11, %v3353_v8  ;;  %v10017_v45 = vld [vmem:[#allocation24_spill] sm:$0xff] }
 0x466   :  { %v3360_v22 = vpop.f32.mrf.mxu2  ;;  %v3024_v3 = vpop.f32.mrf.mxu0  ;;  %v3023_v31 = vadd.f32 %v3022_v41, %v10014_v39  ;;  %v8383_v23 = vadd.f32 %v3526_v14, %v3358_v52 }
 0x467   :  { %v3529_v26 = vpop.f32.mrf.mxu3  ;;  %v3193_v44 = vpop.f32.mrf.mxu1  ;;  %v3790_v28 = vadd.f32 %v3789_v51, %v8310_v0  ;;  %v10015_v51 = vld [vmem:[#allocation22_spill] sm:$0xff]  ;;  %v8379_v13 = vadd.f32 %v3524_v30, %v3356_v49 }
 0x468   :  { %v3025_v0 = vadd.f32 %v3024_v3, %v10015_v51 }
 0x469   :  { %v3791_v19 = vadd.f32 %v3790_v28, %v8317_v37 }
 0x46a   :  { %v3194_v28 = vadd.f32 %v3193_v44, %v3025_v0  ;;  %v10018_v44 = vld [vmem:[#allocation25_spill] sm:$0xff] }
 0x46b   :  { %v3792_v4 = vadd.f32 %v3791_v19, %v8324_v42  ;;  %v3192_v19 = vadd.f32 %v3191_v58, %v3023_v31 }
 0x46d   :  { %v3793_v40 = vadd.f32 %v3792_v4, %v8331_v17  ;;  %v3361_v7 = vadd.f32 %v3360_v22, %v3192_v19  ;;  %v10019_v19 = vld [vmem:[#allocation26_spill] sm:$0xff] }
 0x46e   :  { %v3362_v47 = vpop.f32.mrf.mxu2  ;;  %v3027_v21 = vpop.f32.mrf.mxu0 }
 0x46f   :  { %v3531_v2 = vpop.f32.mrf.mxu3  ;;  %v3196_v35 = vpop.f32.mrf.mxu1  ;;  %v3794_v9 = vadd.f32 %v3793_v40, %v8338_v16  ;;  %v3028_v18 = vadd.f32 %v3027_v21, %v10016_v20  ;;  %v3363_v5 = vadd.f32 %v3362_v47, %v3194_v28  ;;  %v8386_v36 = vadd.f32 %v3529_v26, %v3361_v7 }
 0x471   :  { %v3795_v41 = vadd.f32 %v3794_v9, %v8344_v25  ;;  %v3197_v40 = vadd.f32 %v3196_v35, %v3028_v18  ;;  %v8389_v0 = vadd.f32 %v3531_v2, %v3363_v5 }
 0x473   :  { %v3796_v3 = vadd.f32 %v3795_v41, %v8375_v55 }
 0x475   :  { %v3797_v27 = vadd.f32 %v3796_v3, %v8379_v13  ;;  %v10020_v3 = vld [vmem:[#allocation27_spill] sm:$0xff] }
 0x476   :  { %v3365_v12 = vpop.f32.mrf.mxu2  ;;  %v3029_v34 = vpop.f32.mrf.mxu0 }
 0x477   :  { %v3534_v43 = vpop.f32.mrf.mxu3  ;;  %v3198_v38 = vpop.f32.mrf.mxu1  ;;  %v3030_v56 = vadd.f32 %v3029_v34, %v10017_v45  ;;  %v3366_v21 = vadd.f32 %v3365_v12, %v3197_v40  ;;  %v3798_v22 = vadd.f32 %v3797_v27, %v8383_v23 }
 0x479   :  { %v3199_v31 = vadd.f32 %v3198_v38, %v3030_v56  ;;  %v3799_v47 = vadd.f32 %v3798_v22, %v8386_v36  ;;  %v8393_v35 = vadd.f32 %v3534_v43, %v3366_v21  ;;  %v10021_v22 = vld [vmem:[#allocation28_spill] sm:$0xff] }
 0x47b   :  { %v3800_v4 = vadd.f32 %v3799_v47, %v8389_v0 }
 0x47d   :  { %v3801_v51 = vadd.f32 %v3800_v4, %v8393_v35 }
 0x47e   :  { %v3367_v11 = vpop.f32.mrf.mxu2  ;;  %v3032_v49 = vpop.f32.mrf.mxu0 }
 0x47f   :  { %v3536_v54 = vpop.f32.mrf.mxu3  ;;  %v3201_v30 = vpop.f32.mrf.mxu1  ;;  %v3368_v58 = vadd.f32 %v3367_v11, %v3199_v31  ;;  %v3033_v14 = vadd.f32 %v3032_v49, %v10018_v44 }
 0x481   :  { %v3537_v8 = vadd.f32 %v3536_v54, %v3368_v58  ;;  %v3202_v26 = vadd.f32 %v3201_v30, %v3033_v14 }
 0x483   :  { %v3802_v2 = vadd.f32 %v3801_v51, %v3537_v8 }
 0x486   :  { %v3370_v39 = vpop.f32.mrf.mxu2  ;;  %v3034_v38 = vpop.f32.mrf.mxu0 }
 0x487   :  { %v3539_v12 = vpop.f32.mrf.mxu3  ;;  %v3371_v34 = vadd.f32 %v3370_v39, %v3202_v26  ;;  %v3203_v9 = vpop.f32.mrf.mxu1  ;;  %v3035_v20 = vadd.f32 %v3034_v38, %v10019_v19 }
 0x489   :  { %v3540_v52 = vadd.f32 %v3539_v12, %v3371_v34  ;;  %v3204_v41 = vadd.f32 %v3203_v9, %v3035_v20 }
 0x48b   :  { %v3803_v18 = vadd.f32 %v3802_v2, %v3540_v52 }
 0x48e   :  { %v3372_v7 = vpop.f32.mrf.mxu2  ;;  %v3037_v45 = vpop.f32.mrf.mxu0 }
 0x48f   :  { %v3541_v43 = vpop.f32.mrf.mxu3  ;;  %v3373_v28 = vadd.f32 %v3372_v7, %v3204_v41  ;;  %v3038_v5 = vadd.f32 %v3037_v45, %v10020_v3  ;;  %v3206_v40 = vpop.f32.mrf.mxu1 }
 0x491   :  { %v3542_v56 = vadd.f32 %v3541_v43, %v3373_v28  ;;  %v3207_v54 = vadd.f32 %v3206_v40, %v3038_v5 }
 0x493   :  { %v3804_v11 = vadd.f32 %v3803_v18, %v3542_v56 }
 0x496   :  { %v3375_v27 = vpop.f32.mrf.mxu2  ;;  %v3039_v49 = vpop.f32.mrf.mxu0 }
 0x497   :  { %v3544_v21 = vpop.f32.mrf.mxu3  ;;  %v3376_v31 = vadd.f32 %v3375_v27, %v3207_v54  ;;  %v3040_v58 = vadd.f32 %v3039_v49, %v10021_v22  ;;  %v3208_v14 = vpop.f32.mrf.mxu1 }
 0x499   :  { %v3545_v30 = vadd.f32 %v3544_v21, %v3376_v31  ;;  %v3209_v47 = vadd.f32 %v3208_v14, %v3040_v58 }
 0x49b   :  { %v3805_v44 = vadd.f32 %v3804_v11, %v3545_v30 }
 0x49e   :  { %v3377_v4 = vpop.f32.mrf.mxu2 }
 0x49f   :  { %v3378_v26 = vadd.f32 %v3377_v4, %v3209_v47  ;;  %v3546_v39 = vpop.f32.mrf.mxu3 }
 0x4a1   :  { %v3547_v12 = vadd.f32 %v3546_v39, %v3378_v26 }
 0x4a3   :  { %v3806_v51 = vadd.f32 %v3805_v44, %v3547_v12 }
 0x4a5   :  { %v3807_v34 = vrot.slane %v3806_v51, 4 }
 0x4a7   :  { %v3808_v38 = vadd.f32 %v3807_v34, %v3806_v51 }
 0x4a9   :  { %v3809_v9 = vrot.slane %v3808_v38, 2 }
 0x4ab   :  { %v3810_v2 = vadd.f32 %v3809_v9, %v3808_v38 }
 0x4ad   :  { %v3811_v19 = vrot.slane %v3810_v2, 1 }
 0x4af   :  { %v3812_v20 = vadd.f32 %v3811_v19, %v3810_v2  ;;  %v10026_v2 = vld [vmem:[#allocation29_spill] sm:$0xff] }
 0x4b1   :  { %v8400_v18 = vmul.f32 0.001953125, %v3812_v20 }
 0x4b3   :  { %v8403_v41 = vsub.f32 %v3537_v8, %v8400_v18  ;;  %v8406_v7 = vsub.f32 %v3540_v52, %v8400_v18  ;;  %v8409_v43 = vsub.f32 %v3542_v56, %v8400_v18  ;;  %v8412_v28 = vsub.f32 %v3545_v30, %v8400_v18 }
 0x4b4   :  { %v8415_v45 = vsub.f32 %v3547_v12, %v8400_v18  ;;  %v8419_v3 = vsub.f32 %v7609_v29, %v8400_v18  ;;  %v8423_v8 = vsub.f32 %v7636_v10, %v8400_v18  ;;  %v8427_v52 = vsub.f32 %v7639_v32, %v8400_v18 }
 0x4b5   :  { %10022 = vst [vmem:[#allocation14_spill] sm:$0xff] %v8403_v41  ;;  %v8435_v40 = vsub.f32 %v7666_v15, %v8400_v18  ;;  %v8439_v29 = vsub.f32 %v7669_v57, %v8400_v18  ;;  %v8445_v32 = vsub.f32 %v7696_v48, %v8400_v18  ;;  %v8451_v15 = vsub.f32 %v7699_v50, %v8400_v18 }
 0x4b6   :  { %10023 = vst [vmem:[#allocation15_spill] sm:$0xff] %v8406_v7  ;;  %v3878_v56 = vmul.f32 %v8419_v3, %v8419_v3  ;;  %v3879_v5 = vmul.f32 %v8423_v8, %v8423_v8  ;;  %v3880_v10 = vmul.f32 %v8427_v52, %v8427_v52  ;;  %v8457_v31 = vsub.f32 %v7726_v33, %v8400_v18 }
 0x4b7   :  { %10024 = vst [vmem:[#allocation16_spill] sm:$0xff] %v8409_v43  ;;  %v3881_v54 = vmul.f32 %v8435_v40, %v8435_v40  ;;  %v3882_v57 = vmul.f32 %v8439_v29, %v8439_v29  ;;  %v3883_v48 = vmul.f32 %v8445_v32, %v8445_v32  ;;  %v8463_v30 = vsub.f32 %v7729_v60, %v8400_v18 }
 0x4b8   :  { %10025 = vst [vmem:[#allocation17_spill] sm:$0xff] %v8412_v28  ;;  %v3942_v11 = vadd.f32 %v3879_v5, %v3878_v56  ;;  %v3884_v50 = vmul.f32 %v8451_v15, %v8451_v15  ;;  %v8469_v58 = vsub.f32 %v7756_v59, %v8400_v18  ;;  %v3885_v33 = vmul.f32 %v8457_v31, %v8457_v31 }
 0x4b9   :  { %v8475_v14 = vsub.f32 %v7759_v61, %v8400_v18  ;;  %v3886_v60 = vmul.f32 %v8463_v30, %v8463_v30  ;;  %v8481_v4 = vsub.f32 %v7786_v24, %v8400_v18  ;;  %v8487_v39 = vsub.f32 %v7789_v62, %v8400_v18 }
 0x4ba   :  { %v3943_v27 = vadd.f32 %v3942_v11, %v3880_v10  ;;  %v3887_v59 = vmul.f32 %v8469_v58, %v8469_v58  ;;  %v8493_v51 = vsub.f32 %v7816_v53, %v8400_v18  ;;  %v8499_v38 = vsub.f32 %v7819_v63, %v8400_v18 }
 0x4bb   :  { %v3888_v61 = vmul.f32 %v8475_v14, %v8475_v14  ;;  %v3889_v24 = vmul.f32 %v8481_v4, %v8481_v4  ;;  %v3890_v62 = vmul.f32 %v8487_v39, %v8487_v39  ;;  %v8505_v19 = vsub.f32 %v10026_v2, %v8400_v18 }
 0x4bc   :  { %v3944_v21 = vadd.f32 %v3943_v27, %v3881_v54  ;;  %v3891_v53 = vmul.f32 %v8493_v51, %v8493_v51  ;;  %v8511_v56 = vsub.f32 %v7849_v6, %v8400_v18  ;;  %v3892_v63 = vmul.f32 %v8499_v38, %v8499_v38 }
 0x4bd   :  { %v8517_v10 = vsub.f32 %v7876_v46, %v8400_v18  ;;  %v3893_v11 = vmul.f32 %v8505_v19, %v8505_v19  ;;  %v8523_v27 = vsub.f32 %v7879_v1, %v8400_v18 }
 0x4be   :  { %v3945_v49 = vadd.f32 %v3944_v21, %v3882_v57  ;;  %v3894_v6 = vmul.f32 %v8511_v56, %v8511_v56  ;;  %v10027_v21 = vld [vmem:[#allocation30_spill] sm:$0xff] }
 0x4bf   :  { %v3895_v46 = vmul.f32 %v8517_v10, %v8517_v10  ;;  %v3896_v1 = vmul.f32 %v8523_v27, %v8523_v27 }
 0x4c0   :  { %v3946_v22 = vadd.f32 %v3945_v49, %v3883_v48  ;;  %v8529_v48 = vsub.f32 %v10027_v21, %v8400_v18  ;;  %v10034_v21 = vld [vmem:[#allocation37_spill] sm:$0xff] }
 0x4c2   :  { %v3947_v44 = vadd.f32 %v3946_v22, %v3884_v50  ;;  %v10028_v50 = vld [vmem:[#allocation31_spill] sm:$0xff] }
 0x4c3   :  { %v8535_v22 = vsub.f32 %v10028_v50, %v8400_v18 }
 0x4c4   :  { %v3948_v47 = vadd.f32 %v3947_v44, %v3885_v33  ;;  %v10029_v44 = vld [vmem:[#allocation32_spill] sm:$0xff] }
 0x4c6   :  { %v3949_v26 = vadd.f32 %v3948_v47, %v3886_v60  ;;  %v8541_v60 = vsub.f32 %v10029_v44, %v8400_v18  ;;  %v3897_v47 = vmul.f32 %v8529_v48, %v8529_v48 }
 0x4c8   :  { %v3950_v12 = vadd.f32 %v3949_v26, %v3887_v59  ;;  %v10030_v26 = vld [vmem:[#allocation33_spill] sm:$0xff] }
 0x4ca   :  { %v3951_v34 = vadd.f32 %v3950_v12, %v3888_v61  ;;  %v8547_v61 = vsub.f32 %v10030_v26, %v8400_v18  ;;  %v3898_v12 = vmul.f32 %v8535_v22, %v8535_v22 }
 0x4cc   :  { %v3952_v9 = vadd.f32 %v3951_v34, %v3889_v24  ;;  %v10031_v34 = vld [vmem:[#allocation34_spill] sm:$0xff] }
 0x4ce   :  { %v3953_v20 = vadd.f32 %v3952_v9, %v3890_v62  ;;  %v8553_v62 = vsub.f32 %v10031_v34, %v8400_v18  ;;  %v3899_v9 = vmul.f32 %v8541_v60, %v8541_v60  ;;  %v10037_v34 = vld [vmem:[#allocation40_spill] sm:$0xff] }
 0x4d0   :  { %v3954_v5 = vadd.f32 %v3953_v20, %v3891_v53  ;;  %v10032_v53 = vld [vmem:[#allocation35_spill] sm:$0xff] }
 0x4d1   :  { %v8559_v20 = vsub.f32 %v10032_v53, %v8400_v18 }
 0x4d2   :  { %v3955_v54 = vadd.f32 %v3954_v5, %v3892_v63  ;;  %v3900_v63 = vmul.f32 %v8547_v61, %v8547_v61 }
 0x4d4   :  { %v3956_v57 = vadd.f32 %v3955_v54, %v3893_v11  ;;  %v10033_v11 = vld [vmem:[#allocation36_spill] sm:$0xff] }
 0x4d5   :  { %v8565_v54 = vsub.f32 %v10033_v11, %v8400_v18 }
 0x4d6   :  { %v3957_v49 = vadd.f32 %v3956_v57, %v3894_v6  ;;  %v3901_v6 = vmul.f32 %v8553_v62, %v8553_v62 }
 0x4d7   :  { %v3903_v44 = vmul.f32 %v8565_v54, %v8565_v54 }
 0x4d8   :  { %v3958_v33 = vadd.f32 %v3957_v49, %v3895_v46  ;;  %v8571_v46 = vsub.f32 %v10034_v21, %v8400_v18  ;;  %v3902_v49 = vmul.f32 %v8559_v20, %v8559_v20 }
 0x4da   :  { %v3959_v59 = vadd.f32 %v3958_v33, %v3896_v1  ;;  %v10035_v1 = vld [vmem:[#allocation38_spill] sm:$0xff] }
 0x4db   :  { %v8577_v33 = vsub.f32 %v10035_v1, %v8400_v18  ;;  %v10041_v1 = vld [vmem:[#allocation43_spill] sm:$0xff] }
 0x4dc   :  { %v3960_v24 = vadd.f32 %v3959_v59, %v3897_v47  ;;  %v10036_v59 = vld [vmem:[#allocation39_spill] sm:$0xff] }
 0x4dd   :  { %v8583_v26 = vsub.f32 %v10036_v59, %v8400_v18 }
 0x4de   :  { %v3961_v2 = vadd.f32 %v3960_v24, %v3898_v12  ;;  %v3904_v12 = vmul.f32 %v8571_v46, %v8571_v46 }
 0x4df   :  { %v3906_v11 = vmul.f32 %v8583_v26, %v8583_v26 }
 0x4e0   :  { %v3962_v5 = vadd.f32 %v3961_v2, %v3899_v9  ;;  %v8589_v9 = vsub.f32 %v10037_v34, %v8400_v18  ;;  %v3905_v2 = vmul.f32 %v8577_v33, %v8577_v33 }
 0x4e2   :  { %v3963_v57 = vadd.f32 %v3962_v5, %v3900_v63  ;;  %v10038_v63 = vld [vmem:[#allocation41_spill] sm:$0xff] }
 0x4e3   :  { %v8595_v5 = vsub.f32 %v10038_v63, %v8400_v18 }
 0x4e4   :  { %v3964_v50 = vadd.f32 %v3963_v57, %v3901_v6  ;;  %v10039_v57 = vld [vmem:[#allocation42_spill] sm:$0xff] }
 0x4e5   :  { %v8601_v21 = vsub.f32 %v10039_v57, %v8400_v18  ;;  %v10047_v57 = vld [vmem:[#allocation46_spill] sm:$0xff] }
 0x4e6   :  { %v3965_v47 = vadd.f32 %v3964_v50, %v3902_v49  ;;  %v3907_v49 = vmul.f32 %v8589_v9, %v8589_v9 }
 0x4e7   :  { %10040 = vst [vmem:[#allocation18_spill] sm:$0xff] %v8601_v21  ;;  %v3909_v34 = vmul.f32 %v8601_v21, %v8601_v21 }
 0x4e8   :  { %v3966_v24 = vadd.f32 %v3965_v47, %v3903_v44  ;;  %v8607_v44 = vsub.f32 %v10041_v1, %v8400_v18  ;;  %v3908_v47 = vmul.f32 %v8595_v5, %v8595_v5  ;;  %v8625_v1 = vsub.f32 %v10047_v57, %v8400_v18  ;;  %v10053_v57 = vld [vmem:[#allocation4_spill] sm:$0xff] }
 0x4ea   :  { %v3967_v53 = vadd.f32 %v3966_v24, %v3904_v12  ;;  %10042 = vst [vmem:[#allocation19_spill] sm:$0xff] %v8607_v44  ;;  %v10043_v12 = vld [vmem:[#allocation44_spill] sm:$0xff] }
 0x4eb   :  { %v8613_v24 = vsub.f32 %v10043_v12, %v8400_v18  ;;  %10048 = vst [vmem:[#allocation22_spill] sm:$0xff] %v8625_v1  ;;  %v10049_v12 = vld [vmem:[#allocation47_spill] sm:$0xff] }
 0x4ec   :  { %v3968_v6 = vadd.f32 %v3967_v53, %v3905_v2  ;;  %v10045_v53 = vld [vmem:[#allocation45_spill] sm:$0xff]  ;;  %v8631_v21 = vsub.f32 %v10049_v12, %v8400_v18 }
 0x4ed   :  { %10044 = vst [vmem:[#allocation20_spill] sm:$0xff] %v8613_v24  ;;  %v8619_v63 = vsub.f32 %v10045_v53, %v8400_v18  ;;  %v10051_v53 = vld [vmem:[#allocation3_spill] sm:$0xff]  ;;  %v10055_v12 = vld [vmem:[#allocation5_spill] sm:$0xff] }
 0x4ee   :  { %v3969_v50 = vadd.f32 %v3968_v6, %v3906_v11  ;;  %v3910_v11 = vmul.f32 %v8607_v44, %v8607_v44  ;;  %10050 = vst [vmem:[#allocation23_spill] sm:$0xff] %v8631_v21  ;;  %v8637_v44 = vsub.f32 %v10051_v53, %v8400_v18  ;;  %v10057_v53 = vld [vmem:[#allocation6_spill] sm:$0xff] }
 0x4ef   :  { %10046 = vst [vmem:[#allocation21_spill] sm:$0xff] %v8619_v63 }
 0x4f0   :  { %v3970_v59 = vadd.f32 %v3969_v50, %v3907_v49  ;;  %v3911_v49 = vmul.f32 %v8613_v24, %v8613_v24  ;;  %10052 = vst [vmem:[#allocation24_spill] sm:$0xff] %v8637_v44  ;;  %v8643_v24 = vsub.f32 %v10053_v57, %v8400_v18  ;;  %v10059_v57 = vld [vmem:[#allocation7_spill] sm:$0xff] }
 0x4f2   :  { %v3971_v2 = vadd.f32 %v3970_v59, %v3908_v47  ;;  %v3912_v47 = vmul.f32 %v8619_v63, %v8619_v63  ;;  %10054 = vst [vmem:[#allocation25_spill] sm:$0xff] %v8643_v24  ;;  %v8649_v63 = vsub.f32 %v10055_v12, %v8400_v18  ;;  %v10061_v12 = vld [vmem:[#allocation8_spill] sm:$0xff] }
 0x4f4   :  { %v3972_v6 = vadd.f32 %v3971_v2, %v3909_v34  ;;  %v3913_v34 = vmul.f32 %v8625_v1, %v8625_v1  ;;  %10056 = vst [vmem:[#allocation26_spill] sm:$0xff] %v8649_v63  ;;  %v8655_v1 = vsub.f32 %v10057_v53, %v8400_v18  ;;  %v10063_v53 = vld [vmem:[#allocation9_spill] sm:$0xff] }
 0x4f6   :  { %v3973_v50 = vadd.f32 %v3972_v6, %v3910_v11  ;;  %v3914_v11 = vmul.f32 %v8631_v21, %v8631_v21  ;;  %10058 = vst [vmem:[#allocation27_spill] sm:$0xff] %v8655_v1  ;;  %v8661_v21 = vsub.f32 %v10059_v57, %v8400_v18  ;;  %v10064_v57 = vld [vmem:[#allocation10_spill] sm:$0xff] }
 0x4f8   :  { %v3974_v59 = vadd.f32 %v3973_v50, %v3911_v49  ;;  %v3915_v49 = vmul.f32 %v8637_v44, %v8637_v44  ;;  %10060 = vst [vmem:[#allocation28_spill] sm:$0xff] %v8661_v21  ;;  %v8667_v44 = vsub.f32 %v10061_v12, %v8400_v18  ;;  %v10065_v12 = vld [vmem:[#allocation11_spill] sm:$0xff] }
 0x4fa   :  { %v3975_v2 = vadd.f32 %v3974_v59, %v3912_v47  ;;  %v3916_v47 = vmul.f32 %v8643_v24, %v8643_v24  ;;  %10062 = vst [vmem:[#allocation29_spill] sm:$0xff] %v8667_v44  ;;  %v8673_v24 = vsub.f32 %v10063_v53, %v8400_v18  ;;  %v10066_v53 = vld [vmem:[#allocation12_spill] sm:$0xff] }
 0x4fc   :  { %v3976_v6 = vadd.f32 %v3975_v2, %v3913_v34  ;;  %v3917_v34 = vmul.f32 %v8649_v63, %v8649_v63  ;;  %v8679_v63 = vsub.f32 %v10064_v57, %v8400_v18  ;;  %v10067_v57 = vld [vmem:[#allocation13_spill] sm:$0xff] }
 0x4fe   :  { %v3977_v50 = vadd.f32 %v3976_v6, %v3914_v11  ;;  %v3918_v11 = vmul.f32 %v8655_v1, %v8655_v1  ;;  %v8685_v1 = vsub.f32 %v10065_v12, %v8400_v18  ;;  %v8703_v12 = vsub.f32 %v8317_v37, %v8400_v18 }
 0x500   :  { %v3978_v59 = vadd.f32 %v3977_v50, %v3915_v49  ;;  %v3919_v49 = vmul.f32 %v8661_v21, %v8661_v21  ;;  %v8691_v21 = vsub.f32 %v10066_v53, %v8400_v18  ;;  %v8709_v53 = vsub.f32 %v8324_v42, %v8400_v18 }
 0x501   :  { %v3926_v37 = vmul.f32 %v8703_v12, %v8703_v12 }
 0x502   :  { %v3979_v2 = vadd.f32 %v3978_v59, %v3916_v47  ;;  %v3920_v47 = vmul.f32 %v8667_v44, %v8667_v44  ;;  %v8697_v44 = vsub.f32 %v10067_v57, %v8400_v18  ;;  %v8715_v57 = vsub.f32 %v8331_v17, %v8400_v18 }
 0x503   :  { %v3927_v42 = vmul.f32 %v8709_v53, %v8709_v53 }
 0x504   :  { %v3980_v6 = vadd.f32 %v3979_v2, %v3917_v34  ;;  %v3921_v34 = vmul.f32 %v8673_v24, %v8673_v24  ;;  %v3928_v17 = vmul.f32 %v8715_v57, %v8715_v57 }
 0x506   :  { %v3981_v50 = vadd.f32 %v3980_v6, %v3918_v11  ;;  %v3922_v11 = vmul.f32 %v8679_v63, %v8679_v63 }
 0x508   :  { %v3982_v59 = vadd.f32 %v3981_v50, %v3919_v49  ;;  %v3923_v49 = vmul.f32 %v8685_v1, %v8685_v1 }
 0x50a   :  { %v3983_v2 = vadd.f32 %v3982_v59, %v3920_v47  ;;  %v3924_v47 = vmul.f32 %v8691_v21, %v8691_v21 }
 0x50c   :  { %v3984_v6 = vadd.f32 %v3983_v2, %v3921_v34  ;;  %v3925_v34 = vmul.f32 %v8697_v44, %v8697_v44 }
 0x50e   :  { %v3985_v50 = vadd.f32 %v3984_v6, %v3922_v11  ;;  %v8721_v6 = vsub.f32 %v8338_v16, %v8400_v18 }
 0x510   :  { %v3986_v59 = vadd.f32 %v3985_v50, %v3923_v49  ;;  %v8727_v50 = vsub.f32 %v8344_v25, %v8400_v18  ;;  %v3929_v16 = vmul.f32 %v8721_v6, %v8721_v6 }
 0x512   :  { %v3987_v2 = vadd.f32 %v3986_v59, %v3924_v47  ;;  %v8733_v59 = vsub.f32 %v8375_v55, %v8400_v18  ;;  %v3930_v25 = vmul.f32 %v8727_v50, %v8727_v50 }
 0x514   :  { %v3988_v11 = vadd.f32 %v3987_v2, %v3925_v34  ;;  %v8739_v2 = vsub.f32 %v8379_v13, %v8400_v18  ;;  %v3931_v55 = vmul.f32 %v8733_v59, %v8733_v59 }
 0x516   :  { %v3989_v49 = vadd.f32 %v3988_v11, %v3926_v37  ;;  %v8745_v11 = vsub.f32 %v8383_v23, %v8400_v18  ;;  %v3932_v13 = vmul.f32 %v8739_v2, %v8739_v2 }
 0x518   :  { %v3990_v47 = vadd.f32 %v3989_v49, %v3927_v42  ;;  %10068 = vst [vmem:[#allocation30_spill] sm:$0xff] %v8745_v11  ;;  %v8751_v49 = vsub.f32 %v8386_v36, %v8400_v18  ;;  %v3933_v23 = vmul.f32 %v8745_v11, %v8745_v11  ;;  %v3937_v11 = vmul.f32 %v8403_v41, %v8403_v41 }
 0x51a   :  { %v3991_v34 = vadd.f32 %v3990_v47, %v3928_v17  ;;  %10069 = vst [vmem:[#allocation31_spill] sm:$0xff] %v8751_v49  ;;  %v8757_v47 = vsub.f32 %v8389_v0, %v8400_v18  ;;  %v3934_v36 = vmul.f32 %v8751_v49, %v8751_v49 }
 0x51c   :  { %v3992_v37 = vadd.f32 %v3991_v34, %v3929_v16  ;;  %10070 = vst [vmem:[#allocation32_spill] sm:$0xff] %v8757_v47  ;;  %v8763_v34 = vsub.f32 %v8393_v35, %v8400_v18  ;;  %v3938_v35 = vmul.f32 %v8406_v7, %v8406_v7 }
 0x51e   :  { %v3993_v42 = vadd.f32 %v3992_v37, %v3930_v25  ;;  %10071 = vst [vmem:[#allocation33_spill] sm:$0xff] %v8763_v34  ;;  %v3935_v37 = vmul.f32 %v8757_v47, %v8757_v47  ;;  %v3936_v0 = vmul.f32 %v8763_v34, %v8763_v34 }
 0x520   :  { %v3994_v17 = vadd.f32 %v3993_v42, %v3931_v55 }
 0x522   :  { %v3995_v16 = vadd.f32 %v3994_v17, %v3932_v13  ;;  %v3939_v17 = vmul.f32 %v8409_v43, %v8409_v43 }
 0x524   :  { %v3996_v25 = vadd.f32 %v3995_v16, %v3933_v23  ;;  %v3940_v16 = vmul.f32 %v8412_v28, %v8412_v28 }
 0x526   :  { %v3997_v55 = vadd.f32 %v3996_v25, %v3934_v36  ;;  %v3941_v25 = vmul.f32 %v8415_v45, %v8415_v45 }
 0x528   :  { %v3998_v42 = vadd.f32 %v3997_v55, %v3935_v37 }
 0x52a   :  { %v3999_v13 = vadd.f32 %v3998_v42, %v3936_v0 }
 0x52c   :  { %v4000_v18 = vadd.f32 %v3999_v13, %v3937_v11 }
 0x52e   :  { %v4001_v23 = vadd.f32 %v4000_v18, %v3938_v35 }
 0x530   :  { %v4002_v36 = vadd.f32 %v4001_v23, %v3939_v17 }
 0x532   :  { %v4003_v37 = vadd.f32 %v4002_v36, %v3940_v16  ;;  %v10072_v36 = vld [vmem:[#allocation18_spill] sm:$0xff] }
 0x534   :  { %v4004_v55 = vadd.f32 %v4003_v37, %v3941_v25  ;;  %v10073_v25 = vld [vmem:[#allocation19_spill] sm:$0xff]  ;;  %v10074_v37 = vld [vmem:[#allocation20_spill] sm:$0xff] }
 0x536   :  { %v4005_v34 = vrot.slane %v4004_v55, 4 }
 0x538   :  { %v4006_v41 = vadd.f32 %v4005_v34, %v4004_v55  ;;  %v4012_v34 = vld [vmem:[%s9864_s2] sm:$0x1]  ;;  %v10075_v55 = vld [vmem:[#allocation21_spill] sm:$0xff] }
 0x53a   :  { %v4007_v0 = vrot.slane %v4006_v41, 2 }
 0x53c   :  { %v4008_v42 = vadd.f32 %v4007_v0, %v4006_v41  ;;  %v10076_v0 = vld [vmem:[#allocation22_spill] sm:$0xff] }
 0x53e   :  { %v4009_v47 = vrot.slane %v4008_v42, 1 }
 0x540   :  { %v4010_v7 = vadd.f32 %v4009_v47, %v4008_v42  ;;  %v10077_v42 = vld [vmem:[#allocation23_spill] sm:$0xff] }
 0x542   :  { %v4011_v11 = vmul.f32 0.001953125, %v4010_v7 }
 0x544   :  { %v4013_v13 = vadd.f32 1e-05, %v4011_v11 }
 0x546   :  { %6276 = vrsqrt.f32 %v4013_v13  ;;  %vm4020_vm1 = vweird.f32 %v4013_v13 }
 0x54c   :  { %v6277_v43 = vpop.eup %6276 }
 0x54d   :  { %v4015_v35 = vmul.f32 %v6277_v43, %v4013_v13  ;;  %vm4021_vm0 = vweird.f32 %v6277_v43  ;;  %v10078_v13 = vld [vmem:[#allocation24_spill] sm:$0xff] }
 0x54e   :  { %vm4022_vm2 = vmor %vm4020_vm1, %vm4021_vm0 }
 0x54f   :  { %v4016_v18 = vmul.f32 %v6277_v43, %v4015_v35 }
 0x551   :  { %v4017_v49 = vmul.f32 0.5, %v4016_v18  ;;  %v10079_v18 = vld [vmem:[#allocation25_spill] sm:$0xff] }
 0x553   :  { %v4018_v28 = vsub.f32 1.5, %v4017_v49 }
 0x555   :  { %v4019_v17 = vmul.f32 %v6277_v43, %v4018_v28 }
 0x557   :  { %v4023_v23 = vsel %vm4022_vm2, %v6277_v43, %v4019_v17 }
 0x558   :  { %v4024_v41 = vmul.f32 %v4023_v23, %v4012_v34  ;;  %v10080_v34 = vld [vmem:[#allocation26_spill] sm:$0xff] }
 0x55a   :  { %v8784_v16 = vperm.slane %v4024_v41, 0  ;;  %v10081_v41 = vld [vmem:[#allocation27_spill] sm:$0xff] }
 0x55c   :  { %v8788_v7 = vmul.f32 %v8784_v16, %v8419_v3  ;;  %v8792_v47 = vmul.f32 %v8784_v16, %v8423_v8  ;;  %v8796_v28 = vmul.f32 %v8784_v16, %v8427_v52  ;;  %v8800_v49 = vmul.f32 %v8784_v16, %v8435_v40 }
 0x55d   :  { %v8804_v43 = vmul.f32 %v8784_v16, %v8439_v29  ;;  %v8808_v3 = vmul.f32 %v8784_v16, %v8445_v32  ;;  %v8812_v8 = vmul.f32 %v8784_v16, %v8451_v15  ;;  %v8816_v52 = vmul.f32 %v8784_v16, %v8457_v31 }
 0x55e   :  { %v8820_v40 = vmul.f32 %v8784_v16, %v8463_v30  ;;  %v8824_v29 = vmul.f32 %v8784_v16, %v8469_v58  ;;  %v8828_v32 = vmul.f32 %v8784_v16, %v8475_v14  ;;  %v8832_v15 = vmul.f32 %v8784_v16, %v8481_v4 }
 0x55f   :  { %v8836_v31 = vmul.f32 %v8784_v16, %v8487_v39  ;;  %v8840_v30 = vmul.f32 %v8784_v16, %v8493_v51  ;;  %v8844_v58 = vmul.f32 %v8784_v16, %v8499_v38  ;;  %v8848_v14 = vmul.f32 %v8784_v16, %v8505_v19 }
 0x560   :  { %v8852_v4 = vmul.f32 %v8784_v16, %v8511_v56  ;;  %v8856_v39 = vmul.f32 %v8784_v16, %v8517_v10  ;;  %v8860_v51 = vmul.f32 %v8784_v16, %v8523_v27  ;;  %v8864_v38 = vmul.f32 %v8784_v16, %v8529_v48 }
 0x561   :  { %v8868_v19 = vmul.f32 %v8784_v16, %v8535_v22  ;;  %v8872_v56 = vmul.f32 %v8784_v16, %v8541_v60  ;;  %v8876_v10 = vmul.f32 %v8784_v16, %v8547_v61  ;;  %v8880_v27 = vmul.f32 %v8784_v16, %v8553_v62 }
 0x562   :  { %v8884_v48 = vmul.f32 %v8784_v16, %v8559_v20  ;;  %v8888_v22 = vmul.f32 %v8784_v16, %v8565_v54  ;;  %v8892_v60 = vmul.f32 %v8784_v16, %v8571_v46  ;;  %v8896_v61 = vmul.f32 %v8784_v16, %v8577_v33 }
 0x563   :  { %v8900_v62 = vmul.f32 %v8784_v16, %v8583_v26  ;;  %v8904_v20 = vmul.f32 %v8784_v16, %v8589_v9  ;;  %v8908_v54 = vmul.f32 %v8784_v16, %v8595_v5  ;;  %v8912_v46 = vmul.f32 %v8784_v16, %v10072_v36 }
 0x564   :  { %v8916_v33 = vmul.f32 %v8784_v16, %v10073_v25  ;;  %v8920_v26 = vmul.f32 %v8784_v16, %v10074_v37  ;;  %v8924_v9 = vmul.f32 %v8784_v16, %v10075_v55  ;;  %v8928_v5 = vmul.f32 %v8784_v16, %v10076_v0  ;;  %v10082_v25 = vld [vmem:[#allocation28_spill] sm:$0xff]  ;;  %v10083_v55 = vld [vmem:[#allocation29_spill] sm:$0xff] }
 0x565   :  { %v8932_v11 = vmul.f32 %v8784_v16, %v10077_v42  ;;  %v8936_v35 = vmul.f32 %v8784_v16, %v10078_v13  ;;  %v8940_v17 = vmul.f32 %v8784_v16, %v10079_v18  ;;  %v8944_v23 = vmul.f32 %v8784_v16, %v10080_v34 }
 0x566   :  { %v8948_v36 = vmul.f32 %v8784_v16, %v10081_v41  ;;  %v8952_v37 = vmul.f32 %v8784_v16, %v10082_v25  ;;  %v8956_v0 = vmul.f32 %v8784_v16, %v10083_v55  ;;  %v8960_v42 = vmul.f32 %v8784_v16, %v8673_v24  ;;  %v10089_v55 = vld [vmem:[#allocation30_spill] sm:$0xff] }
 0x567   :  { %v8964_v13 = vmul.f32 %v8784_v16, %v8679_v63  ;;  %v8968_v18 = vmul.f32 %v8784_v16, %v8685_v1  ;;  %v8972_v34 = vmul.f32 %v8784_v16, %v8691_v21  ;;  %v8976_v41 = vmul.f32 %v8784_v16, %v8697_v44  ;;  %v8989_v1 = vld [vmem:[%s9863_s3] ss:$0 sm:$0xff] }
 0x568   :  { %v8980_v24 = vmul.f32 %v8784_v16, %v8703_v12  ;;  %v8984_v63 = vmul.f32 %v8784_v16, %v8709_v53  ;;  %v8993_v21 = vmul.f32 %v8784_v16, %v8715_v57  ;;  %v8997_v44 = vmul.f32 %v8784_v16, %v8721_v6 }
 0x569   :  { %v9001_v12 = vmul.f32 %v8784_v16, %v8727_v50  ;;  %v9005_v53 = vmul.f32 %v8784_v16, %v8733_v59  ;;  %v9009_v25 = vmul.f32 %v8784_v16, %v8739_v2  ;;  %v9013_v57 = vmul.f32 %v8784_v16, %v10089_v55 }
 0x56a   :  { %10084 = vst [vmem:[#allocation34_spill] sm:$0xff] %v8993_v21  ;;  %v10091_v21 = vld [vmem:[#allocation31_spill] sm:$0xff] }
 0x56b   :  { %10085 = vst [vmem:[#allocation35_spill] sm:$0xff] %v8997_v44  ;;  %v9017_v6 = vmul.f32 %v8784_v16, %v10091_v21  ;;  %v10093_v44 = vld [vmem:[#allocation32_spill] sm:$0xff] }
 0x56c   :  { %10086 = vst [vmem:[#allocation36_spill] sm:$0xff] %v9001_v12  ;;  %v9021_v50 = vmul.f32 %v8784_v16, %v10093_v44  ;;  %v10094_v12 = vld [vmem:[#allocation33_spill] sm:$0xff] }
 0x56d   :  { %10087 = vst [vmem:[#allocation37_spill] sm:$0xff] %v9005_v53  ;;  %v9025_v59 = vmul.f32 %v8784_v16, %v10094_v12  ;;  %v10095_v53 = vld [vmem:[#allocation14_spill] sm:$0xff]  ;;  %v9045_v12 = vmul.f32 %v8784_v16, %v8415_v45  ;;  %v9065_v45 = vadd.f32 %v8989_v1, %v8804_v43  ;;  %v9089_v43 = vadd.f32 %v8989_v1, %v8828_v32 }
 0x56e   :  { %10088 = vst [vmem:[#allocation38_spill] sm:$0xff] %v9009_v25  ;;  %v9029_v2 = vmul.f32 %v8784_v16, %v10095_v53  ;;  %v10096_v25 = vld [vmem:[#allocation15_spill] sm:$0xff]  ;;  %v9049_v53 = vadd.f32 %v8989_v1, %v8788_v7  ;;  %v9073_v7 = vadd.f32 %v8989_v1, %v8812_v8  ;;  %v9097_v8 = vadd.f32 %v8989_v1, %v8836_v31 }
 0x56f   :  { %10090 = vst [vmem:[#allocation39_spill] sm:$0xff] %v9013_v57  ;;  %v9033_v55 = vmul.f32 %v8784_v16, %v10096_v25  ;;  %v10097_v57 = vld [vmem:[#allocation16_spill] sm:$0xff]  ;;  %v9053_v25 = vadd.f32 %v8989_v1, %v8792_v47  ;;  %v9077_v47 = vadd.f32 %v8989_v1, %v8816_v52  ;;  %v9101_v52 = vadd.f32 %v8989_v1, %v8840_v30 }
 0x570   :  { %10092 = vst [vmem:[#allocation40_spill] sm:$0xff] %v9017_v6  ;;  %v9037_v21 = vmul.f32 %v8784_v16, %v10097_v57  ;;  %v10098_v6 = vld [vmem:[#allocation17_spill] sm:$0xff]  ;;  %v9057_v57 = vadd.f32 %v8989_v1, %v8796_v28  ;;  %v9081_v28 = vadd.f32 %v8989_v1, %v8820_v40  ;;  %v9105_v40 = vadd.f32 %v8989_v1, %v8844_v58 }
 0x571   :  { %v9041_v44 = vmul.f32 %v8784_v16, %v10098_v6  ;;  %v9061_v6 = vadd.f32 %v8989_v1, %v8800_v49  ;;  %v9069_v16 = vadd.f32 %v8989_v1, %v8808_v3  ;;  %v9085_v49 = vadd.f32 %v8989_v1, %v8824_v29 }
 0x572   :  { %v9093_v3 = vadd.f32 %v8989_v1, %v8832_v15  ;;  %v9109_v29 = vadd.f32 %v8989_v1, %v8848_v14  ;;  %v9113_v32 = vadd.f32 %v8989_v1, %v8852_v4  ;;  %v9117_v15 = vadd.f32 %v8989_v1, %v8856_v39 }
 0x573   :  { %v9121_v31 = vadd.f32 %v8989_v1, %v8860_v51  ;;  %v9125_v30 = vadd.f32 %v8989_v1, %v8864_v38  ;;  %v9129_v58 = vadd.f32 %v8989_v1, %v8868_v19  ;;  %v9133_v14 = vadd.f32 %v8989_v1, %v8872_v56 }
 0x574   :  { %v9137_v4 = vadd.f32 %v8989_v1, %v8876_v10  ;;  %v9141_v39 = vadd.f32 %v8989_v1, %v8880_v27  ;;  %v9145_v51 = vadd.f32 %v8989_v1, %v8884_v48  ;;  %v9149_v38 = vadd.f32 %v8989_v1, %v8888_v22 }
 0x575   :  { %v9153_v19 = vadd.f32 %v8989_v1, %v8892_v60  ;;  %v9157_v56 = vadd.f32 %v8989_v1, %v8896_v61  ;;  %v9161_v10 = vadd.f32 %v8989_v1, %v8900_v62  ;;  %v9165_v27 = vadd.f32 %v8989_v1, %v8904_v20 }
 0x576   :  { %v9169_v48 = vadd.f32 %v8989_v1, %v8908_v54  ;;  %v9173_v22 = vadd.f32 %v8989_v1, %v8912_v46  ;;  %v9177_v60 = vadd.f32 %v8989_v1, %v8916_v33  ;;  %v9181_v61 = vadd.f32 %v8989_v1, %v8920_v26 }
 0x577   :  { %v9185_v62 = vadd.f32 %v8989_v1, %v8924_v9  ;;  %v9189_v20 = vadd.f32 %v8989_v1, %v8928_v5  ;;  %v9193_v54 = vadd.f32 %v8989_v1, %v8932_v11  ;;  %v9197_v46 = vadd.f32 %v8989_v1, %v8936_v35 }
 0x578   :  { %v9201_v33 = vadd.f32 %v8989_v1, %v8940_v17  ;;  %v9205_v26 = vadd.f32 %v8989_v1, %v8944_v23  ;;  %v9209_v9 = vadd.f32 %v8989_v1, %v8948_v36  ;;  %v9213_v5 = vadd.f32 %v8989_v1, %v8952_v37 }
 0x579   :  { %v9217_v11 = vadd.f32 %v8989_v1, %v8956_v0  ;;  %v9221_v35 = vadd.f32 %v8989_v1, %v8960_v42  ;;  %v9225_v17 = vadd.f32 %v8989_v1, %v8964_v13  ;;  %v9229_v23 = vadd.f32 %v8989_v1, %v8968_v18  ;;  %v10104_v13 = vld [vmem:[#allocation34_spill] sm:$0xff] }
 0x57a   :  { %v9233_v36 = vadd.f32 %v8989_v1, %v8972_v34  ;;  %v9237_v37 = vadd.f32 %v8989_v1, %v8976_v41  ;;  %v9241_v0 = vadd.f32 %v8989_v1, %v8980_v24  ;;  %v9245_v42 = vadd.f32 %v8989_v1, %v8984_v63 }
 0x57b   :  { %10099 = vst [vmem:[#allocation41_spill] sm:$0xff] %v9229_v23  ;;  %v9249_v18 = vadd.f32 %v8989_v1, %v10104_v13  ;;  %v10106_v23 = vld [vmem:[#allocation35_spill] sm:$0xff]  ;;  %vm4160_vm3 = vcmp.gt.f32.partialorder %v9049_v53, 0.0  ;;  %vm4161_vm4 = vcmp.gt.f32.partialorder %v9053_v25, 0.0  ;;  %vm4162_vm5 = vcmp.gt.f32.partialorder %v9057_v57, 0.0 }
 0x57c   :  { %10100 = vst [vmem:[#allocation42_spill] sm:$0xff] %v9233_v36  ;;  %v9253_v34 = vadd.f32 %v8989_v1, %v10106_v23  ;;  %v10108_v36 = vld [vmem:[#allocation36_spill] sm:$0xff]  ;;  %vm4163_vm6 = vcmp.gt.f32.partialorder %v9061_v6, 0.0  ;;  %vm4164_vm7 = vcmp.gt.f32.partialorder %v9065_v45, 0.0  ;;  %vm4165_vm8 = vcmp.gt.f32.partialorder %v9069_v16, 0.0 }
 0x57d   :  { %10101 = vst [vmem:[#allocation43_spill] sm:$0xff] %v9237_v37  ;;  %v9257_v41 = vadd.f32 %v8989_v1, %v10108_v36  ;;  %v10110_v37 = vld [vmem:[#allocation37_spill] sm:$0xff]  ;;  %v9277_v36 = vadd.f32 %v8989_v1, %v9021_v50  ;;  %vm4166_vm9 = vcmp.gt.f32.partialorder %v9073_v7, 0.0  ;;  %v4224_v50 = vmul.f32 0.2, %v9049_v53 }
 0x57e   :  { %10102 = vst [vmem:[#allocation44_spill] sm:$0xff] %v9241_v0  ;;  %v9261_v24 = vadd.f32 %v8989_v1, %v10110_v37  ;;  %v10112_v0 = vld [vmem:[#allocation38_spill] sm:$0xff]  ;;  %v9281_v37 = vadd.f32 %v8989_v1, %v9025_v59  ;;  %vm4167_vm10 = vcmp.gt.f32.partialorder %v9077_v47, 0.0  ;;  %vm4168_vm11 = vcmp.gt.f32.partialorder %v9081_v28, 0.0 }
 0x57f   :  { %10103 = vst [vmem:[#allocation45_spill] sm:$0xff] %v9245_v42  ;;  %v9265_v63 = vadd.f32 %v8989_v1, %v10112_v0  ;;  %v10114_v42 = vld [vmem:[#allocation39_spill] sm:$0xff]  ;;  %v9285_v0 = vadd.f32 %v8989_v1, %v9029_v2  ;;  %v4225_v59 = vmul.f32 0.2, %v9053_v25  ;;  %v4226_v2 = vmul.f32 0.2, %v9057_v57 }
 0x580   :  { %10105 = vst [vmem:[#allocation46_spill] sm:$0xff] %v9249_v18  ;;  %v9269_v13 = vadd.f32 %v8989_v1, %v10114_v42  ;;  %v10116_v18 = vld [vmem:[#allocation40_spill] sm:$0xff]  ;;  %v9289_v42 = vadd.f32 %v8989_v1, %v9033_v55  ;;  %v9309_v55 = vadd.f32 %v8989_v1, %v9041_v44  ;;  %vm4169_vm12 = vcmp.gt.f32.partialorder %v9085_v49, 0.0 }
 0x581   :  { %10107 = vst [vmem:[#allocation47_spill] sm:$0xff] %v9253_v34  ;;  %v9273_v23 = vadd.f32 %v8989_v1, %v10116_v18  ;;  %v9293_v18 = vadd.f32 %v8989_v1, %v9037_v21  ;;  %v4227_v21 = vmul.f32 0.2, %v9061_v6  ;;  %vm4170_vm13 = vcmp.gt.f32.partialorder %v9089_v43, 0.0 }
 0x582   :  { %10109 = vst [vmem:[#allocation3_spill] sm:$0xff] %v9257_v41  ;;  %v4232_v44 = vmul.f32 0.2, %v9081_v28  ;;  %vm4171_vm14 = vcmp.gt.f32.partialorder %v9093_v3, 0.0  ;;  %vm4172_vm15 = vcmp.gt.f32.partialorder %v9097_v8, 0.0  ;;  %vm4173_vm0 = vcmp.gt.f32.partialorder %v9101_v52, 0.0 }
 0x583   :  { %10111 = vst [vmem:[#allocation4_spill] sm:$0xff] %v9261_v24  ;;  %v9350_v24 = vsel %vm4161_vm4, %v9053_v25, %v4225_v59  ;;  %vm4174_vm1 = vcmp.gt.f32.partialorder %v9105_v40, 0.0  ;;  %vm4175_vm2 = vcmp.gt.f32.partialorder %v9109_v29, 0.0  ;;  %v9361_v41 = vmul.f32 0.2, %v9117_v15 }
 0x584   :  { %10113 = vst [vmem:[#allocation5_spill] sm:$0xff] %v9265_v63  ;;  %v9345_v63 = vmul.f32 0.2, %v9105_v40  ;;  %v9366_v34 = vsel %vm4162_vm5, %v9057_v57, %v4226_v2  ;;  %vm4177_vm4 = vcmp.gt.f32.partialorder %v9117_v15, 0.0  ;;  %v9371_v25 = vmul.f32 0.2, %v9121_v31 }
 0x585   :  { %10115 = vst [vmem:[#allocation6_spill] sm:$0xff] %v9269_v13  ;;  %v9329_v13 = vmul.f32 0.2, %v9093_v3  ;;  %v9374_v59 = vmul.f32 0.2, %v9125_v30  ;;  %vm4181_vm5 = vcmp.gt.f32.partialorder %v9133_v14, 0.0 }
 0x586   :  { %10117 = vst [vmem:[#allocation7_spill] sm:$0xff] %v9273_v23  ;;  %v9326_v23 = vmul.f32 0.2, %v9089_v43  ;;  %v9387_v57 = vmul.f32 0.2, %v9133_v14 }
 0x587   :  { %10118 = vst [vmem:[#allocation8_spill] sm:$0xff] %v9277_v36  ;;  %v4231_v36 = vmul.f32 0.2, %v9077_v47  ;;  %v9390_v2 = vmul.f32 0.2, %v9137_v4 }
 0x588   :  { %10119 = vst [vmem:[#allocation9_spill] sm:$0xff] %v9281_v37  ;;  %v4230_v37 = vmul.f32 0.2, %v9073_v7 }
 0x589   :  { %10120 = vst [vmem:[#allocation10_spill] sm:$0xff] %v9285_v0  ;;  %v9317_v0 = vadd.f32 %v8989_v1, %v9045_v12  ;;  %v9334_v1 = vsel %vm4160_vm3, %v9049_v53, %v4224_v50  ;;  %v9339_v12 = vmul.f32 0.2, %v9097_v8  ;;  %v9355_v53 = vmul.f32 0.2, %v9109_v29 }
 0x58a   :  { %10121 = vst [vmem:[#allocation11_spill] sm:$0xff] %v9289_v42  ;;  %v4229_v42 = vmul.f32 0.2, %v9069_v16  ;;  %v9358_v50 = vmul.f32 0.2, %v9113_v32  ;;  %vm4179_vm3 = vcmp.gt.f32.partialorder %v9125_v30, 0.0 }
 0x58b   :  { %10122 = vst [vmem:[#allocation12_spill] sm:$0xff] %v9293_v18  ;;  %v4228_v18 = vmul.f32 0.2, %v9065_v45 }
 0x58c   :  { %10123 = vst [vmem:[#allocation13_spill] sm:$0xff] %v9309_v55  ;;  %v4233_v55 = vmul.f32 0.2, %v9085_v49 }
 0x58d   :  { %10124 = vst [vmem:[#allocation18_spill] sm:$0xff] %v9317_v0  ;;  %v9342_v0 = vmul.f32 0.2, %v9101_v52 }
 0x58e   :  { %10125 = vst [vmem:[#allocation19_spill] sm:$0xff] %v9358_v50  ;;  %v9377_v50 = vmul.f32 0.2, %v9129_v58 }
 0x58f   :  { %10126 = vst [vmem:[#allocation20_spill] sm:$0xff] %v9361_v41  ;;  %v9382_v41 = vsel %vm4163_vm6, %v9061_v6, %v4227_v21  ;;  %v9403_v6 = vmul.f32 0.2, %v9145_v51  ;;  %v9406_v21 = vmul.f32 0.2, %v9149_v38  ;;  %vm4193_vm6 = vcmp.gt.f32.partialorder %v9181_v61, 0.0 }
 0x590   :  { %10127 = vst [vmem:[#allocation21_spill] sm:$0xff] %v9374_v59  ;;  %v9393_v59 = vmul.f32 0.2, %v9141_v39 }
 0x591   :  { %10128 = vst [vmem:[#allocation22_spill] sm:$0xff] %v9377_v50  ;;  %v9398_v50 = vsel %vm4164_vm7, %v9065_v45, %v4228_v18  ;;  %v9419_v45 = vmul.f32 0.2, %v9157_v56  ;;  %v9422_v18 = vmul.f32 0.2, %v9161_v10  ;;  %vm4188_vm7 = vcmp.gt.f32.partialorder %v9161_v10, 0.0 }
 0x592   :  { %10129 = vst [vmem:[#allocation23_spill] sm:$0xff] %v9390_v2  ;;  %v9409_v2 = vmul.f32 0.2, %v9153_v19 }
 0x593   :  { %10130 = vst [vmem:[#allocation24_spill] sm:$0xff] %v9393_v59  ;;  %v9414_v59 = vsel %vm4165_vm8, %v9069_v16, %v4229_v42  ;;  %vm4184_vm8 = vcmp.gt.f32.partialorder %v9145_v51, 0.0  ;;  %v9435_v16 = vmul.f32 0.2, %v9169_v48  ;;  %v9438_v42 = vmul.f32 0.2, %v9173_v22 }
 0x594   :  { %10131 = vst [vmem:[#allocation25_spill] sm:$0xff] %v9406_v21  ;;  %v9425_v21 = vmul.f32 0.2, %v9165_v27 }
 0x595   :  { %10132 = vst [vmem:[#allocation26_spill] sm:$0xff] %v9409_v2  ;;  %v9430_v2 = vsel %vm4166_vm9, %v9073_v7, %v4230_v37  ;;  %vm4186_vm9 = vcmp.gt.f32.partialorder %v9153_v19, 0.0  ;;  %v9449_v7 = vmul.f32 0.2, %v9181_v61  ;;  %v9452_v37 = vmul.f32 0.2, %v9185_v62 }
 0x596   :  { %10133 = vst [vmem:[#allocation27_spill] sm:$0xff] %v9422_v18  ;;  %v9441_v18 = vmul.f32 0.2, %v9177_v60 }
 0x597   :  { %10134 = vst [vmem:[#allocation28_spill] sm:$0xff] %v9425_v21  ;;  %v4295_v21 = vsel %vm4167_vm10, %v9077_v47, %v4231_v36  ;;  %vm4189_vm10 = vcmp.gt.f32.partialorder %v9165_v27, 0.0  ;;  %v9463_v47 = vmul.f32 0.2, %v9193_v54  ;;  %v9466_v36 = vmul.f32 0.2, %v9197_v46 }
 0x598   :  { %10135 = vst [vmem:[#allocation29_spill] sm:$0xff] %v9435_v16  ;;  %v9455_v16 = vmul.f32 0.2, %v9189_v20 }
 0x599   :  { %10136 = vst [vmem:[#allocation30_spill] sm:$0xff] %v9441_v18  ;;  %v4296_v18 = vsel %vm4168_vm11, %v9081_v28, %v4232_v44  ;;  %vm4191_vm11 = vcmp.gt.f32.partialorder %v9173_v22, 0.0  ;;  %v9477_v28 = vmul.f32 0.2, %v9205_v26  ;;  %v9480_v44 = vmul.f32 0.2, %v9209_v9 }
 0x59a   :  { %10137 = vst [vmem:[#allocation31_spill] sm:$0xff] %v9449_v7  ;;  %v9469_v7 = vmul.f32 0.2, %v9201_v33 }
 0x59b   :  { %10138 = vst [vmem:[#allocation32_spill] sm:$0xff] %v9455_v16  ;;  %v4297_v16 = vsel %vm4169_vm12, %v9085_v49, %v4233_v55  ;;  %v9492_v49 = vmul.f32 0.2, %v9217_v11  ;;  %v4299_v55 = vsel %vm4171_vm14, %v9093_v3, %v9329_v13  ;;  %vm4195_vm12 = vcmp.gt.f32.partialorder %v9189_v20, 0.0 }
 0x59c   :  { %10139 = vst [vmem:[#allocation33_spill] sm:$0xff] %v9463_v47  ;;  %v9483_v47 = vmul.f32 0.2, %v9213_v5  ;;  %v4301_v3 = vsel %vm4173_vm0, %v9101_v52, %v9342_v0  ;;  %v6102_v13 = vpack.c.bf16 %v4295_v21, %v9430_v2  ;;  %vm4196_vm14 = vcmp.gt.f32.partialorder %v9193_v54, 0.0  ;;  %v10143_v0 = vld [vmem:[#allocation19_spill] sm:$0xff]  ;;  %v10149_v2 = vld [vmem:[#allocation42_spill] sm:$0xff] }
 0x59d   :  { %10140 = vst [vmem:[#allocation14_spill] sm:$0xff] %v9469_v7  ;;  %v4298_v7 = vsel %vm4170_vm13, %v9089_v43, %v9326_v23  ;;  %v4300_v43 = vsel %vm4172_vm15, %v9097_v8, %v9339_v12  ;;  %vm4197_vm13 = vcmp.gt.f32.partialorder %v9197_v46, 0.0  ;;  %v4302_v8 = vsel %vm4174_vm1, %v9105_v40, %v9345_v63  ;;  %v10145_v63 = vld [vmem:[#allocation20_spill] sm:$0xff]  ;;  %v10146_v12 = vld [vmem:[#allocation41_spill] sm:$0xff] }
 0x59e   :  { %10141 = vst [vmem:[#allocation15_spill] sm:$0xff] %v9480_v44  ;;  %v6092_v44 = vpack.c.bf16 %v9382_v41, %v9366_v34  ;;  %v9518_v34 = vmul.f32 0.2, %v9221_v35  ;;  %v4303_v52 = vsel %vm4175_vm2, %v9109_v29, %v9355_v53  ;;  %v6107_v41 = vpack.c.bf16 %v4297_v16, %v4296_v18  ;;  %v10150_v18 = vld [vmem:[#allocation22_spill] sm:$0xff]  ;;  %v10152_v16 = vld [vmem:[#allocation43_spill] sm:$0xff] }
 0x59f   :  { %10142 = vst [vmem:[#allocation16_spill] sm:$0xff] %v9483_v47  ;;  %v6087_v47 = vpack.c.bf16 %v9350_v24, %v9334_v1  ;;  %v6097_v24 = vpack.c.bf16 %v9414_v59, %v9398_v50  ;;  %vm4198_vm15 = vcmp.gt.f32.partialorder %v9201_v33, 0.0  ;;  %v9534_v23 = vmul.f32 0.2, %v9225_v17  ;;  %v10148_v50 = vld [vmem:[#allocation21_spill] sm:$0xff] }
 0x5a0   :  { %vm10144_vm1 = vcmp.gt.f32.partialorder %v9113_v32, 0.0  ;;  %v4305_v29 = vsel %vm4177_vm4, %v9117_v15, %v10145_v63  ;;  %6244 = vst [vmem:[%s9865_s4 + $0x8] sm:$0xff] %v6092_v44   ;;  %v6112_v1 = vpack.c.bf16 %v4299_v55, %v4298_v7  ;;  %vm4200_vm2 = vcmp.gt.f32.partialorder %v9209_v9, 0.0  ;;  %v10155_v44 = vld [vmem:[#allocation24_spill] sm:$0xff]  ;;  %v10165_v63 = vld [vmem:[#allocation27_spill] sm:$0xff] }
 0x5a1   :  { %6088 = vst [vmem:[%s9865_s4] sm:$0xff] %v6087_v47   ;;  %v4304_v40 = vsel %vm10144_vm1, %v9113_v32, %v10143_v0  ;;  %v9550_v53 = vmul.f32 0.2, %v10146_v12  ;;  %vm10147_vm1 = vcmp.gt.f32.partialorder %v9121_v31, 0.0  ;;  %v4307_v15 = vsel %vm4179_vm3, %v9125_v30, %v10148_v50  ;;  %v10153_v47 = vld [vmem:[#allocation23_spill] sm:$0xff]  ;;  %v10157_v55 = vld [vmem:[#allocation44_spill] sm:$0xff] }
 0x5a2   :  { %v4306_v32 = vsel %vm10147_vm1, %v9121_v31, %v9371_v25  ;;  %6245 = vst [vmem:[%s9865_s4 + $0x10] sm:$0xff] %v6097_v24   ;;  %v6117_v59 = vpack.c.bf16 %v4301_v3, %v4300_v43  ;;  %vm4202_vm4 = vcmp.gt.f32.partialorder %v9217_v11, 0.0  ;;  %v9566_v21 = vmul.f32 0.2, %v10149_v2  ;;  %v10158_v3 = vld [vmem:[#allocation25_spill] sm:$0xff]  ;;  %v10164_v0 = vld [vmem:[#allocation47_spill] sm:$0xff] }
 0x5a3   :  { %vm10151_vm1 = vcmp.gt.f32.partialorder %v9129_v58, 0.0  ;;  %v4309_v30 = vsel %vm4181_vm5, %v9133_v14, %v9387_v57  ;;  %6246 = vst [vmem:[%s9865_s4 + $0x18] sm:$0xff] %v6102_v13   ;;  %v6122_v25 = vpack.c.bf16 %v4303_v52, %v4302_v8  ;;  %v9582_v7 = vmul.f32 0.2, %v10152_v16  ;;  %v10160_v13 = vld [vmem:[#allocation45_spill] sm:$0xff]  ;;  %v10161_v52 = vld [vmem:[#allocation26_spill] sm:$0xff] }
 0x5a4   :  { %v4308_v31 = vsel %vm10151_vm1, %v9129_v58, %v10150_v18  ;;  %vm10154_vm1 = vcmp.gt.f32.partialorder %v9137_v4, 0.0  ;;  %vm10156_vm5 = vcmp.gt.f32.partialorder %v9141_v39, 0.0  ;;  %6247 = vst [vmem:[%s9865_s4 + $0x20] sm:$0xff] %v6107_v41   ;;  %v6127_v57 = vpack.c.bf16 %v4305_v29, %v4304_v40  ;;  %v10163_v41 = vld [vmem:[#allocation46_spill] sm:$0xff]  ;;  %v10166_v29 = vld [vmem:[#allocation28_spill] sm:$0xff]  ;;  %v10171_v18 = vld [vmem:[#allocation5_spill] sm:$0xff] }
 0x5a5   :  { %v4310_v58 = vsel %vm10154_vm1, %v9137_v4, %v10153_v47  ;;  %v4311_v14 = vsel %vm10156_vm5, %v9141_v39, %v10155_v44  ;;  %vm4206_vm0 = vcmp.gt.f32.partialorder %v10149_v2, 0.0  ;;  %v9598_v43 = vmul.f32 0.2, %v10157_v55  ;;  %6248 = vst [vmem:[%s9865_s4 + $0x28] sm:$0xff] %v6112_v1   ;;  %v10167_v1 = vld [vmem:[#allocation3_spill] sm:$0xff]  ;;  %v10177_v44 = vld [vmem:[#allocation8_spill] sm:$0xff] }
 0x5a6   :  { %v4312_v4 = vsel %vm4184_vm8, %v9145_v51, %v9403_v6  ;;  %vm10159_vm1 = vcmp.gt.f32.partialorder %v9149_v38, 0.0  ;;  %v6132_v24 = vpack.c.bf16 %v4307_v15, %v4306_v32  ;;  %vm4208_vm5 = vcmp.gt.f32.partialorder %v10157_v55, 0.0  ;;  %6249 = vst [vmem:[%s9865_s4 + $0x30] sm:$0xff] %v6117_v59   ;;  %v10168_v32 = vld [vmem:[#allocation4_spill] sm:$0xff]  ;;  %v10169_v15 = vld [vmem:[#allocation29_spill] sm:$0xff]  ;;  %v10175_v47 = vld [vmem:[#allocation31_spill] sm:$0xff] }
 0x5a7   :  { %v4313_v39 = vsel %vm10159_vm1, %v9149_v38, %v10158_v3  ;;  %v9614_v8 = vmul.f32 0.2, %v10160_v13  ;;  %v4314_v51 = vsel %vm4186_vm9, %v9153_v19, %v10161_v52  ;;  %vm10162_vm8 = vcmp.gt.f32.partialorder %v9157_v56, 0.0  ;;  %6250 = vst [vmem:[%s9865_s4 + $0x38] sm:$0xff] %v6122_v25   ;;  %v10173_v25 = vld [vmem:[#allocation30_spill] sm:$0xff]  ;;  %v10180_v3 = vld [vmem:[#allocation9_spill] sm:$0xff] }
 0x5a8   :  { %v4315_v38 = vsel %vm10162_vm8, %v9157_v56, %v9419_v45  ;;  %v6137_v6 = vpack.c.bf16 %v4309_v30, %v4308_v31  ;;  %vm4210_vm1 = vcmp.gt.f32.partialorder %v10163_v41, 0.0  ;;  %vm4211_vm3 = vcmp.gt.f32.partialorder %v10164_v0, 0.0  ;;  %6251 = vst [vmem:[%s9865_s4 + $0x40] sm:$0xff] %v6127_v57   ;;  %v10172_v31 = vld [vmem:[#allocation6_spill] sm:$0xff]  ;;  %v10179_v57 = vld [vmem:[#allocation32_spill] sm:$0xff]  ;;  %v10182_v52 = vld [vmem:[#allocation33_spill] sm:$0xff] }
 0x5a9   :  { %v9630_v40 = vmul.f32 0.2, %v10163_v41  ;;  %v4316_v19 = vsel %vm4188_vm7, %v9161_v10, %v10165_v63  ;;  %v4317_v56 = vsel %vm4189_vm10, %v9165_v27, %v10166_v29  ;;  %v6142_v45 = vpack.c.bf16 %v4311_v14, %v4310_v58  ;;  %6252 = vst [vmem:[%s9865_s4 + $0x48] sm:$0xff] %v6132_v24   ;;  %v10176_v58 = vld [vmem:[#allocation7_spill] sm:$0xff]  ;;  %v10185_v63 = vld [vmem:[#allocation14_spill] sm:$0xff] }
 0x5aa   :  { %vm4212_vm9 = vcmp.gt.f32.partialorder %v10167_v1, 0.0  ;;  %v4275_v50 = vmul.f32 0.2, %v10164_v0  ;;  %vm10170_vm7 = vcmp.gt.f32.partialorder %v9169_v48, 0.0  ;;  %v4319_v27 = vsel %vm4191_vm11, %v9173_v22, %v9438_v42  ;;  %6253 = vst [vmem:[%s9865_s4 + $0x50] sm:$0xff] %v6137_v6  }
 0x5ab   :  { %v4318_v10 = vsel %vm10170_vm7, %v9169_v48, %v10169_v15  ;;  %v6147_v59 = vpack.c.bf16 %v4313_v39, %v4312_v4  ;;  %vm4214_vm10 = vcmp.gt.f32.partialorder %v10171_v18, 0.0  ;;  %v4276_v30 = vmul.f32 0.2, %v10167_v1  ;;  %v10181_v39 = vld [vmem:[#allocation10_spill] sm:$0xff]  ;;  %6254 = vst [vmem:[%s9865_s4 + $0x58] sm:$0xff] %v6142_v45  }
 0x5ac   :  { %vm10174_vm7 = vcmp.gt.f32.partialorder %v9177_v60, 0.0  ;;  %v4321_v22 = vsel %vm4193_vm6, %v9181_v61, %v10175_v47  ;;  %v6152_v42 = vpack.c.bf16 %v4315_v38, %v4314_v51  ;;  %vm4216_vm11 = vcmp.gt.f32.partialorder %v10176_v58, 0.0  ;;  %v10183_v51 = vld [vmem:[#allocation11_spill] sm:$0xff]  ;;  %v10184_v38 = vld [vmem:[#allocation12_spill] sm:$0xff] }
 0x5ad   :  { %v4320_v48 = vsel %vm10174_vm7, %v9177_v60, %v10173_v25  ;;  %v4277_v14 = vmul.f32 0.2, %v10168_v32  ;;  %vm10178_vm7 = vcmp.gt.f32.partialorder %v9185_v62, 0.0  ;;  %v4323_v61 = vsel %vm4195_vm12, %v9189_v20, %v10179_v57  ;;  %6255 = vst [vmem:[%s9865_s4 + $0x60] sm:$0xff] %v6147_v59  }
 0x5ae   :  { %v4322_v60 = vsel %vm10178_vm7, %v9185_v62, %v9452_v37  ;;  %v6157_v4 = vpack.c.bf16 %v4317_v56, %v4316_v19  ;;  %vm4218_vm6 = vcmp.gt.f32.partialorder %v10180_v3, 0.0  ;;  %vm4219_vm8 = vcmp.gt.f32.partialorder %v10181_v39, 0.0  ;;  %v10187_v19 = vld [vmem:[#allocation13_spill] sm:$0xff]  ;;  %v10188_v56 = vld [vmem:[#allocation15_spill] sm:$0xff]  ;;  %6256 = vst [vmem:[%s9865_s4 + $0x68] sm:$0xff] %v6152_v42  }
 0x5af   :  { %v4278_v24 = vmul.f32 0.2, %v10171_v18  ;;  %v4324_v62 = vsel %vm4196_vm14, %v9193_v54, %v10182_v52  ;;  %v4325_v20 = vsel %vm4197_vm13, %v9197_v46, %v9466_v36  ;;  %v6162_v37 = vpack.c.bf16 %v4319_v27, %v4318_v10 }
 0x5b0   :  { %vm4220_vm12 = vcmp.gt.f32.partialorder %v10183_v51, 0.0  ;;  %vm4221_vm7 = vcmp.gt.f32.partialorder %v10184_v38, 0.0  ;;  %v4279_v6 = vmul.f32 0.2, %v10172_v31  ;;  %v4326_v54 = vsel %vm4198_vm15, %v9201_v33, %v10185_v63  ;;  %v10189_v33 = vld [vmem:[#allocation16_spill] sm:$0xff]  ;;  %6257 = vst [vmem:[%s9865_s4 + $0x70] sm:$0xff] %v6157_v4  }
 0x5b1   :  { %vm10186_vm13 = vcmp.gt.f32.partialorder %v9205_v26, 0.0  ;;  %v6167_v36 = vpack.c.bf16 %v4321_v22, %v4320_v48  ;;  %vm4222_vm14 = vcmp.gt.f32.partialorder %v10187_v19, 0.0  ;;  %v4280_v29 = vmul.f32 0.2, %v10176_v58  ;;  %6258 = vst [vmem:[%s9865_s4 + $0x78] sm:$0xff] %v6162_v37  }
 0x5b2   :  { %v4327_v46 = vsel %vm10186_vm13, %v9205_v26, %v9477_v28  ;;  %v4328_v45 = vsel %vm4200_vm2, %v9209_v9, %v10188_v56  ;;  %vm10190_vm15 = vcmp.gt.f32.partialorder %v9213_v5, 0.0  ;;  %v6172_v26 = vpack.c.bf16 %v4323_v61, %v4322_v60 }
 0x5b3   :  { %v4329_v15 = vsel %vm10190_vm15, %v9213_v5, %v10189_v33  ;;  %v4281_v28 = vmul.f32 0.2, %v10177_v44  ;;  %v4330_v10 = vsel %vm4202_vm4, %v9217_v11, %v9492_v49  ;;  %vm10191_vm2 = vcmp.gt.f32.partialorder %v9221_v35, 0.0  ;;  %6259 = vst [vmem:[%s9865_s4 + $0x80] sm:$0xff] %v6167_v36  }
 0x5b4   :  { %v4331_v9 = vsel %vm10191_vm2, %v9221_v35, %v9518_v34  ;;  %v6177_v5 = vpack.c.bf16 %v4325_v20, %v4324_v62  ;;  %v4282_v27 = vmul.f32 0.2, %v10180_v3  ;;  %vm10192_vm13 = vcmp.gt.f32.partialorder %v9225_v17, 0.0  ;;  %6260 = vst [vmem:[%s9865_s4 + $0x88] sm:$0xff] %v6172_v26  }
 0x5b5   :  { %v4332_v59 = vsel %vm10192_vm13, %v9225_v17, %v9534_v23  ;;  %vm10193_vm4 = vcmp.gt.f32.partialorder %v10146_v12, 0.0  ;;  %v6182_v35 = vpack.c.bf16 %v4327_v46, %v4326_v54  ;;  %v4283_v49 = vmul.f32 0.2, %v10181_v39 }
 0x5b6   :  { %v4333_v11 = vsel %vm10193_vm4, %v10146_v12, %v9550_v53  ;;  %v4334_v34 = vsel %vm4206_vm0, %v10149_v2, %v9566_v21  ;;  %vm10194_vm15 = vcmp.gt.f32.partialorder %v10152_v16, 0.0  ;;  %v6187_v23 = vpack.c.bf16 %v4329_v15, %v4328_v45  ;;  %6261 = vst [vmem:[%s9865_s4 + $0x90] sm:$0xff] %v6177_v5  }
 0x5b7   :  { %v4335_v17 = vsel %vm10194_vm15, %v10152_v16, %v9582_v7  ;;  %v4284_v12 = vmul.f32 0.2, %v10183_v51  ;;  %v4336_v53 = vsel %vm4208_vm5, %v10157_v55, %v9598_v43  ;;  %vm10195_vm0 = vcmp.gt.f32.partialorder %v10160_v13, 0.0  ;;  %6262 = vst [vmem:[%s9865_s4 + $0x98] sm:$0xff] %v6182_v35  }
 0x5b8   :  { %v4337_v2 = vsel %vm10195_vm0, %v10160_v13, %v9614_v8  ;;  %v6192_v21 = vpack.c.bf16 %v4331_v9, %v4330_v10  ;;  %v4285_v16 = vmul.f32 0.2, %v10184_v38  ;;  %v4338_v7 = vsel %vm4210_vm1, %v10163_v41, %v9630_v40  ;;  %6263 = vst [vmem:[%s9865_s4 + $0xa0] sm:$0xff] %v6187_v23  }
 0x5b9   :  { %v4339_v55 = vsel %vm4211_vm3, %v10164_v0, %v4275_v50  ;;  %v6197_v43 = vpack.c.bf16 %v4333_v11, %v4332_v59  ;;  %v4286_v13 = vmul.f32 0.2, %v10187_v19  ;;  %v4340_v8 = vsel %vm4212_vm9, %v10167_v1, %v4276_v30  ;;  %v10197_v0 = vld [vmem:[#allocation18_spill] sm:$0xff] }
 0x5ba   :  { %vm10196_vm5 = vcmp.gt.f32.partialorder %v10168_v32, 0.0  ;;  %v6202_v41 = vpack.c.bf16 %v4335_v17, %v4334_v34  ;;  %v4287_v40 = vmul.f32 0.2, %v10197_v0  ;;  %v4342_v50 = vsel %vm4214_vm10, %v10171_v18, %v4278_v24  ;;  %6264 = vst [vmem:[%s9865_s4 + $0xa8] sm:$0xff] %v6192_v21  }
 0x5bb   :  { %v4341_v25 = vsel %vm10196_vm5, %v10168_v32, %v4277_v14  ;;  %vm10198_vm3 = vcmp.gt.f32.partialorder %v10172_v31, 0.0  ;;  %v6207_v1 = vpack.c.bf16 %v4337_v2, %v4336_v53  ;;  %vm4223_vm1 = vcmp.gt.f32.partialorder %v10197_v0, 0.0  ;;  %6265 = vst [vmem:[%s9865_s4 + $0xb0] sm:$0xff] %v6197_v43  }
 0x5bc   :  { %v4343_v48 = vsel %vm10198_vm3, %v10172_v31, %v4279_v6  ;;  %v4344_v32 = vsel %vm4216_vm11, %v10176_v58, %v4280_v29  ;;  %vm10199_vm9 = vcmp.gt.f32.partialorder %v10177_v44, 0.0  ;;  %v6212_v18 = vpack.c.bf16 %v4339_v55, %v4338_v7  ;;  %6266 = vst [vmem:[%s9865_s4 + $0xb8] sm:$0xff] %v6202_v41  }
 0x5bd   :  { %v4345_v30 = vsel %vm10199_vm9, %v10177_v44, %v4281_v28  ;;  %v4346_v31 = vsel %vm4218_vm6, %v10180_v3, %v4282_v27  ;;  %v4347_v47 = vsel %vm4219_vm8, %v10181_v39, %v4283_v49  ;;  %v6217_v22 = vpack.c.bf16 %v4341_v25, %v4340_v8  ;;  %6267 = vst [vmem:[%s9865_s4 + $0xc0] sm:$0xff] %v6207_v1  }
 0x5be   :  { %v4348_v42 = vsel %vm4220_vm12, %v10183_v51, %v4284_v12  ;;  %v4349_v58 = vsel %vm4221_vm7, %v10184_v38, %v4285_v16  ;;  %v6222_v44 = vpack.c.bf16 %v4343_v48, %v4342_v50  ;;  %v4350_v14 = vsel %vm4222_vm14, %v10187_v19, %v4286_v13  ;;  %6268 = vst [vmem:[%s9865_s4 + $0xc8] sm:$0xff] %v6212_v18  }
 0x5bf   :  { %v4351_v60 = vsel %vm4223_vm1, %v10197_v0, %v4287_v40  ;;  %v6227_v57 = vpack.c.bf16 %v4345_v30, %v4344_v32  ;;  %v6232_v61 = vpack.c.bf16 %v4347_v47, %v4346_v31  ;;  %6269 = vst [vmem:[%s9865_s4 + $0xd0] sm:$0xff] %v6217_v22   ;;  %v6237_v4 = vpack.c.bf16 %v4349_v58, %v4348_v42 }
 0x5c0   :  { %6270 = vst [vmem:[%s9865_s4 + $0xd8] sm:$0xff] %v6222_v44   ;;  %v6242_v3 = vpack.c.bf16 %v4351_v60, %v4350_v14 }
 0x5c1   :  { %6271 = vst [vmem:[%s9865_s4 + $0xe0] sm:$0xff] %v6227_v57  }
 0x5c2   :  { %6272 = vst [vmem:[%s9865_s4 + $0xe8] sm:$0xff] %v6232_v61  }
 0x5c3   :  { %6273 = vst [vmem:[%s9865_s4 + $0xf0] sm:$0xff] %v6237_v4  }
 0x5c4   :  { %6274 = vst [vmem:[%s9865_s4 + $0xf8] sm:$0xff] %v6242_v3  }

// kernel: discriminator_forward.7
= control target key start
LH: loop header
LB: loop body
LE: loop exit
PB: predicated region body
PF: predicated region fallthrough
CT: control target
= control target key end

     0   :  { %s6911_s15 = smov 0   ;;  %s6913_s16 = smov 0   ;;  %s8727_s0 = inlined_call_operand.vmem [shape: bf16[128,2048], index: 0, kind: input, shape index: {}]   ;;  %s8728_s1 = inlined_call_operand.vmem [shape: bf16[2048,256], index: 1, kind: input, shape index: {}]   ;;  %s8729_s2 = inlined_call_operand.vmem [shape: f32[1,256], index: 2, kind: input, shape index: {}]   ;;  %s8730_s3 = inlined_call_operand.vmem [shape: f32[1,256], index: 3, kind: input, shape index: {}]   ;;  %s8731_s4 = inlined_call_operand.vmem [shape: bf16[128,256], index: 4, kind: output, shape index: {}]  }
   0x1   :  { %s6915_s17 = smov 0   ;;  %s6917_s18 = smov 0  }
   0x2   :  { %s6919_s19 = smov 0  }
   0x3 LB: > { %s26_s20 = sadd.s32 1, %s6880_s18  ;;  %s5462_s21 = sadd.s32 4294967295, %s6884_s19   ;;  %s6884_s19 = sphi %s6919_s19, %s14_s19   ;;  %s6880_s18 = sphi %s6917_s18, %s8736_s18   ;;  %s6876_s17 = sphi %s6915_s17, %s8735_s17   ;;  %s6872_s16 = sphi %s6913_s16, %s8734_s16   ;;  %s6868_s15 = sphi %s6911_s15, %s8733_s15  }
   0x4   : > { %p28_p0 = scmp.ge.s32.totalorder %s26_s20, 2  ;;  %p68_p1 = scmp.ne.s32.totalorder %s6872_s16, %s6868_s15 }
   0x5   : > { %p69_p2 = scmp.eq.s32.totalorder %s6884_s19, 0  ;;  %p150_p4 = scmp.eq.s32.totalorder %s5462_s21, 1 }
   0x6   : > { %s8738_s20 = smov (%p28_p0, %s26_s20), 0  ;;  %s61_s23 = sadd.s32 1, %s6872_s16 }
   0x7   : > { %p70_p3 = por %p69_p2, %p68_p1  ;;  %s57_s22 = ssub.s32 %s6880_s18, %s8738_s20 }
   0x8   : > { %p59_p5 = scmp.eq.s32.totalorder %s57_s22, 0  ;;  %p6946_p6 = por %p150_p4, %p68_p1 }
   0x9   : > { %p5466_p7 = scmp.ge.s32.totalorder %s6884_s19, 2 }
   0xa   : > { %s6951_s25 = scalar_select %p59_p5, %s6872_s16, %s61_s23  }
   0xb   : > { %181 = sbr.rel (%p5466_p7) target bundleno = 276 (0x114), region = 20 }
  0x10   : > { %184 = sbr.rel (!%p70_p3) target bundleno = 276 (0x114), region = 24  ;;  %s186_s26 = sand.u32 (%p70_p3), 1, %s6872_s16  }
  0x11   : > { %s5468_s27 = sshll.u32 (%p70_p3), %s6880_s18, 2  ;;  %s5467_s28 = sshll.u32 (%p70_p3), %s186_s26, 10 }
  0x12   : > { %s6959_s5 = scalar_lea.vmem (%p70_p3), %s8728_s1, %s5468_s27  ;;  %s6963_s6 = scalar_lea.vmem (%p70_p3), [#allocation3], %s5467_s28 }
  0x13   : > { %v210_v0 = vld [vmem:[%s6959_s5] sm:$0xf] (%p70_p3)  ;;  %v212_v1 = vld [vmem:[%s6959_s5 + $0x8] sm:$0xf] (%p70_p3)  ;;  %v214_v2 = vld [vmem:[%s6959_s5 + $0x10] sm:$0xf] (%p70_p3) }
  0x14   : > { %211 = vst [vmem:[%s6963_s6] sm:$0xf] (%p70_p3), %v210_v0  ;;  %v216_v3 = vld [vmem:[%s6959_s5 + $0x18] sm:$0xf] (%p70_p3)  ;;  %v218_v4 = vld [vmem:[%s6959_s5 + $0x20] sm:$0xf] (%p70_p3) }
  0x15   : > { %213 = vst [vmem:[%s6963_s6 + $0x4] sm:$0xf] %v212_v1  ;;  %v220_v5 = vld [vmem:[%s6959_s5 + $0x28] sm:$0xf]  ;;  %v222_v6 = vld [vmem:[%s6959_s5 + $0x30] sm:$0xf] }
  0x16   : > { %215 = vst [vmem:[%s6963_s6 + $0x8] sm:$0xf] %v214_v2  ;;  %v224_v7 = vld [vmem:[%s6959_s5 + $0x38] sm:$0xf]  ;;  %v226_v8 = vld [vmem:[%s6959_s5 + $0x40] sm:$0xf] }
  0x17   : > { %217 = vst [vmem:[%s6963_s6 + $0xc] sm:$0xf] %v216_v3  ;;  %v228_v9 = vld [vmem:[%s6959_s5 + $0x48] sm:$0xf]  ;;  %v230_v10 = vld [vmem:[%s6959_s5 + $0x50] sm:$0xf] }
  0x18   : > { %219 = vst [vmem:[%s6963_s6 + $0x10] sm:$0xf] %v218_v4  ;;  %v232_v11 = vld [vmem:[%s6959_s5 + $0x58] sm:$0xf]  ;;  %v234_v12 = vld [vmem:[%s6959_s5 + $0x60] sm:$0xf] }
  0x19   : > { %221 = vst [vmem:[%s6963_s6 + $0x14] sm:$0xf] %v220_v5  ;;  %v236_v13 = vld [vmem:[%s6959_s5 + $0x68] sm:$0xf]  ;;  %v238_v14 = vld [vmem:[%s6959_s5 + $0x70] sm:$0xf] }
  0x1a   : > { %223 = vst [vmem:[%s6963_s6 + $0x18] sm:$0xf] %v222_v6  ;;  %v240_v15 = vld [vmem:[%s6959_s5 + $0x78] sm:$0xf]  ;;  %v242_v16 = vld [vmem:[%s6959_s5 + $0x80] sm:$0xf] }
  0x1b   : > { %225 = vst [vmem:[%s6963_s6 + $0x1c] sm:$0xf] %v224_v7  ;;  %v244_v17 = vld [vmem:[%s6959_s5 + $0x88] sm:$0xf]  ;;  %v246_v18 = vld [vmem:[%s6959_s5 + $0x90] sm:$0xf] }
  0x1c   : > { %227 = vst [vmem:[%s6963_s6 + $0x20] sm:$0xf] %v226_v8  ;;  %v248_v19 = vld [vmem:[%s6959_s5 + $0x98] sm:$0xf]  ;;  %v250_v20 = vld [vmem:[%s6959_s5 + $0xa0] sm:$0xf] }
  0x1d   : > { %229 = vst [vmem:[%s6963_s6 + $0x24] sm:$0xf] %v228_v9  ;;  %v252_v21 = vld [vmem:[%s6959_s5 + $0xa8] sm:$0xf]  ;;  %v254_v22 = vld [vmem:[%s6959_s5 + $0xb0] sm:$0xf] }
  0x1e   : > { %231 = vst [vmem:[%s6963_s6 + $0x28] sm:$0xf] %v230_v10  ;;  %v256_v23 = vld [vmem:[%s6959_s5 + $0xb8] sm:$0xf]  ;;  %v258_v24 = vld [vmem:[%s6959_s5 + $0xc0] sm:$0xf] }
  0x1f   : > { %233 = vst [vmem:[%s6963_s6 + $0x2c] sm:$0xf] %v232_v11  ;;  %v260_v25 = vld [vmem:[%s6959_s5 + $0xc8] sm:$0xf]  ;;  %v262_v26 = vld [vmem:[%s6959_s5 + $0xd0] sm:$0xf] }
  0x20   : > { %235 = vst [vmem:[%s6963_s6 + $0x30] sm:$0xf] %v234_v12  ;;  %v264_v27 = vld [vmem:[%s6959_s5 + $0xd8] sm:$0xf]  ;;  %v266_v28 = vld [vmem:[%s6959_s5 + $0xe0] sm:$0xf] }
  0x21   : > { %237 = vst [vmem:[%s6963_s6 + $0x34] sm:$0xf] %v236_v13  ;;  %v268_v29 = vld [vmem:[%s6959_s5 + $0xe8] sm:$0xf]  ;;  %v270_v30 = vld [vmem:[%s6959_s5 + $0xf0] sm:$0xf] }
  0x22   : > { %239 = vst [vmem:[%s6963_s6 + $0x38] sm:$0xf] %v238_v14  ;;  %v272_v31 = vld [vmem:[%s6959_s5 + $0xf8] sm:$0xf]  ;;  %v274_v32 = vld [vmem:[%s6959_s5 + $0x100] sm:$0xf] }
  0x23   : > { %241 = vst [vmem:[%s6963_s6 + $0x3c] sm:$0xf] %v240_v15  ;;  %v276_v33 = vld [vmem:[%s6959_s5 + $0x108] sm:$0xf]  ;;  %v278_v34 = vld [vmem:[%s6959_s5 + $0x110] sm:$0xf] }
  0x24   : > { %243 = vst [vmem:[%s6963_s6 + $0x40] sm:$0xf] %v242_v16  ;;  %v280_v35 = vld [vmem:[%s6959_s5 + $0x118] sm:$0xf]  ;;  %v282_v36 = vld [vmem:[%s6959_s5 + $0x120] sm:$0xf] }
  0x25   : > { %245 = vst [vmem:[%s6963_s6 + $0x44] sm:$0xf] %v244_v17  ;;  %v284_v37 = vld [vmem:[%s6959_s5 + $0x128] sm:$0xf]  ;;  %v286_v38 = vld [vmem:[%s6959_s5 + $0x130] sm:$0xf] }
  0x26   : > { %247 = vst [vmem:[%s6963_s6 + $0x48] sm:$0xf] %v246_v18  ;;  %v288_v39 = vld [vmem:[%s6959_s5 + $0x138] sm:$0xf]  ;;  %v290_v40 = vld [vmem:[%s6959_s5 + $0x140] sm:$0xf] }
  0x27   : > { %249 = vst [vmem:[%s6963_s6 + $0x4c] sm:$0xf] %v248_v19  ;;  %v292_v41 = vld [vmem:[%s6959_s5 + $0x148] sm:$0xf]  ;;  %v294_v42 = vld [vmem:[%s6959_s5 + $0x150] sm:$0xf] }
  0x28   : > { %251 = vst [vmem:[%s6963_s6 + $0x50] sm:$0xf] %v250_v20  ;;  %v296_v43 = vld [vmem:[%s6959_s5 + $0x158] sm:$0xf]  ;;  %v298_v44 = vld [vmem:[%s6959_s5 + $0x160] sm:$0xf] }
  0x29   : > { %253 = vst [vmem:[%s6963_s6 + $0x54] sm:$0xf] %v252_v21  ;;  %v300_v45 = vld [vmem:[%s6959_s5 + $0x168] sm:$0xf]  ;;  %v302_v46 = vld [vmem:[%s6959_s5 + $0x170] sm:$0xf] }
  0x2a   : > { %255 = vst [vmem:[%s6963_s6 + $0x58] sm:$0xf] %v254_v22  ;;  %v304_v47 = vld [vmem:[%s6959_s5 + $0x178] sm:$0xf]  ;;  %v306_v48 = vld [vmem:[%s6959_s5 + $0x180] sm:$0xf] }
  0x2b   : > { %257 = vst [vmem:[%s6963_s6 + $0x5c] sm:$0xf] %v256_v23  ;;  %v308_v49 = vld [vmem:[%s6959_s5 + $0x188] sm:$0xf]  ;;  %v310_v50 = vld [vmem:[%s6959_s5 + $0x190] sm:$0xf] }
  0x2c   : > { %259 = vst [vmem:[%s6963_s6 + $0x60] sm:$0xf] %v258_v24  ;;  %v312_v51 = vld [vmem:[%s6959_s5 + $0x198] sm:$0xf]  ;;  %v314_v52 = vld [vmem:[%s6959_s5 + $0x1a0] sm:$0xf] }
  0x2d   : > { %261 = vst [vmem:[%s6963_s6 + $0x64] sm:$0xf] %v260_v25  ;;  %v316_v53 = vld [vmem:[%s6959_s5 + $0x1a8] sm:$0xf]  ;;  %v318_v54 = vld [vmem:[%s6959_s5 + $0x1b0] sm:$0xf] }
  0x2e   : > { %263 = vst [vmem:[%s6963_s6 + $0x68] sm:$0xf] %v262_v26  ;;  %v320_v55 = vld [vmem:[%s6959_s5 + $0x1b8] sm:$0xf]  ;;  %v322_v56 = vld [vmem:[%s6959_s5 + $0x1c0] sm:$0xf] }
  0x2f   : > { %265 = vst [vmem:[%s6963_s6 + $0x6c] sm:$0xf] %v264_v27  ;;  %v324_v57 = vld [vmem:[%s6959_s5 + $0x1c8] sm:$0xf]  ;;  %v326_v58 = vld [vmem:[%s6959_s5 + $0x1d0] sm:$0xf] }
  0x30   : > { %267 = vst [vmem:[%s6963_s6 + $0x70] sm:$0xf] %v266_v28  ;;  %v328_v59 = vld [vmem:[%s6959_s5 + $0x1d8] sm:$0xf]  ;;  %v330_v60 = vld [vmem:[%s6959_s5 + $0x1e0] sm:$0xf] }
  0x31   : > { %269 = vst [vmem:[%s6963_s6 + $0x74] sm:$0xf] %v268_v29  ;;  %v332_v61 = vld [vmem:[%s6959_s5 + $0x1e8] sm:$0xf]  ;;  %v334_v62 = vld [vmem:[%s6959_s5 + $0x1f0] sm:$0xf] }
  0x32   : > { %271 = vst [vmem:[%s6963_s6 + $0x78] sm:$0xf] %v270_v30  ;;  %v336_v63 = vld [vmem:[%s6959_s5 + $0x1f8] sm:$0xf]  ;;  %v338_v0 = vld [vmem:[%s6959_s5 + $0x200] sm:$0xf] }
  0x33   : > { %273 = vst [vmem:[%s6963_s6 + $0x7c] sm:$0xf] %v272_v31  ;;  %v340_v1 = vld [vmem:[%s6959_s5 + $0x208] sm:$0xf]  ;;  %v342_v2 = vld [vmem:[%s6959_s5 + $0x210] sm:$0xf] }
  0x34   : > { %275 = vst [vmem:[%s6963_s6 + $0x80] sm:$0xf] %v274_v32  ;;  %v344_v3 = vld [vmem:[%s6959_s5 + $0x218] sm:$0xf]  ;;  %v346_v4 = vld [vmem:[%s6959_s5 + $0x220] sm:$0xf] }
  0x35   : > { %277 = vst [vmem:[%s6963_s6 + $0x84] sm:$0xf] %v276_v33  ;;  %v348_v5 = vld [vmem:[%s6959_s5 + $0x228] sm:$0xf]  ;;  %v350_v6 = vld [vmem:[%s6959_s5 + $0x230] sm:$0xf] }
  0x36   : > { %279 = vst [vmem:[%s6963_s6 + $0x88] sm:$0xf] %v278_v34  ;;  %v352_v7 = vld [vmem:[%s6959_s5 + $0x238] sm:$0xf]  ;;  %v354_v8 = vld [vmem:[%s6959_s5 + $0x240] sm:$0xf] }
  0x37   : > { %281 = vst [vmem:[%s6963_s6 + $0x8c] sm:$0xf] %v280_v35  ;;  %v356_v9 = vld [vmem:[%s6959_s5 + $0x248] sm:$0xf]  ;;  %v358_v10 = vld [vmem:[%s6959_s5 + $0x250] sm:$0xf] }
  0x38   : > { %283 = vst [vmem:[%s6963_s6 + $0x90] sm:$0xf] %v282_v36  ;;  %v360_v11 = vld [vmem:[%s6959_s5 + $0x258] sm:$0xf]  ;;  %v362_v12 = vld [vmem:[%s6959_s5 + $0x260] sm:$0xf] }
  0x39   : > { %285 = vst [vmem:[%s6963_s6 + $0x94] sm:$0xf] %v284_v37  ;;  %v364_v13 = vld [vmem:[%s6959_s5 + $0x268] sm:$0xf]  ;;  %v366_v14 = vld [vmem:[%s6959_s5 + $0x270] sm:$0xf] }
  0x3a   : > { %287 = vst [vmem:[%s6963_s6 + $0x98] sm:$0xf] %v286_v38  ;;  %v368_v15 = vld [vmem:[%s6959_s5 + $0x278] sm:$0xf]  ;;  %v370_v16 = vld [vmem:[%s6959_s5 + $0x280] sm:$0xf] }
  0x3b   : > { %289 = vst [vmem:[%s6963_s6 + $0x9c] sm:$0xf] %v288_v39  ;;  %v372_v17 = vld [vmem:[%s6959_s5 + $0x288] sm:$0xf]  ;;  %v374_v18 = vld [vmem:[%s6959_s5 + $0x290] sm:$0xf] }
  0x3c   : > { %291 = vst [vmem:[%s6963_s6 + $0xa0] sm:$0xf] %v290_v40  ;;  %v376_v19 = vld [vmem:[%s6959_s5 + $0x298] sm:$0xf]  ;;  %v378_v20 = vld [vmem:[%s6959_s5 + $0x2a0] sm:$0xf] }
  0x3d   : > { %293 = vst [vmem:[%s6963_s6 + $0xa4] sm:$0xf] %v292_v41  ;;  %v380_v21 = vld [vmem:[%s6959_s5 + $0x2a8] sm:$0xf]  ;;  %v382_v22 = vld [vmem:[%s6959_s5 + $0x2b0] sm:$0xf] }
  0x3e   : > { %295 = vst [vmem:[%s6963_s6 + $0xa8] sm:$0xf] %v294_v42  ;;  %v384_v23 = vld [vmem:[%s6959_s5 + $0x2b8] sm:$0xf]  ;;  %v386_v24 = vld [vmem:[%s6959_s5 + $0x2c0] sm:$0xf] }
  0x3f   : > { %297 = vst [vmem:[%s6963_s6 + $0xac] sm:$0xf] %v296_v43  ;;  %v388_v25 = vld [vmem:[%s6959_s5 + $0x2c8] sm:$0xf]  ;;  %v390_v26 = vld [vmem:[%s6959_s5 + $0x2d0] sm:$0xf] }
  0x40   : > { %299 = vst [vmem:[%s6963_s6 + $0xb0] sm:$0xf] %v298_v44  ;;  %v392_v27 = vld [vmem:[%s6959_s5 + $0x2d8] sm:$0xf]  ;;  %v394_v28 = vld [vmem:[%s6959_s5 + $0x2e0] sm:$0xf] }
  0x41   : > { %301 = vst [vmem:[%s6963_s6 + $0xb4] sm:$0xf] %v300_v45  ;;  %v396_v29 = vld [vmem:[%s6959_s5 + $0x2e8] sm:$0xf]  ;;  %v398_v30 = vld [vmem:[%s6959_s5 + $0x2f0] sm:$0xf] }
  0x42   : > { %303 = vst [vmem:[%s6963_s6 + $0xb8] sm:$0xf] %v302_v46  ;;  %v400_v31 = vld [vmem:[%s6959_s5 + $0x2f8] sm:$0xf]  ;;  %v402_v32 = vld [vmem:[%s6959_s5 + $0x300] sm:$0xf] }
  0x43   : > { %305 = vst [vmem:[%s6963_s6 + $0xbc] sm:$0xf] %v304_v47  ;;  %v404_v33 = vld [vmem:[%s6959_s5 + $0x308] sm:$0xf]  ;;  %v406_v34 = vld [vmem:[%s6959_s5 + $0x310] sm:$0xf] }
  0x44   : > { %307 = vst [vmem:[%s6963_s6 + $0xc0] sm:$0xf] %v306_v48  ;;  %v408_v35 = vld [vmem:[%s6959_s5 + $0x318] sm:$0xf]  ;;  %v410_v36 = vld [vmem:[%s6959_s5 + $0x320] sm:$0xf] }
  0x45   : > { %309 = vst [vmem:[%s6963_s6 + $0xc4] sm:$0xf] %v308_v49  ;;  %v412_v37 = vld [vmem:[%s6959_s5 + $0x328] sm:$0xf]  ;;  %v414_v38 = vld [vmem:[%s6959_s5 + $0x330] sm:$0xf] }
  0x46   : > { %311 = vst [vmem:[%s6963_s6 + $0xc8] sm:$0xf] %v310_v50  ;;  %v416_v39 = vld [vmem:[%s6959_s5 + $0x338] sm:$0xf]  ;;  %v418_v40 = vld [vmem:[%s6959_s5 + $0x340] sm:$0xf] }
  0x47   : > { %313 = vst [vmem:[%s6963_s6 + $0xcc] sm:$0xf] %v312_v51  ;;  %v420_v41 = vld [vmem:[%s6959_s5 + $0x348] sm:$0xf]  ;;  %v422_v42 = vld [vmem:[%s6959_s5 + $0x350] sm:$0xf] }
  0x48   : > { %315 = vst [vmem:[%s6963_s6 + $0xd0] sm:$0xf] %v314_v52  ;;  %v424_v43 = vld [vmem:[%s6959_s5 + $0x358] sm:$0xf]  ;;  %v426_v44 = vld [vmem:[%s6959_s5 + $0x360] sm:$0xf] }
  0x49   : > { %317 = vst [vmem:[%s6963_s6 + $0xd4] sm:$0xf] %v316_v53  ;;  %v428_v45 = vld [vmem:[%s6959_s5 + $0x368] sm:$0xf]  ;;  %v430_v46 = vld [vmem:[%s6959_s5 + $0x370] sm:$0xf] }
  0x4a   : > { %319 = vst [vmem:[%s6963_s6 + $0xd8] sm:$0xf] %v318_v54  ;;  %v432_v47 = vld [vmem:[%s6959_s5 + $0x378] sm:$0xf]  ;;  %v434_v48 = vld [vmem:[%s6959_s5 + $0x380] sm:$0xf] }
  0x4b   : > { %321 = vst [vmem:[%s6963_s6 + $0xdc] sm:$0xf] %v320_v55  ;;  %v436_v49 = vld [vmem:[%s6959_s5 + $0x388] sm:$0xf]  ;;  %v438_v50 = vld [vmem:[%s6959_s5 + $0x390] sm:$0xf] }
  0x4c   : > { %323 = vst [vmem:[%s6963_s6 + $0xe0] sm:$0xf] %v322_v56  ;;  %v440_v51 = vld [vmem:[%s6959_s5 + $0x398] sm:$0xf]  ;;  %v442_v52 = vld [vmem:[%s6959_s5 + $0x3a0] sm:$0xf] }
  0x4d   : > { %325 = vst [vmem:[%s6963_s6 + $0xe4] sm:$0xf] %v324_v57  ;;  %v444_v53 = vld [vmem:[%s6959_s5 + $0x3a8] sm:$0xf]  ;;  %v446_v54 = vld [vmem:[%s6959_s5 + $0x3b0] sm:$0xf] }
  0x4e   : > { %327 = vst [vmem:[%s6963_s6 + $0xe8] sm:$0xf] %v326_v58  ;;  %v448_v55 = vld [vmem:[%s6959_s5 + $0x3b8] sm:$0xf]  ;;  %v450_v56 = vld [vmem:[%s6959_s5 + $0x3c0] sm:$0xf] }
  0x4f   : > { %329 = vst [vmem:[%s6963_s6 + $0xec] sm:$0xf] %v328_v59  ;;  %v452_v57 = vld [vmem:[%s6959_s5 + $0x3c8] sm:$0xf]  ;;  %v454_v58 = vld [vmem:[%s6959_s5 + $0x3d0] sm:$0xf] }
  0x50   : > { %331 = vst [vmem:[%s6963_s6 + $0xf0] sm:$0xf] %v330_v60  ;;  %v456_v59 = vld [vmem:[%s6959_s5 + $0x3d8] sm:$0xf]  ;;  %v458_v60 = vld [vmem:[%s6959_s5 + $0x3e0] sm:$0xf] }
  0x51   : > { %333 = vst [vmem:[%s6963_s6 + $0xf4] sm:$0xf] %v332_v61  ;;  %v460_v61 = vld [vmem:[%s6959_s5 + $0x3e8] sm:$0xf] }
  0x52   : > { %335 = vst [vmem:[%s6963_s6 + $0xf8] sm:$0xf] %v334_v62  ;;  %v462_v62 = vld [vmem:[%s6959_s5 + $0x3f0] sm:$0xf] }
  0x53   : > { %337 = vst [vmem:[%s6963_s6 + $0xfc] sm:$0xf] %v336_v63  ;;  %v464_v63 = vld [vmem:[%s6959_s5 + $0x3f8] sm:$0xf] }
  0x54   : > { %339 = vst [vmem:[%s6963_s6 + $0x100] sm:$0xf] %v338_v0  ;;  %v466_v0 = vld [vmem:[%s6959_s5 + $0x400] sm:$0xf] }
  0x55   : > { %341 = vst [vmem:[%s6963_s6 + $0x104] sm:$0xf] %v340_v1  ;;  %v468_v1 = vld [vmem:[%s6959_s5 + $0x408] sm:$0xf] }
  0x56   : > { %343 = vst [vmem:[%s6963_s6 + $0x108] sm:$0xf] %v342_v2  ;;  %v470_v2 = vld [vmem:[%s6959_s5 + $0x410] sm:$0xf] }
  0x57   : > { %345 = vst [vmem:[%s6963_s6 + $0x10c] sm:$0xf] %v344_v3  ;;  %v472_v3 = vld [vmem:[%s6959_s5 + $0x418] sm:$0xf] }
  0x58   : > { %347 = vst [vmem:[%s6963_s6 + $0x110] sm:$0xf] %v346_v4  ;;  %v474_v4 = vld [vmem:[%s6959_s5 + $0x420] sm:$0xf] }
  0x59   : > { %349 = vst [vmem:[%s6963_s6 + $0x114] sm:$0xf] %v348_v5  ;;  %v476_v5 = vld [vmem:[%s6959_s5 + $0x428] sm:$0xf] }
  0x5a   : > { %351 = vst [vmem:[%s6963_s6 + $0x118] sm:$0xf] %v350_v6  ;;  %v478_v6 = vld [vmem:[%s6959_s5 + $0x430] sm:$0xf] }
  0x5b   : > { %353 = vst [vmem:[%s6963_s6 + $0x11c] sm:$0xf] %v352_v7  ;;  %v480_v7 = vld [vmem:[%s6959_s5 + $0x438] sm:$0xf] }
  0x5c   : > { %355 = vst [vmem:[%s6963_s6 + $0x120] sm:$0xf] %v354_v8  ;;  %v482_v8 = vld [vmem:[%s6959_s5 + $0x440] sm:$0xf] }
  0x5d   : > { %357 = vst [vmem:[%s6963_s6 + $0x124] sm:$0xf] %v356_v9  ;;  %v484_v9 = vld [vmem:[%s6959_s5 + $0x448] sm:$0xf] }
  0x5e   : > { %359 = vst [vmem:[%s6963_s6 + $0x128] sm:$0xf] %v358_v10  ;;  %v486_v10 = vld [vmem:[%s6959_s5 + $0x450] sm:$0xf] }
  0x5f   : > { %361 = vst [vmem:[%s6963_s6 + $0x12c] sm:$0xf] %v360_v11  ;;  %v488_v11 = vld [vmem:[%s6959_s5 + $0x458] sm:$0xf] }
  0x60   : > { %363 = vst [vmem:[%s6963_s6 + $0x130] sm:$0xf] %v362_v12  ;;  %v490_v12 = vld [vmem:[%s6959_s5 + $0x460] sm:$0xf] }
  0x61   : > { %365 = vst [vmem:[%s6963_s6 + $0x134] sm:$0xf] %v364_v13  ;;  %v492_v13 = vld [vmem:[%s6959_s5 + $0x468] sm:$0xf] }
  0x62   : > { %367 = vst [vmem:[%s6963_s6 + $0x138] sm:$0xf] %v366_v14  ;;  %v494_v14 = vld [vmem:[%s6959_s5 + $0x470] sm:$0xf] }
  0x63   : > { %369 = vst [vmem:[%s6963_s6 + $0x13c] sm:$0xf] %v368_v15  ;;  %v496_v15 = vld [vmem:[%s6959_s5 + $0x478] sm:$0xf] }
  0x64   : > { %371 = vst [vmem:[%s6963_s6 + $0x140] sm:$0xf] %v370_v16  ;;  %v498_v16 = vld [vmem:[%s6959_s5 + $0x480] sm:$0xf] }
  0x65   : > { %373 = vst [vmem:[%s6963_s6 + $0x144] sm:$0xf] %v372_v17  ;;  %v500_v17 = vld [vmem:[%s6959_s5 + $0x488] sm:$0xf] }
  0x66   : > { %375 = vst [vmem:[%s6963_s6 + $0x148] sm:$0xf] %v374_v18  ;;  %v502_v18 = vld [vmem:[%s6959_s5 + $0x490] sm:$0xf] }
  0x67   : > { %377 = vst [vmem:[%s6963_s6 + $0x14c] sm:$0xf] %v376_v19  ;;  %v504_v19 = vld [vmem:[%s6959_s5 + $0x498] sm:$0xf] }
  0x68   : > { %379 = vst [vmem:[%s6963_s6 + $0x150] sm:$0xf] %v378_v20  ;;  %v506_v20 = vld [vmem:[%s6959_s5 + $0x4a0] sm:$0xf] }
  0x69   : > { %381 = vst [vmem:[%s6963_s6 + $0x154] sm:$0xf] %v380_v21  ;;  %v508_v21 = vld [vmem:[%s6959_s5 + $0x4a8] sm:$0xf] }
  0x6a   : > { %383 = vst [vmem:[%s6963_s6 + $0x158] sm:$0xf] %v382_v22  ;;  %v510_v22 = vld [vmem:[%s6959_s5 + $0x4b0] sm:$0xf] }
  0x6b   : > { %385 = vst [vmem:[%s6963_s6 + $0x15c] sm:$0xf] %v384_v23  ;;  %v512_v23 = vld [vmem:[%s6959_s5 + $0x4b8] sm:$0xf] }
  0x6c   : > { %387 = vst [vmem:[%s6963_s6 + $0x160] sm:$0xf] %v386_v24  ;;  %v514_v24 = vld [vmem:[%s6959_s5 + $0x4c0] sm:$0xf] }
  0x6d   : > { %389 = vst [vmem:[%s6963_s6 + $0x164] sm:$0xf] %v388_v25  ;;  %v516_v25 = vld [vmem:[%s6959_s5 + $0x4c8] sm:$0xf] }
  0x6e   : > { %391 = vst [vmem:[%s6963_s6 + $0x168] sm:$0xf] %v390_v26  ;;  %v518_v26 = vld [vmem:[%s6959_s5 + $0x4d0] sm:$0xf] }
  0x6f   : > { %393 = vst [vmem:[%s6963_s6 + $0x16c] sm:$0xf] %v392_v27  ;;  %v520_v27 = vld [vmem:[%s6959_s5 + $0x4d8] sm:$0xf] }
  0x70   : > { %395 = vst [vmem:[%s6963_s6 + $0x170] sm:$0xf] %v394_v28  ;;  %v522_v28 = vld [vmem:[%s6959_s5 + $0x4e0] sm:$0xf] }
  0x71   : > { %397 = vst [vmem:[%s6963_s6 + $0x174] sm:$0xf] %v396_v29  ;;  %v524_v29 = vld [vmem:[%s6959_s5 + $0x4e8] sm:$0xf] }
  0x72   : > { %399 = vst [vmem:[%s6963_s6 + $0x178] sm:$0xf] %v398_v30  ;;  %v526_v30 = vld [vmem:[%s6959_s5 + $0x4f0] sm:$0xf] }
  0x73   : > { %401 = vst [vmem:[%s6963_s6 + $0x17c] sm:$0xf] %v400_v31  ;;  %v528_v31 = vld [vmem:[%s6959_s5 + $0x4f8] sm:$0xf] }
  0x74   : > { %403 = vst [vmem:[%s6963_s6 + $0x180] sm:$0xf] %v402_v32  ;;  %v530_v32 = vld [vmem:[%s6959_s5 + $0x500] sm:$0xf] }
  0x75   : > { %405 = vst [vmem:[%s6963_s6 + $0x184] sm:$0xf] %v404_v33  ;;  %v532_v33 = vld [vmem:[%s6959_s5 + $0x508] sm:$0xf] }
  0x76   : > { %407 = vst [vmem:[%s6963_s6 + $0x188] sm:$0xf] %v406_v34  ;;  %v534_v34 = vld [vmem:[%s6959_s5 + $0x510] sm:$0xf] }
  0x77   : > { %409 = vst [vmem:[%s6963_s6 + $0x18c] sm:$0xf] %v408_v35  ;;  %v536_v35 = vld [vmem:[%s6959_s5 + $0x518] sm:$0xf] }
  0x78   : > { %411 = vst [vmem:[%s6963_s6 + $0x190] sm:$0xf] %v410_v36  ;;  %v538_v36 = vld [vmem:[%s6959_s5 + $0x520] sm:$0xf] }
  0x79   : > { %413 = vst [vmem:[%s6963_s6 + $0x194] sm:$0xf] %v412_v37  ;;  %v540_v37 = vld [vmem:[%s6959_s5 + $0x528] sm:$0xf] }
  0x7a   : > { %415 = vst [vmem:[%s6963_s6 + $0x198] sm:$0xf] %v414_v38  ;;  %v542_v38 = vld [vmem:[%s6959_s5 + $0x530] sm:$0xf] }
  0x7b   : > { %417 = vst [vmem:[%s6963_s6 + $0x19c] sm:$0xf] %v416_v39  ;;  %v544_v39 = vld [vmem:[%s6959_s5 + $0x538] sm:$0xf] }
  0x7c   : > { %419 = vst [vmem:[%s6963_s6 + $0x1a0] sm:$0xf] %v418_v40  ;;  %v546_v40 = vld [vmem:[%s6959_s5 + $0x540] sm:$0xf] }
  0x7d   : > { %421 = vst [vmem:[%s6963_s6 + $0x1a4] sm:$0xf] %v420_v41  ;;  %v548_v41 = vld [vmem:[%s6959_s5 + $0x548] sm:$0xf] }
  0x7e   : > { %423 = vst [vmem:[%s6963_s6 + $0x1a8] sm:$0xf] %v422_v42  ;;  %v550_v42 = vld [vmem:[%s6959_s5 + $0x550] sm:$0xf] }
  0x7f   : > { %425 = vst [vmem:[%s6963_s6 + $0x1ac] sm:$0xf] %v424_v43  ;;  %v552_v43 = vld [vmem:[%s6959_s5 + $0x558] sm:$0xf] }
  0x80   : > { %427 = vst [vmem:[%s6963_s6 + $0x1b0] sm:$0xf] %v426_v44  ;;  %v554_v44 = vld [vmem:[%s6959_s5 + $0x560] sm:$0xf] }
  0x81   : > { %429 = vst [vmem:[%s6963_s6 + $0x1b4] sm:$0xf] %v428_v45  ;;  %v556_v45 = vld [vmem:[%s6959_s5 + $0x568] sm:$0xf] }
  0x82   : > { %431 = vst [vmem:[%s6963_s6 + $0x1b8] sm:$0xf] %v430_v46  ;;  %v558_v46 = vld [vmem:[%s6959_s5 + $0x570] sm:$0xf] }
  0x83   : > { %433 = vst [vmem:[%s6963_s6 + $0x1bc] sm:$0xf] %v432_v47  ;;  %v560_v47 = vld [vmem:[%s6959_s5 + $0x578] sm:$0xf] }
  0x84   : > { %435 = vst [vmem:[%s6963_s6 + $0x1c0] sm:$0xf] %v434_v48  ;;  %v562_v48 = vld [vmem:[%s6959_s5 + $0x580] sm:$0xf] }
  0x85   : > { %437 = vst [vmem:[%s6963_s6 + $0x1c4] sm:$0xf] %v436_v49  ;;  %v564_v49 = vld [vmem:[%s6959_s5 + $0x588] sm:$0xf] }
  0x86   : > { %439 = vst [vmem:[%s6963_s6 + $0x1c8] sm:$0xf] %v438_v50  ;;  %v566_v50 = vld [vmem:[%s6959_s5 + $0x590] sm:$0xf] }
  0x87   : > { %441 = vst [vmem:[%s6963_s6 + $0x1cc] sm:$0xf] %v440_v51  ;;  %v568_v51 = vld [vmem:[%s6959_s5 + $0x598] sm:$0xf] }
  0x88   : > { %443 = vst [vmem:[%s6963_s6 + $0x1d0] sm:$0xf] %v442_v52  ;;  %v570_v52 = vld [vmem:[%s6959_s5 + $0x5a0] sm:$0xf] }
  0x89   : > { %445 = vst [vmem:[%s6963_s6 + $0x1d4] sm:$0xf] %v444_v53  ;;  %v572_v53 = vld [vmem:[%s6959_s5 + $0x5a8] sm:$0xf] }
  0x8a   : > { %447 = vst [vmem:[%s6963_s6 + $0x1d8] sm:$0xf] %v446_v54  ;;  %v574_v54 = vld [vmem:[%s6959_s5 + $0x5b0] sm:$0xf] }
  0x8b   : > { %449 = vst [vmem:[%s6963_s6 + $0x1dc] sm:$0xf] %v448_v55  ;;  %v576_v55 = vld [vmem:[%s6959_s5 + $0x5b8] sm:$0xf] }
  0x8c   : > { %451 = vst [vmem:[%s6963_s6 + $0x1e0] sm:$0xf] %v450_v56  ;;  %v578_v56 = vld [vmem:[%s6959_s5 + $0x5c0] sm:$0xf] }
  0x8d   : > { %453 = vst [vmem:[%s6963_s6 + $0x1e4] sm:$0xf] %v452_v57  ;;  %v580_v57 = vld [vmem:[%s6959_s5 + $0x5c8] sm:$0xf] }
  0x8e   : > { %455 = vst [vmem:[%s6963_s6 + $0x1e8] sm:$0xf] %v454_v58  ;;  %v582_v58 = vld [vmem:[%s6959_s5 + $0x5d0] sm:$0xf] }
  0x8f   : > { %457 = vst [vmem:[%s6963_s6 + $0x1ec] sm:$0xf] %v456_v59  ;;  %v584_v59 = vld [vmem:[%s6959_s5 + $0x5d8] sm:$0xf] }
  0x90   : > { %459 = vst [vmem:[%s6963_s6 + $0x1f0] sm:$0xf] %v458_v60  ;;  %v586_v60 = vld [vmem:[%s6959_s5 + $0x5e0] sm:$0xf] }
  0x91   : > { %461 = vst [vmem:[%s6963_s6 + $0x1f4] sm:$0xf] %v460_v61  ;;  %v588_v61 = vld [vmem:[%s6959_s5 + $0x5e8] sm:$0xf] }
  0x92   : > { %463 = vst [vmem:[%s6963_s6 + $0x1f8] sm:$0xf] %v462_v62  ;;  %v590_v62 = vld [vmem:[%s6959_s5 + $0x5f0] sm:$0xf] }
  0x93   : > { %465 = vst [vmem:[%s6963_s6 + $0x1fc] sm:$0xf] %v464_v63  ;;  %v592_v63 = vld [vmem:[%s6959_s5 + $0x5f8] sm:$0xf] }
  0x94   : > { %467 = vst [vmem:[%s6963_s6 + $0x200] sm:$0xf] %v466_v0  ;;  %v594_v0 = vld [vmem:[%s6959_s5 + $0x600] sm:$0xf] }
  0x95   : > { %469 = vst [vmem:[%s6963_s6 + $0x204] sm:$0xf] %v468_v1  ;;  %v596_v1 = vld [vmem:[%s6959_s5 + $0x608] sm:$0xf] }
  0x96   : > { %471 = vst [vmem:[%s6963_s6 + $0x208] sm:$0xf] %v470_v2  ;;  %v598_v2 = vld [vmem:[%s6959_s5 + $0x610] sm:$0xf] }
  0x97   : > { %473 = vst [vmem:[%s6963_s6 + $0x20c] sm:$0xf] %v472_v3  ;;  %v600_v3 = vld [vmem:[%s6959_s5 + $0x618] sm:$0xf] }
  0x98   : > { %475 = vst [vmem:[%s6963_s6 + $0x210] sm:$0xf] %v474_v4  ;;  %v602_v4 = vld [vmem:[%s6959_s5 + $0x620] sm:$0xf] }
  0x99   : > { %477 = vst [vmem:[%s6963_s6 + $0x214] sm:$0xf] %v476_v5  ;;  %v604_v5 = vld [vmem:[%s6959_s5 + $0x628] sm:$0xf] }
  0x9a   : > { %479 = vst [vmem:[%s6963_s6 + $0x218] sm:$0xf] %v478_v6  ;;  %v606_v6 = vld [vmem:[%s6959_s5 + $0x630] sm:$0xf] }
  0x9b   : > { %481 = vst [vmem:[%s6963_s6 + $0x21c] sm:$0xf] %v480_v7  ;;  %v608_v7 = vld [vmem:[%s6959_s5 + $0x638] sm:$0xf] }
  0x9c   : > { %483 = vst [vmem:[%s6963_s6 + $0x220] sm:$0xf] %v482_v8  ;;  %v610_v8 = vld [vmem:[%s6959_s5 + $0x640] sm:$0xf] }
  0x9d   : > { %485 = vst [vmem:[%s6963_s6 + $0x224] sm:$0xf] %v484_v9  ;;  %v612_v9 = vld [vmem:[%s6959_s5 + $0x648] sm:$0xf] }
  0x9e   : > { %487 = vst [vmem:[%s6963_s6 + $0x228] sm:$0xf] %v486_v10  ;;  %v614_v10 = vld [vmem:[%s6959_s5 + $0x650] sm:$0xf] }
  0x9f   : > { %489 = vst [vmem:[%s6963_s6 + $0x22c] sm:$0xf] %v488_v11  ;;  %v616_v11 = vld [vmem:[%s6959_s5 + $0x658] sm:$0xf] }
  0xa0   : > { %491 = vst [vmem:[%s6963_s6 + $0x230] sm:$0xf] %v490_v12  ;;  %v618_v12 = vld [vmem:[%s6959_s5 + $0x660] sm:$0xf] }
  0xa1   : > { %493 = vst [vmem:[%s6963_s6 + $0x234] sm:$0xf] %v492_v13  ;;  %v620_v13 = vld [vmem:[%s6959_s5 + $0x668] sm:$0xf] }
  0xa2   : > { %495 = vst [vmem:[%s6963_s6 + $0x238] sm:$0xf] %v494_v14  ;;  %v622_v14 = vld [vmem:[%s6959_s5 + $0x670] sm:$0xf] }
  0xa3   : > { %497 = vst [vmem:[%s6963_s6 + $0x23c] sm:$0xf] %v496_v15  ;;  %v624_v15 = vld [vmem:[%s6959_s5 + $0x678] sm:$0xf] }
  0xa4   : > { %499 = vst [vmem:[%s6963_s6 + $0x240] sm:$0xf] %v498_v16  ;;  %v626_v16 = vld [vmem:[%s6959_s5 + $0x680] sm:$0xf] }
  0xa5   : > { %501 = vst [vmem:[%s6963_s6 + $0x244] sm:$0xf] %v500_v17  ;;  %v628_v17 = vld [vmem:[%s6959_s5 + $0x688] sm:$0xf] }
  0xa6   : > { %503 = vst [vmem:[%s6963_s6 + $0x248] sm:$0xf] %v502_v18  ;;  %v630_v18 = vld [vmem:[%s6959_s5 + $0x690] sm:$0xf] }
  0xa7   : > { %505 = vst [vmem:[%s6963_s6 + $0x24c] sm:$0xf] %v504_v19  ;;  %v632_v19 = vld [vmem:[%s6959_s5 + $0x698] sm:$0xf] }
  0xa8   : > { %507 = vst [vmem:[%s6963_s6 + $0x250] sm:$0xf] %v506_v20  ;;  %v634_v20 = vld [vmem:[%s6959_s5 + $0x6a0] sm:$0xf] }
  0xa9   : > { %509 = vst [vmem:[%s6963_s6 + $0x254] sm:$0xf] %v508_v21  ;;  %v636_v21 = vld [vmem:[%s6959_s5 + $0x6a8] sm:$0xf] }
  0xaa   : > { %511 = vst [vmem:[%s6963_s6 + $0x258] sm:$0xf] %v510_v22  ;;  %v638_v22 = vld [vmem:[%s6959_s5 + $0x6b0] sm:$0xf] }
  0xab   : > { %513 = vst [vmem:[%s6963_s6 + $0x25c] sm:$0xf] %v512_v23  ;;  %v640_v23 = vld [vmem:[%s6959_s5 + $0x6b8] sm:$0xf] }
  0xac   : > { %515 = vst [vmem:[%s6963_s6 + $0x260] sm:$0xf] %v514_v24  ;;  %v642_v24 = vld [vmem:[%s6959_s5 + $0x6c0] sm:$0xf] }
  0xad   : > { %517 = vst [vmem:[%s6963_s6 + $0x264] sm:$0xf] %v516_v25  ;;  %v644_v25 = vld [vmem:[%s6959_s5 + $0x6c8] sm:$0xf] }
  0xae   : > { %519 = vst [vmem:[%s6963_s6 + $0x268] sm:$0xf] %v518_v26  ;;  %v646_v26 = vld [vmem:[%s6959_s5 + $0x6d0] sm:$0xf] }
  0xaf   : > { %521 = vst [vmem:[%s6963_s6 + $0x26c] sm:$0xf] %v520_v27  ;;  %v648_v27 = vld [vmem:[%s6959_s5 + $0x6d8] sm:$0xf] }
  0xb0   : > { %523 = vst [vmem:[%s6963_s6 + $0x270] sm:$0xf] %v522_v28  ;;  %v650_v28 = vld [vmem:[%s6959_s5 + $0x6e0] sm:$0xf] }
  0xb1   : > { %525 = vst [vmem:[%s6963_s6 + $0x274] sm:$0xf] %v524_v29  ;;  %v652_v29 = vld [vmem:[%s6959_s5 + $0x6e8] sm:$0xf] }
  0xb2   : > { %527 = vst [vmem:[%s6963_s6 + $0x278] sm:$0xf] %v526_v30  ;;  %v654_v30 = vld [vmem:[%s6959_s5 + $0x6f0] sm:$0xf] }
  0xb3   : > { %529 = vst [vmem:[%s6963_s6 + $0x27c] sm:$0xf] %v528_v31  ;;  %v656_v31 = vld [vmem:[%s6959_s5 + $0x6f8] sm:$0xf] }
  0xb4   : > { %531 = vst [vmem:[%s6963_s6 + $0x280] sm:$0xf] %v530_v32  ;;  %v658_v32 = vld [vmem:[%s6959_s5 + $0x700] sm:$0xf] }
  0xb5   : > { %533 = vst [vmem:[%s6963_s6 + $0x284] sm:$0xf] %v532_v33  ;;  %v660_v33 = vld [vmem:[%s6959_s5 + $0x708] sm:$0xf] }
  0xb6   : > { %535 = vst [vmem:[%s6963_s6 + $0x288] sm:$0xf] %v534_v34  ;;  %v662_v34 = vld [vmem:[%s6959_s5 + $0x710] sm:$0xf] }
  0xb7   : > { %537 = vst [vmem:[%s6963_s6 + $0x28c] sm:$0xf] %v536_v35  ;;  %v664_v35 = vld [vmem:[%s6959_s5 + $0x718] sm:$0xf] }
  0xb8   : > { %539 = vst [vmem:[%s6963_s6 + $0x290] sm:$0xf] %v538_v36  ;;  %v666_v36 = vld [vmem:[%s6959_s5 + $0x720] sm:$0xf] }
  0xb9   : > { %541 = vst [vmem:[%s6963_s6 + $0x294] sm:$0xf] %v540_v37  ;;  %v668_v37 = vld [vmem:[%s6959_s5 + $0x728] sm:$0xf] }
  0xba   : > { %543 = vst [vmem:[%s6963_s6 + $0x298] sm:$0xf] %v542_v38  ;;  %v670_v38 = vld [vmem:[%s6959_s5 + $0x730] sm:$0xf] }
  0xbb   : > { %545 = vst [vmem:[%s6963_s6 + $0x29c] sm:$0xf] %v544_v39  ;;  %v672_v39 = vld [vmem:[%s6959_s5 + $0x738] sm:$0xf] }
  0xbc   : > { %547 = vst [vmem:[%s6963_s6 + $0x2a0] sm:$0xf] %v546_v40  ;;  %v674_v40 = vld [vmem:[%s6959_s5 + $0x740] sm:$0xf] }
  0xbd   : > { %549 = vst [vmem:[%s6963_s6 + $0x2a4] sm:$0xf] %v548_v41  ;;  %v676_v41 = vld [vmem:[%s6959_s5 + $0x748] sm:$0xf] }
  0xbe   : > { %551 = vst [vmem:[%s6963_s6 + $0x2a8] sm:$0xf] %v550_v42  ;;  %v678_v42 = vld [vmem:[%s6959_s5 + $0x750] sm:$0xf] }
  0xbf   : > { %553 = vst [vmem:[%s6963_s6 + $0x2ac] sm:$0xf] %v552_v43  ;;  %v680_v43 = vld [vmem:[%s6959_s5 + $0x758] sm:$0xf] }
  0xc0   : > { %555 = vst [vmem:[%s6963_s6 + $0x2b0] sm:$0xf] %v554_v44  ;;  %v682_v44 = vld [vmem:[%s6959_s5 + $0x760] sm:$0xf] }
  0xc1   : > { %557 = vst [vmem:[%s6963_s6 + $0x2b4] sm:$0xf] %v556_v45  ;;  %v684_v45 = vld [vmem:[%s6959_s5 + $0x768] sm:$0xf] }
  0xc2   : > { %559 = vst [vmem:[%s6963_s6 + $0x2b8] sm:$0xf] %v558_v46  ;;  %v686_v46 = vld [vmem:[%s6959_s5 + $0x770] sm:$0xf] }
  0xc3   : > { %561 = vst [vmem:[%s6963_s6 + $0x2bc] sm:$0xf] %v560_v47  ;;  %v688_v47 = vld [vmem:[%s6959_s5 + $0x778] sm:$0xf] }
  0xc4   : > { %563 = vst [vmem:[%s6963_s6 + $0x2c0] sm:$0xf] %v562_v48  ;;  %v690_v48 = vld [vmem:[%s6959_s5 + $0x780] sm:$0xf] }
  0xc5   : > { %565 = vst [vmem:[%s6963_s6 + $0x2c4] sm:$0xf] %v564_v49  ;;  %v692_v49 = vld [vmem:[%s6959_s5 + $0x788] sm:$0xf] }
  0xc6   : > { %567 = vst [vmem:[%s6963_s6 + $0x2c8] sm:$0xf] %v566_v50  ;;  %v694_v50 = vld [vmem:[%s6959_s5 + $0x790] sm:$0xf] }
  0xc7   : > { %569 = vst [vmem:[%s6963_s6 + $0x2cc] sm:$0xf] %v568_v51  ;;  %v696_v51 = vld [vmem:[%s6959_s5 + $0x798] sm:$0xf] }
  0xc8   : > { %571 = vst [vmem:[%s6963_s6 + $0x2d0] sm:$0xf] %v570_v52  ;;  %v698_v52 = vld [vmem:[%s6959_s5 + $0x7a0] sm:$0xf] }
  0xc9   : > { %573 = vst [vmem:[%s6963_s6 + $0x2d4] sm:$0xf] %v572_v53  ;;  %v700_v53 = vld [vmem:[%s6959_s5 + $0x7a8] sm:$0xf] }
  0xca   : > { %575 = vst [vmem:[%s6963_s6 + $0x2d8] sm:$0xf] %v574_v54  ;;  %v702_v54 = vld [vmem:[%s6959_s5 + $0x7b0] sm:$0xf] }
  0xcb   : > { %577 = vst [vmem:[%s6963_s6 + $0x2dc] sm:$0xf] %v576_v55  ;;  %v704_v55 = vld [vmem:[%s6959_s5 + $0x7b8] sm:$0xf] }
  0xcc   : > { %579 = vst [vmem:[%s6963_s6 + $0x2e0] sm:$0xf] %v578_v56  ;;  %v706_v56 = vld [vmem:[%s6959_s5 + $0x7c0] sm:$0xf] }
  0xcd   : > { %581 = vst [vmem:[%s6963_s6 + $0x2e4] sm:$0xf] %v580_v57  ;;  %v708_v57 = vld [vmem:[%s6959_s5 + $0x7c8] sm:$0xf] }
  0xce   : > { %583 = vst [vmem:[%s6963_s6 + $0x2e8] sm:$0xf] %v582_v58  ;;  %v710_v58 = vld [vmem:[%s6959_s5 + $0x7d0] sm:$0xf] }
  0xcf   : > { %585 = vst [vmem:[%s6963_s6 + $0x2ec] sm:$0xf] %v584_v59  ;;  %v712_v59 = vld [vmem:[%s6959_s5 + $0x7d8] sm:$0xf] }
  0xd0   : > { %587 = vst [vmem:[%s6963_s6 + $0x2f0] sm:$0xf] %v586_v60  ;;  %v714_v60 = vld [vmem:[%s6959_s5 + $0x7e0] sm:$0xf] }
  0xd1   : > { %589 = vst [vmem:[%s6963_s6 + $0x2f4] sm:$0xf] %v588_v61  ;;  %v716_v61 = vld [vmem:[%s6959_s5 + $0x7e8] sm:$0xf] }
  0xd2   : > { %591 = vst [vmem:[%s6963_s6 + $0x2f8] sm:$0xf] %v590_v62  ;;  %v718_v62 = vld [vmem:[%s6959_s5 + $0x7f0] sm:$0xf] }
  0xd3   : > { %593 = vst [vmem:[%s6963_s6 + $0x2fc] sm:$0xf] %v592_v63  ;;  %v720_v63 = vld [vmem:[%s6959_s5 + $0x7f8] sm:$0xf] }
  0xd4   : > { %595 = vst [vmem:[%s6963_s6 + $0x300] sm:$0xf] %v594_v0 }
  0xd5   : > { %597 = vst [vmem:[%s6963_s6 + $0x304] sm:$0xf] %v596_v1 }
  0xd6   : > { %599 = vst [vmem:[%s6963_s6 + $0x308] sm:$0xf] %v598_v2 }
  0xd7   : > { %601 = vst [vmem:[%s6963_s6 + $0x30c] sm:$0xf] %v600_v3 }
  0xd8   : > { %603 = vst [vmem:[%s6963_s6 + $0x310] sm:$0xf] %v602_v4 }
  0xd9   : > { %605 = vst [vmem:[%s6963_s6 + $0x314] sm:$0xf] %v604_v5 }
  0xda   : > { %607 = vst [vmem:[%s6963_s6 + $0x318] sm:$0xf] %v606_v6 }
  0xdb   : > { %609 = vst [vmem:[%s6963_s6 + $0x31c] sm:$0xf] %v608_v7 }
  0xdc   : > { %611 = vst [vmem:[%s6963_s6 + $0x320] sm:$0xf] %v610_v8 }
  0xdd   : > { %613 = vst [vmem:[%s6963_s6 + $0x324] sm:$0xf] %v612_v9 }
  0xde   : > { %615 = vst [vmem:[%s6963_s6 + $0x328] sm:$0xf] %v614_v10 }
  0xdf   : > { %617 = vst [vmem:[%s6963_s6 + $0x32c] sm:$0xf] %v616_v11 }
  0xe0   : > { %619 = vst [vmem:[%s6963_s6 + $0x330] sm:$0xf] %v618_v12 }
  0xe1   : > { %621 = vst [vmem:[%s6963_s6 + $0x334] sm:$0xf] %v620_v13 }
  0xe2   : > { %623 = vst [vmem:[%s6963_s6 + $0x338] sm:$0xf] %v622_v14 }
  0xe3   : > { %625 = vst [vmem:[%s6963_s6 + $0x33c] sm:$0xf] %v624_v15 }
  0xe4   : > { %627 = vst [vmem:[%s6963_s6 + $0x340] sm:$0xf] %v626_v16 }
  0xe5   : > { %629 = vst [vmem:[%s6963_s6 + $0x344] sm:$0xf] %v628_v17 }
  0xe6   : > { %631 = vst [vmem:[%s6963_s6 + $0x348] sm:$0xf] %v630_v18 }
  0xe7   : > { %633 = vst [vmem:[%s6963_s6 + $0x34c] sm:$0xf] %v632_v19 }
  0xe8   : > { %635 = vst [vmem:[%s6963_s6 + $0x350] sm:$0xf] %v634_v20 }
  0xe9   : > { %637 = vst [vmem:[%s6963_s6 + $0x354] sm:$0xf] %v636_v21 }
  0xea   : > { %639 = vst [vmem:[%s6963_s6 + $0x358] sm:$0xf] %v638_v22 }
  0xeb   : > { %641 = vst [vmem:[%s6963_s6 + $0x35c] sm:$0xf] %v640_v23 }
  0xec   : > { %643 = vst [vmem:[%s6963_s6 + $0x360] sm:$0xf] %v642_v24 }
  0xed   : > { %645 = vst [vmem:[%s6963_s6 + $0x364] sm:$0xf] %v644_v25 }
  0xee   : > { %647 = vst [vmem:[%s6963_s6 + $0x368] sm:$0xf] %v646_v26 }
  0xef   : > { %649 = vst [vmem:[%s6963_s6 + $0x36c] sm:$0xf] %v648_v27 }
  0xf0   : > { %651 = vst [vmem:[%s6963_s6 + $0x370] sm:$0xf] %v650_v28 }
  0xf1   : > { %653 = vst [vmem:[%s6963_s6 + $0x374] sm:$0xf] %v652_v29 }
  0xf2   : > { %655 = vst [vmem:[%s6963_s6 + $0x378] sm:$0xf] %v654_v30 }
  0xf3   : > { %657 = vst [vmem:[%s6963_s6 + $0x37c] sm:$0xf] %v656_v31 }
  0xf4   : > { %659 = vst [vmem:[%s6963_s6 + $0x380] sm:$0xf] %v658_v32 }
  0xf5   : > { %661 = vst [vmem:[%s6963_s6 + $0x384] sm:$0xf] %v660_v33 }
  0xf6   : > { %663 = vst [vmem:[%s6963_s6 + $0x388] sm:$0xf] %v662_v34 }
  0xf7   : > { %665 = vst [vmem:[%s6963_s6 + $0x38c] sm:$0xf] %v664_v35 }
  0xf8   : > { %667 = vst [vmem:[%s6963_s6 + $0x390] sm:$0xf] %v666_v36 }
  0xf9   : > { %669 = vst [vmem:[%s6963_s6 + $0x394] sm:$0xf] %v668_v37 }
  0xfa   : > { %671 = vst [vmem:[%s6963_s6 + $0x398] sm:$0xf] %v670_v38 }
  0xfb   : > { %673 = vst [vmem:[%s6963_s6 + $0x39c] sm:$0xf] %v672_v39 }
  0xfc   : > { %675 = vst [vmem:[%s6963_s6 + $0x3a0] sm:$0xf] %v674_v40 }
  0xfd   : > { %677 = vst [vmem:[%s6963_s6 + $0x3a4] sm:$0xf] %v676_v41 }
  0xfe   : > { %679 = vst [vmem:[%s6963_s6 + $0x3a8] sm:$0xf] %v678_v42 }
  0xff   : > { %681 = vst [vmem:[%s6963_s6 + $0x3ac] sm:$0xf] %v680_v43 }
 0x100   : > { %683 = vst [vmem:[%s6963_s6 + $0x3b0] sm:$0xf] %v682_v44 }
 0x101   : > { %685 = vst [vmem:[%s6963_s6 + $0x3b4] sm:$0xf] %v684_v45 }
 0x102   : > { %687 = vst [vmem:[%s6963_s6 + $0x3b8] sm:$0xf] %v686_v46 }
 0x103   : > { %689 = vst [vmem:[%s6963_s6 + $0x3bc] sm:$0xf] %v688_v47 }
 0x104   : > { %691 = vst [vmem:[%s6963_s6 + $0x3c0] sm:$0xf] %v690_v48 }
 0x105   : > { %693 = vst [vmem:[%s6963_s6 + $0x3c4] sm:$0xf] %v692_v49 }
 0x106   : > { %695 = vst [vmem:[%s6963_s6 + $0x3c8] sm:$0xf] %v694_v50 }
 0x107   : > { %697 = vst [vmem:[%s6963_s6 + $0x3cc] sm:$0xf] %v696_v51 }
 0x108   : > { %699 = vst [vmem:[%s6963_s6 + $0x3d0] sm:$0xf] %v698_v52 }
 0x109   : > { %701 = vst [vmem:[%s6963_s6 + $0x3d4] sm:$0xf] %v700_v53 }
 0x10a   : > { %703 = vst [vmem:[%s6963_s6 + $0x3d8] sm:$0xf] %v702_v54 }
 0x10b   : > { %705 = vst [vmem:[%s6963_s6 + $0x3dc] sm:$0xf] %v704_v55 }
 0x10c   : > { %707 = vst [vmem:[%s6963_s6 + $0x3e0] sm:$0xf] %v706_v56 }
 0x10d   : > { %709 = vst [vmem:[%s6963_s6 + $0x3e4] sm:$0xf] %v708_v57 }
 0x10e   : > { %711 = vst [vmem:[%s6963_s6 + $0x3e8] sm:$0xf] %v710_v58 }
 0x10f   : > { %713 = vst [vmem:[%s6963_s6 + $0x3ec] sm:$0xf] %v712_v59 }
 0x110   : > { %715 = vst [vmem:[%s6963_s6 + $0x3f0] sm:$0xf] %v714_v60 }
 0x111   : > { %717 = vst [vmem:[%s6963_s6 + $0x3f4] sm:$0xf] %v716_v61 }
 0x112   : > { %719 = vst [vmem:[%s6963_s6 + $0x3f8] sm:$0xf] %v718_v62 }
 0x113   : > { %721 = vst [vmem:[%s6963_s6 + $0x3fc] sm:$0xf] %v720_v63 }
 0x114 PF: > { %p5469_p8 = scmp.ge.s32.totalorder %s6884_s19, 1  ;;  %p2318_p9 = scmp.lt.s32.totalorder %s6884_s19, 3 }
 0x116   : > { %p2319_p10 = pnand %p5469_p8, %p2318_p9 }
 0x117   : > { %s2325_s7 = sand.u32 (!%p2319_p10), 1, %s6868_s15   ;;  %p2367_p11 = scmp.lt.s32.totalorder (!%p2319_p10), %s6876_s17, 1 }
 0x118   : > { %2322 = sbr.rel (%p2319_p10) target bundleno = 1095 (0x447), region = 84  ;;  %s5470_s8 = sshll.u32 (!%p2319_p10), %s2325_s7, 10 }
 0x119   : > { %s7480_s9 = scalar_lea.vmem (!%p2319_p10), [#allocation3], %s5470_s8  ;;  %s8661_s8 = sshll.u32 (!%p2319_p10), %s2325_s7, 6 }
 0x11a   : > { %s8680_s15 = scalar_lea.vmem (!%p2319_p10), [#allocation4], %s8661_s8 }
 0x11d   : > { %v6635_v0 = vld [vmem:[%s7480_s9 + $0x38] sm:$0xff]  ;;  %v6634_v4 = vld [vmem:[%s7480_s9 + $0x30] sm:$0xff]  ;;  %v6633_v8 = vld [vmem:[%s7480_s9 + $0x28] sm:$0xff]  ;;  %s8509_s23 = scalar_select %p2367_p11, %s6876_s17, 1 }
 0x11e   : > { %v6643_v1 = vld [vmem:[%s7480_s9 + $0x78] sm:$0xff]  ;;  %4201 = vmatpush.bf16.msra.mxu0 %v6635_v0  ;;  %v6642_v5 = vld [vmem:[%s7480_s9 + $0x70] sm:$0xff]  ;;  %v6641_v9 = vld [vmem:[%s7480_s9 + $0x68] sm:$0xff]  ;;  %s6497_s7 = sshll.u32 (%p6946_p6), %s6876_s17, 2 }
 0x11f   : > { %v6651_v2 = vld [vmem:[%s7480_s9 + $0xb8] sm:$0xff]  ;;  %4250 = vmatpush.bf16.msra.mxu1 %v6643_v1  ;;  %v6650_v6 = vld [vmem:[%s7480_s9 + $0xb0] sm:$0xff]  ;;  %v6649_v10 = vld [vmem:[%s7480_s9 + $0xa8] sm:$0xff]  ;;  %s2369_s30 = scalar_lea.vmem %s8729_s2, %s8509_s23  ;;  %s5252_s12 = scalar_lea.vmem (%p6946_p6), %s8731_s4, %s6497_s7 }
 0x120   : > { %v6659_v3 = vld [vmem:[%s7480_s9 + $0xf8] sm:$0xff]  ;;  %4299 = vmatpush.bf16.msra.mxu2 %v6651_v2  ;;  %v6658_v7 = vld [vmem:[%s7480_s9 + $0xf0] sm:$0xff]  ;;  %v6657_v11 = vld [vmem:[%s7480_s9 + $0xe8] sm:$0xff] }
 0x121   : > { %4348 = vmatpush.bf16.msra.mxu3 %v6659_v3  ;;  %v6632_v12 = vld [vmem:[%s7480_s9 + $0x20] sm:$0xff]  ;;  %v6631_v16 = vld [vmem:[%s7480_s9 + $0x18] sm:$0xff]  ;;  %v6630_v20 = vld [vmem:[%s7480_s9 + $0x10] sm:$0xff] }
 0x122   : > { %4202 = vmatpush.bf16.msra.mxu0 %v6634_v4  ;;  %v6640_v13 = vld [vmem:[%s7480_s9 + $0x60] sm:$0xff]  ;;  %v6639_v17 = vld [vmem:[%s7480_s9 + $0x58] sm:$0xff]  ;;  %v6638_v21 = vld [vmem:[%s7480_s9 + $0x50] sm:$0xff] }
 0x123   : > { %4251 = vmatpush.bf16.msra.mxu1 %v6642_v5  ;;  %v6648_v14 = vld [vmem:[%s7480_s9 + $0xa0] sm:$0xff]  ;;  %v6647_v18 = vld [vmem:[%s7480_s9 + $0x98] sm:$0xff]  ;;  %v6646_v22 = vld [vmem:[%s7480_s9 + $0x90] sm:$0xff] }
 0x124   : > { %4300 = vmatpush.bf16.msra.mxu2 %v6650_v6  ;;  %v6656_v15 = vld [vmem:[%s7480_s9 + $0xe0] sm:$0xff]  ;;  %v6655_v19 = vld [vmem:[%s7480_s9 + $0xd8] sm:$0xff]  ;;  %v6654_v23 = vld [vmem:[%s7480_s9 + $0xd0] sm:$0xff] }
 0x125   : > { %4349 = vmatpush.bf16.msra.mxu3 %v6658_v7  ;;  %v6629_v24 = vld [vmem:[%s7480_s9 + $0x8] sm:$0xff]  ;;  %v6628_v28 = vld [vmem:[%s7480_s9] sm:$0xff]  ;;  %v6683_v40 = vld [vmem:[%s7480_s9 + $0x1b8] sm:$0xff] }
 0x126   : > { %4203 = vmatpush.bf16.msra.mxu0 %v6633_v8  ;;  %v6637_v25 = vld [vmem:[%s7480_s9 + $0x48] sm:$0xff]  ;;  %v5474_v29 = vld [vmem:[%s8727_s0] sm:$0xf]  ;;  %v6500_v34 = vld [vmem:[%s8727_s0 + $0x4] sm:$0xf] }
 0x127   : > { %4252 = vmatpush.bf16.msra.mxu1 %v6641_v9  ;;  %v6645_v26 = vld [vmem:[%s7480_s9 + $0x88] sm:$0xff]  ;;  %v6508_v30 = vld [vmem:[%s8727_s0 + $0x3c] sm:$0xf0]  ;;  %v5476_v35 = vld [vmem:[%s8727_s0 + $0x40] sm:$0xf0] }
 0x128   : > { %4301 = vmatpush.bf16.msra.mxu2 %v6649_v10  ;;  %v6653_v27 = vld [vmem:[%s7480_s9 + $0xc8] sm:$0xff]  ;;  %v6636_v31 = vld [vmem:[%s7480_s9 + $0x40] sm:$0xff]  ;;  %v6667_v41 = vld [vmem:[%s7480_s9 + $0x138] sm:$0xff]  ;;  %v5475_v42 = vor.u32 %v6508_v30, %v5474_v29  ;;  %v5479_v43 = vor.u32 %v6500_v34, %v5476_v35 }
 0x129   : > { %4350 = vmatpush.bf16.msra.mxu3 %v6657_v11  ;;  %v6644_v32 = vld [vmem:[%s7480_s9 + $0x80] sm:$0xff]  ;;  %v5482_v36 = vld [vmem:[%s8727_s0 + $0x8] sm:$0xf]  ;;  %v6501_v38 = vld [vmem:[%s8727_s0 + $0xc] sm:$0xf] }
 0x12a   : > { %4204 = vmatpush.bf16.msra.mxu0 %v6632_v12  ;;  %v6652_v33 = vld [vmem:[%s7480_s9 + $0xc0] sm:$0xff]  ;;  %v6509_v37 = vld [vmem:[%s8727_s0 + $0x44] sm:$0xf0]  ;;  %v5484_v39 = vld [vmem:[%s8727_s0 + $0x48] sm:$0xf0] }
 0x12b   : > { %4253 = vmatpush.bf16.msra.mxu1 %v6640_v13  ;;  %v5483_v44 = vor.u32 %v6509_v37, %v5482_v36  ;;  %v5487_v45 = vor.u32 %v6501_v38, %v5484_v39  ;;  %v6691_v46 = vld [vmem:[%s7480_s9 + $0x1f8] sm:$0xff]  ;;  %v6682_v48 = vld [vmem:[%s7480_s9 + $0x1b0] sm:$0xff]  ;;  %v6681_v52 = vld [vmem:[%s7480_s9 + $0x1a8] sm:$0xff] }
 0x12c   : > { %4302 = vmatpush.bf16.msra.mxu2 %v6648_v14  ;;  %v6675_v47 = vld [vmem:[%s7480_s9 + $0x178] sm:$0xff]  ;;  %v6666_v49 = vld [vmem:[%s7480_s9 + $0x130] sm:$0xff]  ;;  %v6665_v53 = vld [vmem:[%s7480_s9 + $0x128] sm:$0xff] }
 0x12d   : > { %4351 = vmatpush.bf16.msra.mxu3 %v6656_v15  ;;  %v6690_v50 = vld [vmem:[%s7480_s9 + $0x1f0] sm:$0xff]  ;;  %v6689_v54 = vld [vmem:[%s7480_s9 + $0x1e8] sm:$0xff]  ;;  %v5538_v56 = vld [vmem:[%s8727_s0 + $0x80] sm:$0xf] }
 0x12e   : > { %4205 = vmatpush.bf16.msra.mxu0 %v6631_v16  ;;  %v6674_v51 = vld [vmem:[%s7480_s9 + $0x170] sm:$0xff]  ;;  %v6673_v55 = vld [vmem:[%s7480_s9 + $0x168] sm:$0xff]  ;;  %v6524_v57 = vld [vmem:[%s8727_s0 + $0xbc] sm:$0xf0] }
 0x12f   : > { %4254 = vmatpush.bf16.msra.mxu1 %v6639_v17  ;;  %v6516_v58 = vld [vmem:[%s8727_s0 + $0x84] sm:$0xf]  ;;  %v5546_v60 = vld [vmem:[%s8727_s0 + $0x88] sm:$0xf]  ;;  %v6517_v62 = vld [vmem:[%s8727_s0 + $0x8c] sm:$0xf]  ;;  %v5539_v0 = vor.u32 %v6524_v57, %v5538_v56 }
 0x130   : > { %4303 = vmatpush.bf16.msra.mxu2 %v6647_v18  ;;  %v5540_v59 = vld [vmem:[%s8727_s0 + $0xc0] sm:$0xf0]  ;;  %v6525_v61 = vld [vmem:[%s8727_s0 + $0xc4] sm:$0xf0]  ;;  %v5548_v63 = vld [vmem:[%s8727_s0 + $0xc8] sm:$0xf0] }
 0x131   : > { %4352 = vmatpush.bf16.msra.mxu3 %v6655_v19  ;;  %v5543_v1 = vor.u32 %v6516_v58, %v5540_v59  ;;  %v5547_v2 = vor.u32 %v6525_v61, %v5546_v60  ;;  %v5551_v3 = vor.u32 %v6517_v62, %v5548_v63  ;;  %v6680_v4 = vld [vmem:[%s7480_s9 + $0x1a0] sm:$0xff]  ;;  %v5610_v12 = vld [vmem:[%s8727_s0 + $0x108] sm:$0xf]  ;;  %v6533_v14 = vld [vmem:[%s8727_s0 + $0x10c] sm:$0xf] }
 0x132   : > { %4206 = vmatpush.bf16.msra.mxu0 %v6630_v20  ;;  %v6664_v5 = vld [vmem:[%s7480_s9 + $0x120] sm:$0xff]  ;;  %v6541_v13 = vld [vmem:[%s8727_s0 + $0x144] sm:$0xf0]  ;;  %v5612_v15 = vld [vmem:[%s8727_s0 + $0x148] sm:$0xf0] }
 0x133   : > { %4255 = vmatpush.bf16.msra.mxu1 %v6638_v21  ;;  %v6688_v6 = vld [vmem:[%s7480_s9 + $0x1e0] sm:$0xff]  ;;  %v5611_v18 = vor.u32 %v6541_v13, %v5610_v12  ;;  %v5615_v19 = vor.u32 %v6533_v14, %v5612_v15  ;;  %v6679_v20 = vld [vmem:[%s7480_s9 + $0x198] sm:$0xff]  ;;  %v6557_v29 = vld [vmem:[%s8727_s0 + $0x1c4] sm:$0xf0] }
 0x134   : > { %4304 = vmatpush.bf16.msra.mxu2 %v6646_v22  ;;  %v6672_v7 = vld [vmem:[%s7480_s9 + $0x160] sm:$0xff]  ;;  %v6663_v21 = vld [vmem:[%s7480_s9 + $0x118] sm:$0xff]  ;;  %v6549_v30 = vld [vmem:[%s8727_s0 + $0x18c] sm:$0xf] }
 0x135   : > { %4353 = vmatpush.bf16.msra.mxu3 %v6654_v23  ;;  %v5602_v8 = vld [vmem:[%s8727_s0 + $0x100] sm:$0xf]  ;;  %v6532_v10 = vld [vmem:[%s8727_s0 + $0x104] sm:$0xf]  ;;  %v6687_v22 = vld [vmem:[%s7480_s9 + $0x1d8] sm:$0xff] }
 0x136   : > { %4207 = vmatpush.bf16.msra.mxu0 %v6629_v24  ;;  %v6540_v9 = vld [vmem:[%s8727_s0 + $0x13c] sm:$0xf0]  ;;  %v5604_v11 = vld [vmem:[%s8727_s0 + $0x140] sm:$0xf0]  ;;  %v6671_v23 = vld [vmem:[%s7480_s9 + $0x158] sm:$0xff] }
 0x137   : > { %4256 = vmatpush.bf16.msra.mxu1 %v6637_v25  ;;  %v5603_v16 = vor.u32 %v6540_v9, %v5602_v8  ;;  %v5607_v17 = vor.u32 %v6532_v10, %v5604_v11  ;;  %v5666_v24 = vld [vmem:[%s8727_s0 + $0x180] sm:$0xf]  ;;  %v6678_v36 = vld [vmem:[%s7480_s9 + $0x190] sm:$0xff]  ;;  %v6580_v58 = vld [vmem:[%s8727_s0 + $0x284] sm:$0xf] }
 0x138   : > { %4305 = vmatpush.bf16.msra.mxu2 %v6645_v26  ;;  %v6556_v25 = vld [vmem:[%s8727_s0 + $0x1bc] sm:$0xf0]  ;;  %v6548_v26 = vld [vmem:[%s8727_s0 + $0x184] sm:$0xf]  ;;  %v6662_v37 = vld [vmem:[%s7480_s9 + $0x110] sm:$0xff] }
 0x139   : > { %4354 = vmatpush.bf16.msra.mxu3 %v6653_v27  ;;  %v5668_v27 = vld [vmem:[%s8727_s0 + $0x1c0] sm:$0xf0]  ;;  %v6686_v38 = vld [vmem:[%s7480_s9 + $0x1d0] sm:$0xff]  ;;  %v5794_v56 = vld [vmem:[%s8727_s0 + $0x280] sm:$0xf] }
 0x13a   : > { %4208 = vmatpush.bf16.msra.mxu0 %v6628_v28  ;;  %v5674_v28 = vld [vmem:[%s8727_s0 + $0x188] sm:$0xf]  ;;  %v6670_v39 = vld [vmem:[%s7480_s9 + $0x150] sm:$0xff]  ;;  %v6588_v57 = vld [vmem:[%s8727_s0 + $0x2bc] sm:$0xf0] }
 0x13b   : > { %4257 = vmatpush.bf16.msra.mxu1 %v6636_v31  ;;  %v5676_v31 = vld [vmem:[%s8727_s0 + $0x1c8] sm:$0xf0]  ;;  %v5675_v34 = vor.u32 %v6557_v29, %v5674_v28  ;;  %v5796_v59 = vld [vmem:[%s8727_s0 + $0x2c0] sm:$0xf0]  ;;  %v5802_v60 = vld [vmem:[%s8727_s0 + $0x288] sm:$0xf] }
 0x13c   : > { %4306 = vmatpush.bf16.msra.mxu2 %v6644_v32  ;;  %v5667_v32 = vor.u32 %v6556_v25, %v5666_v24  ;;  %v5679_v35 = vor.u32 %v6549_v30, %v5676_v31  ;;  %v6589_v61 = vld [vmem:[%s8727_s0 + $0x2c4] sm:$0xf0]  ;;  %v6581_v62 = vld [vmem:[%s8727_s0 + $0x28c] sm:$0xf]  ;;  %v5858_v8 = vld [vmem:[%s8727_s0 + $0x300] sm:$0xf] }
 0x13d   : > { %4355 = vmatpush.bf16.msra.mxu3 %v6652_v33  ;;  %4209 = vmatmul.bf16.vlgmr.msra.gmra.mxu0 %v5475_v42  ;;  %v5671_v33 = vor.u32 %v6548_v26, %v5668_v27  ;;  %v6564_v42 = vld [vmem:[%s8727_s0 + $0x204] sm:$0xf]  ;;  %v5804_v63 = vld [vmem:[%s8727_s0 + $0x2c8] sm:$0xf0]  ;;  %v6604_v9 = vld [vmem:[%s8727_s0 + $0x33c] sm:$0xf0] }
 0x13e   : > { %4397 = vmatpush.bf16.msrb.mxu0 %v6667_v41  ;;  %4258 = vmatmul.bf16.vlgmr.msra.gmra.mxu1 %v5479_v43  ;;  %v6572_v41 = vld [vmem:[%s8727_s0 + $0x23c] sm:$0xf0]  ;;  %v5732_v43 = vld [vmem:[%s8727_s0 + $0x240] sm:$0xf0]  ;;  %v5866_v12 = vld [vmem:[%s8727_s0 + $0x308] sm:$0xf] }
 0x13f   : > { %4307 = vmatmul.bf16.vlgmr.msra.gmra.mxu2 %v5483_v44  ;;  %4446 = vmatpush.bf16.msrb.mxu1 %v6675_v47  ;;  %v5738_v44 = vld [vmem:[%s8727_s0 + $0x208] sm:$0xf]  ;;  %v5740_v47 = vld [vmem:[%s8727_s0 + $0x248] sm:$0xf0]  ;;  %v6596_v10 = vld [vmem:[%s8727_s0 + $0x304] sm:$0xf] }
 0x140   : > { %4495 = vmatpush.bf16.msrb.mxu2 %v6683_v40  ;;  %4356 = vmatmul.bf16.vlgmr.msra.gmra.mxu3 %v5487_v45  ;;  %v5730_v40 = vld [vmem:[%s8727_s0 + $0x200] sm:$0xf]  ;;  %v6573_v45 = vld [vmem:[%s8727_s0 + $0x244] sm:$0xf0]  ;;  %v5860_v11 = vld [vmem:[%s8727_s0 + $0x340] sm:$0xf0] }
 0x141   : > { %4544 = vmatpush.bf16.msrb.mxu3 %v6691_v46  ;;  %v6565_v46 = vld [vmem:[%s8727_s0 + $0x20c] sm:$0xf]  ;;  %v6605_v13 = vld [vmem:[%s8727_s0 + $0x344] sm:$0xf0]  ;;  %v5922_v24 = vld [vmem:[%s8727_s0 + $0x380] sm:$0xf] }
 0x142   : > { %4398 = vmatpush.bf16.msrb.mxu0 %v6666_v49  ;;  %v5735_v49 = vor.u32 %v6564_v42, %v5732_v43  ;;  %v6597_v14 = vld [vmem:[%s8727_s0 + $0x30c] sm:$0xf]  ;;  %v6620_v25 = vld [vmem:[%s8727_s0 + $0x3bc] sm:$0xf0]  ;;  %v6612_v26 = vld [vmem:[%s8727_s0 + $0x384] sm:$0xf] }
 0x143   : > { %4447 = vmatpush.bf16.msrb.mxu1 %v6674_v51  ;;  %v5743_v51 = vor.u32 %v6565_v46, %v5740_v47  ;;  %v5868_v15 = vld [vmem:[%s8727_s0 + $0x348] sm:$0xf0]  ;;  %v5924_v27 = vld [vmem:[%s8727_s0 + $0x3c0] sm:$0xf0]  ;;  %v5930_v28 = vld [vmem:[%s8727_s0 + $0x388] sm:$0xf] }
 0x144   : > { %4496 = vmatpush.bf16.msrb.mxu2 %v6682_v48  ;;  %v5731_v48 = vor.u32 %v6572_v41, %v5730_v40  ;;  %v6621_v29 = vld [vmem:[%s8727_s0 + $0x3c4] sm:$0xf0]  ;;  %v6613_v30 = vld [vmem:[%s8727_s0 + $0x38c] sm:$0xf]  ;;  %v5490_v40 = vld [vmem:[%s8727_s0 + $0x10] sm:$0xf] }
 0x145   : > { %4545 = vmatpush.bf16.msrb.mxu3 %v6690_v50  ;;  %v5739_v50 = vor.u32 %v6573_v45, %v5738_v44  ;;  %v5932_v31 = vld [vmem:[%s8727_s0 + $0x3c8] sm:$0xf0]  ;;  %v6510_v41 = vld [vmem:[%s8727_s0 + $0x4c] sm:$0xf0]  ;;  %v6502_v42 = vld [vmem:[%s8727_s0 + $0x14] sm:$0xf] }
 0x146   : > { %4399 = vmatpush.bf16.msrb.mxu0 %v6665_v53  ;;  %v6661_v53 = vld [vmem:[%s7480_s9 + $0x108] sm:$0xff]  ;;  %v5492_v43 = vld [vmem:[%s8727_s0 + $0x50] sm:$0xf0]  ;;  %v5498_v44 = vld [vmem:[%s8727_s0 + $0x18] sm:$0xf] }
 0x147   : > { %4448 = vmatpush.bf16.msrb.mxu1 %v6673_v55  ;;  %v6669_v55 = vld [vmem:[%s7480_s9 + $0x148] sm:$0xff]  ;;  %v6511_v45 = vld [vmem:[%s8727_s0 + $0x54] sm:$0xf0]  ;;  %v6503_v46 = vld [vmem:[%s8727_s0 + $0x1c] sm:$0xf] }
 0x148   : > { %4497 = vmatpush.bf16.msrb.mxu2 %v6681_v52  ;;  %v6677_v52 = vld [vmem:[%s7480_s9 + $0x188] sm:$0xff]  ;;  %v5500_v47 = vld [vmem:[%s8727_s0 + $0x58] sm:$0xf0] }
 0x149   : > { %4546 = vmatpush.bf16.msrb.mxu3 %v6689_v54  ;;  %v6685_v54 = vld [vmem:[%s7480_s9 + $0x1c8] sm:$0xff] }
 0x14a   : > { %4400 = vmatpush.bf16.msrb.mxu0 %v6664_v5  ;;  %v6660_v5 = vld [vmem:[%s7480_s9 + $0x100] sm:$0xff] }
 0x14b   : > { %4449 = vmatpush.bf16.msrb.mxu1 %v6672_v7  ;;  %v6668_v7 = vld [vmem:[%s7480_s9 + $0x140] sm:$0xff] }
 0x14c   : > { %4498 = vmatpush.bf16.msrb.mxu2 %v6680_v4  ;;  %v6676_v4 = vld [vmem:[%s7480_s9 + $0x180] sm:$0xff] }
 0x14d   : > { %4214 = vmatmul.bf16.gmra.mxu0 %v5539_v0  ;;  %4547 = vmatpush.bf16.msrb.mxu3 %v6688_v6  ;;  %v5795_v0 = vor.u32 %v6588_v57, %v5794_v56  ;;  %v6684_v6 = vld [vmem:[%s7480_s9 + $0x1c0] sm:$0xff]  ;;  %v6697_v56 = vld [vmem:[%s7480_s9 + $0x228] sm:$0xff] }
 0x14e   : > { %4263 = vmatmul.bf16.gmra.mxu1 %v5543_v1  ;;  %4401 = vmatpush.bf16.msrb.mxu0 %v6663_v21  ;;  %v5799_v1 = vor.u32 %v6580_v58, %v5796_v59  ;;  %v6699_v21 = vld [vmem:[%s7480_s9 + $0x238] sm:$0xff]  ;;  %v6721_v57 = vld [vmem:[%s7480_s9 + $0x2e8] sm:$0xff] }
 0x14f   : > { %4312 = vmatmul.bf16.gmra.mxu2 %v5547_v2  ;;  %4450 = vmatpush.bf16.msrb.mxu1 %v6671_v23  ;;  %v5803_v2 = vor.u32 %v6589_v61, %v5802_v60  ;;  %v6707_v23 = vld [vmem:[%s7480_s9 + $0x278] sm:$0xff] }
 0x150   : > { %4361 = vmatmul.bf16.gmra.mxu3 %v5551_v3  ;;  %4499 = vmatpush.bf16.msrb.mxu2 %v6679_v20  ;;  %v5807_v3 = vor.u32 %v6581_v62, %v5804_v63  ;;  %v6715_v20 = vld [vmem:[%s7480_s9 + $0x2b8] sm:$0xff] }
 0x151   : > { %4548 = vmatpush.bf16.msrb.mxu3 %v6687_v22  ;;  %v6723_v22 = vld [vmem:[%s7480_s9 + $0x2f8] sm:$0xff] }
 0x152   : > { %4402 = vmatpush.bf16.msrb.mxu0 %v6662_v37  ;;  %v6698_v37 = vld [vmem:[%s7480_s9 + $0x230] sm:$0xff] }
 0x153   : > { %4451 = vmatpush.bf16.msrb.mxu1 %v6670_v39  ;;  %v6706_v39 = vld [vmem:[%s7480_s9 + $0x270] sm:$0xff] }
 0x154   : > { %4500 = vmatpush.bf16.msrb.mxu2 %v6678_v36  ;;  %v6714_v36 = vld [vmem:[%s7480_s9 + $0x2b0] sm:$0xff] }
 0x155   : > { %4549 = vmatpush.bf16.msrb.mxu3 %v6686_v38  ;;  %v6722_v38 = vld [vmem:[%s7480_s9 + $0x2f0] sm:$0xff] }
 0x156   : > { %4403 = vmatpush.bf16.msrb.mxu0 %v6661_v53  ;;  %v5503_v53 = vor.u32 %v6503_v46, %v5500_v47 }
 0x157   : > { %4452 = vmatpush.bf16.msrb.mxu1 %v6669_v55  ;;  %v6713_v55 = vld [vmem:[%s7480_s9 + $0x2a8] sm:$0xff] }
 0x158   : > { %4501 = vmatpush.bf16.msrb.mxu2 %v6677_v52  ;;  %v5499_v52 = vor.u32 %v6511_v45, %v5498_v44 }
 0x159   : > { %4550 = vmatpush.bf16.msrb.mxu3 %v6685_v54 }
 0x15a   : > { %4404 = vmatpush.bf16.msrb.mxu0 %v6660_v5  ;;  %v5556_v5 = vld [vmem:[%s8727_s0 + $0xd0] sm:$0xf0] }
 0x15b   : > { %4453 = vmatpush.bf16.msrb.mxu1 %v6668_v7  ;;  %v6527_v7 = vld [vmem:[%s8727_s0 + $0xd4] sm:$0xf0] }
 0x15c   : > { %4502 = vmatpush.bf16.msrb.mxu2 %v6676_v4  ;;  %v6518_v4 = vld [vmem:[%s8727_s0 + $0x94] sm:$0xf] }
 0x15d   : > { %4219 = vmatmul.bf16.gmra.mxu0 %v5603_v16  ;;  %4551 = vmatpush.bf16.msrb.mxu3 %v6684_v6  ;;  %v5859_v16 = vor.u32 %v6604_v9, %v5858_v8  ;;  %v5562_v6 = vld [vmem:[%s8727_s0 + $0x98] sm:$0xf]  ;;  %v6519_v8 = vld [vmem:[%s8727_s0 + $0x9c] sm:$0xf] }
 0x15e   : > { %4268 = vmatmul.bf16.gmra.mxu1 %v5607_v17  ;;  %v5863_v17 = vor.u32 %v6596_v10, %v5860_v11  ;;  %4593 = vmatpush.bf16.msra.mxu0 %v6699_v21  ;;  %v5564_v9 = vld [vmem:[%s8727_s0 + $0xd8] sm:$0xf0]  ;;  %v6712_v21 = vld [vmem:[%s7480_s9 + $0x2a0] sm:$0xff] }
 0x15f   : > { %4317 = vmatmul.bf16.gmra.mxu2 %v5611_v18  ;;  %v5867_v18 = vor.u32 %v6605_v13, %v5866_v12  ;;  %4642 = vmatpush.bf16.msra.mxu1 %v6707_v23  ;;  %v5559_v13 = vor.u32 %v6518_v4, %v5556_v5  ;;  %v6720_v23 = vld [vmem:[%s7480_s9 + $0x2e0] sm:$0xff]  ;;  %v6559_v4 = vld [vmem:[%s8727_s0 + $0x1d4] sm:$0xf0]  ;;  %v6551_v5 = vld [vmem:[%s8727_s0 + $0x19c] sm:$0xf] }
 0x160   : > { %4366 = vmatmul.bf16.gmra.mxu3 %v5615_v19  ;;  %v5871_v19 = vor.u32 %v6597_v14, %v5868_v15  ;;  %4691 = vmatpush.bf16.msra.mxu2 %v6715_v20 }
 0x161   : > { %4740 = vmatpush.bf16.msra.mxu3 %v6723_v22  ;;  %v6696_v22 = vld [vmem:[%s7480_s9 + $0x220] sm:$0xff] }
 0x162   : > { %4594 = vmatpush.bf16.msra.mxu0 %v6698_v37  ;;  %v6543_v37 = vld [vmem:[%s8727_s0 + $0x154] sm:$0xf0] }
 0x163   : > { %4643 = vmatpush.bf16.msra.mxu1 %v6706_v39  ;;  %v5628_v39 = vld [vmem:[%s8727_s0 + $0x158] sm:$0xf0] }
 0x164   : > { %4692 = vmatpush.bf16.msra.mxu2 %v6714_v36  ;;  %v5626_v36 = vld [vmem:[%s8727_s0 + $0x118] sm:$0xf] }
 0x165   : > { %4741 = vmatpush.bf16.msra.mxu3 %v6722_v38  ;;  %v6535_v38 = vld [vmem:[%s8727_s0 + $0x11c] sm:$0xf]  ;;  %v5627_v47 = vor.u32 %v6543_v37, %v5626_v36  ;;  %v6575_v36 = vld [vmem:[%s8727_s0 + $0x254] sm:$0xf0] }
 0x166   : > { %4595 = vmatpush.bf16.msra.mxu0 %v6697_v56  ;;  %v6567_v37 = vld [vmem:[%s8727_s0 + $0x21c] sm:$0xf] }
 0x168   : > { %4693 = vmatpush.bf16.msra.mxu2 %v6713_v55 }
 0x169   : > { %4742 = vmatpush.bf16.msra.mxu3 %v6721_v57 }
 0x16a   : > { %4596 = vmatpush.bf16.msra.mxu0 %v6696_v22 }
 0x16c   : > { %4694 = vmatpush.bf16.msra.mxu2 %v6712_v21  ;;  %v6718_v21 = vld [vmem:[%s7480_s9 + $0x2d0] sm:$0xff] }
 0x16d   : > { %4224 = vmatmul.bf16.gmra.mxu0 %v5667_v32  ;;  %v5923_v32 = vor.u32 %v6620_v25, %v5922_v24  ;;  %4743 = vmatpush.bf16.msra.mxu3 %v6720_v23 }
 0x16e   : > { %4273 = vmatmul.bf16.gmra.mxu1 %v5671_v33  ;;  %v5927_v33 = vor.u32 %v6612_v26, %v5924_v27 }
 0x16f   : > { %4322 = vmatmul.bf16.gmra.mxu2 %v5675_v34  ;;  %v5931_v34 = vor.u32 %v6621_v29, %v5930_v28 }
 0x170   : > { %4371 = vmatmul.bf16.gmra.mxu3 %v5679_v35  ;;  %v5935_v35 = vor.u32 %v6613_v30, %v5932_v31  ;;  %v6704_v31 = vld [vmem:[%s7480_s9 + $0x260] sm:$0xff] }
 0x17d   : > { %4229 = vmatmul.bf16.gmra.mxu0 %v5731_v48  ;;  %v5491_v48 = vor.u32 %v6510_v41, %v5490_v40 }
 0x17e   : > { %4278 = vmatmul.bf16.gmra.mxu1 %v5735_v49  ;;  %v5495_v49 = vor.u32 %v6502_v42, %v5492_v43 }
 0x17f   : > { %4327 = vmatmul.bf16.gmra.mxu2 %v5739_v50 }
 0x180   : > { %4376 = vmatmul.bf16.gmra.mxu3 %v5743_v51 }
 0x18d   : > { %4234 = vmatmul.bf16.gmra.mxu0 %v5795_v0 }
 0x18e   : > { %4283 = vmatmul.bf16.gmra.mxu1 %v5799_v1  ;;  %v6705_v1 = vld [vmem:[%s7480_s9 + $0x268] sm:$0xff] }
 0x18f   : > { %4332 = vmatmul.bf16.gmra.mxu2 %v5803_v2  ;;  %v5554_v2 = vld [vmem:[%s8727_s0 + $0x90] sm:$0xf]  ;;  %4644 = vmatpush.bf16.msra.mxu1 %v6705_v1  ;;  %v6550_v1 = vld [vmem:[%s8727_s0 + $0x194] sm:$0xf] }
 0x190   : > { %4381 = vmatmul.bf16.gmra.mxu3 %v5807_v3  ;;  %v6526_v3 = vld [vmem:[%s8727_s0 + $0xcc] sm:$0xf0] }
 0x191   : > { %v5555_v12 = vor.u32 %v6526_v3, %v5554_v2  ;;  %v5684_v2 = vld [vmem:[%s8727_s0 + $0x1d0] sm:$0xf0]  ;;  %v5690_v3 = vld [vmem:[%s8727_s0 + $0x198] sm:$0xf] }
 0x193   : > { %4645 = vmatpush.bf16.msra.mxu1 %v6704_v31  ;;  %v5746_v31 = vld [vmem:[%s8727_s0 + $0x210] sm:$0xf] }
 0x19d   : > { %4239 = vmatmul.bf16.gmra.mxu0 %v5859_v16 }
 0x19e   : > { %4288 = vmatmul.bf16.gmra.mxu1 %v5863_v17  ;;  %v5563_v17 = vor.u32 %v6527_v7, %v5562_v6  ;;  %v5692_v6 = vld [vmem:[%s8727_s0 + $0x1d8] sm:$0xf0] }
 0x19f   : > { %4337 = vmatmul.bf16.gmra.mxu2 %v5867_v18  ;;  %v5567_v18 = vor.u32 %v6519_v8, %v5564_v9 }
 0x1a0   : > { %4386 = vmatmul.bf16.gmra.mxu3 %v5871_v19 }
 0x1ad   : > { %4244 = vmatmul.bf16.gmra.mxu0 %v5923_v32  ;;  %v5618_v32 = vld [vmem:[%s8727_s0 + $0x110] sm:$0xf] }
 0x1ae   : > { %4293 = vmatmul.bf16.gmra.mxu1 %v5927_v33  ;;  %v6542_v33 = vld [vmem:[%s8727_s0 + $0x14c] sm:$0xf0] }
 0x1af   : > { %4342 = vmatmul.bf16.gmra.mxu2 %v5931_v34  ;;  %v6534_v34 = vld [vmem:[%s8727_s0 + $0x114] sm:$0xf]  ;;  %v5619_v42 = vor.u32 %v6542_v33, %v5618_v32  ;;  %v6574_v32 = vld [vmem:[%s8727_s0 + $0x24c] sm:$0xf0] }
 0x1b0   : > { %4391 = vmatmul.bf16.gmra.mxu3 %v5935_v35  ;;  %v5620_v35 = vld [vmem:[%s8727_s0 + $0x150] sm:$0xf0] }
 0x1b1   : > { %v5623_v43 = vor.u32 %v6534_v34, %v5620_v35  ;;  %v6566_v33 = vld [vmem:[%s8727_s0 + $0x214] sm:$0xf]  ;;  %v5754_v35 = vld [vmem:[%s8727_s0 + $0x218] sm:$0xf] }
 0x1b2   : > { %v5748_v34 = vld [vmem:[%s8727_s0 + $0x250] sm:$0xf0] }
 0x1ba   : > { %v4210_v50 = vpop.f32.mrf.mxu0 }
 0x1bb   : > { %v4259_v51 = vpop.f32.mrf.mxu1 }
 0x1bc   : > { %v4260_v54 = vadd.f32 %v4259_v51, %v4210_v50  ;;  %v6711_v51 = vld [vmem:[%s7480_s9 + $0x298] sm:$0xff] }
 0x1bd   : > { %4405 = vmatmul.bf16.vlgmr.msrb.gmra.mxu0 %v5491_v48  ;;  %v5631_v48 = vor.u32 %v6535_v38, %v5628_v39  ;;  %4695 = vmatpush.bf16.msra.mxu2 %v6711_v51  ;;  %v5756_v38 = vld [vmem:[%s8727_s0 + $0x258] sm:$0xf0]  ;;  %v6709_v51 = vld [vmem:[%s7480_s9 + $0x288] sm:$0xff] }
 0x1be   : > { %4454 = vmatmul.bf16.vlgmr.msrb.gmra.mxu1 %v5495_v49 }
 0x1bf   : > { %4503 = vmatmul.bf16.vlgmr.msrb.gmra.mxu2 %v5499_v52  ;;  %v6695_v52 = vld [vmem:[%s7480_s9 + $0x218] sm:$0xff] }
 0x1c0   : > { %4552 = vmatmul.bf16.vlgmr.msrb.gmra.mxu3 %v5503_v53  ;;  %v6719_v53 = vld [vmem:[%s7480_s9 + $0x2d8] sm:$0xff]  ;;  %4597 = vmatpush.bf16.msra.mxu0 %v6695_v52  ;;  %v6693_v52 = vld [vmem:[%s7480_s9 + $0x208] sm:$0xff] }
 0x1c1   : > { %4744 = vmatpush.bf16.msra.mxu3 %v6719_v53  ;;  %v6717_v53 = vld [vmem:[%s7480_s9 + $0x2c8] sm:$0xff] }
 0x1c2   : > { %v4308_v58 = vpop.f32.mrf.mxu2  ;;  %v4212_v61 = vpop.f32.mrf.mxu0 }
 0x1c3   : > { %v4357_v59 = vpop.f32.mrf.mxu3  ;;  %v4309_v60 = vadd.f32 %v4308_v58, %v4260_v54  ;;  %v4261_v62 = vpop.f32.mrf.mxu1 }
 0x1c4   : > { %v4262_v63 = vadd.f32 %v4261_v62, %v4212_v61  ;;  %v6703_v61 = vld [vmem:[%s7480_s9 + $0x258] sm:$0xff]  ;;  %v5682_v62 = vld [vmem:[%s8727_s0 + $0x190] sm:$0xf] }
 0x1c5   : > { %v7773_v0 = vadd.f32 %v4357_v59, %v4309_v60  ;;  %4646 = vmatpush.bf16.msra.mxu1 %v6703_v61  ;;  %4745 = vmatpush.bf16.msra.mxu3 %v6718_v21  ;;  %v6708_v21 = vld [vmem:[%s7480_s9 + $0x280] sm:$0xff] }
 0x1c9   : > { %4746 = vmatpush.bf16.msra.mxu3 %v6717_v53 }
 0x1ca   : > { %v4310_v10 = vpop.f32.mrf.mxu2  ;;  %v4215_v15 = vpop.f32.mrf.mxu0 }
 0x1cb   : > { %v4359_v11 = vpop.f32.mrf.mxu3  ;;  %v4311_v14 = vadd.f32 %v4310_v10, %v4262_v63  ;;  %v4264_v16 = vpop.f32.mrf.mxu1  ;;  %v6558_v63 = vld [vmem:[%s8727_s0 + $0x1cc] sm:$0xf0]  ;;  %v5687_v10 = vor.u32 %v6550_v1, %v5684_v2  ;;  %v6582_v2 = vld [vmem:[%s8727_s0 + $0x294] sm:$0xf] }
 0x1cc   : > { %v4265_v19 = vadd.f32 %v4264_v16, %v4215_v15  ;;  %v5683_v9 = vor.u32 %v6558_v63, %v5682_v62  ;;  %v5695_v15 = vor.u32 %v6551_v5, %v5692_v6  ;;  %v6701_v62 = vld [vmem:[%s7480_s9 + $0x248] sm:$0xff]  ;;  %v5810_v63 = vld [vmem:[%s8727_s0 + $0x290] sm:$0xf]  ;;  %v6591_v5 = vld [vmem:[%s8727_s0 + $0x2d4] sm:$0xf0] }
 0x1cd   : > { %v7800_v20 = vadd.f32 %v4359_v11, %v4311_v14  ;;  %4410 = vmatmul.bf16.gmra.mxu0 %v5555_v12  ;;  %v5691_v14 = vor.u32 %v6559_v4, %v5690_v3  ;;  %v6590_v1 = vld [vmem:[%s8727_s0 + $0x2cc] sm:$0xf0]  ;;  %v5812_v3 = vld [vmem:[%s8727_s0 + $0x2d0] sm:$0xf0]  ;;  %v5818_v4 = vld [vmem:[%s8727_s0 + $0x298] sm:$0xf] }
 0x1ce   : > { %4459 = vmatmul.bf16.gmra.mxu1 %v5559_v13  ;;  %v6583_v6 = vld [vmem:[%s8727_s0 + $0x29c] sm:$0xf] }
 0x1cf   : > { %4508 = vmatmul.bf16.gmra.mxu2 %v5563_v17 }
 0x1d0   : > { %4557 = vmatmul.bf16.gmra.mxu3 %v5567_v18  ;;  %v6710_v18 = vld [vmem:[%s7480_s9 + $0x290] sm:$0xff] }
 0x1d1   : > { %4696 = vmatpush.bf16.msra.mxu2 %v6710_v18 }
 0x1d2   : > { %v4313_v24 = vpop.f32.mrf.mxu2  ;;  %v4217_v27 = vpop.f32.mrf.mxu0 }
 0x1d3   : > { %v4362_v25 = vpop.f32.mrf.mxu3  ;;  %v4314_v26 = vadd.f32 %v4313_v24, %v4265_v19  ;;  %v4266_v28 = vpop.f32.mrf.mxu1  ;;  %v6694_v19 = vld [vmem:[%s7480_s9 + $0x210] sm:$0xff] }
 0x1d4   : > { %v4267_v29 = vadd.f32 %v4266_v28, %v4217_v27  ;;  %4598 = vmatpush.bf16.msra.mxu0 %v6694_v19 }
 0x1d5   : > { %v7805_v30 = vadd.f32 %v4362_v25, %v4314_v26  ;;  %4697 = vmatpush.bf16.msra.mxu2 %v6709_v51 }
 0x1d8   : > { %4599 = vmatpush.bf16.msra.mxu0 %v6693_v52 }
 0x1d9   : > { %4698 = vmatpush.bf16.msra.mxu2 %v6708_v21 }
 0x1da   : > { %v4315_v40 = vpop.f32.mrf.mxu2  ;;  %v4220_v45 = vpop.f32.mrf.mxu0 }
 0x1db   : > { %v4364_v41 = vpop.f32.mrf.mxu3  ;;  %v4316_v44 = vadd.f32 %v4315_v40, %v4267_v29  ;;  %v4269_v46 = vpop.f32.mrf.mxu1  ;;  %v6702_v29 = vld [vmem:[%s7480_s9 + $0x250] sm:$0xff] }
 0x1dc   : > { %v4270_v49 = vadd.f32 %v4269_v46, %v4220_v45  ;;  %4647 = vmatpush.bf16.msra.mxu1 %v6702_v29  ;;  %v5755_v46 = vor.u32 %v6575_v36, %v5754_v35  ;;  %v6606_v35 = vld [vmem:[%s8727_s0 + $0x34c] sm:$0xf0]  ;;  %v6598_v36 = vld [vmem:[%s8727_s0 + $0x314] sm:$0xf] }
 0x1dd   : > { %v7832_v50 = vadd.f32 %v4364_v41, %v4316_v44  ;;  %4415 = vmatmul.bf16.gmra.mxu0 %v5619_v42  ;;  %v5747_v41 = vor.u32 %v6574_v32, %v5746_v31  ;;  %v5751_v42 = vor.u32 %v6566_v33, %v5748_v34  ;;  %v6700_v33 = vld [vmem:[%s7480_s9 + $0x240] sm:$0xff]  ;;  %v5874_v34 = vld [vmem:[%s8727_s0 + $0x310] sm:$0xf] }
 0x1de   : > { %4464 = vmatmul.bf16.gmra.mxu1 %v5623_v43 }
 0x1df   : > { %4513 = vmatmul.bf16.gmra.mxu2 %v5627_v47  ;;  %v5759_v47 = vor.u32 %v6567_v37, %v5756_v38  ;;  %v5876_v37 = vld [vmem:[%s8727_s0 + $0x350] sm:$0xf0]  ;;  %v5882_v38 = vld [vmem:[%s8727_s0 + $0x318] sm:$0xf] }
 0x1e0   : > { %4562 = vmatmul.bf16.gmra.mxu3 %v5631_v48  ;;  %4648 = vmatpush.bf16.msra.mxu1 %v6701_v62 }
 0x1e2   : > { %v4318_v54 = vpop.f32.mrf.mxu2  ;;  %v4222_v57 = vpop.f32.mrf.mxu0 }
 0x1e3   : > { %v4367_v55 = vpop.f32.mrf.mxu3  ;;  %v4319_v56 = vadd.f32 %v4318_v54, %v4270_v49  ;;  %v4271_v58 = vpop.f32.mrf.mxu1 }
 0x1e4   : > { %v4272_v59 = vadd.f32 %v4271_v58, %v4222_v57  ;;  %4649 = vmatpush.bf16.msra.mxu1 %v6700_v33 }
 0x1e5   : > { %v7837_v60 = vadd.f32 %v4367_v55, %v4319_v56 }
 0x1ea   : > { %v4320_v7 = vpop.f32.mrf.mxu2  ;;  %v4225_v12 = vpop.f32.mrf.mxu0 }
 0x1eb   : > { %v4369_v8 = vpop.f32.mrf.mxu3  ;;  %v4321_v11 = vadd.f32 %v4320_v7, %v4272_v59  ;;  %v4274_v13 = vpop.f32.mrf.mxu1  ;;  %v5820_v7 = vld [vmem:[%s8727_s0 + $0x2d8] sm:$0xf0] }
 0x1ec   : > { %v4275_v16 = vadd.f32 %v4274_v13, %v4225_v12 }
 0x1ed   : > { %v7864_v17 = vadd.f32 %v4369_v8, %v4321_v11  ;;  %4420 = vmatmul.bf16.gmra.mxu0 %v5683_v9  ;;  %v5815_v11 = vor.u32 %v6582_v2, %v5812_v3 }
 0x1ee   : > { %4469 = vmatmul.bf16.gmra.mxu1 %v5687_v10  ;;  %v5811_v10 = vor.u32 %v6590_v1, %v5810_v63 }
 0x1ef   : > { %4518 = vmatmul.bf16.gmra.mxu2 %v5691_v14 }
 0x1f0   : > { %4567 = vmatmul.bf16.gmra.mxu3 %v5695_v15  ;;  %v5819_v15 = vor.u32 %v6591_v5, %v5818_v4  ;;  %v6739_v4 = vld [vmem:[%s7480_s9 + $0x378] sm:$0xff]  ;;  %v5938_v5 = vld [vmem:[%s8727_s0 + $0x390] sm:$0xf] }
 0x1f1   : > { %4838 = vmatpush.bf16.msrb.mxu1 %v6739_v4  ;;  %v6745_v4 = vld [vmem:[%s7480_s9 + $0x3a8] sm:$0xff] }
 0x1f2   : > { %v4323_v22 = vpop.f32.mrf.mxu2  ;;  %v4227_v25 = vpop.f32.mrf.mxu0 }
 0x1f3   : > { %v4372_v23 = vpop.f32.mrf.mxu3  ;;  %v4324_v24 = vadd.f32 %v4323_v22, %v4275_v16  ;;  %v4276_v26 = vpop.f32.mrf.mxu1  ;;  %v5823_v16 = vor.u32 %v6583_v6, %v5820_v7  ;;  %v6692_v22 = vld [vmem:[%s7480_s9 + $0x200] sm:$0xff]  ;;  %v6622_v6 = vld [vmem:[%s8727_s0 + $0x3cc] sm:$0xf0]  ;;  %v6614_v7 = vld [vmem:[%s8727_s0 + $0x394] sm:$0xf] }
 0x1f4   : > { %v4277_v27 = vadd.f32 %v4276_v26, %v4227_v25  ;;  %4600 = vmatpush.bf16.msra.mxu0 %v6692_v22 }
 0x1f5   : > { %v7869_v28 = vadd.f32 %v4372_v23, %v4324_v24  ;;  %v6716_v23 = vld [vmem:[%s7480_s9 + $0x2c0] sm:$0xff] }
 0x1f6   : > { %4747 = vmatpush.bf16.msra.mxu3 %v6716_v23 }
 0x1fa   : > { %v4325_v39 = vpop.f32.mrf.mxu2  ;;  %v4230_v44 = vpop.f32.mrf.mxu0 }
 0x1fb   : > { %v4374_v40 = vpop.f32.mrf.mxu3  ;;  %v4326_v43 = vadd.f32 %v4325_v39, %v4277_v27  ;;  %v4279_v45 = vpop.f32.mrf.mxu1  ;;  %v6607_v39 = vld [vmem:[%s8727_s0 + $0x354] sm:$0xf0] }
 0x1fc   : > { %v4280_v48 = vadd.f32 %v4279_v45, %v4230_v44  ;;  %v5875_v44 = vor.u32 %v6606_v35, %v5874_v34  ;;  %v5879_v45 = vor.u32 %v6598_v36, %v5876_v37  ;;  %v5883_v51 = vor.u32 %v6607_v39, %v5882_v38 }
 0x1fd   : > { %v7896_v49 = vadd.f32 %v4374_v40, %v4326_v43  ;;  %4425 = vmatmul.bf16.gmra.mxu0 %v5747_v41  ;;  %v6599_v40 = vld [vmem:[%s8727_s0 + $0x31c] sm:$0xf] }
 0x1fe   : > { %4474 = vmatmul.bf16.gmra.mxu1 %v5751_v42  ;;  %v5884_v41 = vld [vmem:[%s8727_s0 + $0x358] sm:$0xf0] }
 0x1ff   : > { %4523 = vmatmul.bf16.gmra.mxu2 %v5755_v46  ;;  %v5887_v52 = vor.u32 %v6599_v40, %v5884_v41  ;;  %v6738_v40 = vld [vmem:[%s7480_s9 + $0x370] sm:$0xff]  ;;  %v5506_v41 = vld [vmem:[%s8727_s0 + $0x20] sm:$0xf] }
 0x200   : > { %4572 = vmatmul.bf16.gmra.mxu3 %v5759_v47  ;;  %4839 = vmatpush.bf16.msrb.mxu1 %v6738_v40 }
 0x202   : > { %v4328_v54 = vpop.f32.mrf.mxu2  ;;  %v4232_v57 = vpop.f32.mrf.mxu0 }
 0x203   : > { %v4377_v55 = vpop.f32.mrf.mxu3  ;;  %v4329_v56 = vadd.f32 %v4328_v54, %v4280_v48  ;;  %v4281_v58 = vpop.f32.mrf.mxu1 }
 0x204   : > { %v4282_v59 = vadd.f32 %v4281_v58, %v4232_v57  ;;  %v6755_v57 = vld [vmem:[%s7480_s9 + $0x3f8] sm:$0xff] }
 0x205   : > { %v7901_v61 = vadd.f32 %v4377_v55, %v4329_v56  ;;  %v6747_v55 = vld [vmem:[%s7480_s9 + $0x3b8] sm:$0xff]  ;;  %4936 = vmatpush.bf16.msrb.mxu3 %v6755_v57 }
 0x206   : > { %v6731_v56 = vld [vmem:[%s7480_s9 + $0x338] sm:$0xff]  ;;  %4887 = vmatpush.bf16.msrb.mxu2 %v6747_v55 }
 0x207   : > { %4789 = vmatpush.bf16.msrb.mxu0 %v6731_v56 }
 0x20a   : > { %v4330_v8 = vpop.f32.mrf.mxu2  ;;  %v4235_v13 = vpop.f32.mrf.mxu0 }
 0x20b   : > { %v4379_v9 = vpop.f32.mrf.mxu3  ;;  %v4331_v12 = vadd.f32 %v4330_v8, %v4282_v59  ;;  %v4284_v14 = vpop.f32.mrf.mxu1  ;;  %v5940_v8 = vld [vmem:[%s8727_s0 + $0x3d0] sm:$0xf0] }
 0x20c   : > { %v4285_v18 = vadd.f32 %v4284_v14, %v4235_v13 }
 0x20d   : > { %v7928_v19 = vadd.f32 %v4379_v9, %v4331_v12  ;;  %4430 = vmatmul.bf16.gmra.mxu0 %v5811_v10  ;;  %v5946_v9 = vld [vmem:[%s8727_s0 + $0x398] sm:$0xf]  ;;  %v5948_v12 = vld [vmem:[%s8727_s0 + $0x3d8] sm:$0xf0] }
 0x20e   : > { %4479 = vmatmul.bf16.gmra.mxu1 %v5815_v11  ;;  %v6623_v10 = vld [vmem:[%s8727_s0 + $0x3d4] sm:$0xf0]  ;;  %v6615_v11 = vld [vmem:[%s8727_s0 + $0x39c] sm:$0xf] }
 0x20f   : > { %4528 = vmatmul.bf16.gmra.mxu2 %v5819_v15  ;;  %v5939_v15 = vor.u32 %v6622_v6, %v5938_v5  ;;  %v5947_v23 = vor.u32 %v6623_v10, %v5946_v9  ;;  %v6729_v5 = vld [vmem:[%s7480_s9 + $0x328] sm:$0xff] }
 0x210   : > { %4577 = vmatmul.bf16.gmra.mxu3 %v5823_v16  ;;  %v5943_v16 = vor.u32 %v6614_v7, %v5940_v8  ;;  %v6753_v6 = vld [vmem:[%s7480_s9 + $0x3e8] sm:$0xff] }
 0x212   : > { %v4333_v24 = vpop.f32.mrf.mxu2  ;;  %v4237_v27 = vpop.f32.mrf.mxu0 }
 0x213   : > { %v4382_v25 = vpop.f32.mrf.mxu3  ;;  %v4334_v26 = vadd.f32 %v4333_v24, %v4285_v18  ;;  %v4286_v29 = vpop.f32.mrf.mxu1  ;;  %v5951_v24 = vor.u32 %v6615_v11, %v5948_v12 }
 0x214   : > { %v4287_v31 = vadd.f32 %v4286_v29, %v4237_v27  ;;  %v6746_v27 = vld [vmem:[%s7480_s9 + $0x3b0] sm:$0xff] }
 0x215   : > { %v7933_v32 = vadd.f32 %v4382_v25, %v4334_v26  ;;  %v6730_v29 = vld [vmem:[%s7480_s9 + $0x330] sm:$0xff]  ;;  %4888 = vmatpush.bf16.msrb.mxu2 %v6746_v27 }
 0x216   : > { %4790 = vmatpush.bf16.msrb.mxu0 %v6730_v29 }
 0x219   : > { %4889 = vmatpush.bf16.msrb.mxu2 %v6745_v4 }
 0x21a   : > { %v4335_v42 = vpop.f32.mrf.mxu2  ;;  %v4240_v47 = vpop.f32.mrf.mxu0  ;;  %4791 = vmatpush.bf16.msrb.mxu0 %v6729_v5 }
 0x21b   : > { %v4384_v43 = vpop.f32.mrf.mxu3  ;;  %v4336_v46 = vadd.f32 %v4335_v42, %v4287_v31  ;;  %v4289_v48 = vpop.f32.mrf.mxu1  ;;  %v6754_v31 = vld [vmem:[%s7480_s9 + $0x3f0] sm:$0xff]  ;;  %v6512_v42 = vld [vmem:[%s8727_s0 + $0x5c] sm:$0xf0] }
 0x21c   : > { %v4290_v53 = vadd.f32 %v4289_v48, %v4240_v47  ;;  %4937 = vmatpush.bf16.msrb.mxu3 %v6754_v31  ;;  %v6505_v47 = vld [vmem:[%s8727_s0 + $0x2c] sm:$0xf] }
 0x21d   : > { %v7960_v54 = vadd.f32 %v4384_v43, %v4336_v46  ;;  %4435 = vmatmul.bf16.gmra.mxu0 %v5875_v44  ;;  %v6504_v43 = vld [vmem:[%s8727_s0 + $0x24] sm:$0xf]  ;;  %v6513_v46 = vld [vmem:[%s8727_s0 + $0x64] sm:$0xf0]  ;;  %v5516_v48 = vld [vmem:[%s8727_s0 + $0x68] sm:$0xf0] }
 0x21e   : > { %4484 = vmatmul.bf16.gmra.mxu1 %v5879_v45  ;;  %v5508_v44 = vld [vmem:[%s8727_s0 + $0x60] sm:$0xf0]  ;;  %v5514_v45 = vld [vmem:[%s8727_s0 + $0x28] sm:$0xf] }
 0x21f   : > { %4533 = vmatmul.bf16.gmra.mxu2 %v5883_v51  ;;  %v5511_v55 = vor.u32 %v6504_v43, %v5508_v44  ;;  %v6728_v43 = vld [vmem:[%s7480_s9 + $0x320] sm:$0xff] }
 0x220   : > { %4582 = vmatmul.bf16.gmra.mxu3 %v5887_v52  ;;  %v6752_v44 = vld [vmem:[%s7480_s9 + $0x3e0] sm:$0xff]  ;;  %4792 = vmatpush.bf16.msrb.mxu0 %v6728_v43 }
 0x221   : > { %4938 = vmatpush.bf16.msrb.mxu3 %v6753_v6 }
 0x222   : > { %v4338_v58 = vpop.f32.mrf.mxu2  ;;  %v4242_v63 = vpop.f32.mrf.mxu0 }
 0x223   : > { %v4387_v59 = vpop.f32.mrf.mxu3  ;;  %v4339_v62 = vadd.f32 %v4338_v58, %v4290_v53  ;;  %v4291_v1 = vpop.f32.mrf.mxu1  ;;  %v5507_v53 = vor.u32 %v6512_v42, %v5506_v41  ;;  %v6744_v42 = vld [vmem:[%s7480_s9 + $0x3a0] sm:$0xff] }
 0x224   : > { %v4292_v2 = vadd.f32 %v4291_v1, %v4242_v63  ;;  %4890 = vmatpush.bf16.msrb.mxu2 %v6744_v42 }
 0x225   : > { %v7965_v3 = vadd.f32 %v4387_v59, %v4339_v62  ;;  %v5515_v59 = vor.u32 %v6513_v46, %v5514_v45  ;;  %v5519_v62 = vor.u32 %v6505_v47, %v5516_v48  ;;  %4939 = vmatpush.bf16.msrb.mxu3 %v6752_v44 }
 0x22a   : > { %v4340_v13 = vpop.f32.mrf.mxu2  ;;  %v4245_v21 = vpop.f32.mrf.mxu0 }
 0x22b   : > { %v4389_v14 = vpop.f32.mrf.mxu3  ;;  %v4341_v18 = vadd.f32 %v4340_v13, %v4292_v2  ;;  %v4294_v22 = vpop.f32.mrf.mxu1  ;;  %v6737_v13 = vld [vmem:[%s7480_s9 + $0x368] sm:$0xff] }
 0x22c   : > { %v4295_v25 = vadd.f32 %v4294_v22, %v4245_v21  ;;  %v5578_v21 = vld [vmem:[%s8727_s0 + $0xa8] sm:$0xf]  ;;  %4840 = vmatpush.bf16.msrb.mxu1 %v6737_v13 }
 0x22d   : > { %v7992_v26 = vadd.f32 %v4389_v14, %v4341_v18  ;;  %4440 = vmatmul.bf16.gmra.mxu0 %v5939_v15  ;;  %v5570_v15 = vld [vmem:[%s8727_s0 + $0xa0] sm:$0xf]  ;;  %v6520_v18 = vld [vmem:[%s8727_s0 + $0xa4] sm:$0xf]  ;;  %v6529_v22 = vld [vmem:[%s8727_s0 + $0xe4] sm:$0xf0] }
 0x22e   : > { %4489 = vmatmul.bf16.gmra.mxu1 %v5943_v16  ;;  %v6528_v16 = vld [vmem:[%s8727_s0 + $0xdc] sm:$0xf0] }
 0x22f   : > { %4538 = vmatmul.bf16.gmra.mxu2 %v5947_v23  ;;  %v6521_v23 = vld [vmem:[%s8727_s0 + $0xac] sm:$0xf]  ;;  %v5571_v29 = vor.u32 %v6528_v16, %v5570_v15  ;;  %v6743_v16 = vld [vmem:[%s7480_s9 + $0x398] sm:$0xff] }
 0x230   : > { %4587 = vmatmul.bf16.gmra.mxu3 %v5951_v24  ;;  %v5580_v24 = vld [vmem:[%s8727_s0 + $0xe8] sm:$0xf0]  ;;  %4891 = vmatpush.bf16.msrb.mxu2 %v6743_v16 }
 0x232   : > { %v4343_v33 = vpop.f32.mrf.mxu2  ;;  %v4247_v36 = vpop.f32.mrf.mxu0 }
 0x233   : > { %v4392_v34 = vpop.f32.mrf.mxu3  ;;  %v4344_v35 = vadd.f32 %v4343_v33, %v4295_v25  ;;  %v4296_v37 = vpop.f32.mrf.mxu1 }
 0x234   : > { %v4297_v38 = vadd.f32 %v4296_v37, %v4247_v36  ;;  %v5579_v36 = vor.u32 %v6529_v22, %v5578_v21  ;;  %v5583_v37 = vor.u32 %v6521_v23, %v5580_v24 }
 0x235   : > { %v7997_v39 = vadd.f32 %v4392_v34, %v4344_v35 }
 0x23a   : > { %v4345_v51 = vpop.f32.mrf.mxu2  ;;  %v4406_v57 = vpop.f32.mrf.mxu0 }
 0x23b   : > { %v4394_v52 = vpop.f32.mrf.mxu3  ;;  %v4346_v56 = vadd.f32 %v4345_v51, %v4297_v38  ;;  %v4455_v58 = vpop.f32.mrf.mxu1  ;;  %v4407_v63 = vadd.f32 %v4406_v57, %v7773_v0  ;;  %v6544_v57 = vld [vmem:[%s8727_s0 + $0x15c] sm:$0xf0] }
 0x23d   : > { %v8025_v1 = vadd.f32 %v4394_v52, %v4346_v56  ;;  %v4456_v2 = vadd.f32 %v4455_v58, %v4407_v63  ;;  %4601 = vmatmul.bf16.vlgmr.msra.gmra.mxu0 %v5507_v53  ;;  %v6736_v53 = vld [vmem:[%s7480_s9 + $0x360] sm:$0xff]  ;;  %v6537_v63 = vld [vmem:[%s8727_s0 + $0x12c] sm:$0xf] }
 0x23e   : > { %4650 = vmatmul.bf16.vlgmr.msra.gmra.mxu1 %v5511_v55  ;;  %v5634_v56 = vld [vmem:[%s8727_s0 + $0x120] sm:$0xf]  ;;  %v6536_v58 = vld [vmem:[%s8727_s0 + $0x124] sm:$0xf] }
 0x23f   : > { %4699 = vmatmul.bf16.vlgmr.msra.gmra.mxu2 %v5515_v59  ;;  %v5642_v59 = vld [vmem:[%s8727_s0 + $0x128] sm:$0xf]  ;;  %4841 = vmatpush.bf16.msrb.mxu1 %v6736_v53  ;;  %v5635_v6 = vor.u32 %v6544_v57, %v5634_v56  ;;  %v6742_v57 = vld [vmem:[%s7480_s9 + $0x390] sm:$0xff] }
 0x240   : > { %4748 = vmatmul.bf16.vlgmr.msra.gmra.mxu3 %v5519_v62  ;;  %v6545_v62 = vld [vmem:[%s8727_s0 + $0x164] sm:$0xf0]  ;;  %4892 = vmatpush.bf16.msrb.mxu2 %v6742_v57 }
 0x242   : > { %v4504_v7 = vpop.f32.mrf.mxu2  ;;  %v4408_v10 = vpop.f32.mrf.mxu0 }
 0x243   : > { %v4553_v8 = vpop.f32.mrf.mxu3  ;;  %v4505_v9 = vadd.f32 %v4504_v7, %v4456_v2  ;;  %v4457_v11 = vpop.f32.mrf.mxu1  ;;  %v4409_v0 = vadd.f32 %v4408_v10, %v7800_v20  ;;  %v5572_v20 = vld [vmem:[%s8727_s0 + $0xe0] sm:$0xf0]  ;;  %v5644_v2 = vld [vmem:[%s8727_s0 + $0x168] sm:$0xf0] }
 0x244   : > { %v5575_v31 = vor.u32 %v6520_v18, %v5572_v20  ;;  %v6727_v18 = vld [vmem:[%s7480_s9 + $0x318] sm:$0xff] }
 0x245   : > { %v8031_v12 = vadd.f32 %v4553_v8, %v4505_v9  ;;  %v4458_v14 = vadd.f32 %v4457_v11, %v4409_v0  ;;  %v5643_v11 = vor.u32 %v6545_v62, %v5642_v59  ;;  %v5647_v0 = vor.u32 %v6537_v63, %v5644_v2  ;;  %v6751_v20 = vld [vmem:[%s7480_s9 + $0x3d8] sm:$0xff]  ;;  %4793 = vmatpush.bf16.msrb.mxu0 %v6727_v18 }
 0x246   : > { %4940 = vmatpush.bf16.msrb.mxu3 %v6751_v20 }
 0x24a   : > { %v4506_v25 = vpop.f32.mrf.mxu2  ;;  %v4411_v34 = vpop.f32.mrf.mxu0 }
 0x24b   : > { %v4555_v27 = vpop.f32.mrf.mxu3  ;;  %v4507_v33 = vadd.f32 %v4506_v25, %v4458_v14  ;;  %v4460_v35 = vpop.f32.mrf.mxu1  ;;  %v4412_v38 = vadd.f32 %v4411_v34, %v7805_v30  ;;  %v6560_v34 = vld [vmem:[%s8727_s0 + $0x1dc] sm:$0xf0] }
 0x24d   : > { %v8059_v40 = vadd.f32 %v4555_v27, %v4507_v33  ;;  %v4461_v41 = vadd.f32 %v4460_v35, %v4412_v38  ;;  %4606 = vmatmul.bf16.gmra.mxu0 %v5571_v29  ;;  %v6735_v29 = vld [vmem:[%s7480_s9 + $0x358] sm:$0xff]  ;;  %v5698_v33 = vld [vmem:[%s8727_s0 + $0x1a0] sm:$0xf]  ;;  %v6552_v35 = vld [vmem:[%s8727_s0 + $0x1a4] sm:$0xf] }
 0x24e   : > { %4655 = vmatmul.bf16.gmra.mxu1 %v5575_v31  ;;  %v6553_v38 = vld [vmem:[%s8727_s0 + $0x1ac] sm:$0xf]  ;;  %v5699_v44 = vor.u32 %v6560_v34, %v5698_v33 }
 0x24f   : > { %4704 = vmatmul.bf16.gmra.mxu2 %v5579_v36  ;;  %v5706_v36 = vld [vmem:[%s8727_s0 + $0x1a8] sm:$0xf]  ;;  %4842 = vmatpush.bf16.msrb.mxu1 %v6735_v29 }
 0x250   : > { %4753 = vmatmul.bf16.gmra.mxu3 %v5583_v37  ;;  %v6561_v37 = vld [vmem:[%s8727_s0 + $0x1e4] sm:$0xf0] }
 0x251   : > { %v6741_v34 = vld [vmem:[%s7480_s9 + $0x388] sm:$0xff] }
 0x252   : > { %v4509_v45 = vpop.f32.mrf.mxu2  ;;  %v4413_v48 = vpop.f32.mrf.mxu0  ;;  %4893 = vmatpush.bf16.msrb.mxu2 %v6741_v34 }
 0x253   : > { %v4558_v46 = vpop.f32.mrf.mxu3  ;;  %v4510_v47 = vadd.f32 %v4509_v45, %v4461_v41  ;;  %v4462_v51 = vpop.f32.mrf.mxu1  ;;  %v4414_v30 = vadd.f32 %v4413_v48, %v7832_v50  ;;  %v5636_v50 = vld [vmem:[%s8727_s0 + $0x160] sm:$0xf0]  ;;  %v5708_v41 = vld [vmem:[%s8727_s0 + $0x1e8] sm:$0xf0] }
 0x254   : > { %v5639_v7 = vor.u32 %v6536_v58, %v5636_v50  ;;  %v6726_v58 = vld [vmem:[%s7480_s9 + $0x310] sm:$0xff] }
 0x255   : > { %v8065_v52 = vadd.f32 %v4558_v46, %v4510_v47  ;;  %v4463_v55 = vadd.f32 %v4462_v51, %v4414_v30  ;;  %v5707_v51 = vor.u32 %v6561_v37, %v5706_v36  ;;  %v5711_v30 = vor.u32 %v6553_v38, %v5708_v41  ;;  %v6750_v50 = vld [vmem:[%s7480_s9 + $0x3d0] sm:$0xff]  ;;  %4794 = vmatpush.bf16.msrb.mxu0 %v6726_v58 }
 0x256   : > { %4941 = vmatpush.bf16.msrb.mxu3 %v6750_v50 }
 0x25a   : > { %v4511_v4 = vpop.f32.mrf.mxu2  ;;  %v4416_v9 = vpop.f32.mrf.mxu0 }
 0x25b   : > { %v4560_v5 = vpop.f32.mrf.mxu3  ;;  %v4512_v8 = vadd.f32 %v4511_v4, %v4463_v55  ;;  %v4465_v10 = vpop.f32.mrf.mxu1  ;;  %v4417_v13 = vadd.f32 %v4416_v9, %v7837_v60  ;;  %v6576_v9 = vld [vmem:[%s8727_s0 + $0x25c] sm:$0xf0] }
 0x25d   : > { %v8093_v14 = vadd.f32 %v4560_v5, %v4512_v8  ;;  %v4466_v15 = vadd.f32 %v4465_v10, %v4417_v13  ;;  %4611 = vmatmul.bf16.gmra.mxu0 %v5635_v6  ;;  %v6734_v6 = vld [vmem:[%s7480_s9 + $0x350] sm:$0xff]  ;;  %v5762_v8 = vld [vmem:[%s8727_s0 + $0x220] sm:$0xf]  ;;  %v6568_v10 = vld [vmem:[%s8727_s0 + $0x224] sm:$0xf] }
 0x25e   : > { %4660 = vmatmul.bf16.gmra.mxu1 %v5639_v7  ;;  %v6569_v13 = vld [vmem:[%s8727_s0 + $0x22c] sm:$0xf]  ;;  %v5763_v20 = vor.u32 %v6576_v9, %v5762_v8  ;;  %v6740_v9 = vld [vmem:[%s7480_s9 + $0x380] sm:$0xff] }
 0x25f   : > { %4709 = vmatmul.bf16.gmra.mxu2 %v5643_v11  ;;  %v5770_v11 = vld [vmem:[%s8727_s0 + $0x228] sm:$0xf]  ;;  %4843 = vmatpush.bf16.msrb.mxu1 %v6734_v6 }
 0x260   : > { %4758 = vmatmul.bf16.gmra.mxu3 %v5647_v0  ;;  %v6577_v0 = vld [vmem:[%s8727_s0 + $0x264] sm:$0xf0]  ;;  %4894 = vmatpush.bf16.msrb.mxu2 %v6740_v9 }
 0x262   : > { %v4514_v21 = vpop.f32.mrf.mxu2  ;;  %v4418_v24 = vpop.f32.mrf.mxu0 }
 0x263   : > { %v4563_v22 = vpop.f32.mrf.mxu3  ;;  %v4515_v23 = vadd.f32 %v4514_v21, %v4466_v15  ;;  %v4467_v25 = vpop.f32.mrf.mxu1  ;;  %v4419_v60 = vadd.f32 %v4418_v24, %v7864_v17  ;;  %v5700_v17 = vld [vmem:[%s8727_s0 + $0x1e0] sm:$0xf0]  ;;  %v5772_v15 = vld [vmem:[%s8727_s0 + $0x268] sm:$0xf0] }
 0x264   : > { %v5703_v45 = vor.u32 %v6552_v35, %v5700_v17  ;;  %v6725_v35 = vld [vmem:[%s7480_s9 + $0x308] sm:$0xff] }
 0x265   : > { %v8099_v27 = vadd.f32 %v4563_v22, %v4515_v23  ;;  %v4468_v31 = vadd.f32 %v4467_v25, %v4419_v60  ;;  %v5771_v25 = vor.u32 %v6577_v0, %v5770_v11  ;;  %v5775_v60 = vor.u32 %v6569_v13, %v5772_v15  ;;  %v6749_v17 = vld [vmem:[%s7480_s9 + $0x3c8] sm:$0xff]  ;;  %4795 = vmatpush.bf16.msrb.mxu0 %v6725_v35 }
 0x266   : > { %4942 = vmatpush.bf16.msrb.mxu3 %v6749_v17 }
 0x26a   : > { %v4516_v42 = vpop.f32.mrf.mxu2  ;;  %v4421_v47 = vpop.f32.mrf.mxu0 }
 0x26b   : > { %v4565_v43 = vpop.f32.mrf.mxu3  ;;  %v4517_v46 = vadd.f32 %v4516_v42, %v4468_v31  ;;  %v4470_v48 = vpop.f32.mrf.mxu1  ;;  %v4422_v53 = vadd.f32 %v4421_v47, %v7869_v28  ;;  %v6592_v47 = vld [vmem:[%s8727_s0 + $0x2dc] sm:$0xf0] }
 0x26d   : > { %v8127_v55 = vadd.f32 %v4565_v43, %v4517_v46  ;;  %v4471_v56 = vadd.f32 %v4470_v48, %v4422_v53  ;;  %4616 = vmatmul.bf16.gmra.mxu0 %v5699_v44  ;;  %v6733_v44 = vld [vmem:[%s7480_s9 + $0x348] sm:$0xff]  ;;  %v5826_v46 = vld [vmem:[%s8727_s0 + $0x2a0] sm:$0xf]  ;;  %v6584_v48 = vld [vmem:[%s8727_s0 + $0x2a4] sm:$0xf] }
 0x26e   : > { %4665 = vmatmul.bf16.gmra.mxu1 %v5703_v45  ;;  %v6585_v53 = vld [vmem:[%s8727_s0 + $0x2ac] sm:$0xf]  ;;  %v5827_v50 = vor.u32 %v6592_v47, %v5826_v46 }
 0x26f   : > { %4714 = vmatmul.bf16.gmra.mxu2 %v5707_v51  ;;  %v5834_v51 = vld [vmem:[%s8727_s0 + $0x2a8] sm:$0xf]  ;;  %4844 = vmatpush.bf16.msrb.mxu1 %v6733_v44 }
 0x270   : > { %4763 = vmatmul.bf16.gmra.mxu3 %v5711_v30  ;;  %v6593_v30 = vld [vmem:[%s8727_s0 + $0x2e4] sm:$0xf0] }
 0x272   : > { %v4519_v59 = vpop.f32.mrf.mxu2  ;;  %v4423_v2 = vpop.f32.mrf.mxu0 }
 0x273   : > { %v4568_v62 = vpop.f32.mrf.mxu3  ;;  %v4520_v63 = vadd.f32 %v4519_v59, %v4471_v56  ;;  %v4472_v4 = vpop.f32.mrf.mxu1  ;;  %v4424_v28 = vadd.f32 %v4423_v2, %v7896_v49  ;;  %v5764_v49 = vld [vmem:[%s8727_s0 + $0x260] sm:$0xf0]  ;;  %v5836_v56 = vld [vmem:[%s8727_s0 + $0x2e8] sm:$0xf0] }
 0x274   : > { %v5767_v21 = vor.u32 %v6568_v10, %v5764_v49  ;;  %v6724_v10 = vld [vmem:[%s7480_s9 + $0x300] sm:$0xff] }
 0x275   : > { %v8133_v5 = vadd.f32 %v4568_v62, %v4520_v63  ;;  %v4473_v7 = vadd.f32 %v4472_v4, %v4424_v28  ;;  %v5835_v4 = vor.u32 %v6593_v30, %v5834_v51  ;;  %v5839_v28 = vor.u32 %v6585_v53, %v5836_v56  ;;  %v6748_v49 = vld [vmem:[%s7480_s9 + $0x3c0] sm:$0xff]  ;;  %4796 = vmatpush.bf16.msrb.mxu0 %v6724_v10 }
 0x276   : > { %4943 = vmatpush.bf16.msrb.mxu3 %v6748_v49 }
 0x27a   : > { %v4521_v16 = vpop.f32.mrf.mxu2  ;;  %v4426_v23 = vpop.f32.mrf.mxu0 }
 0x27b   : > { %v4570_v18 = vpop.f32.mrf.mxu3  ;;  %v4522_v22 = vadd.f32 %v4521_v16, %v4473_v7  ;;  %v4475_v24 = vpop.f32.mrf.mxu1  ;;  %v4427_v29 = vadd.f32 %v4426_v23, %v7901_v61  ;;  %v6608_v23 = vld [vmem:[%s8727_s0 + $0x35c] sm:$0xf0] }
 0x27d   : > { %v8161_v31 = vadd.f32 %v4570_v18, %v4522_v22  ;;  %v4476_v33 = vadd.f32 %v4475_v24, %v4427_v29  ;;  %4621 = vmatmul.bf16.gmra.mxu0 %v5763_v20  ;;  %v6732_v20 = vld [vmem:[%s7480_s9 + $0x340] sm:$0xff]  ;;  %v6601_v29 = vld [vmem:[%s8727_s0 + $0x32c] sm:$0xf]  ;;  %s2372_s9 = scalar_lea.vmem %s8730_s3, %s8509_s23 }
 0x27e   : > { %4670 = vmatmul.bf16.gmra.mxu1 %v5767_v21  ;;  %v5890_v22 = vld [vmem:[%s8727_s0 + $0x320] sm:$0xf]  ;;  %v6600_v24 = vld [vmem:[%s8727_s0 + $0x324] sm:$0xf] }
 0x27f   : > { %4719 = vmatmul.bf16.gmra.mxu2 %v5771_v25  ;;  %v5898_v25 = vld [vmem:[%s8727_s0 + $0x328] sm:$0xf]  ;;  %4845 = vmatpush.bf16.msrb.mxu1 %v6732_v20  ;;  %v5891_v17 = vor.u32 %v6608_v23, %v5890_v22 }
 0x280   : > { %4768 = vmatmul.bf16.gmra.mxu3 %v5775_v60  ;;  %v6609_v60 = vld [vmem:[%s8727_s0 + $0x364] sm:$0xf0] }
 0x282   : > { %v4524_v36 = vpop.f32.mrf.mxu2  ;;  %v4428_v41 = vpop.f32.mrf.mxu0 }
 0x283   : > { %v4573_v37 = vpop.f32.mrf.mxu3  ;;  %v4525_v38 = vadd.f32 %v4524_v36, %v4476_v33  ;;  %v4477_v42 = vpop.f32.mrf.mxu1  ;;  %v4429_v61 = vadd.f32 %v4428_v41, %v7928_v19  ;;  %v5828_v19 = vld [vmem:[%s8727_s0 + $0x2e0] sm:$0xf0]  ;;  %v5900_v33 = vld [vmem:[%s8727_s0 + $0x368] sm:$0xf0] }
 0x284   : > { %v5831_v59 = vor.u32 %v6584_v48, %v5828_v19 }
 0x285   : > { %v8167_v43 = vadd.f32 %v4573_v37, %v4525_v38  ;;  %v4478_v45 = vadd.f32 %v4477_v42, %v4429_v61  ;;  %v5899_v42 = vor.u32 %v6609_v60, %v5898_v25  ;;  %v5903_v61 = vor.u32 %v6601_v29, %v5900_v33  ;;  %v6514_v60 = vld [vmem:[%s8727_s0 + $0x6c] sm:$0xf0]  ;;  %v6506_v29 = vld [vmem:[%s8727_s0 + $0x34] sm:$0xf] }
 0x286   : > { %v5524_v33 = vld [vmem:[%s8727_s0 + $0x70] sm:$0xf0] }
 0x28a   : > { %v4526_v57 = vpop.f32.mrf.mxu2  ;;  %v4431_v63 = vpop.f32.mrf.mxu0 }
 0x28b   : > { %v4575_v58 = vpop.f32.mrf.mxu3  ;;  %v4527_v62 = vadd.f32 %v4526_v57, %v4478_v45  ;;  %v4480_v2 = vpop.f32.mrf.mxu1  ;;  %v4432_v6 = vadd.f32 %v4431_v63, %v7933_v32  ;;  %v6617_v63 = vld [vmem:[%s8727_s0 + $0x3ac] sm:$0xf] }
 0x28d   : > { %v8195_v7 = vadd.f32 %v4575_v58, %v4527_v62  ;;  %v4481_v8 = vadd.f32 %v4480_v2, %v4432_v6  ;;  %4626 = vmatmul.bf16.gmra.mxu0 %v5827_v50  ;;  %v6624_v58 = vld [vmem:[%s8727_s0 + $0x3dc] sm:$0xf0]  ;;  %v6616_v50 = vld [vmem:[%s8727_s0 + $0x3a4] sm:$0xf]  ;;  %v6625_v62 = vld [vmem:[%s8727_s0 + $0x3e4] sm:$0xf0] }
 0x28e   : > { %4675 = vmatmul.bf16.gmra.mxu1 %v5831_v59  ;;  %v5956_v59 = vld [vmem:[%s8727_s0 + $0x3e0] sm:$0xf0]  ;;  %v5964_v2 = vld [vmem:[%s8727_s0 + $0x3e8] sm:$0xf0] }
 0x28f   : > { %4724 = vmatmul.bf16.gmra.mxu2 %v5835_v4 }
 0x290   : > { %4773 = vmatmul.bf16.gmra.mxu3 %v5839_v28 }
 0x292   : > { %v4529_v11 = vpop.f32.mrf.mxu2  ;;  %v4433_v15 = vpop.f32.mrf.mxu0 }
 0x293   : > { %v4578_v0 = vpop.f32.mrf.mxu3  ;;  %v4530_v13 = vadd.f32 %v4529_v11, %v4481_v8  ;;  %v4482_v16 = vpop.f32.mrf.mxu1  ;;  %v4434_v32 = vadd.f32 %v4433_v15, %v7960_v54  ;;  %v5892_v54 = vld [vmem:[%s8727_s0 + $0x360] sm:$0xf0]  ;;  %v5959_v8 = vor.u32 %v6616_v50, %v5956_v59 }
 0x294   : > { %v5895_v36 = vor.u32 %v6600_v24, %v5892_v54 }
 0x295   : > { %v8201_v18 = vadd.f32 %v4578_v0, %v4530_v13  ;;  %v4483_v21 = vadd.f32 %v4482_v16, %v4434_v32  ;;  %v5967_v0 = vor.u32 %v6617_v63, %v5964_v2  ;;  %v6522_v63 = vld [vmem:[%s8727_s0 + $0xb4] sm:$0xf] }
 0x296   : > { %v5588_v2 = vld [vmem:[%s8727_s0 + $0xf0] sm:$0xf0] }
 0x29a   : > { %v4531_v34 = vpop.f32.mrf.mxu2  ;;  %v4436_v38 = vpop.f32.mrf.mxu0 }
 0x29b   : > { %v4580_v35 = vpop.f32.mrf.mxu3  ;;  %v4532_v37 = vadd.f32 %v4531_v34, %v4483_v21  ;;  %v4485_v41 = vpop.f32.mrf.mxu1  ;;  %v4437_v44 = vadd.f32 %v4436_v38, %v7965_v3  ;;  %v5954_v3 = vld [vmem:[%s8727_s0 + $0x3a0] sm:$0xf]  ;;  %v6515_v34 = vld [vmem:[%s8727_s0 + $0x74] sm:$0xf0] }
 0x29c   : > { %v5955_v6 = vor.u32 %v6624_v58, %v5954_v3 }
 0x29d   : > { %v8229_v45 = vadd.f32 %v4580_v35, %v4532_v37  ;;  %v4486_v46 = vadd.f32 %v4485_v41, %v4437_v44  ;;  %4631 = vmatmul.bf16.gmra.mxu0 %v5891_v17  ;;  %v6507_v35 = vld [vmem:[%s8727_s0 + $0x3c] sm:$0xf]  ;;  %v5527_v41 = vor.u32 %v6506_v29, %v5524_v33 }
 0x29e   : > { %4680 = vmatmul.bf16.gmra.mxu1 %v5895_v36  ;;  %v5532_v17 = vld [vmem:[%s8727_s0 + $0x78] sm:$0xf0] }
 0x29f   : > { %4729 = vmatmul.bf16.gmra.mxu2 %v5899_v42 }
 0x2a0   : > { %4778 = vmatmul.bf16.gmra.mxu3 %v5903_v61 }
 0x2a2   : > { %v4534_v47 = vpop.f32.mrf.mxu2  ;;  %v4438_v51 = vpop.f32.mrf.mxu0 }
 0x2a3   : > { %v4583_v48 = vpop.f32.mrf.mxu3  ;;  %v4535_v19 = vadd.f32 %v4534_v47, %v4486_v46  ;;  %v4487_v30 = vpop.f32.mrf.mxu1  ;;  %v4439_v53 = vadd.f32 %v4438_v51, %v7992_v26  ;;  %v5962_v26 = vld [vmem:[%s8727_s0 + $0x3a8] sm:$0xf]  ;;  %v5535_v47 = vor.u32 %v6507_v35, %v5532_v17  ;;  %v6538_v35 = vld [vmem:[%s8727_s0 + $0x134] sm:$0xf] }
 0x2a4   : > { %v5963_v11 = vor.u32 %v6625_v62, %v5962_v26  ;;  %v6530_v62 = vld [vmem:[%s8727_s0 + $0xec] sm:$0xf0]  ;;  %v5652_v17 = vld [vmem:[%s8727_s0 + $0x170] sm:$0xf0] }
 0x2a5   : > { %v8232_v56 = vadd.f32 %v4583_v48, %v4535_v19  ;;  %v4488_v57 = vadd.f32 %v4487_v30, %v4439_v53 }
 0x2aa   : > { %v4536_v4 = vpop.f32.mrf.mxu2  ;;  %v4441_v10 = vpop.f32.mrf.mxu0 }
 0x2ab   : > { %v4585_v28 = vpop.f32.mrf.mxu3  ;;  %v4537_v9 = vadd.f32 %v4536_v4, %v4488_v57  ;;  %v4490_v49 = vpop.f32.mrf.mxu1  ;;  %v4442_v13 = vadd.f32 %v4441_v10, %v7997_v39  ;;  %v5522_v39 = vld [vmem:[%s8727_s0 + $0x30] sm:$0xf]  ;;  %v6531_v4 = vld [vmem:[%s8727_s0 + $0xf4] sm:$0xf0] }
 0x2ac   : > { %v5523_v38 = vor.u32 %v6514_v60, %v5522_v39 }
 0x2ad   : > { %v8259_v15 = vadd.f32 %v4585_v28, %v4537_v9  ;;  %v4491_v16 = vadd.f32 %v4490_v49, %v4442_v13  ;;  %4636 = vmatmul.bf16.gmra.mxu0 %v5955_v6  ;;  %v6523_v28 = vld [vmem:[%s8727_s0 + $0xbc] sm:$0xf]  ;;  %v5591_v49 = vor.u32 %v6522_v63, %v5588_v2 }
 0x2ae   : > { %4685 = vmatmul.bf16.gmra.mxu1 %v5959_v8  ;;  %v5596_v6 = vld [vmem:[%s8727_s0 + $0xf8] sm:$0xf0] }
 0x2af   : > { %4734 = vmatmul.bf16.gmra.mxu2 %v5963_v11 }
 0x2b0   : > { %4783 = vmatmul.bf16.gmra.mxu3 %v5967_v0 }
 0x2b2   : > { %v4539_v32 = vpop.f32.mrf.mxu2  ;;  %v4443_v22 = vpop.f32.mrf.mxu0 }
 0x2b3   : > { %v4588_v20 = vpop.f32.mrf.mxu3  ;;  %v4540_v21 = vadd.f32 %v4539_v32, %v4491_v16  ;;  %v4492_v23 = vpop.f32.mrf.mxu1  ;;  %v4444_v24 = vadd.f32 %v4443_v22, %v8025_v1  ;;  %v5530_v1 = vld [vmem:[%s8727_s0 + $0x38] sm:$0xf]  ;;  %v5599_v32 = vor.u32 %v6523_v28, %v5596_v6  ;;  %v6554_v28 = vld [vmem:[%s8727_s0 + $0x1b4] sm:$0xf] }
 0x2b4   : > { %v5531_v46 = vor.u32 %v6515_v34, %v5530_v1  ;;  %v6546_v34 = vld [vmem:[%s8727_s0 + $0x16c] sm:$0xf0]  ;;  %v5716_v6 = vld [vmem:[%s8727_s0 + $0x1f0] sm:$0xf0] }
 0x2b5   : > { %v8262_v54 = vadd.f32 %v4588_v20, %v4540_v21  ;;  %v4493_v25 = vadd.f32 %v4492_v23, %v4444_v24 }
 0x2ba   : > { %v4541_v36 = vpop.f32.mrf.mxu2  ;;  %v4602_v61 = vpop.f32.mrf.mxu0 }
 0x2bb   : > { %v4590_v37 = vpop.f32.mrf.mxu3  ;;  %v4542_v42 = vadd.f32 %v4541_v36, %v4493_v25  ;;  %v4651_v44 = vpop.f32.mrf.mxu1  ;;  %v4603_v48 = vadd.f32 %v4602_v61, %v8031_v12  ;;  %v5586_v12 = vld [vmem:[%s8727_s0 + $0xb0] sm:$0xf]  ;;  %v6547_v36 = vld [vmem:[%s8727_s0 + $0x174] sm:$0xf0] }
 0x2bc   : > { %v5587_v10 = vor.u32 %v6530_v62, %v5586_v12 }
 0x2bd   : > { %v8289_v19 = vadd.f32 %v4590_v37, %v4542_v42  ;;  %v4652_v51 = vadd.f32 %v4651_v44, %v4603_v48  ;;  %4797 = vmatmul.bf16.vlgmr.msrb.gmra.mxu0 %v5523_v38  ;;  %v6539_v37 = vld [vmem:[%s8727_s0 + $0x13c] sm:$0xf]  ;;  %v5655_v44 = vor.u32 %v6538_v35, %v5652_v17 }
 0x2be   : > { %4846 = vmatmul.bf16.vlgmr.msrb.gmra.mxu1 %v5527_v41  ;;  %v5660_v38 = vld [vmem:[%s8727_s0 + $0x178] sm:$0xf0] }
 0x2bf   : > { %4895 = vmatmul.bf16.vlgmr.msrb.gmra.mxu2 %v5531_v46 }
 0x2c0   : > { %4944 = vmatmul.bf16.vlgmr.msrb.gmra.mxu3 %v5535_v47 }
 0x2c2   : > { %v4700_v30 = vpop.f32.mrf.mxu2  ;;  %v4604_v3 = vpop.f32.mrf.mxu0 }
 0x2c3   : > { %v4749_v53 = vpop.f32.mrf.mxu3  ;;  %v4701_v57 = vadd.f32 %v4700_v30, %v4652_v51  ;;  %v4653_v58 = vpop.f32.mrf.mxu1  ;;  %v4605_v50 = vadd.f32 %v4604_v3, %v8059_v40  ;;  %v5594_v40 = vld [vmem:[%s8727_s0 + $0xb8] sm:$0xf]  ;;  %v5663_v30 = vor.u32 %v6539_v37, %v5660_v38  ;;  %v6570_v37 = vld [vmem:[%s8727_s0 + $0x234] sm:$0xf] }
 0x2c4   : > { %v5595_v16 = vor.u32 %v6531_v4, %v5594_v40  ;;  %v6562_v4 = vld [vmem:[%s8727_s0 + $0x1ec] sm:$0xf0]  ;;  %v5780_v38 = vld [vmem:[%s8727_s0 + $0x270] sm:$0xf0] }
 0x2c5   : > { %v8292_v59 = vadd.f32 %v4749_v53, %v4701_v57  ;;  %v4654_v26 = vadd.f32 %v4653_v58, %v4605_v50 }
 0x2ca   : > { %v4702_v8 = vpop.f32.mrf.mxu2  ;;  %v4607_v0 = vpop.f32.mrf.mxu0 }
 0x2cb   : > { %v4751_v9 = vpop.f32.mrf.mxu3  ;;  %v4703_v11 = vadd.f32 %v4702_v8, %v4654_v26  ;;  %v4656_v13 = vpop.f32.mrf.mxu1  ;;  %v4608_v20 = vadd.f32 %v4607_v0, %v8065_v52  ;;  %v5650_v52 = vld [vmem:[%s8727_s0 + $0x130] sm:$0xf]  ;;  %v6563_v8 = vld [vmem:[%s8727_s0 + $0x1f4] sm:$0xf0] }
 0x2cc   : > { %v5651_v61 = vor.u32 %v6546_v34, %v5650_v52 }
 0x2cd   : > { %v8319_v21 = vadd.f32 %v4751_v9, %v4703_v11  ;;  %v4657_v22 = vadd.f32 %v4656_v13, %v4608_v20  ;;  %4802 = vmatmul.bf16.gmra.mxu0 %v5587_v10  ;;  %v6555_v9 = vld [vmem:[%s8727_s0 + $0x1bc] sm:$0xf]  ;;  %v5719_v13 = vor.u32 %v6554_v28, %v5716_v6 }
 0x2ce   : > { %4851 = vmatmul.bf16.gmra.mxu1 %v5591_v49  ;;  %v5724_v10 = vld [vmem:[%s8727_s0 + $0x1f8] sm:$0xf0] }
 0x2cf   : > { %4900 = vmatmul.bf16.gmra.mxu2 %v5595_v16 }
 0x2d0   : > { %4949 = vmatmul.bf16.gmra.mxu3 %v5599_v32 }
 0x2d2   : > { %v4705_v23 = vpop.f32.mrf.mxu2  ;;  %v4609_v39 = vpop.f32.mrf.mxu0 }
 0x2d3   : > { %v4754_v24 = vpop.f32.mrf.mxu3  ;;  %v4706_v25 = vadd.f32 %v4705_v23, %v4657_v22  ;;  %v4658_v60 = vpop.f32.mrf.mxu1  ;;  %v4610_v29 = vadd.f32 %v4609_v39, %v8093_v14  ;;  %v5658_v14 = vld [vmem:[%s8727_s0 + $0x138] sm:$0xf]  ;;  %v5727_v23 = vor.u32 %v6555_v9, %v5724_v10  ;;  %v6586_v9 = vld [vmem:[%s8727_s0 + $0x2b4] sm:$0xf] }
 0x2d4   : > { %v5659_v51 = vor.u32 %v6547_v36, %v5658_v14  ;;  %v6578_v36 = vld [vmem:[%s8727_s0 + $0x26c] sm:$0xf0]  ;;  %v5844_v10 = vld [vmem:[%s8727_s0 + $0x2f0] sm:$0xf0] }
 0x2d5   : > { %v8322_v33 = vadd.f32 %v4754_v24, %v4706_v25  ;;  %v4659_v1 = vadd.f32 %v4658_v60, %v4610_v29 }
 0x2da   : > { %v4707_v41 = vpop.f32.mrf.mxu2  ;;  %v4612_v47 = vpop.f32.mrf.mxu0 }
 0x2db   : > { %v4756_v42 = vpop.f32.mrf.mxu3  ;;  %v4708_v46 = vadd.f32 %v4707_v41, %v4659_v1  ;;  %v4661_v48 = vpop.f32.mrf.mxu1  ;;  %v4613_v53 = vadd.f32 %v4612_v47, %v8099_v27  ;;  %v5714_v27 = vld [vmem:[%s8727_s0 + $0x1b0] sm:$0xf]  ;;  %v6579_v41 = vld [vmem:[%s8727_s0 + $0x274] sm:$0xf0] }
 0x2dc   : > { %v5715_v0 = vor.u32 %v6562_v4, %v5714_v27 }
 0x2dd   : > { %v8349_v57 = vadd.f32 %v4756_v42, %v4708_v46  ;;  %v4662_v3 = vadd.f32 %v4661_v48, %v4613_v53  ;;  %4807 = vmatmul.bf16.gmra.mxu0 %v5651_v61  ;;  %v6571_v42 = vld [vmem:[%s8727_s0 + $0x23c] sm:$0xf]  ;;  %v5783_v48 = vor.u32 %v6570_v37, %v5780_v38 }
 0x2de   : > { %4856 = vmatmul.bf16.gmra.mxu1 %v5655_v44  ;;  %v5788_v61 = vld [vmem:[%s8727_s0 + $0x278] sm:$0xf0] }
 0x2df   : > { %4905 = vmatmul.bf16.gmra.mxu2 %v5659_v51 }
 0x2e0   : > { %4954 = vmatmul.bf16.gmra.mxu3 %v5663_v30 }
 0x2e2   : > { %v4710_v58 = vpop.f32.mrf.mxu2  ;;  %v4614_v12 = vpop.f32.mrf.mxu0 }
 0x2e3   : > { %v4759_v50 = vpop.f32.mrf.mxu3  ;;  %v4711_v26 = vadd.f32 %v4710_v58, %v4662_v3  ;;  %v4663_v62 = vpop.f32.mrf.mxu1  ;;  %v4615_v63 = vadd.f32 %v4614_v12, %v8127_v55  ;;  %v5722_v55 = vld [vmem:[%s8727_s0 + $0x1b8] sm:$0xf]  ;;  %v5791_v58 = vor.u32 %v6571_v42, %v5788_v61  ;;  %v6602_v42 = vld [vmem:[%s8727_s0 + $0x334] sm:$0xf] }
 0x2e4   : > { %v5723_v22 = vor.u32 %v6563_v8, %v5722_v55  ;;  %v6594_v8 = vld [vmem:[%s8727_s0 + $0x2ec] sm:$0xf0]  ;;  %v5908_v61 = vld [vmem:[%s8727_s0 + $0x370] sm:$0xf0] }
 0x2e5   : > { %v8352_v2 = vadd.f32 %v4759_v50, %v4711_v26  ;;  %v4664_v40 = vadd.f32 %v4663_v62, %v4615_v63 }
 0x2ea   : > { %v4712_v49 = vpop.f32.mrf.mxu2  ;;  %v4617_v32 = vpop.f32.mrf.mxu0 }
 0x2eb   : > { %v4761_v11 = vpop.f32.mrf.mxu3  ;;  %v4713_v16 = vadd.f32 %v4712_v49, %v4664_v40  ;;  %v4666_v20 = vpop.f32.mrf.mxu1  ;;  %v4618_v24 = vadd.f32 %v4617_v32, %v8133_v5  ;;  %v5778_v5 = vld [vmem:[%s8727_s0 + $0x230] sm:$0xf]  ;;  %v6595_v49 = vld [vmem:[%s8727_s0 + $0x2f4] sm:$0xf0] }
 0x2ec   : > { %v5779_v47 = vor.u32 %v6578_v36, %v5778_v5 }
 0x2ed   : > { %v8379_v25 = vadd.f32 %v4761_v11, %v4713_v16  ;;  %v4667_v39 = vadd.f32 %v4666_v20, %v4618_v24  ;;  %4812 = vmatmul.bf16.gmra.mxu0 %v5715_v0  ;;  %v6587_v11 = vld [vmem:[%s8727_s0 + $0x2bc] sm:$0xf]  ;;  %v5847_v20 = vor.u32 %v6586_v9, %v5844_v10 }
 0x2ee   : > { %4861 = vmatmul.bf16.gmra.mxu1 %v5719_v13  ;;  %v5852_v0 = vld [vmem:[%s8727_s0 + $0x2f8] sm:$0xf0] }
 0x2ef   : > { %4910 = vmatmul.bf16.gmra.mxu2 %v5723_v22 }
 0x2f0   : > { %4959 = vmatmul.bf16.gmra.mxu3 %v5727_v23 }
 0x2f2   : > { %v4715_v60 = vpop.f32.mrf.mxu2  ;;  %v4619_v52 = vpop.f32.mrf.mxu0 }
 0x2f3   : > { %v4764_v29 = vpop.f32.mrf.mxu3  ;;  %v4716_v1 = vadd.f32 %v4715_v60, %v4667_v39  ;;  %v4668_v34 = vpop.f32.mrf.mxu1  ;;  %v4620_v35 = vadd.f32 %v4619_v52, %v8161_v31  ;;  %v5786_v31 = vld [vmem:[%s8727_s0 + $0x238] sm:$0xf]  ;;  %v5855_v60 = vor.u32 %v6587_v11, %v5852_v0  ;;  %v6618_v11 = vld [vmem:[%s8727_s0 + $0x3b4] sm:$0xf] }
 0x2f4   : > { %v5787_v3 = vor.u32 %v6579_v41, %v5786_v31  ;;  %v6610_v41 = vld [vmem:[%s8727_s0 + $0x36c] sm:$0xf0]  ;;  %v5972_v0 = vld [vmem:[%s8727_s0 + $0x3f0] sm:$0xf0] }
 0x2f5   : > { %v8382_v17 = vadd.f32 %v4764_v29, %v4716_v1  ;;  %v4669_v14 = vadd.f32 %v4668_v34, %v4620_v35 }
 0x2fa   : > { %v4717_v44 = vpop.f32.mrf.mxu2  ;;  %v4622_v30 = vpop.f32.mrf.mxu0 }
 0x2fb   : > { %v4766_v46 = vpop.f32.mrf.mxu3  ;;  %v4718_v51 = vadd.f32 %v4717_v44, %v4669_v14  ;;  %v4671_v53 = vpop.f32.mrf.mxu1  ;;  %v4623_v50 = vadd.f32 %v4622_v30, %v8167_v43  ;;  %v5842_v43 = vld [vmem:[%s8727_s0 + $0x2b0] sm:$0xf]  ;;  %v6611_v44 = vld [vmem:[%s8727_s0 + $0x374] sm:$0xf0] }
 0x2fc   : > { %v5843_v32 = vor.u32 %v6594_v8, %v5842_v43 }
 0x2fd   : > { %v8409_v26 = vadd.f32 %v4766_v46, %v4718_v51  ;;  %v4672_v12 = vadd.f32 %v4671_v53, %v4623_v50  ;;  %4817 = vmatmul.bf16.gmra.mxu0 %v5779_v47  ;;  %v6603_v46 = vld [vmem:[%s8727_s0 + $0x33c] sm:$0xf]  ;;  %v5911_v53 = vor.u32 %v6602_v42, %v5908_v61 }
 0x2fe   : > { %4866 = vmatmul.bf16.gmra.mxu1 %v5783_v48  ;;  %v5916_v47 = vld [vmem:[%s8727_s0 + $0x378] sm:$0xf0] }
 0x2ff   : > { %4915 = vmatmul.bf16.gmra.mxu2 %v5787_v3 }
 0x300   : > { %4964 = vmatmul.bf16.gmra.mxu3 %v5791_v58 }
 0x302   : > { %v4720_v62 = vpop.f32.mrf.mxu2  ;;  %v4624_v27 = vpop.f32.mrf.mxu0 }
 0x303   : > { %v4769_v63 = vpop.f32.mrf.mxu3  ;;  %v4721_v40 = vadd.f32 %v4720_v62, %v4672_v12  ;;  %v4673_v4 = vpop.f32.mrf.mxu1  ;;  %v4625_v28 = vadd.f32 %v4624_v27, %v8195_v7  ;;  %v5850_v7 = vld [vmem:[%s8727_s0 + $0x2b8] sm:$0xf]  ;;  %v5919_v62 = vor.u32 %v6603_v46, %v5916_v47 }
 0x304   : > { %v5851_v39 = vor.u32 %v6595_v49, %v5850_v7  ;;  %v6626_v49 = vld [vmem:[%s8727_s0 + $0x3ec] sm:$0xf0] }
 0x305   : > { %v8412_v6 = vadd.f32 %v4769_v63, %v4721_v40  ;;  %v4674_v55 = vadd.f32 %v4673_v4, %v4625_v28 }
 0x30a   : > { %v4722_v13 = vpop.f32.mrf.mxu2  ;;  %v4627_v23 = vpop.f32.mrf.mxu0 }
 0x30b   : > { %v4771_v16 = vpop.f32.mrf.mxu3  ;;  %v4723_v22 = vadd.f32 %v4722_v13, %v4674_v55  ;;  %v4676_v24 = vpop.f32.mrf.mxu1  ;;  %v4628_v29 = vadd.f32 %v4627_v23, %v8201_v18  ;;  %v5906_v18 = vld [vmem:[%s8727_s0 + $0x330] sm:$0xf]  ;;  %v6627_v13 = vld [vmem:[%s8727_s0 + $0x3f4] sm:$0xf0] }
 0x30c   : > { %v5907_v30 = vor.u32 %v6610_v41, %v5906_v18 }
 0x30d   : > { %v8439_v1 = vadd.f32 %v4771_v16, %v4723_v22  ;;  %v4677_v52 = vadd.f32 %v4676_v24, %v4628_v29  ;;  %4822 = vmatmul.bf16.gmra.mxu0 %v5843_v32  ;;  %v6619_v16 = vld [vmem:[%s8727_s0 + $0x3bc] sm:$0xf]  ;;  %v5975_v24 = vor.u32 %v6618_v11, %v5972_v0 }
 0x30e   : > { %4871 = vmatmul.bf16.gmra.mxu1 %v5847_v20  ;;  %v5980_v32 = vld [vmem:[%s8727_s0 + $0x3f8] sm:$0xf0] }
 0x30f   : > { %4920 = vmatmul.bf16.gmra.mxu2 %v5851_v39 }
 0x310   : > { %4969 = vmatmul.bf16.gmra.mxu3 %v5855_v60 }
 0x312   : > { %v4725_v34 = vpop.f32.mrf.mxu2  ;;  %v4629_v5 = vpop.f32.mrf.mxu0 }
 0x313   : > { %v4774_v35 = vpop.f32.mrf.mxu3  ;;  %v4726_v14 = vadd.f32 %v4725_v34, %v4677_v52  ;;  %v4678_v36 = vpop.f32.mrf.mxu1  ;;  %v4630_v37 = vadd.f32 %v4629_v5, %v8229_v45  ;;  %v5914_v45 = vld [vmem:[%s8727_s0 + $0x338] sm:$0xf]  ;;  %v5983_v34 = vor.u32 %v6619_v16, %v5980_v32 }
 0x314   : > { %v5915_v12 = vor.u32 %v6611_v44, %v5914_v45 }
 0x315   : > { %v8442_v38 = vadd.f32 %v4774_v35, %v4726_v14  ;;  %v4679_v31 = vadd.f32 %v4678_v36, %v4630_v37 }
 0x31a   : > { %v4727_v48 = vpop.f32.mrf.mxu2  ;;  %v4632_v58 = vpop.f32.mrf.mxu0 }
 0x31b   : > { %v4776_v51 = vpop.f32.mrf.mxu3  ;;  %v4728_v3 = vadd.f32 %v4727_v48, %v4679_v31  ;;  %v4681_v50 = vpop.f32.mrf.mxu1  ;;  %v4633_v63 = vadd.f32 %v4632_v58, %v8232_v56  ;;  %v5970_v56 = vld [vmem:[%s8727_s0 + $0x3b0] sm:$0xf] }
 0x31c   : > { %v5971_v23 = vor.u32 %v6626_v49, %v5970_v56 }
 0x31d   : > { %v8469_v40 = vadd.f32 %v4776_v51, %v4728_v3  ;;  %v4682_v27 = vadd.f32 %v4681_v50, %v4633_v63  ;;  %4827 = vmatmul.bf16.gmra.mxu0 %v5907_v30 }
 0x31e   : > { %4876 = vmatmul.bf16.gmra.mxu1 %v5911_v53 }
 0x31f   : > { %4925 = vmatmul.bf16.gmra.mxu2 %v5915_v12 }
 0x320   : > { %4974 = vmatmul.bf16.gmra.mxu3 %v5919_v62 }
 0x322   : > { %v4730_v4 = vpop.f32.mrf.mxu2  ;;  %v4634_v43 = vpop.f32.mrf.mxu0 }
 0x323   : > { %v4779_v28 = vpop.f32.mrf.mxu3  ;;  %v4731_v55 = vadd.f32 %v4730_v4, %v4682_v27  ;;  %v4683_v8 = vpop.f32.mrf.mxu1  ;;  %v4635_v9 = vadd.f32 %v4634_v43, %v8259_v15  ;;  %v5978_v15 = vld [vmem:[%s8727_s0 + $0x3b8] sm:$0xf] }
 0x324   : > { %v5979_v52 = vor.u32 %v6627_v13, %v5978_v15 }
 0x325   : > { %v8472_v10 = vadd.f32 %v4779_v28, %v4731_v55  ;;  %v4684_v7 = vadd.f32 %v4683_v8, %v4635_v9 }
 0x32a   : > { %v4732_v20 = vpop.f32.mrf.mxu2  ;;  %v4637_v60 = vpop.f32.mrf.mxu0 }
 0x32b   : > { %v4781_v22 = vpop.f32.mrf.mxu3  ;;  %v4733_v39 = vadd.f32 %v4732_v20, %v4684_v7  ;;  %v4686_v29 = vpop.f32.mrf.mxu1  ;;  %v4638_v35 = vadd.f32 %v4637_v60, %v8262_v54 }
 0x32d   : > { %v8499_v14 = vadd.f32 %v4781_v22, %v4733_v39  ;;  %v4687_v5 = vadd.f32 %v4686_v29, %v4638_v35  ;;  %4832 = vmatmul.bf16.gmra.mxu0 %v5971_v23 }
 0x32e   : > { %4881 = vmatmul.bf16.gmra.mxu1 %v5975_v24 }
 0x32f   : > { %4930 = vmatmul.bf16.gmra.mxu2 %v5979_v52 }
 0x330   : > { %4979 = vmatmul.bf16.gmra.mxu3 %v5983_v34 }
 0x332   : > { %v4735_v36 = vpop.f32.mrf.mxu2  ;;  %v4639_v18 = vpop.f32.mrf.mxu0 }
 0x333   : > { %v4784_v37 = vpop.f32.mrf.mxu3  ;;  %v4736_v31 = vadd.f32 %v4735_v36, %v4687_v5  ;;  %v4688_v41 = vpop.f32.mrf.mxu1  ;;  %v4640_v42 = vadd.f32 %v4639_v18, %v8289_v19 }
 0x335   : > { %v8502_v61 = vadd.f32 %v4784_v37, %v4736_v31  ;;  %v4689_v45 = vadd.f32 %v4688_v41, %v4640_v42 }
 0x33a   : > { %v4737_v54 = vpop.f32.mrf.mxu2  ;;  %v4798_v47 = vpop.f32.mrf.mxu0 }
 0x33b   : > { %v4786_v44 = vpop.f32.mrf.mxu3  ;;  %v4738_v46 = vadd.f32 %v4737_v54, %v4689_v45  ;;  %v4847_v48 = vpop.f32.mrf.mxu1  ;;  %v4799_v51 = vadd.f32 %v4798_v47, %v8292_v59 }
 0x33d   : > { %v8506_v30 = vadd.f32 %v4786_v44, %v4738_v46  ;;  %v4848_v53 = vadd.f32 %v4847_v48, %v4799_v51 }
 0x342   : > { %v4896_v19 = vpop.f32.mrf.mxu2  ;;  %v4800_v50 = vpop.f32.mrf.mxu0 }
 0x343   : > { %v4945_v3 = vpop.f32.mrf.mxu3  ;;  %v4897_v58 = vadd.f32 %v4896_v19, %v4848_v53  ;;  %v4849_v12 = vpop.f32.mrf.mxu1  ;;  %v4801_v62 = vadd.f32 %v4800_v50, %v8319_v21 }
 0x345   : > { %v8516_v63 = vadd.f32 %v4945_v3, %v4897_v58  ;;  %v4850_v59 = vadd.f32 %v4849_v12, %v4801_v62 }
 0x34a   : > { %v4898_v27 = vpop.f32.mrf.mxu2  ;;  %v4803_v55 = vpop.f32.mrf.mxu0 }
 0x34b   : > { %v4947_v4 = vpop.f32.mrf.mxu3  ;;  %v4899_v28 = vadd.f32 %v4898_v27, %v4850_v59  ;;  %v4852_v43 = vpop.f32.mrf.mxu1  ;;  %v4804_v8 = vadd.f32 %v4803_v55, %v8322_v33 }
 0x34d   : > { %v8519_v9 = vadd.f32 %v4947_v4, %v4899_v28  ;;  %v4853_v7 = vadd.f32 %v4852_v43, %v4804_v8 }
 0x34f   : > { %v5036_v56 = vadd.f32 %v8519_v9, %v8516_v63 }
 0x352   : > { %v4901_v49 = vpop.f32.mrf.mxu2  ;;  %v4805_v21 = vpop.f32.mrf.mxu0 }
 0x353   : > { %v4950_v11 = vpop.f32.mrf.mxu3  ;;  %v4902_v0 = vadd.f32 %v4901_v49, %v4853_v7  ;;  %v4854_v15 = vpop.f32.mrf.mxu1  ;;  %v4806_v13 = vadd.f32 %v4805_v21, %v8349_v57 }
 0x355   : > { %v8524_v16 = vadd.f32 %v4950_v11, %v4902_v0  ;;  %v4855_v32 = vadd.f32 %v4854_v15, %v4806_v13 }
 0x357   : > { %v5037_v20 = vadd.f32 %v5036_v56, %v8524_v16 }
 0x35a   : > { %v4903_v22 = vpop.f32.mrf.mxu2  ;;  %v4808_v24 = vpop.f32.mrf.mxu0 }
 0x35b   : > { %v4952_v33 = vpop.f32.mrf.mxu3  ;;  %v4904_v23 = vadd.f32 %v4903_v22, %v4855_v32  ;;  %v4857_v39 = vpop.f32.mrf.mxu1  ;;  %v4809_v60 = vadd.f32 %v4808_v24, %v8352_v2 }
 0x35d   : > { %v8528_v29 = vadd.f32 %v4952_v33, %v4904_v23  ;;  %v4858_v52 = vadd.f32 %v4857_v39, %v4809_v60 }
 0x35f   : > { %v5038_v34 = vadd.f32 %v5037_v20, %v8528_v29 }
 0x362   : > { %v4906_v35 = vpop.f32.mrf.mxu2  ;;  %v4810_v36 = vpop.f32.mrf.mxu0 }
 0x363   : > { %v4955_v5 = vpop.f32.mrf.mxu3  ;;  %v4907_v57 = vadd.f32 %v4906_v35, %v4858_v52  ;;  %v4859_v37 = vpop.f32.mrf.mxu1  ;;  %v4811_v18 = vadd.f32 %v4810_v36, %v8379_v25 }
 0x365   : > { %v8531_v31 = vadd.f32 %v4955_v5, %v4907_v57  ;;  %v4860_v42 = vadd.f32 %v4859_v37, %v4811_v18 }
 0x367   : > { %v5039_v41 = vadd.f32 %v5038_v34, %v8531_v31 }
 0x36a   : > { %v4908_v45 = vpop.f32.mrf.mxu2  ;;  %v4813_v44 = vpop.f32.mrf.mxu0 }
 0x36b   : > { %v4957_v54 = vpop.f32.mrf.mxu3  ;;  %v4909_v2 = vadd.f32 %v4908_v45, %v4860_v42  ;;  %v4862_v46 = vpop.f32.mrf.mxu1  ;;  %v4814_v48 = vadd.f32 %v4813_v44, %v8382_v17 }
 0x36d   : > { %v8535_v47 = vadd.f32 %v4957_v54, %v4909_v2  ;;  %v4863_v53 = vadd.f32 %v4862_v46, %v4814_v48 }
 0x36f   : > { %v5040_v51 = vadd.f32 %v5039_v41, %v8535_v47 }
 0x372   : > { %v4911_v19 = vpop.f32.mrf.mxu2  ;;  %v4815_v50 = vpop.f32.mrf.mxu0 }
 0x373   : > { %v4960_v3 = vpop.f32.mrf.mxu3  ;;  %v4912_v58 = vadd.f32 %v4911_v19, %v4863_v53  ;;  %v4864_v25 = vpop.f32.mrf.mxu1  ;;  %v4816_v62 = vadd.f32 %v4815_v50, %v8409_v26 }
 0x375   : > { %v8539_v12 = vadd.f32 %v4960_v3, %v4912_v58  ;;  %v4865_v27 = vadd.f32 %v4864_v25, %v4816_v62 }
 0x377   : > { %v5041_v59 = vadd.f32 %v5040_v51, %v8539_v12 }
 0x37a   : > { %v4913_v4 = vpop.f32.mrf.mxu2  ;;  %v4818_v43 = vpop.f32.mrf.mxu0 }
 0x37b   : > { %v4962_v28 = vpop.f32.mrf.mxu3  ;;  %v4914_v55 = vadd.f32 %v4913_v4, %v4865_v27  ;;  %v4867_v17 = vpop.f32.mrf.mxu1  ;;  %v4819_v7 = vadd.f32 %v4818_v43, %v8412_v6 }
 0x37d   : > { %v8543_v8 = vadd.f32 %v4962_v28, %v4914_v55  ;;  %v4868_v49 = vadd.f32 %v4867_v17, %v4819_v7 }
 0x37f   : > { %v5042_v56 = vadd.f32 %v5041_v59, %v8543_v8 }
 0x382   : > { %v4916_v11 = vpop.f32.mrf.mxu2  ;;  %v4820_v15 = vpop.f32.mrf.mxu0 }
 0x383   : > { %v4965_v0 = vpop.f32.mrf.mxu3  ;;  %v4917_v21 = vadd.f32 %v4916_v11, %v4868_v49  ;;  %v4869_v26 = vpop.f32.mrf.mxu1  ;;  %v4821_v32 = vadd.f32 %v4820_v15, %v8439_v1 }
 0x385   : > { %v8547_v13 = vadd.f32 %v4965_v0, %v4917_v21  ;;  %v4870_v22 = vadd.f32 %v4869_v26, %v4821_v32 }
 0x387   : > { %v5043_v20 = vadd.f32 %v5042_v56, %v8547_v13 }
 0x38a   : > { %v4918_v33 = vpop.f32.mrf.mxu2  ;;  %v4823_v39 = vpop.f32.mrf.mxu0 }
 0x38b   : > { %v4967_v23 = vpop.f32.mrf.mxu3  ;;  %v4919_v24 = vadd.f32 %v4918_v33, %v4870_v22  ;;  %v4872_v6 = vpop.f32.mrf.mxu1  ;;  %v4824_v52 = vadd.f32 %v4823_v39, %v8442_v38 }
 0x38d   : > { %v8551_v60 = vadd.f32 %v4967_v23, %v4919_v24  ;;  %v4873_v35 = vadd.f32 %v4872_v6, %v4824_v52 }
 0x38f   : > { %v5044_v34 = vadd.f32 %v5043_v20, %v8551_v60 }
 0x392   : > { %v4921_v5 = vpop.f32.mrf.mxu2  ;;  %v4825_v37 = vpop.f32.mrf.mxu0 }
 0x393   : > { %v4970_v57 = vpop.f32.mrf.mxu3  ;;  %v4922_v36 = vadd.f32 %v4921_v5, %v4873_v35  ;;  %v4874_v1 = vpop.f32.mrf.mxu1  ;;  %v4826_v41 = vadd.f32 %v4825_v37, %v8469_v40 }
 0x395   : > { %v4971_v18 = vadd.f32 %v4970_v57, %v4922_v36  ;;  %v4875_v45 = vadd.f32 %v4874_v1, %v4826_v41 }
 0x397   : > { %v5045_v42 = vadd.f32 %v5044_v34, %v4971_v18 }
 0x39a   : > { %v4923_v54 = vpop.f32.mrf.mxu2  ;;  %v4828_v46 = vpop.f32.mrf.mxu0 }
 0x39b   : > { %v4972_v2 = vpop.f32.mrf.mxu3  ;;  %v4924_v44 = vadd.f32 %v4923_v54, %v4875_v45  ;;  %v4877_v48 = vpop.f32.mrf.mxu1  ;;  %v4829_v38 = vadd.f32 %v4828_v46, %v8472_v10 }
 0x39d   : > { %v4973_v51 = vadd.f32 %v4972_v2, %v4924_v44  ;;  %v4878_v19 = vadd.f32 %v4877_v48, %v4829_v38 }
 0x39f   : > { %v5046_v53 = vadd.f32 %v5045_v42, %v4973_v51 }
 0x3a2   : > { %v4926_v3 = vpop.f32.mrf.mxu2  ;;  %v4830_v25 = vpop.f32.mrf.mxu0 }
 0x3a3   : > { %v4975_v58 = vpop.f32.mrf.mxu3  ;;  %v4927_v50 = vadd.f32 %v4926_v3, %v4878_v19  ;;  %v4879_v62 = vpop.f32.mrf.mxu1  ;;  %v4831_v40 = vadd.f32 %v4830_v25, %v8499_v14 }
 0x3a5   : > { %v4976_v59 = vadd.f32 %v4975_v58, %v4927_v50  ;;  %v4880_v4 = vadd.f32 %v4879_v62, %v4831_v40 }
 0x3a7   : > { %v5047_v27 = vadd.f32 %v5046_v53, %v4976_v59 }
 0x3aa   : > { %v4928_v28 = vpop.f32.mrf.mxu2  ;;  %v4833_v17 = vpop.f32.mrf.mxu0 }
 0x3ab   : > { %v4977_v55 = vpop.f32.mrf.mxu3  ;;  %v4929_v43 = vadd.f32 %v4928_v28, %v4880_v4  ;;  %v4834_v56 = vadd.f32 %v4833_v17, %v8502_v61  ;;  %v4882_v10 = vpop.f32.mrf.mxu1 }
 0x3ad   : > { %v4978_v7 = vadd.f32 %v4977_v55, %v4929_v43  ;;  %v4883_v11 = vadd.f32 %v4882_v10, %v4834_v56 }
 0x3af   : > { %v5048_v49 = vadd.f32 %v5047_v27, %v4978_v7 }
 0x3b2   : > { %v4931_v0 = vpop.f32.mrf.mxu2  ;;  %v4835_v26 = vpop.f32.mrf.mxu0 }
 0x3b3   : > { %v4980_v21 = vpop.f32.mrf.mxu3  ;;  %v4932_v15 = vadd.f32 %v4931_v0, %v4883_v11  ;;  %v4836_v20 = vadd.f32 %v4835_v26, %v8506_v30  ;;  %v4884_v22 = vpop.f32.mrf.mxu1 }
 0x3b5   : > { %v4981_v32 = vadd.f32 %v4980_v21, %v4932_v15  ;;  %v4885_v33 = vadd.f32 %v4884_v22, %v4836_v20 }
 0x3b7   : > { %v5049_v14 = vadd.f32 %v5048_v49, %v4981_v32 }
 0x3ba   : > { %v4933_v23 = vpop.f32.mrf.mxu2 }
 0x3bb   : > { %v4934_v24 = vadd.f32 %v4933_v23, %v4885_v33  ;;  %v4982_v39 = vpop.f32.mrf.mxu3 }
 0x3bd   : > { %v4983_v6 = vadd.f32 %v4982_v39, %v4934_v24 }
 0x3bf   : > { %v5050_v52 = vadd.f32 %v5049_v14, %v4983_v6 }
 0x3c1   : > { %v5051_v34 = vrot.slane %v5050_v52, 4 }
 0x3c3   : > { %v5052_v61 = vadd.f32 %v5051_v34, %v5050_v52 }
 0x3c5   : > { %v5053_v35 = vrot.slane %v5052_v61, 2 }
 0x3c7   : > { %v5054_v5 = vadd.f32 %v5053_v35, %v5052_v61 }
 0x3c9   : > { %v5055_v57 = vrot.slane %v5054_v5, 1 }
 0x3cb   : > { %v5056_v36 = vadd.f32 %v5055_v57, %v5054_v5  ;;  %v5112_v5 = vld [vmem:[%s2369_s30] sm:$0x1] }
 0x3cd   : > { %v5057_v37 = vmul.f32 0.0078125, %v5056_v36 }
 0x3cf   : > { %v8561_v1 = vsub.f32 %v8516_v63, %v5057_v37  ;;  %v8564_v30 = vsub.f32 %v8519_v9, %v5057_v37  ;;  %v8567_v41 = vsub.f32 %v8524_v16, %v5057_v37  ;;  %v8570_v42 = vsub.f32 %v8528_v29, %v5057_v37 }
 0x3d0   : > { %v8573_v45 = vsub.f32 %v8531_v31, %v5057_v37  ;;  %v8576_v54 = vsub.f32 %v8535_v47, %v5057_v37  ;;  %v8579_v2 = vsub.f32 %v8539_v12, %v5057_v37  ;;  %v8582_v63 = vsub.f32 %v8543_v8, %v5057_v37 }
 0x3d1   : > { %v8585_v9 = vsub.f32 %v8547_v13, %v5057_v37  ;;  %v8588_v16 = vsub.f32 %v8551_v60, %v5057_v37  ;;  %v8590_v29 = vsub.f32 %v4971_v18, %v5057_v37  ;;  %v8592_v44 = vsub.f32 %v4973_v51, %v5057_v37 }
 0x3d2   : > { %v8594_v31 = vsub.f32 %v4976_v59, %v5057_v37  ;;  %v8596_v47 = vsub.f32 %v4978_v7, %v5057_v37  ;;  %v8598_v46 = vsub.f32 %v4981_v32, %v5057_v37  ;;  %v8600_v12 = vsub.f32 %v4983_v6, %v5057_v37 }
 0x3d3   : > { %v5074_v8 = vmul.f32 %v8561_v1, %v8561_v1  ;;  %v5075_v13 = vmul.f32 %v8564_v30, %v8564_v30  ;;  %v5076_v60 = vmul.f32 %v8567_v41, %v8567_v41  ;;  %v5077_v48 = vmul.f32 %v8570_v42, %v8570_v42 }
 0x3d4   : > { %v5078_v38 = vmul.f32 %v8573_v45, %v8573_v45  ;;  %v5079_v19 = vmul.f32 %v8576_v54, %v8576_v54  ;;  %v5080_v58 = vmul.f32 %v8579_v2, %v8579_v2  ;;  %v5081_v25 = vmul.f32 %v8582_v63, %v8582_v63 }
 0x3d5   : > { %v5090_v18 = vadd.f32 %v5075_v13, %v5074_v8  ;;  %v5082_v59 = vmul.f32 %v8585_v9, %v8585_v9  ;;  %v5083_v27 = vmul.f32 %v8588_v16, %v8588_v16  ;;  %v5084_v28 = vmul.f32 %v8590_v29, %v8590_v29 }
 0x3d6   : > { %v5085_v43 = vmul.f32 %v8592_v44, %v8592_v44  ;;  %v5086_v7 = vmul.f32 %v8594_v31, %v8594_v31  ;;  %v5087_v10 = vmul.f32 %v8596_v47, %v8596_v47  ;;  %v5088_v11 = vmul.f32 %v8598_v46, %v8598_v46 }
 0x3d7   : > { %v5091_v51 = vadd.f32 %v5090_v18, %v5076_v60  ;;  %v5089_v21 = vmul.f32 %v8600_v12, %v8600_v12 }
 0x3d9   : > { %v5092_v53 = vadd.f32 %v5091_v51, %v5077_v48  ;;  %v6843_v51 = vld [vmem:[%s2372_s9] ss:$0 sm:$0xff] }
 0x3db   : > { %v5093_v3 = vadd.f32 %v5092_v53, %v5078_v38 }
 0x3dd   : > { %v5094_v50 = vadd.f32 %v5093_v3, %v5079_v19 }
 0x3df   : > { %v5095_v62 = vadd.f32 %v5094_v50, %v5080_v58 }
 0x3e1   : > { %v5096_v40 = vadd.f32 %v5095_v62, %v5081_v25 }
 0x3e3   : > { %v5097_v4 = vadd.f32 %v5096_v40, %v5082_v59 }
 0x3e5   : > { %v5098_v55 = vadd.f32 %v5097_v4, %v5083_v27 }
 0x3e7   : > { %v5099_v17 = vadd.f32 %v5098_v55, %v5084_v28 }
 0x3e9   : > { %v5100_v56 = vadd.f32 %v5099_v17, %v5085_v43 }
 0x3eb   : > { %v5101_v49 = vadd.f32 %v5100_v56, %v5086_v7 }
 0x3ed   : > { %v5102_v0 = vadd.f32 %v5101_v49, %v5087_v10 }
 0x3ef   : > { %v5103_v15 = vadd.f32 %v5102_v0, %v5088_v11 }
 0x3f1   : > { %v5104_v26 = vadd.f32 %v5103_v15, %v5089_v21 }
 0x3f3   : > { %v5105_v32 = vrot.slane %v5104_v26, 4 }
 0x3f5   : > { %v5106_v20 = vadd.f32 %v5105_v32, %v5104_v26 }
 0x3f7   : > { %v5107_v14 = vrot.slane %v5106_v20, 2 }
 0x3f9   : > { %v5108_v22 = vadd.f32 %v5107_v14, %v5106_v20 }
 0x3fb   : > { %v5109_v33 = vrot.slane %v5108_v22, 1 }
 0x3fd   : > { %v5110_v23 = vadd.f32 %v5109_v33, %v5108_v22 }
 0x3ff   : > { %v5111_v24 = vmul.f32 0.0078125, %v5110_v23 }
 0x401   : > { %v5113_v39 = vadd.f32 1e-05, %v5111_v24 }
 0x403   : > { %6844 = vrsqrt.f32 %v5113_v39  ;;  %vm5120_vm1 = vweird.f32 %v5113_v39 }
 0x409   : > { %v6845_v6 = vpop.eup %6844 }
 0x40a   : > { %v5115_v52 = vmul.f32 %v6845_v6, %v5113_v39  ;;  %vm5121_vm0 = vweird.f32 %v6845_v6 }
 0x40b   : > { %vm5122_vm2 = vmor %vm5120_vm1, %vm5121_vm0 }
 0x40c   : > { %v5116_v34 = vmul.f32 %v6845_v6, %v5115_v52 }
 0x40e   : > { %v5117_v61 = vmul.f32 0.5, %v5116_v34 }
 0x410   : > { %v5118_v35 = vsub.f32 1.5, %v5117_v61 }
 0x412   : > { %v5119_v57 = vmul.f32 %v6845_v6, %v5118_v35 }
 0x414   : > { %v5123_v36 = vsel %vm5122_vm2, %v6845_v6, %v5119_v57 }
 0x415   : > { %v5124_v37 = vmul.f32 %v5123_v36, %v5112_v5 }
 0x417   : > { %v5126_v8 = vperm.slane %v5124_v37, 0 }
 0x419   : > { %v5128_v13 = vmul.f32 %v5126_v8, %v8561_v1  ;;  %v5129_v60 = vmul.f32 %v5126_v8, %v8564_v30  ;;  %v5130_v18 = vmul.f32 %v5126_v8, %v8567_v41  ;;  %v5131_v48 = vmul.f32 %v5126_v8, %v8570_v42 }
 0x41a   : > { %v5132_v38 = vmul.f32 %v5126_v8, %v8573_v45  ;;  %v5133_v53 = vmul.f32 %v5126_v8, %v8576_v54  ;;  %v5134_v19 = vmul.f32 %v5126_v8, %v8579_v2  ;;  %v5135_v3 = vmul.f32 %v5126_v8, %v8582_v63 }
 0x41b   : > { %v5136_v1 = vmul.f32 %v5126_v8, %v8585_v9  ;;  %v5137_v30 = vmul.f32 %v5126_v8, %v8588_v16  ;;  %v5138_v41 = vmul.f32 %v5126_v8, %v8590_v29  ;;  %v5139_v42 = vmul.f32 %v5126_v8, %v8592_v44 }
 0x41c   : > { %v5140_v58 = vmul.f32 %v5126_v8, %v8594_v31  ;;  %v5141_v50 = vmul.f32 %v5126_v8, %v8596_v47  ;;  %v5142_v45 = vmul.f32 %v5126_v8, %v8598_v46  ;;  %v5143_v54 = vmul.f32 %v5126_v8, %v8600_v12 }
 0x41d   : > { %v5148_v25 = vadd.f32 %v6843_v51, %v5128_v13  ;;  %v5149_v2 = vadd.f32 %v6843_v51, %v5129_v60  ;;  %v5150_v62 = vadd.f32 %v6843_v51, %v5130_v18  ;;  %v5151_v63 = vadd.f32 %v6843_v51, %v5131_v48 }
 0x41e   : > { %v5152_v59 = vadd.f32 %v6843_v51, %v5132_v38  ;;  %v5153_v9 = vadd.f32 %v6843_v51, %v5133_v53  ;;  %v5154_v40 = vadd.f32 %v6843_v51, %v5134_v19  ;;  %v5155_v16 = vadd.f32 %v6843_v51, %v5135_v3 }
 0x41f   : > { %v5156_v27 = vadd.f32 %v6843_v51, %v5136_v1  ;;  %v5157_v29 = vadd.f32 %v6843_v51, %v5137_v30  ;;  %v5158_v4 = vadd.f32 %v6843_v51, %v5138_v41  ;;  %v5159_v44 = vadd.f32 %v6843_v51, %v5139_v42 }
 0x420   : > { %v5160_v28 = vadd.f32 %v6843_v51, %v5140_v58  ;;  %v5161_v31 = vadd.f32 %v6843_v51, %v5141_v50  ;;  %v5162_v47 = vadd.f32 %v6843_v51, %v5142_v45  ;;  %v5163_v55 = vadd.f32 %v6843_v51, %v5143_v54 }
 0x421   : > { %vm5164_vm3 = vcmp.gt.f32.partialorder %v5148_v25, 0.0  ;;  %vm5165_vm4 = vcmp.gt.f32.partialorder %v5149_v2, 0.0  ;;  %vm5166_vm5 = vcmp.gt.f32.partialorder %v5150_v62, 0.0  ;;  %vm5167_vm6 = vcmp.gt.f32.partialorder %v5151_v63, 0.0 }
 0x422   : > { %vm5168_vm7 = vcmp.gt.f32.partialorder %v5152_v59, 0.0  ;;  %vm5169_vm8 = vcmp.gt.f32.partialorder %v5153_v9, 0.0  ;;  %vm5170_vm9 = vcmp.gt.f32.partialorder %v5154_v40, 0.0  ;;  %vm5171_vm10 = vcmp.gt.f32.partialorder %v5155_v16, 0.0 }
 0x423   : > { %vm5172_vm11 = vcmp.gt.f32.partialorder %v5156_v27, 0.0  ;;  %vm5173_vm12 = vcmp.gt.f32.partialorder %v5157_v29, 0.0  ;;  %vm5174_vm13 = vcmp.gt.f32.partialorder %v5158_v4, 0.0  ;;  %vm5175_vm14 = vcmp.gt.f32.partialorder %v5159_v44, 0.0 }
 0x424   : > { %vm5176_vm15 = vcmp.gt.f32.partialorder %v5160_v28, 0.0  ;;  %vm5177_vm0 = vcmp.gt.f32.partialorder %v5161_v31, 0.0  ;;  %vm5178_vm1 = vcmp.gt.f32.partialorder %v5162_v47, 0.0  ;;  %vm5179_vm2 = vcmp.gt.f32.partialorder %v5163_v55, 0.0 }
 0x425   : > { %v5180_v46 = vmul.f32 0.2, %v5148_v25  ;;  %v5181_v12 = vmul.f32 0.2, %v5149_v2  ;;  %v5182_v43 = vmul.f32 0.2, %v5150_v62 }
 0x426   : > { %v5183_v17 = vmul.f32 0.2, %v5151_v63  ;;  %v5184_v7 = vmul.f32 0.2, %v5152_v59  ;;  %v5185_v56 = vmul.f32 0.2, %v5153_v9 }
 0x427   : > { %v5186_v10 = vmul.f32 0.2, %v5154_v40  ;;  %v5187_v49 = vmul.f32 0.2, %v5155_v16  ;;  %v5188_v11 = vmul.f32 0.2, %v5156_v27  ;;  %v5196_v0 = vsel %vm5164_vm3, %v5148_v25, %v5180_v46 }
 0x428   : > { %v5189_v21 = vmul.f32 0.2, %v5157_v29  ;;  %v5190_v15 = vmul.f32 0.2, %v5158_v4  ;;  %v5191_v26 = vmul.f32 0.2, %v5159_v44  ;;  %v5197_v32 = vsel %vm5165_vm4, %v5149_v2, %v5181_v12 }
 0x429   : > { %v5192_v20 = vmul.f32 0.2, %v5160_v28  ;;  %v5193_v14 = vmul.f32 0.2, %v5161_v31  ;;  %v5194_v22 = vmul.f32 0.2, %v5162_v47  ;;  %v5198_v33 = vsel %vm5166_vm5, %v5150_v62, %v5182_v43 }
 0x42a   : > { %v5195_v23 = vmul.f32 0.2, %v5163_v55  ;;  %v5199_v24 = vsel %vm5167_vm6, %v5151_v63, %v5183_v17  ;;  %v5200_v39 = vsel %vm5168_vm7, %v5152_v59, %v5184_v7  ;;  %v5201_v6 = vsel %vm5169_vm8, %v5153_v9, %v5185_v56 }
 0x42b   : > { %v5202_v52 = vsel %vm5170_vm9, %v5154_v40, %v5186_v10  ;;  %v5203_v34 = vsel %vm5171_vm10, %v5155_v16, %v5187_v49  ;;  %v5204_v61 = vsel %vm5172_vm11, %v5156_v27, %v5188_v11  ;;  %v5205_v35 = vsel %vm5173_vm12, %v5157_v29, %v5189_v21 }
 0x42c   : > { %v5206_v5 = vsel %vm5174_vm13, %v5158_v4, %v5190_v15  ;;  %v5207_v57 = vsel %vm5175_vm14, %v5159_v44, %v5191_v26  ;;  %v5208_v36 = vsel %vm5176_vm15, %v5160_v28, %v5192_v20  ;;  %v5209_v37 = vsel %vm5177_vm0, %v5161_v31, %v5193_v14 }
 0x42d   : > { %v5210_v8 = vsel %vm5178_vm1, %v5162_v47, %v5194_v22  ;;  %v5211_v13 = vsel %vm5179_vm2, %v5163_v55, %v5195_v23  ;;  %v6759_v60 = vpack.c.bf16 %v5197_v32, %v5196_v0  ;;  %v6764_v18 = vpack.c.bf16 %v5199_v24, %v5198_v33 }
 0x42e   : > { %v6769_v48 = vpack.c.bf16 %v5201_v6, %v5200_v39  ;;  %v6774_v51 = vpack.c.bf16 %v5203_v34, %v5202_v52  ;;  %v6779_v38 = vpack.c.bf16 %v5205_v35, %v5204_v61  ;;  %v6784_v53 = vpack.c.bf16 %v5207_v57, %v5206_v5 }
 0x42f   : > { %6760 = vst [vmem:[%s8680_s15] sm:$0xff] %v6759_v60   ;;  %v6789_v19 = vpack.c.bf16 %v5209_v37, %v5208_v36  ;;  %v6794_v3 = vpack.c.bf16 %v5211_v13, %v5210_v8 }
 0x430   : > { %6796 = vst [vmem:[%s8680_s15 + $0x8] sm:$0xff] %v6764_v18  }
 0x431   : > { %6797 = vst [vmem:[%s8680_s15 + $0x10] sm:$0xff] %v6769_v48  }
 0x432   : > { %6798 = vst [vmem:[%s8680_s15 + $0x18] sm:$0xff] %v6774_v51   ;;  %5250 = sbr.rel (!%p6946_p6) target bundleno = 1095 (0x447), region = 100 }
 0x433   : > { %6799 = vst [vmem:[%s8680_s15 + $0x20] sm:$0xff] %v6779_v38  }
 0x434   : > { %6800 = vst [vmem:[%s8680_s15 + $0x28] sm:$0xff] %v6784_v53  }
 0x435   : > { %6801 = vst [vmem:[%s8680_s15 + $0x30] sm:$0xff] %v6789_v19  }
 0x436   : > { %6802 = vst [vmem:[%s8680_s15 + $0x38] sm:$0xff] %v6794_v3   ;;  %v5269_v1 = vld [vmem:[%s8680_s15] sm:$0xf] (%p6946_p6)  ;;  %v5271_v30 = vld [vmem:[%s8680_s15 + $0x4] sm:$0xf] (%p6946_p6) }
 0x437   : > { %v5273_v41 = vld [vmem:[%s8680_s15 + $0x8] sm:$0xf]  ;;  %5270 = vst [vmem:[%s5252_s12] sm:$0xf] %v5269_v1  ;;  %v5275_v42 = vld [vmem:[%s8680_s15 + $0xc] sm:$0xf] }
 0x438   : > { %5272 = vst [vmem:[%s5252_s12 + $0x8] sm:$0xf] %v5271_v30  ;;  %v5277_v58 = vld [vmem:[%s8680_s15 + $0x10] sm:$0xf]  ;;  %v5279_v50 = vld [vmem:[%s8680_s15 + $0x14] sm:$0xf] }
 0x439   : > { %5274 = vst [vmem:[%s5252_s12 + $0x10] sm:$0xf] %v5273_v41  ;;  %v5281_v45 = vld [vmem:[%s8680_s15 + $0x18] sm:$0xf]  ;;  %v5283_v54 = vld [vmem:[%s8680_s15 + $0x1c] sm:$0xf] }
 0x43a   : > { %5276 = vst [vmem:[%s5252_s12 + $0x18] sm:$0xf] %v5275_v42  ;;  %v5285_v25 = vld [vmem:[%s8680_s15 + $0x20] sm:$0xf]  ;;  %v5287_v2 = vld [vmem:[%s8680_s15 + $0x24] sm:$0xf] }
 0x43b   : > { %5278 = vst [vmem:[%s5252_s12 + $0x20] sm:$0xf] %v5277_v58  ;;  %v5289_v62 = vld [vmem:[%s8680_s15 + $0x28] sm:$0xf]  ;;  %v5291_v63 = vld [vmem:[%s8680_s15 + $0x2c] sm:$0xf] }
 0x43c   : > { %5280 = vst [vmem:[%s5252_s12 + $0x28] sm:$0xf] %v5279_v50  ;;  %v5293_v59 = vld [vmem:[%s8680_s15 + $0x30] sm:$0xf]  ;;  %v5295_v9 = vld [vmem:[%s8680_s15 + $0x34] sm:$0xf] }
 0x43d   : > { %5282 = vst [vmem:[%s5252_s12 + $0x30] sm:$0xf] %v5281_v45  ;;  %v5297_v40 = vld [vmem:[%s8680_s15 + $0x38] sm:$0xf]  ;;  %v5299_v16 = vld [vmem:[%s8680_s15 + $0x3c] sm:$0xf] }
 0x43e   : > { %5284 = vst [vmem:[%s5252_s12 + $0x38] sm:$0xf] %v5283_v54 }
 0x43f   : > { %5286 = vst [vmem:[%s5252_s12 + $0x40] sm:$0xf] %v5285_v25 }
 0x440   : > { %5288 = vst [vmem:[%s5252_s12 + $0x48] sm:$0xf] %v5287_v2 }
 0x441   : > { %5290 = vst [vmem:[%s5252_s12 + $0x50] sm:$0xf] %v5289_v62 }
 0x442   : > { %5292 = vst [vmem:[%s5252_s12 + $0x58] sm:$0xf] %v5291_v63 }
 0x443   : > { %5294 = vst [vmem:[%s5252_s12 + $0x60] sm:$0xf] %v5293_v59 }
 0x444   : > { %5296 = vst [vmem:[%s5252_s12 + $0x68] sm:$0xf] %v5295_v9 }
 0x445   : > { %5298 = vst [vmem:[%s5252_s12 + $0x70] sm:$0xf] %v5297_v40 }
 0x446   : > { %5300 = vst [vmem:[%s5252_s12 + $0x78] sm:$0xf] %v5299_v16 }
 0x447 PF: > { %s14_s19 = sadd.s32 1, %s6884_s19   ;;  %s8733_s15 = smov %s6872_s16 }
 0x448   : > { %p11_p12 = scmp.ge.s32.totalorder %s14_s19, 4   ;;  %s8734_s16 = smov %s6951_s25 }
 0x449   : > { %s8735_s17 = smov %s6880_s18  ;;  %s8736_s18 = smov %s8738_s20 }
 0x44a   :  { %13 = sbr.rel (!%p11_p12) target bundleno = 3 (0x3), region = 185 }

// kernel: discriminator_forward.8
= control target key start
LH: loop header
LB: loop body
LE: loop exit
PB: predicated region body
PF: predicated region fallthrough
CT: control target
= control target key end

     0   :  { %s6264_s0 = inlined_call_operand.vmem [shape: bf16[32,4096], index: 0, kind: input, shape index: {}]   ;;  %s6265_s1 = inlined_call_operand.vmem [shape: bf16[4096,512], index: 1, kind: input, shape index: {}]   ;;  %s6266_s2 = inlined_call_operand.vmem [shape: f32[1,512], index: 2, kind: input, shape index: {}]   ;;  %s6267_s3 = inlined_call_operand.vmem [shape: f32[1,512], index: 3, kind: input, shape index: {}]   ;;  %s6268_s4 = inlined_call_operand.vmem [shape: bf16[32,512], index: 4, kind: output, shape index: {}]  }
   0x1   :  { %6272 = sst [smem:[#allocation9_spill]] %s6264_s0 }
   0x2   :  { %6273 = sst [smem:[#allocation10_spill]] %s6265_s1 }
   0x3   :  { %s5294_s15 = smov 0   ;;  %s5296_s16 = smov 0  }
   0x4   :  { %s5298_s17 = smov 0   ;;  %s5300_s18 = smov 0  }
   0x5   :  { %s5302_s19 = smov 0   ;;  %s5304_s20 = smov 0  }
   0x6   :  { %s5306_s21 = smov 0   ;;  %s5308_s22 = smov 0  }
   0x7   :  { %s5310_s23 = smov 0   ;;  %s5312_s24 = smov 0  }
   0x8   :  { %s5314_s25 = smov 0  }
   0x9 LB: > { %6274 = sst [smem:[#allocation6_spill]] %s5262_s24  ;;  %s4254_s26 = sadd.s32 4294967295, %s5266_s25   ;;  %s5266_s25 = sphi %s5314_s25, %s14_s25   ;;  %s5262_s24 = sphi %s5312_s24, %s6284_s24   ;;  %s5258_s23 = sphi %s5310_s23, %s6292_s23   ;;  %s5254_s22 = sphi %s5308_s22, %s6282_s22   ;;  %s5250_s21 = sphi %s5306_s21, %s6291_s21   ;;  %s5246_s20 = sphi %s5304_s20, %s6290_s20   ;;  %s5242_s19 = sphi %s5302_s19, %s6289_s19   ;;  %s5238_s18 = sphi %s5300_s18, %s6288_s18   ;;  %s5234_s17 = sphi %s5298_s17, %s6287_s17   ;;  %s5230_s16 = sphi %s5296_s16, %s6286_s16   ;;  %s5226_s15 = sphi %s5294_s15, %s6285_s15  }
   0xa   : > { %s23_s27 = sadd.s32 1, %s5258_s23  ;;  %s26_s28 = sadd.s32 1, %s5262_s24 }
   0xb   : > { %p24_p0 = scmp.ge.s32.totalorder %s23_s27, 2  ;;  %s33_s29 = sadd.s32 1, %s5246_s20 }
   0xc   : > { %p40_p1 = scmp.ne.s32.totalorder %s5246_s20, %s5242_s19  ;;  %p41_p2 = scmp.eq.s32.totalorder %s5266_s25, 0 }
   0xd   : > { %s6294_s27 = smov (%p24_p0, %s23_s27), 0  ;;  %s6296_s28 = smov (!%p24_p0, %s26_s28), %s5262_s24 }
   0xe   : > { %6275 = sst [smem:[#allocation7_spill]] %s6294_s27  ;;  %s30_s30 = ssub.s32 %s5258_s23, %s6294_s27 }
   0xf   : > { %p28_p3 = scmp.ge.s32.totalorder %s6296_s28, 4  ;;  %p31_p4 = scmp.eq.s32.totalorder %s30_s30, 0 }
  0x10   : > { %p5361_p5 = por %p41_p2, %p40_p1  ;;  %s61_s6 = sadd.s32 1, %s5238_s18 }
  0x11   : > { %s6298_s28 = smov (%p28_p3, %s6296_s28), 0  ;;  %p68_p6 = scmp.ne.s32.totalorder %s5238_s18, %s5234_s17 }
  0x12   : > { %6277 = sst [smem:[#allocation8_spill]] %s6298_s28  ;;  %s57_s8 = ssub.s32 %s5262_s24, %s6298_s28 }
  0x13   : > { %s5369_s7 = scalar_select %p31_p4, %s5246_s20, %s33_s29  }
  0x14   : > { %s58_s9 = sor.u32 %s57_s8, %s30_s30  ;;  %p137_p7 = scmp.eq.s32.totalorder %s57_s8, 0 }
  0x15   : > { %p59_p8 = scmp.eq.s32.totalorder %s58_s9, 0  ;;  %p5375_p9 = por %p68_p6, %p41_p2 }
  0x16   : > { %s139_s11 = sadd.s32 1, %s5230_s16  ;;  %p149_p10 = scmp.ne.s32.totalorder %s5230_s16, %s5226_s15 }
  0x17   : > { %s5383_s12 = scalar_select %p59_p8, %s5238_s18, %s61_s6  }
  0x18   : > { %s5386_s13 = scalar_select %p137_p7, %s5230_s16, %s139_s11  }
  0x19   : > { %p150_p11 = scmp.eq.s32.totalorder %s4254_s26, 7  ;;  %p4257_p13 = scmp.ge.s32.totalorder %s5266_s25, 8 }
  0x1b   : > { %p5388_p12 = por %p150_p11, %p149_p10  ;;  %172 = sbr.rel (%p4257_p13) target bundleno = 340 (0x154), region = 16 }
  0x20   : > { %175 = sbr.rel (!%p5361_p5) target bundleno = 74 (0x4a), region = 20  ;;  %s177_s29 = sand.u32 (%p5361_p5), 1, %s5246_s20  }
  0x21   : > { %s4915_s30 = sshll.u32 (%p5361_p5), %s5258_s23, 6  ;;  %s4258_s8 = sshll.u32 (%p5361_p5), %s177_s29, 8 }
  0x22   : > { %s6280_s0 = sld [smem:[#allocation9_spill]] (%p5361_p5)  ;;  %s5405_s26 = scalar_lea.vmem (%p5361_p5), [#allocation3], %s4258_s8 }
  0x28   : > { %s5400_s11 = scalar_lea.vmem %s6280_s0, %s4915_s30 }
  0x29   : > { %v195_v0 = vld [vmem:[%s5400_s11] sm:$0xff]  ;;  %v197_v1 = vld [vmem:[%s5400_s11 + $0x8] sm:$0xff]  ;;  %v199_v2 = vld [vmem:[%s5400_s11 + $0x10] sm:$0xff] }
  0x2a   : > { %196 = vst [vmem:[%s5405_s26] sm:$0xff] %v195_v0  ;;  %v201_v3 = vld [vmem:[%s5400_s11 + $0x18] sm:$0xff]  ;;  %v203_v4 = vld [vmem:[%s5400_s11 + $0x20] sm:$0xff]  ;;  %v205_v5 = vld [vmem:[%s5400_s11 + $0x28] sm:$0xff] }
  0x2b   : > { %198 = vst [vmem:[%s5405_s26 + $0x8] sm:$0xff] %v197_v1  ;;  %v207_v6 = vld [vmem:[%s5400_s11 + $0x30] sm:$0xff]  ;;  %v209_v7 = vld [vmem:[%s5400_s11 + $0x38] sm:$0xff]  ;;  %v211_v8 = vld [vmem:[%s5400_s11 + $0x80] sm:$0xff] }
  0x2c   : > { %200 = vst [vmem:[%s5405_s26 + $0x10] sm:$0xff] %v199_v2  ;;  %v213_v9 = vld [vmem:[%s5400_s11 + $0x88] sm:$0xff]  ;;  %v215_v10 = vld [vmem:[%s5400_s11 + $0x90] sm:$0xff]  ;;  %v217_v11 = vld [vmem:[%s5400_s11 + $0x98] sm:$0xff] }
  0x2d   : > { %202 = vst [vmem:[%s5405_s26 + $0x18] sm:$0xff] %v201_v3  ;;  %v219_v12 = vld [vmem:[%s5400_s11 + $0xa0] sm:$0xff]  ;;  %v221_v13 = vld [vmem:[%s5400_s11 + $0xa8] sm:$0xff]  ;;  %v223_v14 = vld [vmem:[%s5400_s11 + $0xb0] sm:$0xff] }
  0x2e   : > { %204 = vst [vmem:[%s5405_s26 + $0x20] sm:$0xff] %v203_v4  ;;  %v225_v15 = vld [vmem:[%s5400_s11 + $0xb8] sm:$0xff]  ;;  %v227_v16 = vld [vmem:[%s5400_s11 + $0x100] sm:$0xff]  ;;  %v229_v17 = vld [vmem:[%s5400_s11 + $0x108] sm:$0xff] }
  0x2f   : > { %206 = vst [vmem:[%s5405_s26 + $0x28] sm:$0xff] %v205_v5  ;;  %v231_v18 = vld [vmem:[%s5400_s11 + $0x110] sm:$0xff]  ;;  %v233_v19 = vld [vmem:[%s5400_s11 + $0x118] sm:$0xff]  ;;  %v235_v20 = vld [vmem:[%s5400_s11 + $0x120] sm:$0xff] }
  0x30   : > { %208 = vst [vmem:[%s5405_s26 + $0x30] sm:$0xff] %v207_v6  ;;  %v237_v21 = vld [vmem:[%s5400_s11 + $0x128] sm:$0xff]  ;;  %v239_v22 = vld [vmem:[%s5400_s11 + $0x130] sm:$0xff]  ;;  %v241_v23 = vld [vmem:[%s5400_s11 + $0x138] sm:$0xff] }
  0x31   : > { %210 = vst [vmem:[%s5405_s26 + $0x38] sm:$0xff] %v209_v7  ;;  %v243_v24 = vld [vmem:[%s5400_s11 + $0x180] sm:$0xff]  ;;  %v245_v25 = vld [vmem:[%s5400_s11 + $0x188] sm:$0xff]  ;;  %v247_v26 = vld [vmem:[%s5400_s11 + $0x190] sm:$0xff] }
  0x32   : > { %212 = vst [vmem:[%s5405_s26 + $0x40] sm:$0xff] %v211_v8  ;;  %v249_v27 = vld [vmem:[%s5400_s11 + $0x198] sm:$0xff]  ;;  %v251_v28 = vld [vmem:[%s5400_s11 + $0x1a0] sm:$0xff]  ;;  %v253_v29 = vld [vmem:[%s5400_s11 + $0x1a8] sm:$0xff] }
  0x33   : > { %214 = vst [vmem:[%s5405_s26 + $0x48] sm:$0xff] %v213_v9  ;;  %v255_v30 = vld [vmem:[%s5400_s11 + $0x1b0] sm:$0xff]  ;;  %v257_v31 = vld [vmem:[%s5400_s11 + $0x1b8] sm:$0xff] }
  0x34   : > { %216 = vst [vmem:[%s5405_s26 + $0x50] sm:$0xff] %v215_v10 }
  0x35   : > { %218 = vst [vmem:[%s5405_s26 + $0x58] sm:$0xff] %v217_v11 }
  0x36   : > { %220 = vst [vmem:[%s5405_s26 + $0x60] sm:$0xff] %v219_v12 }
  0x37   : > { %222 = vst [vmem:[%s5405_s26 + $0x68] sm:$0xff] %v221_v13 }
  0x38   : > { %224 = vst [vmem:[%s5405_s26 + $0x70] sm:$0xff] %v223_v14 }
  0x39   : > { %226 = vst [vmem:[%s5405_s26 + $0x78] sm:$0xff] %v225_v15 }
  0x3a   : > { %228 = vst [vmem:[%s5405_s26 + $0x80] sm:$0xff] %v227_v16 }
  0x3b   : > { %230 = vst [vmem:[%s5405_s26 + $0x88] sm:$0xff] %v229_v17 }
  0x3c   : > { %232 = vst [vmem:[%s5405_s26 + $0x90] sm:$0xff] %v231_v18 }
  0x3d   : > { %234 = vst [vmem:[%s5405_s26 + $0x98] sm:$0xff] %v233_v19 }
  0x3e   : > { %236 = vst [vmem:[%s5405_s26 + $0xa0] sm:$0xff] %v235_v20 }
  0x3f   : > { %238 = vst [vmem:[%s5405_s26 + $0xa8] sm:$0xff] %v237_v21 }
  0x40   : > { %240 = vst [vmem:[%s5405_s26 + $0xb0] sm:$0xff] %v239_v22 }
  0x41   : > { %242 = vst [vmem:[%s5405_s26 + $0xb8] sm:$0xff] %v241_v23 }
  0x42   : > { %244 = vst [vmem:[%s5405_s26 + $0xc0] sm:$0xff] %v243_v24 }
  0x43   : > { %246 = vst [vmem:[%s5405_s26 + $0xc8] sm:$0xff] %v245_v25 }
  0x44   : > { %248 = vst [vmem:[%s5405_s26 + $0xd0] sm:$0xff] %v247_v26 }
  0x45   : > { %250 = vst [vmem:[%s5405_s26 + $0xd8] sm:$0xff] %v249_v27 }
  0x46   : > { %252 = vst [vmem:[%s5405_s26 + $0xe0] sm:$0xff] %v251_v28 }
  0x47   : > { %254 = vst [vmem:[%s5405_s26 + $0xe8] sm:$0xff] %v253_v29 }
  0x48   : > { %256 = vst [vmem:[%s5405_s26 + $0xf0] sm:$0xff] %v255_v30 }
  0x49   : > { %258 = vst [vmem:[%s5405_s26 + $0xf8] sm:$0xff] %v257_v31 }
  0x4a PF: > { %264 = sbr.rel (!%p5375_p9) target bundleno = 340 (0x154), region = 43  ;;  %s266_s5 = sand.u32 (%p5375_p9), 1, %s5238_s18  }
  0x4b   : > { %s4916_s29 = sshll.u32 (%p5375_p9), %s5258_s23, 10  ;;  %s4261_s30 = sshll.u32 (%p5375_p9), %s266_s5, 10 }
  0x4c   : > { %s271_s8 = sadd.s32 (%p5375_p9), %s5262_s24, %s4916_s29  ;;  %s6281_s1 = sld [smem:[#allocation10_spill]] (%p5375_p9) }
  0x4d   : > { %s4264_s6 = sshll.u32 (%p5375_p9), %s271_s8, 2  ;;  %s5481_s10 = scalar_lea.vmem (%p5375_p9), [#allocation4], %s4261_s30 }
  0x52   : > { %s5476_s28 = scalar_lea.vmem %s6281_s1, %s4264_s6 }
  0x53   : > { %v290_v32 = vld [vmem:[%s5476_s28] sm:$0xf]  ;;  %v292_v33 = vld [vmem:[%s5476_s28 + $0x10] sm:$0xf] }
  0x54   : > { %v294_v34 = vld [vmem:[%s5476_s28 + $0x20] sm:$0xf]  ;;  %291 = vst [vmem:[%s5481_s10] sm:$0xf] %v290_v32  ;;  %v296_v35 = vld [vmem:[%s5476_s28 + $0x30] sm:$0xf] }
  0x55   : > { %293 = vst [vmem:[%s5481_s10 + $0x4] sm:$0xf] %v292_v33  ;;  %v298_v36 = vld [vmem:[%s5476_s28 + $0x40] sm:$0xf]  ;;  %v300_v37 = vld [vmem:[%s5476_s28 + $0x50] sm:$0xf] }
  0x56   : > { %295 = vst [vmem:[%s5481_s10 + $0x8] sm:$0xf] %v294_v34  ;;  %v302_v38 = vld [vmem:[%s5476_s28 + $0x60] sm:$0xf]  ;;  %v304_v39 = vld [vmem:[%s5476_s28 + $0x70] sm:$0xf] }
  0x57   : > { %297 = vst [vmem:[%s5481_s10 + $0xc] sm:$0xf] %v296_v35  ;;  %v306_v40 = vld [vmem:[%s5476_s28 + $0x80] sm:$0xf]  ;;  %v308_v41 = vld [vmem:[%s5476_s28 + $0x90] sm:$0xf] }
  0x58   : > { %299 = vst [vmem:[%s5481_s10 + $0x10] sm:$0xf] %v298_v36  ;;  %v310_v42 = vld [vmem:[%s5476_s28 + $0xa0] sm:$0xf]  ;;  %v312_v43 = vld [vmem:[%s5476_s28 + $0xb0] sm:$0xf] }
  0x59   : > { %301 = vst [vmem:[%s5481_s10 + $0x14] sm:$0xf] %v300_v37  ;;  %v314_v44 = vld [vmem:[%s5476_s28 + $0xc0] sm:$0xf]  ;;  %v316_v45 = vld [vmem:[%s5476_s28 + $0xd0] sm:$0xf] }
  0x5a   : > { %303 = vst [vmem:[%s5481_s10 + $0x18] sm:$0xf] %v302_v38  ;;  %v318_v46 = vld [vmem:[%s5476_s28 + $0xe0] sm:$0xf]  ;;  %v320_v47 = vld [vmem:[%s5476_s28 + $0xf0] sm:$0xf] }
  0x5b   : > { %305 = vst [vmem:[%s5481_s10 + $0x1c] sm:$0xf] %v304_v39  ;;  %v322_v48 = vld [vmem:[%s5476_s28 + $0x100] sm:$0xf]  ;;  %v324_v49 = vld [vmem:[%s5476_s28 + $0x110] sm:$0xf] }
  0x5c   : > { %307 = vst [vmem:[%s5481_s10 + $0x20] sm:$0xf] %v306_v40  ;;  %v326_v50 = vld [vmem:[%s5476_s28 + $0x120] sm:$0xf]  ;;  %v328_v51 = vld [vmem:[%s5476_s28 + $0x130] sm:$0xf] }
  0x5d   : > { %309 = vst [vmem:[%s5481_s10 + $0x24] sm:$0xf] %v308_v41  ;;  %v330_v52 = vld [vmem:[%s5476_s28 + $0x140] sm:$0xf]  ;;  %v332_v53 = vld [vmem:[%s5476_s28 + $0x150] sm:$0xf] }
  0x5e   : > { %311 = vst [vmem:[%s5481_s10 + $0x28] sm:$0xf] %v310_v42  ;;  %v334_v54 = vld [vmem:[%s5476_s28 + $0x160] sm:$0xf]  ;;  %v336_v55 = vld [vmem:[%s5476_s28 + $0x170] sm:$0xf] }
  0x5f   : > { %313 = vst [vmem:[%s5481_s10 + $0x2c] sm:$0xf] %v312_v43  ;;  %v338_v56 = vld [vmem:[%s5476_s28 + $0x180] sm:$0xf]  ;;  %v340_v57 = vld [vmem:[%s5476_s28 + $0x190] sm:$0xf] }
  0x60   : > { %315 = vst [vmem:[%s5481_s10 + $0x30] sm:$0xf] %v314_v44  ;;  %v342_v58 = vld [vmem:[%s5476_s28 + $0x1a0] sm:$0xf]  ;;  %v344_v59 = vld [vmem:[%s5476_s28 + $0x1b0] sm:$0xf] }
  0x61   : > { %317 = vst [vmem:[%s5481_s10 + $0x34] sm:$0xf] %v316_v45  ;;  %v346_v60 = vld [vmem:[%s5476_s28 + $0x1c0] sm:$0xf]  ;;  %v348_v61 = vld [vmem:[%s5476_s28 + $0x1d0] sm:$0xf] }
  0x62   : > { %319 = vst [vmem:[%s5481_s10 + $0x38] sm:$0xf] %v318_v46  ;;  %v350_v62 = vld [vmem:[%s5476_s28 + $0x1e0] sm:$0xf]  ;;  %v352_v63 = vld [vmem:[%s5476_s28 + $0x1f0] sm:$0xf] }
  0x63   : > { %321 = vst [vmem:[%s5481_s10 + $0x3c] sm:$0xf] %v320_v47  ;;  %v354_v0 = vld [vmem:[%s5476_s28 + $0x200] sm:$0xf]  ;;  %v356_v1 = vld [vmem:[%s5476_s28 + $0x210] sm:$0xf] }
  0x64   : > { %323 = vst [vmem:[%s5481_s10 + $0x40] sm:$0xf] %v322_v48  ;;  %v358_v2 = vld [vmem:[%s5476_s28 + $0x220] sm:$0xf]  ;;  %v360_v3 = vld [vmem:[%s5476_s28 + $0x230] sm:$0xf] }
  0x65   : > { %325 = vst [vmem:[%s5481_s10 + $0x44] sm:$0xf] %v324_v49  ;;  %v362_v4 = vld [vmem:[%s5476_s28 + $0x240] sm:$0xf]  ;;  %v364_v5 = vld [vmem:[%s5476_s28 + $0x250] sm:$0xf] }
  0x66   : > { %327 = vst [vmem:[%s5481_s10 + $0x48] sm:$0xf] %v326_v50  ;;  %v366_v6 = vld [vmem:[%s5476_s28 + $0x260] sm:$0xf]  ;;  %v368_v7 = vld [vmem:[%s5476_s28 + $0x270] sm:$0xf] }
  0x67   : > { %329 = vst [vmem:[%s5481_s10 + $0x4c] sm:$0xf] %v328_v51  ;;  %v370_v8 = vld [vmem:[%s5476_s28 + $0x280] sm:$0xf]  ;;  %v372_v9 = vld [vmem:[%s5476_s28 + $0x290] sm:$0xf] }
  0x68   : > { %331 = vst [vmem:[%s5481_s10 + $0x50] sm:$0xf] %v330_v52  ;;  %v374_v10 = vld [vmem:[%s5476_s28 + $0x2a0] sm:$0xf]  ;;  %v376_v11 = vld [vmem:[%s5476_s28 + $0x2b0] sm:$0xf] }
  0x69   : > { %333 = vst [vmem:[%s5481_s10 + $0x54] sm:$0xf] %v332_v53  ;;  %v378_v12 = vld [vmem:[%s5476_s28 + $0x2c0] sm:$0xf]  ;;  %v380_v13 = vld [vmem:[%s5476_s28 + $0x2d0] sm:$0xf] }
  0x6a   : > { %335 = vst [vmem:[%s5481_s10 + $0x58] sm:$0xf] %v334_v54  ;;  %v382_v14 = vld [vmem:[%s5476_s28 + $0x2e0] sm:$0xf]  ;;  %v384_v15 = vld [vmem:[%s5476_s28 + $0x2f0] sm:$0xf] }
  0x6b   : > { %337 = vst [vmem:[%s5481_s10 + $0x5c] sm:$0xf] %v336_v55  ;;  %v386_v16 = vld [vmem:[%s5476_s28 + $0x300] sm:$0xf]  ;;  %v388_v17 = vld [vmem:[%s5476_s28 + $0x310] sm:$0xf] }
  0x6c   : > { %339 = vst [vmem:[%s5481_s10 + $0x60] sm:$0xf] %v338_v56  ;;  %v390_v18 = vld [vmem:[%s5476_s28 + $0x320] sm:$0xf]  ;;  %v392_v19 = vld [vmem:[%s5476_s28 + $0x330] sm:$0xf] }
  0x6d   : > { %341 = vst [vmem:[%s5481_s10 + $0x64] sm:$0xf] %v340_v57  ;;  %v394_v20 = vld [vmem:[%s5476_s28 + $0x340] sm:$0xf]  ;;  %v396_v21 = vld [vmem:[%s5476_s28 + $0x350] sm:$0xf] }
  0x6e   : > { %343 = vst [vmem:[%s5481_s10 + $0x68] sm:$0xf] %v342_v58  ;;  %v398_v22 = vld [vmem:[%s5476_s28 + $0x360] sm:$0xf]  ;;  %v400_v23 = vld [vmem:[%s5476_s28 + $0x370] sm:$0xf] }
  0x6f   : > { %345 = vst [vmem:[%s5481_s10 + $0x6c] sm:$0xf] %v344_v59  ;;  %v402_v24 = vld [vmem:[%s5476_s28 + $0x380] sm:$0xf]  ;;  %v404_v25 = vld [vmem:[%s5476_s28 + $0x390] sm:$0xf] }
  0x70   : > { %347 = vst [vmem:[%s5481_s10 + $0x70] sm:$0xf] %v346_v60  ;;  %v406_v26 = vld [vmem:[%s5476_s28 + $0x3a0] sm:$0xf]  ;;  %v408_v27 = vld [vmem:[%s5476_s28 + $0x3b0] sm:$0xf] }
  0x71   : > { %349 = vst [vmem:[%s5481_s10 + $0x74] sm:$0xf] %v348_v61  ;;  %v410_v28 = vld [vmem:[%s5476_s28 + $0x3c0] sm:$0xf]  ;;  %v412_v29 = vld [vmem:[%s5476_s28 + $0x3d0] sm:$0xf] }
  0x72   : > { %351 = vst [vmem:[%s5481_s10 + $0x78] sm:$0xf] %v350_v62  ;;  %v414_v30 = vld [vmem:[%s5476_s28 + $0x3e0] sm:$0xf]  ;;  %v416_v31 = vld [vmem:[%s5476_s28 + $0x3f0] sm:$0xf] }
  0x73   : > { %353 = vst [vmem:[%s5481_s10 + $0x7c] sm:$0xf] %v352_v63  ;;  %v418_v32 = vld [vmem:[%s5476_s28 + $0x400] sm:$0xf]  ;;  %v420_v33 = vld [vmem:[%s5476_s28 + $0x410] sm:$0xf] }
  0x74   : > { %355 = vst [vmem:[%s5481_s10 + $0x80] sm:$0xf] %v354_v0  ;;  %v422_v34 = vld [vmem:[%s5476_s28 + $0x420] sm:$0xf]  ;;  %v424_v35 = vld [vmem:[%s5476_s28 + $0x430] sm:$0xf] }
  0x75   : > { %357 = vst [vmem:[%s5481_s10 + $0x84] sm:$0xf] %v356_v1  ;;  %v426_v36 = vld [vmem:[%s5476_s28 + $0x440] sm:$0xf]  ;;  %v428_v37 = vld [vmem:[%s5476_s28 + $0x450] sm:$0xf] }
  0x76   : > { %359 = vst [vmem:[%s5481_s10 + $0x88] sm:$0xf] %v358_v2  ;;  %v430_v38 = vld [vmem:[%s5476_s28 + $0x460] sm:$0xf]  ;;  %v432_v39 = vld [vmem:[%s5476_s28 + $0x470] sm:$0xf] }
  0x77   : > { %361 = vst [vmem:[%s5481_s10 + $0x8c] sm:$0xf] %v360_v3  ;;  %v434_v40 = vld [vmem:[%s5476_s28 + $0x480] sm:$0xf]  ;;  %v436_v41 = vld [vmem:[%s5476_s28 + $0x490] sm:$0xf] }
  0x78   : > { %363 = vst [vmem:[%s5481_s10 + $0x90] sm:$0xf] %v362_v4  ;;  %v438_v42 = vld [vmem:[%s5476_s28 + $0x4a0] sm:$0xf]  ;;  %v440_v43 = vld [vmem:[%s5476_s28 + $0x4b0] sm:$0xf] }
  0x79   : > { %365 = vst [vmem:[%s5481_s10 + $0x94] sm:$0xf] %v364_v5  ;;  %v442_v44 = vld [vmem:[%s5476_s28 + $0x4c0] sm:$0xf]  ;;  %v444_v45 = vld [vmem:[%s5476_s28 + $0x4d0] sm:$0xf] }
  0x7a   : > { %367 = vst [vmem:[%s5481_s10 + $0x98] sm:$0xf] %v366_v6  ;;  %v446_v46 = vld [vmem:[%s5476_s28 + $0x4e0] sm:$0xf]  ;;  %v448_v47 = vld [vmem:[%s5476_s28 + $0x4f0] sm:$0xf] }
  0x7b   : > { %369 = vst [vmem:[%s5481_s10 + $0x9c] sm:$0xf] %v368_v7  ;;  %v450_v48 = vld [vmem:[%s5476_s28 + $0x500] sm:$0xf]  ;;  %v452_v49 = vld [vmem:[%s5476_s28 + $0x510] sm:$0xf] }
  0x7c   : > { %371 = vst [vmem:[%s5481_s10 + $0xa0] sm:$0xf] %v370_v8  ;;  %v454_v50 = vld [vmem:[%s5476_s28 + $0x520] sm:$0xf]  ;;  %v456_v51 = vld [vmem:[%s5476_s28 + $0x530] sm:$0xf] }
  0x7d   : > { %373 = vst [vmem:[%s5481_s10 + $0xa4] sm:$0xf] %v372_v9  ;;  %v458_v52 = vld [vmem:[%s5476_s28 + $0x540] sm:$0xf]  ;;  %v460_v53 = vld [vmem:[%s5476_s28 + $0x550] sm:$0xf] }
  0x7e   : > { %375 = vst [vmem:[%s5481_s10 + $0xa8] sm:$0xf] %v374_v10  ;;  %v462_v54 = vld [vmem:[%s5476_s28 + $0x560] sm:$0xf]  ;;  %v464_v55 = vld [vmem:[%s5476_s28 + $0x570] sm:$0xf] }
  0x7f   : > { %377 = vst [vmem:[%s5481_s10 + $0xac] sm:$0xf] %v376_v11  ;;  %v466_v56 = vld [vmem:[%s5476_s28 + $0x580] sm:$0xf]  ;;  %v468_v57 = vld [vmem:[%s5476_s28 + $0x590] sm:$0xf] }
  0x80   : > { %379 = vst [vmem:[%s5481_s10 + $0xb0] sm:$0xf] %v378_v12  ;;  %v470_v58 = vld [vmem:[%s5476_s28 + $0x5a0] sm:$0xf]  ;;  %v472_v59 = vld [vmem:[%s5476_s28 + $0x5b0] sm:$0xf] }
  0x81   : > { %381 = vst [vmem:[%s5481_s10 + $0xb4] sm:$0xf] %v380_v13  ;;  %v474_v60 = vld [vmem:[%s5476_s28 + $0x5c0] sm:$0xf]  ;;  %v476_v61 = vld [vmem:[%s5476_s28 + $0x5d0] sm:$0xf] }
  0x82   : > { %383 = vst [vmem:[%s5481_s10 + $0xb8] sm:$0xf] %v382_v14  ;;  %v478_v62 = vld [vmem:[%s5476_s28 + $0x5e0] sm:$0xf]  ;;  %v480_v63 = vld [vmem:[%s5476_s28 + $0x5f0] sm:$0xf] }
  0x83   : > { %385 = vst [vmem:[%s5481_s10 + $0xbc] sm:$0xf] %v384_v15  ;;  %v482_v0 = vld [vmem:[%s5476_s28 + $0x600] sm:$0xf]  ;;  %v484_v1 = vld [vmem:[%s5476_s28 + $0x610] sm:$0xf] }
  0x84   : > { %387 = vst [vmem:[%s5481_s10 + $0xc0] sm:$0xf] %v386_v16  ;;  %v486_v2 = vld [vmem:[%s5476_s28 + $0x620] sm:$0xf]  ;;  %v488_v3 = vld [vmem:[%s5476_s28 + $0x630] sm:$0xf] }
  0x85   : > { %389 = vst [vmem:[%s5481_s10 + $0xc4] sm:$0xf] %v388_v17  ;;  %v490_v4 = vld [vmem:[%s5476_s28 + $0x640] sm:$0xf]  ;;  %v492_v5 = vld [vmem:[%s5476_s28 + $0x650] sm:$0xf] }
  0x86   : > { %391 = vst [vmem:[%s5481_s10 + $0xc8] sm:$0xf] %v390_v18  ;;  %v494_v6 = vld [vmem:[%s5476_s28 + $0x660] sm:$0xf]  ;;  %v496_v7 = vld [vmem:[%s5476_s28 + $0x670] sm:$0xf] }
  0x87   : > { %393 = vst [vmem:[%s5481_s10 + $0xcc] sm:$0xf] %v392_v19  ;;  %v498_v8 = vld [vmem:[%s5476_s28 + $0x680] sm:$0xf]  ;;  %v500_v9 = vld [vmem:[%s5476_s28 + $0x690] sm:$0xf] }
  0x88   : > { %395 = vst [vmem:[%s5481_s10 + $0xd0] sm:$0xf] %v394_v20  ;;  %v502_v10 = vld [vmem:[%s5476_s28 + $0x6a0] sm:$0xf]  ;;  %v504_v11 = vld [vmem:[%s5476_s28 + $0x6b0] sm:$0xf] }
  0x89   : > { %397 = vst [vmem:[%s5481_s10 + $0xd4] sm:$0xf] %v396_v21  ;;  %v506_v12 = vld [vmem:[%s5476_s28 + $0x6c0] sm:$0xf]  ;;  %v508_v13 = vld [vmem:[%s5476_s28 + $0x6d0] sm:$0xf] }
  0x8a   : > { %399 = vst [vmem:[%s5481_s10 + $0xd8] sm:$0xf] %v398_v22  ;;  %v510_v14 = vld [vmem:[%s5476_s28 + $0x6e0] sm:$0xf]  ;;  %v512_v15 = vld [vmem:[%s5476_s28 + $0x6f0] sm:$0xf] }
  0x8b   : > { %401 = vst [vmem:[%s5481_s10 + $0xdc] sm:$0xf] %v400_v23  ;;  %v514_v16 = vld [vmem:[%s5476_s28 + $0x700] sm:$0xf]  ;;  %v516_v17 = vld [vmem:[%s5476_s28 + $0x710] sm:$0xf] }
  0x8c   : > { %403 = vst [vmem:[%s5481_s10 + $0xe0] sm:$0xf] %v402_v24  ;;  %v518_v18 = vld [vmem:[%s5476_s28 + $0x720] sm:$0xf]  ;;  %v520_v19 = vld [vmem:[%s5476_s28 + $0x730] sm:$0xf] }
  0x8d   : > { %405 = vst [vmem:[%s5481_s10 + $0xe4] sm:$0xf] %v404_v25  ;;  %v522_v20 = vld [vmem:[%s5476_s28 + $0x740] sm:$0xf]  ;;  %v524_v21 = vld [vmem:[%s5476_s28 + $0x750] sm:$0xf] }
  0x8e   : > { %407 = vst [vmem:[%s5481_s10 + $0xe8] sm:$0xf] %v406_v26  ;;  %v526_v22 = vld [vmem:[%s5476_s28 + $0x760] sm:$0xf]  ;;  %v528_v23 = vld [vmem:[%s5476_s28 + $0x770] sm:$0xf] }
  0x8f   : > { %409 = vst [vmem:[%s5481_s10 + $0xec] sm:$0xf] %v408_v27  ;;  %v530_v24 = vld [vmem:[%s5476_s28 + $0x780] sm:$0xf]  ;;  %v532_v25 = vld [vmem:[%s5476_s28 + $0x790] sm:$0xf] }
  0x90   : > { %411 = vst [vmem:[%s5481_s10 + $0xf0] sm:$0xf] %v410_v28  ;;  %v534_v26 = vld [vmem:[%s5476_s28 + $0x7a0] sm:$0xf]  ;;  %v536_v27 = vld [vmem:[%s5476_s28 + $0x7b0] sm:$0xf] }
  0x91   : > { %413 = vst [vmem:[%s5481_s10 + $0xf4] sm:$0xf] %v412_v29  ;;  %v538_v28 = vld [vmem:[%s5476_s28 + $0x7c0] sm:$0xf]  ;;  %v540_v29 = vld [vmem:[%s5476_s28 + $0x7d0] sm:$0xf] }
  0x92   : > { %415 = vst [vmem:[%s5481_s10 + $0xf8] sm:$0xf] %v414_v30  ;;  %v542_v30 = vld [vmem:[%s5476_s28 + $0x7e0] sm:$0xf] }
  0x93   : > { %417 = vst [vmem:[%s5481_s10 + $0xfc] sm:$0xf] %v416_v31  ;;  %v544_v31 = vld [vmem:[%s5476_s28 + $0x7f0] sm:$0xf] }
  0x94   : > { %419 = vst [vmem:[%s5481_s10 + $0x100] sm:$0xf] %v418_v32  ;;  %v546_v32 = vld [vmem:[%s5476_s28 + $0x800] sm:$0xf] }
  0x95   : > { %421 = vst [vmem:[%s5481_s10 + $0x104] sm:$0xf] %v420_v33  ;;  %v548_v33 = vld [vmem:[%s5476_s28 + $0x810] sm:$0xf] }
  0x96   : > { %423 = vst [vmem:[%s5481_s10 + $0x108] sm:$0xf] %v422_v34  ;;  %v550_v34 = vld [vmem:[%s5476_s28 + $0x820] sm:$0xf] }
  0x97   : > { %425 = vst [vmem:[%s5481_s10 + $0x10c] sm:$0xf] %v424_v35  ;;  %v552_v35 = vld [vmem:[%s5476_s28 + $0x830] sm:$0xf] }
  0x98   : > { %427 = vst [vmem:[%s5481_s10 + $0x110] sm:$0xf] %v426_v36  ;;  %v554_v36 = vld [vmem:[%s5476_s28 + $0x840] sm:$0xf] }
  0x99   : > { %429 = vst [vmem:[%s5481_s10 + $0x114] sm:$0xf] %v428_v37  ;;  %v556_v37 = vld [vmem:[%s5476_s28 + $0x850] sm:$0xf] }
  0x9a   : > { %431 = vst [vmem:[%s5481_s10 + $0x118] sm:$0xf] %v430_v38  ;;  %v558_v38 = vld [vmem:[%s5476_s28 + $0x860] sm:$0xf] }
  0x9b   : > { %433 = vst [vmem:[%s5481_s10 + $0x11c] sm:$0xf] %v432_v39  ;;  %v560_v39 = vld [vmem:[%s5476_s28 + $0x870] sm:$0xf] }
  0x9c   : > { %435 = vst [vmem:[%s5481_s10 + $0x120] sm:$0xf] %v434_v40  ;;  %v562_v40 = vld [vmem:[%s5476_s28 + $0x880] sm:$0xf] }
  0x9d   : > { %437 = vst [vmem:[%s5481_s10 + $0x124] sm:$0xf] %v436_v41  ;;  %v564_v41 = vld [vmem:[%s5476_s28 + $0x890] sm:$0xf] }
  0x9e   : > { %439 = vst [vmem:[%s5481_s10 + $0x128] sm:$0xf] %v438_v42  ;;  %v566_v42 = vld [vmem:[%s5476_s28 + $0x8a0] sm:$0xf] }
  0x9f   : > { %441 = vst [vmem:[%s5481_s10 + $0x12c] sm:$0xf] %v440_v43  ;;  %v568_v43 = vld [vmem:[%s5476_s28 + $0x8b0] sm:$0xf] }
  0xa0   : > { %443 = vst [vmem:[%s5481_s10 + $0x130] sm:$0xf] %v442_v44  ;;  %v570_v44 = vld [vmem:[%s5476_s28 + $0x8c0] sm:$0xf] }
  0xa1   : > { %445 = vst [vmem:[%s5481_s10 + $0x134] sm:$0xf] %v444_v45  ;;  %v572_v45 = vld [vmem:[%s5476_s28 + $0x8d0] sm:$0xf] }
  0xa2   : > { %447 = vst [vmem:[%s5481_s10 + $0x138] sm:$0xf] %v446_v46  ;;  %v574_v46 = vld [vmem:[%s5476_s28 + $0x8e0] sm:$0xf] }
  0xa3   : > { %449 = vst [vmem:[%s5481_s10 + $0x13c] sm:$0xf] %v448_v47  ;;  %v576_v47 = vld [vmem:[%s5476_s28 + $0x8f0] sm:$0xf] }
  0xa4   : > { %451 = vst [vmem:[%s5481_s10 + $0x140] sm:$0xf] %v450_v48  ;;  %v578_v48 = vld [vmem:[%s5476_s28 + $0x900] sm:$0xf] }
  0xa5   : > { %453 = vst [vmem:[%s5481_s10 + $0x144] sm:$0xf] %v452_v49  ;;  %v580_v49 = vld [vmem:[%s5476_s28 + $0x910] sm:$0xf] }
  0xa6   : > { %455 = vst [vmem:[%s5481_s10 + $0x148] sm:$0xf] %v454_v50  ;;  %v582_v50 = vld [vmem:[%s5476_s28 + $0x920] sm:$0xf] }
  0xa7   : > { %457 = vst [vmem:[%s5481_s10 + $0x14c] sm:$0xf] %v456_v51  ;;  %v584_v51 = vld [vmem:[%s5476_s28 + $0x930] sm:$0xf] }
  0xa8   : > { %459 = vst [vmem:[%s5481_s10 + $0x150] sm:$0xf] %v458_v52  ;;  %v586_v52 = vld [vmem:[%s5476_s28 + $0x940] sm:$0xf] }
  0xa9   : > { %461 = vst [vmem:[%s5481_s10 + $0x154] sm:$0xf] %v460_v53  ;;  %v588_v53 = vld [vmem:[%s5476_s28 + $0x950] sm:$0xf] }
  0xaa   : > { %463 = vst [vmem:[%s5481_s10 + $0x158] sm:$0xf] %v462_v54  ;;  %v590_v54 = vld [vmem:[%s5476_s28 + $0x960] sm:$0xf] }
  0xab   : > { %465 = vst [vmem:[%s5481_s10 + $0x15c] sm:$0xf] %v464_v55  ;;  %v592_v55 = vld [vmem:[%s5476_s28 + $0x970] sm:$0xf] }
  0xac   : > { %467 = vst [vmem:[%s5481_s10 + $0x160] sm:$0xf] %v466_v56  ;;  %v594_v56 = vld [vmem:[%s5476_s28 + $0x980] sm:$0xf] }
  0xad   : > { %469 = vst [vmem:[%s5481_s10 + $0x164] sm:$0xf] %v468_v57  ;;  %v596_v57 = vld [vmem:[%s5476_s28 + $0x990] sm:$0xf] }
  0xae   : > { %471 = vst [vmem:[%s5481_s10 + $0x168] sm:$0xf] %v470_v58  ;;  %v598_v58 = vld [vmem:[%s5476_s28 + $0x9a0] sm:$0xf] }
  0xaf   : > { %473 = vst [vmem:[%s5481_s10 + $0x16c] sm:$0xf] %v472_v59  ;;  %v600_v59 = vld [vmem:[%s5476_s28 + $0x9b0] sm:$0xf] }
  0xb0   : > { %475 = vst [vmem:[%s5481_s10 + $0x170] sm:$0xf] %v474_v60  ;;  %v602_v60 = vld [vmem:[%s5476_s28 + $0x9c0] sm:$0xf] }
  0xb1   : > { %477 = vst [vmem:[%s5481_s10 + $0x174] sm:$0xf] %v476_v61  ;;  %v604_v61 = vld [vmem:[%s5476_s28 + $0x9d0] sm:$0xf] }
  0xb2   : > { %479 = vst [vmem:[%s5481_s10 + $0x178] sm:$0xf] %v478_v62  ;;  %v606_v62 = vld [vmem:[%s5476_s28 + $0x9e0] sm:$0xf] }
  0xb3   : > { %481 = vst [vmem:[%s5481_s10 + $0x17c] sm:$0xf] %v480_v63  ;;  %v608_v63 = vld [vmem:[%s5476_s28 + $0x9f0] sm:$0xf] }
  0xb4   : > { %483 = vst [vmem:[%s5481_s10 + $0x180] sm:$0xf] %v482_v0  ;;  %v610_v0 = vld [vmem:[%s5476_s28 + $0xa00] sm:$0xf] }
  0xb5   : > { %485 = vst [vmem:[%s5481_s10 + $0x184] sm:$0xf] %v484_v1  ;;  %v612_v1 = vld [vmem:[%s5476_s28 + $0xa10] sm:$0xf] }
  0xb6   : > { %487 = vst [vmem:[%s5481_s10 + $0x188] sm:$0xf] %v486_v2  ;;  %v614_v2 = vld [vmem:[%s5476_s28 + $0xa20] sm:$0xf] }
  0xb7   : > { %489 = vst [vmem:[%s5481_s10 + $0x18c] sm:$0xf] %v488_v3  ;;  %v616_v3 = vld [vmem:[%s5476_s28 + $0xa30] sm:$0xf] }
  0xb8   : > { %491 = vst [vmem:[%s5481_s10 + $0x190] sm:$0xf] %v490_v4  ;;  %v618_v4 = vld [vmem:[%s5476_s28 + $0xa40] sm:$0xf] }
  0xb9   : > { %493 = vst [vmem:[%s5481_s10 + $0x194] sm:$0xf] %v492_v5  ;;  %v620_v5 = vld [vmem:[%s5476_s28 + $0xa50] sm:$0xf] }
  0xba   : > { %495 = vst [vmem:[%s5481_s10 + $0x198] sm:$0xf] %v494_v6  ;;  %v622_v6 = vld [vmem:[%s5476_s28 + $0xa60] sm:$0xf] }
  0xbb   : > { %497 = vst [vmem:[%s5481_s10 + $0x19c] sm:$0xf] %v496_v7  ;;  %v624_v7 = vld [vmem:[%s5476_s28 + $0xa70] sm:$0xf] }
  0xbc   : > { %499 = vst [vmem:[%s5481_s10 + $0x1a0] sm:$0xf] %v498_v8  ;;  %v626_v8 = vld [vmem:[%s5476_s28 + $0xa80] sm:$0xf] }
  0xbd   : > { %501 = vst [vmem:[%s5481_s10 + $0x1a4] sm:$0xf] %v500_v9  ;;  %v628_v9 = vld [vmem:[%s5476_s28 + $0xa90] sm:$0xf] }
  0xbe   : > { %503 = vst [vmem:[%s5481_s10 + $0x1a8] sm:$0xf] %v502_v10  ;;  %v630_v10 = vld [vmem:[%s5476_s28 + $0xaa0] sm:$0xf] }
  0xbf   : > { %505 = vst [vmem:[%s5481_s10 + $0x1ac] sm:$0xf] %v504_v11  ;;  %v632_v11 = vld [vmem:[%s5476_s28 + $0xab0] sm:$0xf] }
  0xc0   : > { %507 = vst [vmem:[%s5481_s10 + $0x1b0] sm:$0xf] %v506_v12  ;;  %v634_v12 = vld [vmem:[%s5476_s28 + $0xac0] sm:$0xf] }
  0xc1   : > { %509 = vst [vmem:[%s5481_s10 + $0x1b4] sm:$0xf] %v508_v13  ;;  %v636_v13 = vld [vmem:[%s5476_s28 + $0xad0] sm:$0xf] }
  0xc2   : > { %511 = vst [vmem:[%s5481_s10 + $0x1b8] sm:$0xf] %v510_v14  ;;  %v638_v14 = vld [vmem:[%s5476_s28 + $0xae0] sm:$0xf] }
  0xc3   : > { %513 = vst [vmem:[%s5481_s10 + $0x1bc] sm:$0xf] %v512_v15  ;;  %v640_v15 = vld [vmem:[%s5476_s28 + $0xaf0] sm:$0xf] }
  0xc4   : > { %515 = vst [vmem:[%s5481_s10 + $0x1c0] sm:$0xf] %v514_v16  ;;  %v642_v16 = vld [vmem:[%s5476_s28 + $0xb00] sm:$0xf] }
  0xc5   : > { %517 = vst [vmem:[%s5481_s10 + $0x1c4] sm:$0xf] %v516_v17  ;;  %v644_v17 = vld [vmem:[%s5476_s28 + $0xb10] sm:$0xf] }
  0xc6   : > { %519 = vst [vmem:[%s5481_s10 + $0x1c8] sm:$0xf] %v518_v18  ;;  %v646_v18 = vld [vmem:[%s5476_s28 + $0xb20] sm:$0xf] }
  0xc7   : > { %521 = vst [vmem:[%s5481_s10 + $0x1cc] sm:$0xf] %v520_v19  ;;  %v648_v19 = vld [vmem:[%s5476_s28 + $0xb30] sm:$0xf] }
  0xc8   : > { %523 = vst [vmem:[%s5481_s10 + $0x1d0] sm:$0xf] %v522_v20  ;;  %v650_v20 = vld [vmem:[%s5476_s28 + $0xb40] sm:$0xf] }
  0xc9   : > { %525 = vst [vmem:[%s5481_s10 + $0x1d4] sm:$0xf] %v524_v21  ;;  %v652_v21 = vld [vmem:[%s5476_s28 + $0xb50] sm:$0xf] }
  0xca   : > { %527 = vst [vmem:[%s5481_s10 + $0x1d8] sm:$0xf] %v526_v22  ;;  %v654_v22 = vld [vmem:[%s5476_s28 + $0xb60] sm:$0xf] }
  0xcb   : > { %529 = vst [vmem:[%s5481_s10 + $0x1dc] sm:$0xf] %v528_v23  ;;  %v656_v23 = vld [vmem:[%s5476_s28 + $0xb70] sm:$0xf] }
  0xcc   : > { %531 = vst [vmem:[%s5481_s10 + $0x1e0] sm:$0xf] %v530_v24  ;;  %v658_v24 = vld [vmem:[%s5476_s28 + $0xb80] sm:$0xf] }
  0xcd   : > { %533 = vst [vmem:[%s5481_s10 + $0x1e4] sm:$0xf] %v532_v25  ;;  %v660_v25 = vld [vmem:[%s5476_s28 + $0xb90] sm:$0xf] }
  0xce   : > { %535 = vst [vmem:[%s5481_s10 + $0x1e8] sm:$0xf] %v534_v26  ;;  %v662_v26 = vld [vmem:[%s5476_s28 + $0xba0] sm:$0xf] }
  0xcf   : > { %537 = vst [vmem:[%s5481_s10 + $0x1ec] sm:$0xf] %v536_v27  ;;  %v664_v27 = vld [vmem:[%s5476_s28 + $0xbb0] sm:$0xf] }
  0xd0   : > { %539 = vst [vmem:[%s5481_s10 + $0x1f0] sm:$0xf] %v538_v28  ;;  %v666_v28 = vld [vmem:[%s5476_s28 + $0xbc0] sm:$0xf] }
  0xd1   : > { %541 = vst [vmem:[%s5481_s10 + $0x1f4] sm:$0xf] %v540_v29  ;;  %v668_v29 = vld [vmem:[%s5476_s28 + $0xbd0] sm:$0xf] }
  0xd2   : > { %543 = vst [vmem:[%s5481_s10 + $0x1f8] sm:$0xf] %v542_v30  ;;  %v670_v30 = vld [vmem:[%s5476_s28 + $0xbe0] sm:$0xf] }
  0xd3   : > { %545 = vst [vmem:[%s5481_s10 + $0x1fc] sm:$0xf] %v544_v31  ;;  %v672_v31 = vld [vmem:[%s5476_s28 + $0xbf0] sm:$0xf] }
  0xd4   : > { %547 = vst [vmem:[%s5481_s10 + $0x200] sm:$0xf] %v546_v32  ;;  %v674_v32 = vld [vmem:[%s5476_s28 + $0xc00] sm:$0xf] }
  0xd5   : > { %549 = vst [vmem:[%s5481_s10 + $0x204] sm:$0xf] %v548_v33  ;;  %v676_v33 = vld [vmem:[%s5476_s28 + $0xc10] sm:$0xf] }
  0xd6   : > { %551 = vst [vmem:[%s5481_s10 + $0x208] sm:$0xf] %v550_v34  ;;  %v678_v34 = vld [vmem:[%s5476_s28 + $0xc20] sm:$0xf] }
  0xd7   : > { %553 = vst [vmem:[%s5481_s10 + $0x20c] sm:$0xf] %v552_v35  ;;  %v680_v35 = vld [vmem:[%s5476_s28 + $0xc30] sm:$0xf] }
  0xd8   : > { %555 = vst [vmem:[%s5481_s10 + $0x210] sm:$0xf] %v554_v36  ;;  %v682_v36 = vld [vmem:[%s5476_s28 + $0xc40] sm:$0xf] }
  0xd9   : > { %557 = vst [vmem:[%s5481_s10 + $0x214] sm:$0xf] %v556_v37  ;;  %v684_v37 = vld [vmem:[%s5476_s28 + $0xc50] sm:$0xf] }
  0xda   : > { %559 = vst [vmem:[%s5481_s10 + $0x218] sm:$0xf] %v558_v38  ;;  %v686_v38 = vld [vmem:[%s5476_s28 + $0xc60] sm:$0xf] }
  0xdb   : > { %561 = vst [vmem:[%s5481_s10 + $0x21c] sm:$0xf] %v560_v39  ;;  %v688_v39 = vld [vmem:[%s5476_s28 + $0xc70] sm:$0xf] }
  0xdc   : > { %563 = vst [vmem:[%s5481_s10 + $0x220] sm:$0xf] %v562_v40  ;;  %v690_v40 = vld [vmem:[%s5476_s28 + $0xc80] sm:$0xf] }
  0xdd   : > { %565 = vst [vmem:[%s5481_s10 + $0x224] sm:$0xf] %v564_v41  ;;  %v692_v41 = vld [vmem:[%s5476_s28 + $0xc90] sm:$0xf] }
  0xde   : > { %567 = vst [vmem:[%s5481_s10 + $0x228] sm:$0xf] %v566_v42  ;;  %v694_v42 = vld [vmem:[%s5476_s28 + $0xca0] sm:$0xf] }
  0xdf   : > { %569 = vst [vmem:[%s5481_s10 + $0x22c] sm:$0xf] %v568_v43  ;;  %v696_v43 = vld [vmem:[%s5476_s28 + $0xcb0] sm:$0xf] }
  0xe0   : > { %571 = vst [vmem:[%s5481_s10 + $0x230] sm:$0xf] %v570_v44  ;;  %v698_v44 = vld [vmem:[%s5476_s28 + $0xcc0] sm:$0xf] }
  0xe1   : > { %573 = vst [vmem:[%s5481_s10 + $0x234] sm:$0xf] %v572_v45  ;;  %v700_v45 = vld [vmem:[%s5476_s28 + $0xcd0] sm:$0xf] }
  0xe2   : > { %575 = vst [vmem:[%s5481_s10 + $0x238] sm:$0xf] %v574_v46  ;;  %v702_v46 = vld [vmem:[%s5476_s28 + $0xce0] sm:$0xf] }
  0xe3   : > { %577 = vst [vmem:[%s5481_s10 + $0x23c] sm:$0xf] %v576_v47  ;;  %v704_v47 = vld [vmem:[%s5476_s28 + $0xcf0] sm:$0xf] }
  0xe4   : > { %579 = vst [vmem:[%s5481_s10 + $0x240] sm:$0xf] %v578_v48  ;;  %v706_v48 = vld [vmem:[%s5476_s28 + $0xd00] sm:$0xf] }
  0xe5   : > { %581 = vst [vmem:[%s5481_s10 + $0x244] sm:$0xf] %v580_v49  ;;  %v708_v49 = vld [vmem:[%s5476_s28 + $0xd10] sm:$0xf] }
  0xe6   : > { %583 = vst [vmem:[%s5481_s10 + $0x248] sm:$0xf] %v582_v50  ;;  %v710_v50 = vld [vmem:[%s5476_s28 + $0xd20] sm:$0xf] }
  0xe7   : > { %585 = vst [vmem:[%s5481_s10 + $0x24c] sm:$0xf] %v584_v51  ;;  %v712_v51 = vld [vmem:[%s5476_s28 + $0xd30] sm:$0xf] }
  0xe8   : > { %587 = vst [vmem:[%s5481_s10 + $0x250] sm:$0xf] %v586_v52  ;;  %v714_v52 = vld [vmem:[%s5476_s28 + $0xd40] sm:$0xf] }
  0xe9   : > { %589 = vst [vmem:[%s5481_s10 + $0x254] sm:$0xf] %v588_v53  ;;  %v716_v53 = vld [vmem:[%s5476_s28 + $0xd50] sm:$0xf] }
  0xea   : > { %591 = vst [vmem:[%s5481_s10 + $0x258] sm:$0xf] %v590_v54  ;;  %v718_v54 = vld [vmem:[%s5476_s28 + $0xd60] sm:$0xf] }
  0xeb   : > { %593 = vst [vmem:[%s5481_s10 + $0x25c] sm:$0xf] %v592_v55  ;;  %v720_v55 = vld [vmem:[%s5476_s28 + $0xd70] sm:$0xf] }
  0xec   : > { %595 = vst [vmem:[%s5481_s10 + $0x260] sm:$0xf] %v594_v56  ;;  %v722_v56 = vld [vmem:[%s5476_s28 + $0xd80] sm:$0xf] }
  0xed   : > { %597 = vst [vmem:[%s5481_s10 + $0x264] sm:$0xf] %v596_v57  ;;  %v724_v57 = vld [vmem:[%s5476_s28 + $0xd90] sm:$0xf] }
  0xee   : > { %599 = vst [vmem:[%s5481_s10 + $0x268] sm:$0xf] %v598_v58  ;;  %v726_v58 = vld [vmem:[%s5476_s28 + $0xda0] sm:$0xf] }
  0xef   : > { %601 = vst [vmem:[%s5481_s10 + $0x26c] sm:$0xf] %v600_v59  ;;  %v728_v59 = vld [vmem:[%s5476_s28 + $0xdb0] sm:$0xf] }
  0xf0   : > { %603 = vst [vmem:[%s5481_s10 + $0x270] sm:$0xf] %v602_v60  ;;  %v730_v60 = vld [vmem:[%s5476_s28 + $0xdc0] sm:$0xf] }
  0xf1   : > { %605 = vst [vmem:[%s5481_s10 + $0x274] sm:$0xf] %v604_v61  ;;  %v732_v61 = vld [vmem:[%s5476_s28 + $0xdd0] sm:$0xf] }
  0xf2   : > { %607 = vst [vmem:[%s5481_s10 + $0x278] sm:$0xf] %v606_v62  ;;  %v734_v62 = vld [vmem:[%s5476_s28 + $0xde0] sm:$0xf] }
  0xf3   : > { %609 = vst [vmem:[%s5481_s10 + $0x27c] sm:$0xf] %v608_v63  ;;  %v736_v63 = vld [vmem:[%s5476_s28 + $0xdf0] sm:$0xf] }
  0xf4   : > { %611 = vst [vmem:[%s5481_s10 + $0x280] sm:$0xf] %v610_v0  ;;  %v738_v0 = vld [vmem:[%s5476_s28 + $0xe00] sm:$0xf] }
  0xf5   : > { %613 = vst [vmem:[%s5481_s10 + $0x284] sm:$0xf] %v612_v1  ;;  %v740_v1 = vld [vmem:[%s5476_s28 + $0xe10] sm:$0xf] }
  0xf6   : > { %615 = vst [vmem:[%s5481_s10 + $0x288] sm:$0xf] %v614_v2  ;;  %v742_v2 = vld [vmem:[%s5476_s28 + $0xe20] sm:$0xf] }
  0xf7   : > { %617 = vst [vmem:[%s5481_s10 + $0x28c] sm:$0xf] %v616_v3  ;;  %v744_v3 = vld [vmem:[%s5476_s28 + $0xe30] sm:$0xf] }
  0xf8   : > { %619 = vst [vmem:[%s5481_s10 + $0x290] sm:$0xf] %v618_v4  ;;  %v746_v4 = vld [vmem:[%s5476_s28 + $0xe40] sm:$0xf] }
  0xf9   : > { %621 = vst [vmem:[%s5481_s10 + $0x294] sm:$0xf] %v620_v5  ;;  %v748_v5 = vld [vmem:[%s5476_s28 + $0xe50] sm:$0xf] }
  0xfa   : > { %623 = vst [vmem:[%s5481_s10 + $0x298] sm:$0xf] %v622_v6  ;;  %v750_v6 = vld [vmem:[%s5476_s28 + $0xe60] sm:$0xf] }
  0xfb   : > { %625 = vst [vmem:[%s5481_s10 + $0x29c] sm:$0xf] %v624_v7  ;;  %v752_v7 = vld [vmem:[%s5476_s28 + $0xe70] sm:$0xf] }
  0xfc   : > { %627 = vst [vmem:[%s5481_s10 + $0x2a0] sm:$0xf] %v626_v8  ;;  %v754_v8 = vld [vmem:[%s5476_s28 + $0xe80] sm:$0xf] }
  0xfd   : > { %629 = vst [vmem:[%s5481_s10 + $0x2a4] sm:$0xf] %v628_v9  ;;  %v756_v9 = vld [vmem:[%s5476_s28 + $0xe90] sm:$0xf] }
  0xfe   : > { %631 = vst [vmem:[%s5481_s10 + $0x2a8] sm:$0xf] %v630_v10  ;;  %v758_v10 = vld [vmem:[%s5476_s28 + $0xea0] sm:$0xf] }
  0xff   : > { %633 = vst [vmem:[%s5481_s10 + $0x2ac] sm:$0xf] %v632_v11  ;;  %v760_v11 = vld [vmem:[%s5476_s28 + $0xeb0] sm:$0xf] }
 0x100   : > { %635 = vst [vmem:[%s5481_s10 + $0x2b0] sm:$0xf] %v634_v12  ;;  %v762_v12 = vld [vmem:[%s5476_s28 + $0xec0] sm:$0xf] }
 0x101   : > { %637 = vst [vmem:[%s5481_s10 + $0x2b4] sm:$0xf] %v636_v13  ;;  %v764_v13 = vld [vmem:[%s5476_s28 + $0xed0] sm:$0xf] }
 0x102   : > { %639 = vst [vmem:[%s5481_s10 + $0x2b8] sm:$0xf] %v638_v14  ;;  %v766_v14 = vld [vmem:[%s5476_s28 + $0xee0] sm:$0xf] }
 0x103   : > { %641 = vst [vmem:[%s5481_s10 + $0x2bc] sm:$0xf] %v640_v15  ;;  %v768_v15 = vld [vmem:[%s5476_s28 + $0xef0] sm:$0xf] }
 0x104   : > { %643 = vst [vmem:[%s5481_s10 + $0x2c0] sm:$0xf] %v642_v16  ;;  %v770_v16 = vld [vmem:[%s5476_s28 + $0xf00] sm:$0xf] }
 0x105   : > { %645 = vst [vmem:[%s5481_s10 + $0x2c4] sm:$0xf] %v644_v17  ;;  %v772_v17 = vld [vmem:[%s5476_s28 + $0xf10] sm:$0xf] }
 0x106   : > { %647 = vst [vmem:[%s5481_s10 + $0x2c8] sm:$0xf] %v646_v18  ;;  %v774_v18 = vld [vmem:[%s5476_s28 + $0xf20] sm:$0xf] }
 0x107   : > { %649 = vst [vmem:[%s5481_s10 + $0x2cc] sm:$0xf] %v648_v19  ;;  %v776_v19 = vld [vmem:[%s5476_s28 + $0xf30] sm:$0xf] }
 0x108   : > { %651 = vst [vmem:[%s5481_s10 + $0x2d0] sm:$0xf] %v650_v20  ;;  %v778_v20 = vld [vmem:[%s5476_s28 + $0xf40] sm:$0xf] }
 0x109   : > { %653 = vst [vmem:[%s5481_s10 + $0x2d4] sm:$0xf] %v652_v21  ;;  %v780_v21 = vld [vmem:[%s5476_s28 + $0xf50] sm:$0xf] }
 0x10a   : > { %655 = vst [vmem:[%s5481_s10 + $0x2d8] sm:$0xf] %v654_v22  ;;  %v782_v22 = vld [vmem:[%s5476_s28 + $0xf60] sm:$0xf] }
 0x10b   : > { %657 = vst [vmem:[%s5481_s10 + $0x2dc] sm:$0xf] %v656_v23  ;;  %v784_v23 = vld [vmem:[%s5476_s28 + $0xf70] sm:$0xf] }
 0x10c   : > { %659 = vst [vmem:[%s5481_s10 + $0x2e0] sm:$0xf] %v658_v24  ;;  %v786_v24 = vld [vmem:[%s5476_s28 + $0xf80] sm:$0xf] }
 0x10d   : > { %661 = vst [vmem:[%s5481_s10 + $0x2e4] sm:$0xf] %v660_v25  ;;  %v788_v25 = vld [vmem:[%s5476_s28 + $0xf90] sm:$0xf] }
 0x10e   : > { %663 = vst [vmem:[%s5481_s10 + $0x2e8] sm:$0xf] %v662_v26  ;;  %v790_v26 = vld [vmem:[%s5476_s28 + $0xfa0] sm:$0xf] }
 0x10f   : > { %665 = vst [vmem:[%s5481_s10 + $0x2ec] sm:$0xf] %v664_v27  ;;  %v792_v27 = vld [vmem:[%s5476_s28 + $0xfb0] sm:$0xf] }
 0x110   : > { %667 = vst [vmem:[%s5481_s10 + $0x2f0] sm:$0xf] %v666_v28  ;;  %v794_v28 = vld [vmem:[%s5476_s28 + $0xfc0] sm:$0xf] }
 0x111   : > { %669 = vst [vmem:[%s5481_s10 + $0x2f4] sm:$0xf] %v668_v29  ;;  %v796_v29 = vld [vmem:[%s5476_s28 + $0xfd0] sm:$0xf] }
 0x112   : > { %671 = vst [vmem:[%s5481_s10 + $0x2f8] sm:$0xf] %v670_v30  ;;  %v798_v30 = vld [vmem:[%s5476_s28 + $0xfe0] sm:$0xf] }
 0x113   : > { %673 = vst [vmem:[%s5481_s10 + $0x2fc] sm:$0xf] %v672_v31  ;;  %v800_v31 = vld [vmem:[%s5476_s28 + $0xff0] sm:$0xf] }
 0x114   : > { %675 = vst [vmem:[%s5481_s10 + $0x300] sm:$0xf] %v674_v32 }
 0x115   : > { %677 = vst [vmem:[%s5481_s10 + $0x304] sm:$0xf] %v676_v33 }
 0x116   : > { %679 = vst [vmem:[%s5481_s10 + $0x308] sm:$0xf] %v678_v34 }
 0x117   : > { %681 = vst [vmem:[%s5481_s10 + $0x30c] sm:$0xf] %v680_v35 }
 0x118   : > { %683 = vst [vmem:[%s5481_s10 + $0x310] sm:$0xf] %v682_v36 }
 0x119   : > { %685 = vst [vmem:[%s5481_s10 + $0x314] sm:$0xf] %v684_v37 }
 0x11a   : > { %687 = vst [vmem:[%s5481_s10 + $0x318] sm:$0xf] %v686_v38 }
 0x11b   : > { %689 = vst [vmem:[%s5481_s10 + $0x31c] sm:$0xf] %v688_v39 }
 0x11c   : > { %691 = vst [vmem:[%s5481_s10 + $0x320] sm:$0xf] %v690_v40 }
 0x11d   : > { %693 = vst [vmem:[%s5481_s10 + $0x324] sm:$0xf] %v692_v41 }
 0x11e   : > { %695 = vst [vmem:[%s5481_s10 + $0x328] sm:$0xf] %v694_v42 }
 0x11f   : > { %697 = vst [vmem:[%s5481_s10 + $0x32c] sm:$0xf] %v696_v43 }
 0x120   : > { %699 = vst [vmem:[%s5481_s10 + $0x330] sm:$0xf] %v698_v44 }
 0x121   : > { %701 = vst [vmem:[%s5481_s10 + $0x334] sm:$0xf] %v700_v45 }
 0x122   : > { %703 = vst [vmem:[%s5481_s10 + $0x338] sm:$0xf] %v702_v46 }
 0x123   : > { %705 = vst [vmem:[%s5481_s10 + $0x33c] sm:$0xf] %v704_v47 }
 0x124   : > { %707 = vst [vmem:[%s5481_s10 + $0x340] sm:$0xf] %v706_v48 }
 0x125   : > { %709 = vst [vmem:[%s5481_s10 + $0x344] sm:$0xf] %v708_v49 }
 0x126   : > { %711 = vst [vmem:[%s5481_s10 + $0x348] sm:$0xf] %v710_v50 }
 0x127   : > { %713 = vst [vmem:[%s5481_s10 + $0x34c] sm:$0xf] %v712_v51 }
 0x128   : > { %715 = vst [vmem:[%s5481_s10 + $0x350] sm:$0xf] %v714_v52 }
 0x129   : > { %717 = vst [vmem:[%s5481_s10 + $0x354] sm:$0xf] %v716_v53 }
 0x12a   : > { %719 = vst [vmem:[%s5481_s10 + $0x358] sm:$0xf] %v718_v54 }
 0x12b   : > { %721 = vst [vmem:[%s5481_s10 + $0x35c] sm:$0xf] %v720_v55 }
 0x12c   : > { %723 = vst [vmem:[%s5481_s10 + $0x360] sm:$0xf] %v722_v56 }
 0x12d   : > { %725 = vst [vmem:[%s5481_s10 + $0x364] sm:$0xf] %v724_v57 }
 0x12e   : > { %727 = vst [vmem:[%s5481_s10 + $0x368] sm:$0xf] %v726_v58 }
 0x12f   : > { %729 = vst [vmem:[%s5481_s10 + $0x36c] sm:$0xf] %v728_v59 }
 0x130   : > { %731 = vst [vmem:[%s5481_s10 + $0x370] sm:$0xf] %v730_v60 }
 0x131   : > { %733 = vst [vmem:[%s5481_s10 + $0x374] sm:$0xf] %v732_v61 }
 0x132   : > { %735 = vst [vmem:[%s5481_s10 + $0x378] sm:$0xf] %v734_v62 }
 0x133   : > { %737 = vst [vmem:[%s5481_s10 + $0x37c] sm:$0xf] %v736_v63 }
 0x134   : > { %739 = vst [vmem:[%s5481_s10 + $0x380] sm:$0xf] %v738_v0 }
 0x135   : > { %741 = vst [vmem:[%s5481_s10 + $0x384] sm:$0xf] %v740_v1 }
 0x136   : > { %743 = vst [vmem:[%s5481_s10 + $0x388] sm:$0xf] %v742_v2 }
 0x137   : > { %745 = vst [vmem:[%s5481_s10 + $0x38c] sm:$0xf] %v744_v3 }
 0x138   : > { %747 = vst [vmem:[%s5481_s10 + $0x390] sm:$0xf] %v746_v4 }
 0x139   : > { %749 = vst [vmem:[%s5481_s10 + $0x394] sm:$0xf] %v748_v5 }
 0x13a   : > { %751 = vst [vmem:[%s5481_s10 + $0x398] sm:$0xf] %v750_v6 }
 0x13b   : > { %753 = vst [vmem:[%s5481_s10 + $0x39c] sm:$0xf] %v752_v7 }
 0x13c   : > { %755 = vst [vmem:[%s5481_s10 + $0x3a0] sm:$0xf] %v754_v8 }
 0x13d   : > { %757 = vst [vmem:[%s5481_s10 + $0x3a4] sm:$0xf] %v756_v9 }
 0x13e   : > { %759 = vst [vmem:[%s5481_s10 + $0x3a8] sm:$0xf] %v758_v10 }
 0x13f   : > { %761 = vst [vmem:[%s5481_s10 + $0x3ac] sm:$0xf] %v760_v11 }
 0x140   : > { %763 = vst [vmem:[%s5481_s10 + $0x3b0] sm:$0xf] %v762_v12 }
 0x141   : > { %765 = vst [vmem:[%s5481_s10 + $0x3b4] sm:$0xf] %v764_v13 }
 0x142   : > { %767 = vst [vmem:[%s5481_s10 + $0x3b8] sm:$0xf] %v766_v14 }
 0x143   : > { %769 = vst [vmem:[%s5481_s10 + $0x3bc] sm:$0xf] %v768_v15 }
 0x144   : > { %771 = vst [vmem:[%s5481_s10 + $0x3c0] sm:$0xf] %v770_v16 }
 0x145   : > { %773 = vst [vmem:[%s5481_s10 + $0x3c4] sm:$0xf] %v772_v17 }
 0x146   : > { %775 = vst [vmem:[%s5481_s10 + $0x3c8] sm:$0xf] %v774_v18 }
 0x147   : > { %777 = vst [vmem:[%s5481_s10 + $0x3cc] sm:$0xf] %v776_v19 }
 0x148   : > { %779 = vst [vmem:[%s5481_s10 + $0x3d0] sm:$0xf] %v778_v20 }
 0x149   : > { %781 = vst [vmem:[%s5481_s10 + $0x3d4] sm:$0xf] %v780_v21 }
 0x14a   : > { %783 = vst [vmem:[%s5481_s10 + $0x3d8] sm:$0xf] %v782_v22 }
 0x14b   : > { %785 = vst [vmem:[%s5481_s10 + $0x3dc] sm:$0xf] %v784_v23 }
 0x14c   : > { %787 = vst [vmem:[%s5481_s10 + $0x3e0] sm:$0xf] %v786_v24 }
 0x14d   : > { %789 = vst [vmem:[%s5481_s10 + $0x3e4] sm:$0xf] %v788_v25 }
 0x14e   : > { %791 = vst [vmem:[%s5481_s10 + $0x3e8] sm:$0xf] %v790_v26 }
 0x14f   : > { %793 = vst [vmem:[%s5481_s10 + $0x3ec] sm:$0xf] %v792_v27 }
 0x150   : > { %795 = vst [vmem:[%s5481_s10 + $0x3f0] sm:$0xf] %v794_v28 }
 0x151   : > { %797 = vst [vmem:[%s5481_s10 + $0x3f4] sm:$0xf] %v796_v29 }
 0x152   : > { %799 = vst [vmem:[%s5481_s10 + $0x3f8] sm:$0xf] %v798_v30 }
 0x153   : > { %801 = vst [vmem:[%s5481_s10 + $0x3fc] sm:$0xf] %v800_v31 }
 0x154 PF: > { %p4265_p0 = scmp.ge.s32.totalorder %s5266_s25, 1  ;;  %p2398_p1 = scmp.lt.s32.totalorder %s5266_s25, 9 }
 0x156   : > { %p2399_p2 = pnand %p4265_p0, %p2398_p1 }
 0x157   : > { %s2405_s0 = sand.u32 (!%p2399_p2), 1, %s5242_s19   ;;  %s2412_s11 = sand.u32 (!%p2399_p2), 1, %s5234_s17  }
 0x158   : > { %2402 = sbr.rel (%p2399_p2) target bundleno = 745 (0x2e9), region = 103  ;;  %s4266_s26 = sshll.u32 (!%p2399_p2), %s2405_s0, 8 }
 0x159   : > { %s4267_s28 = sshll.u32 (!%p2399_p2), %s2412_s11, 10  ;;  %s2443_s5 = sand.u32 (!%p2399_p2), 1, %s5226_s15  }
 0x15a   : > { %p2448_p3 = scmp.lt.s32.totalorder (!%p2399_p2), %s5254_s22, 3  ;;  %s4268_s29 = sshll.u32 (!%p2399_p2), %s2443_s5, 4 }
 0x15b   : > { %s6009_s24 = scalar_lea.vmem (!%p2399_p2), [#allocation3], %s4266_s26  ;;  %s6011_s17 = scalar_lea.vmem (!%p2399_p2), [#allocation4], %s4267_s28 }
 0x15c   : > { %s6013_s19 = scalar_lea.vmem (!%p2399_p2), [#allocation5], %s4268_s29  ;;  %p4269_p4 = scmp.ne.s32.totalorder (!%p2399_p2), %s5250_s21, 0 }
 0x15d   : > { %s5999_s30 = scalar_select %p2448_p3, %s5254_s22, 3 }
 0x15e   : > { %2457 = sbr.rel (%p4269_p4) target bundleno = 360 (0x168), region = 115 }
 0x15f   : > { %s2450_s9 = scalar_lea.vmem %s6266_s2, %s5999_s30  ;;  %s2453_s27 = scalar_lea.vmem %s6267_s3, %s5999_s30 }
 0x163   : > { %v5268_v32 = vmov 0.0  }
 0x164   : > { %2458 = vst [vmem:[#allocation2 + $0x10] sm:$0xff] %v5268_v32 }
 0x165   : > { %2459 = vst [vmem:[#allocation2] sm:$0xff] %v5268_v32 }
 0x166   : > { %2460 = vst [vmem:[#allocation2 + $0x18] sm:$0xff] %v5268_v32 }
 0x167   : > { %2461 = vst [vmem:[#allocation2 + $0x8] sm:$0xff] %v5268_v32 }
 0x168 PF: > { %v4956_v33 = vld [vmem:[%s6011_s17 + $0x38] sm:$0xff]  ;;  %v4955_v37 = vld [vmem:[%s6011_s17 + $0x30] sm:$0xff]  ;;  %v4954_v41 = vld [vmem:[%s6011_s17 + $0x28] sm:$0xff]  ;;  %p4910_p5 = scmp.ne.s32.totalorder %s5250_s21, 1 }
 0x169   : > { %v4964_v34 = vld [vmem:[%s6011_s17 + $0x78] sm:$0xff]  ;;  %3682 = vmatpush.bf16.msra.mxu0 %v4956_v33  ;;  %v4963_v38 = vld [vmem:[%s6011_s17 + $0x70] sm:$0xff]  ;;  %v4962_v42 = vld [vmem:[%s6011_s17 + $0x68] sm:$0xff] }
 0x16a   : > { %v4972_v35 = vld [vmem:[%s6011_s17 + $0xb8] sm:$0xff]  ;;  %3701 = vmatpush.bf16.msra.mxu1 %v4964_v34  ;;  %v4971_v39 = vld [vmem:[%s6011_s17 + $0xb0] sm:$0xff]  ;;  %v4970_v43 = vld [vmem:[%s6011_s17 + $0xa8] sm:$0xff] }
 0x16b   : > { %v4980_v36 = vld [vmem:[%s6011_s17 + $0xf8] sm:$0xff]  ;;  %3720 = vmatpush.bf16.msra.mxu2 %v4972_v35  ;;  %v4979_v40 = vld [vmem:[%s6011_s17 + $0xf0] sm:$0xff]  ;;  %v4978_v44 = vld [vmem:[%s6011_s17 + $0xe8] sm:$0xff] }
 0x16c   : > { %3739 = vmatpush.bf16.msra.mxu3 %v4980_v36  ;;  %v4953_v45 = vld [vmem:[%s6011_s17 + $0x20] sm:$0xff]  ;;  %v4952_v49 = vld [vmem:[%s6011_s17 + $0x18] sm:$0xff]  ;;  %v4951_v53 = vld [vmem:[%s6011_s17 + $0x10] sm:$0xff] }
 0x16d   : > { %3683 = vmatpush.bf16.msra.mxu0 %v4955_v37  ;;  %v4961_v46 = vld [vmem:[%s6011_s17 + $0x60] sm:$0xff]  ;;  %v4960_v50 = vld [vmem:[%s6011_s17 + $0x58] sm:$0xff]  ;;  %v4959_v54 = vld [vmem:[%s6011_s17 + $0x50] sm:$0xff] }
 0x16e   : > { %3702 = vmatpush.bf16.msra.mxu1 %v4963_v38  ;;  %v4969_v47 = vld [vmem:[%s6011_s17 + $0xa0] sm:$0xff]  ;;  %v4968_v51 = vld [vmem:[%s6011_s17 + $0x98] sm:$0xff]  ;;  %v4967_v55 = vld [vmem:[%s6011_s17 + $0x90] sm:$0xff] }
 0x16f   : > { %3721 = vmatpush.bf16.msra.mxu2 %v4971_v39  ;;  %v4977_v48 = vld [vmem:[%s6011_s17 + $0xe0] sm:$0xff]  ;;  %v4976_v52 = vld [vmem:[%s6011_s17 + $0xd8] sm:$0xff]  ;;  %v4975_v56 = vld [vmem:[%s6011_s17 + $0xd0] sm:$0xff] }
 0x170   : > { %3740 = vmatpush.bf16.msra.mxu3 %v4979_v40  ;;  %v4950_v57 = vld [vmem:[%s6011_s17 + $0x8] sm:$0xff]  ;;  %v4949_v61 = vld [vmem:[%s6011_s17] sm:$0xff]  ;;  %v5004_v9 = vld [vmem:[%s6011_s17 + $0x1b8] sm:$0xff] }
 0x171   : > { %3684 = vmatpush.bf16.msra.mxu0 %v4954_v41  ;;  %v4958_v58 = vld [vmem:[%s6011_s17 + $0x48] sm:$0xff]  ;;  %v4957_v62 = vld [vmem:[%s6011_s17 + $0x40] sm:$0xff]  ;;  %v4988_v10 = vld [vmem:[%s6011_s17 + $0x138] sm:$0xff] }
 0x172   : > { %3703 = vmatpush.bf16.msra.mxu1 %v4962_v42  ;;  %v4966_v59 = vld [vmem:[%s6011_s17 + $0x88] sm:$0xff]  ;;  %v4965_v63 = vld [vmem:[%s6011_s17 + $0x80] sm:$0xff]  ;;  %v4996_v15 = vld [vmem:[%s6011_s17 + $0x178] sm:$0xff] }
 0x173   : > { %3722 = vmatpush.bf16.msra.mxu2 %v4970_v43  ;;  %v4974_v60 = vld [vmem:[%s6011_s17 + $0xc8] sm:$0xff]  ;;  %v4973_v0 = vld [vmem:[%s6011_s17 + $0xc0] sm:$0xff]  ;;  %v5012_v16 = vld [vmem:[%s6011_s17 + $0x1f8] sm:$0xff] }
 0x174   : > { %3741 = vmatpush.bf16.msra.mxu3 %v4978_v44  ;;  %v4272_v1 = vld [vmem:[%s6009_s24] sm:$0xf]  ;;  %v4917_v3 = vld [vmem:[%s6009_s24 + $0x4] sm:$0xf]  ;;  %v4280_v5 = vld [vmem:[%s6009_s24 + $0x8] sm:$0xf] }
 0x175   : > { %3685 = vmatpush.bf16.msra.mxu0 %v4953_v45  ;;  %v4925_v2 = vld [vmem:[%s6009_s24 + $0x3c] sm:$0xf0]  ;;  %v4274_v4 = vld [vmem:[%s6009_s24 + $0x40] sm:$0xf0]  ;;  %v4926_v6 = vld [vmem:[%s6009_s24 + $0x44] sm:$0xf0] }
 0x176   : > { %3704 = vmatpush.bf16.msra.mxu1 %v4961_v46  ;;  %v4918_v7 = vld [vmem:[%s6009_s24 + $0xc] sm:$0xf]  ;;  %v4273_v11 = vor.u32 %v4925_v2, %v4272_v1  ;;  %v4277_v12 = vor.u32 %v4917_v3, %v4274_v4  ;;  %v4281_v13 = vor.u32 %v4926_v6, %v4280_v5  ;;  %v5003_v17 = vld [vmem:[%s6011_s17 + $0x1b0] sm:$0xff]  ;;  %v5001_v25 = vld [vmem:[%s6011_s17 + $0x1a0] sm:$0xff] }
 0x177   : > { %3723 = vmatpush.bf16.msra.mxu2 %v4969_v47  ;;  %v4282_v8 = vld [vmem:[%s6009_s24 + $0x48] sm:$0xf0]  ;;  %v4987_v18 = vld [vmem:[%s6011_s17 + $0x130] sm:$0xff]  ;;  %v4985_v26 = vld [vmem:[%s6011_s17 + $0x120] sm:$0xff] }
 0x178   : > { %3742 = vmatpush.bf16.msra.mxu3 %v4977_v48  ;;  %v4285_v14 = vor.u32 %v4918_v7, %v4282_v8  ;;  %v4995_v19 = vld [vmem:[%s6011_s17 + $0x170] sm:$0xff]  ;;  %v5002_v21 = vld [vmem:[%s6011_s17 + $0x1a8] sm:$0xff]  ;;  %v4993_v27 = vld [vmem:[%s6011_s17 + $0x160] sm:$0xff] }
 0x179   : > { %3686 = vmatpush.bf16.msra.mxu0 %v4952_v49  ;;  %v5011_v20 = vld [vmem:[%s6011_s17 + $0x1f0] sm:$0xff]  ;;  %v4986_v22 = vld [vmem:[%s6011_s17 + $0x128] sm:$0xff]  ;;  %v5009_v28 = vld [vmem:[%s6011_s17 + $0x1e0] sm:$0xff] }
 0x17a   : > { %3705 = vmatpush.bf16.msra.mxu1 %v4960_v50  ;;  %v4994_v23 = vld [vmem:[%s6011_s17 + $0x168] sm:$0xff]  ;;  %v4336_v29 = vld [vmem:[%s6009_s24 + $0x80] sm:$0xf]  ;;  %v4933_v31 = vld [vmem:[%s6009_s24 + $0x84] sm:$0xf] }
 0x17b   : > { %3724 = vmatpush.bf16.msra.mxu2 %v4968_v51  ;;  %v5010_v24 = vld [vmem:[%s6011_s17 + $0x1e8] sm:$0xff]  ;;  %v4941_v30 = vld [vmem:[%s6009_s24 + $0xbc] sm:$0xf0]  ;;  %v4338_v32 = vld [vmem:[%s6009_s24 + $0xc0] sm:$0xf0] }
 0x17c   : > { %3743 = vmatpush.bf16.msra.mxu3 %v4976_v52  ;;  %v4344_v33 = vld [vmem:[%s6009_s24 + $0x88] sm:$0xf]  ;;  %v4934_v35 = vld [vmem:[%s6009_s24 + $0x8c] sm:$0xf]  ;;  %v5000_v37 = vld [vmem:[%s6011_s17 + $0x198] sm:$0xff]  ;;  %v4337_v39 = vor.u32 %v4941_v30, %v4336_v29  ;;  %v4341_v40 = vor.u32 %v4933_v31, %v4338_v32 }
 0x17d   : > { %3687 = vmatpush.bf16.msra.mxu0 %v4951_v53  ;;  %v4942_v34 = vld [vmem:[%s6009_s24 + $0xc4] sm:$0xf0]  ;;  %v4346_v36 = vld [vmem:[%s6009_s24 + $0xc8] sm:$0xf0]  ;;  %v4984_v38 = vld [vmem:[%s6011_s17 + $0x118] sm:$0xff] }
 0x17e   : > { %3706 = vmatpush.bf16.msra.mxu1 %v4959_v54  ;;  %v4345_v41 = vor.u32 %v4942_v34, %v4344_v33  ;;  %v4349_v42 = vor.u32 %v4934_v35, %v4346_v36  ;;  %v4992_v43 = vld [vmem:[%s6011_s17 + $0x158] sm:$0xff]  ;;  %v4999_v45 = vld [vmem:[%s6011_s17 + $0x190] sm:$0xff]  ;;  %v4998_v49 = vld [vmem:[%s6011_s17 + $0x188] sm:$0xff] }
 0x17f   : > { %3725 = vmatpush.bf16.msra.mxu2 %v4967_v55  ;;  %v5008_v44 = vld [vmem:[%s6011_s17 + $0x1d8] sm:$0xff]  ;;  %v4983_v46 = vld [vmem:[%s6011_s17 + $0x110] sm:$0xff]  ;;  %v4982_v50 = vld [vmem:[%s6011_s17 + $0x108] sm:$0xff] }
 0x180   : > { %3744 = vmatpush.bf16.msra.mxu3 %v4975_v56  ;;  %v4991_v47 = vld [vmem:[%s6011_s17 + $0x150] sm:$0xff]  ;;  %v4990_v51 = vld [vmem:[%s6011_s17 + $0x148] sm:$0xff]  ;;  %v4997_v53 = vld [vmem:[%s6011_s17 + $0x180] sm:$0xff] }
 0x181   : > { %3688 = vmatpush.bf16.msra.mxu0 %v4950_v57  ;;  %v5007_v48 = vld [vmem:[%s6011_s17 + $0x1d0] sm:$0xff]  ;;  %v5006_v52 = vld [vmem:[%s6011_s17 + $0x1c8] sm:$0xff]  ;;  %v4981_v54 = vld [vmem:[%s6011_s17 + $0x100] sm:$0xff] }
 0x182   : > { %3707 = vmatpush.bf16.msra.mxu1 %v4958_v58  ;;  %v4989_v55 = vld [vmem:[%s6011_s17 + $0x140] sm:$0xff]  ;;  %v4288_v57 = vld [vmem:[%s6009_s24 + $0x10] sm:$0xf]  ;;  %v5036_v58 = vld [vmem:[%s6011_s17 + $0x2b8] sm:$0xff] }
 0x183   : > { %3726 = vmatpush.bf16.msra.mxu2 %v4966_v59  ;;  %v5005_v56 = vld [vmem:[%s6011_s17 + $0x1c0] sm:$0xff]  ;;  %v5020_v59 = vld [vmem:[%s6011_s17 + $0x238] sm:$0xff]  ;;  %v5035_v6 = vld [vmem:[%s6011_s17 + $0x2b0] sm:$0xff] }
 0x184   : > { %3745 = vmatpush.bf16.msra.mxu3 %v4974_v60  ;;  %v4927_v60 = vld [vmem:[%s6009_s24 + $0x4c] sm:$0xf0]  ;;  %v4920_v1 = vld [vmem:[%s6009_s24 + $0x1c] sm:$0xf] }
 0x185   : > { %3689 = vmatpush.bf16.msra.mxu0 %v4949_v61  ;;  %v4919_v61 = vld [vmem:[%s6009_s24 + $0x14] sm:$0xf]  ;;  %v4298_v2 = vld [vmem:[%s6009_s24 + $0x58] sm:$0xf0]  ;;  %v4289_v5 = vor.u32 %v4927_v60, %v4288_v57  ;;  %v4306_v57 = vld [vmem:[%s6009_s24 + $0x60] sm:$0xf0] }
 0x186   : > { %3708 = vmatpush.bf16.msra.mxu1 %v4957_v62  ;;  %v4290_v62 = vld [vmem:[%s6009_s24 + $0x50] sm:$0xf0]  ;;  %v5028_v3 = vld [vmem:[%s6011_s17 + $0x278] sm:$0xff]  ;;  %v4922_v60 = vld [vmem:[%s6009_s24 + $0x2c] sm:$0xf] }
 0x187   : > { %3727 = vmatpush.bf16.msra.mxu2 %v4965_v63  ;;  %v4296_v63 = vld [vmem:[%s6009_s24 + $0x18] sm:$0xf]  ;;  %v4293_v7 = vor.u32 %v4919_v61, %v4290_v62  ;;  %v4362_v30 = vld [vmem:[%s6009_s24 + $0xd8] sm:$0xf0]  ;;  %v5031_v34 = vld [vmem:[%s6011_s17 + $0x290] sm:$0xff] }
 0x188   : > { %3746 = vmatpush.bf16.msra.mxu3 %v4973_v0  ;;  %3690 = vmatmul.bf16.vlgmr.msra.gmra.mxu0 %v4273_v11  ;;  %v4928_v0 = vld [vmem:[%s6009_s24 + $0x54] sm:$0xf0]  ;;  %v5027_v11 = vld [vmem:[%s6011_s17 + $0x270] sm:$0xff]  ;;  %v4314_v61 = vld [vmem:[%s6009_s24 + $0x68] sm:$0xf0] }
 0x189   : > { %3758 = vmatpush.bf16.msrb.mxu0 %v4988_v10  ;;  %3709 = vmatmul.bf16.vlgmr.msra.gmra.mxu1 %v4277_v12  ;;  %v5044_v4 = vld [vmem:[%s6011_s17 + $0x2f8] sm:$0xff]  ;;  %v4297_v8 = vor.u32 %v4928_v0, %v4296_v63  ;;  %v5019_v10 = vld [vmem:[%s6011_s17 + $0x230] sm:$0xff] }
 0x18a   : > { %3728 = vmatmul.bf16.vlgmr.msra.gmra.mxu2 %v4281_v13  ;;  %3777 = vmatpush.bf16.msrb.mxu1 %v4996_v15  ;;  %v5043_v12 = vld [vmem:[%s6011_s17 + $0x2f0] sm:$0xff]  ;;  %v5034_v13 = vld [vmem:[%s6011_s17 + $0x2a8] sm:$0xff]  ;;  %v5016_v29 = vld [vmem:[%s6011_s17 + $0x218] sm:$0xff] }
 0x18b   : > { %3796 = vmatpush.bf16.msrb.mxu2 %v5004_v9  ;;  %3747 = vmatmul.bf16.vlgmr.msra.gmra.mxu3 %v4285_v14  ;;  %v4301_v9 = vor.u32 %v4920_v1, %v4298_v2  ;;  %v5018_v14 = vld [vmem:[%s6011_s17 + $0x228] sm:$0xff]  ;;  %v5024_v31 = vld [vmem:[%s6011_s17 + $0x258] sm:$0xff]  ;;  %v5059_v63 = vld [vmem:[%s6011_s17 + $0x370] sm:$0xff]  ;;  %v4317_v2 = vor.u32 %v4922_v60, %v4314_v61 }
 0x18c   : > { %3815 = vmatpush.bf16.msrb.mxu3 %v5012_v16  ;;  %v5026_v15 = vld [vmem:[%s6011_s17 + $0x268] sm:$0xff]  ;;  %v5040_v32 = vld [vmem:[%s6011_s17 + $0x2d8] sm:$0xff] }
 0x18d   : > { %3759 = vmatpush.bf16.msrb.mxu0 %v4987_v18  ;;  %v5042_v16 = vld [vmem:[%s6011_s17 + $0x2e8] sm:$0xff]  ;;  %v5017_v18 = vld [vmem:[%s6011_s17 + $0x220] sm:$0xff]  ;;  %v4394_v60 = vld [vmem:[%s6009_s24 + $0xf8] sm:$0xf0] }
 0x18e   : > { %3778 = vmatpush.bf16.msrb.mxu1 %v4995_v19  ;;  %v5025_v19 = vld [vmem:[%s6011_s17 + $0x260] sm:$0xff] }
 0x18f   : > { %3797 = vmatpush.bf16.msrb.mxu2 %v5003_v17  ;;  %v5033_v17 = vld [vmem:[%s6011_s17 + $0x2a0] sm:$0xff] }
 0x190   : > { %3816 = vmatpush.bf16.msrb.mxu3 %v5011_v20  ;;  %v5041_v20 = vld [vmem:[%s6011_s17 + $0x2e0] sm:$0xff] }
 0x191   : > { %3760 = vmatpush.bf16.msrb.mxu0 %v4986_v22  ;;  %v4943_v22 = vld [vmem:[%s6009_s24 + $0xcc] sm:$0xf0] }
 0x192   : > { %3779 = vmatpush.bf16.msrb.mxu1 %v4994_v23  ;;  %v5032_v23 = vld [vmem:[%s6011_s17 + $0x298] sm:$0xff] }
 0x193   : > { %3798 = vmatpush.bf16.msrb.mxu2 %v5002_v21  ;;  %v4352_v21 = vld [vmem:[%s6009_s24 + $0x90] sm:$0xf] }
 0x194   : > { %3817 = vmatpush.bf16.msrb.mxu3 %v5010_v24  ;;  %v4935_v24 = vld [vmem:[%s6009_s24 + $0x94] sm:$0xf]  ;;  %v4353_v33 = vor.u32 %v4943_v22, %v4352_v21  ;;  %v4938_v21 = vld [vmem:[%s6009_s24 + $0xac] sm:$0xf]  ;;  %v5048_v22 = vld [vmem:[%s6011_s17 + $0x318] sm:$0xff] }
 0x195   : > { %3761 = vmatpush.bf16.msrb.mxu0 %v4985_v26  ;;  %v4360_v26 = vld [vmem:[%s6009_s24 + $0x98] sm:$0xf] }
 0x196   : > { %3780 = vmatpush.bf16.msrb.mxu1 %v4993_v27  ;;  %v4944_v27 = vld [vmem:[%s6009_s24 + $0xd4] sm:$0xf0] }
 0x197   : > { %3799 = vmatpush.bf16.msrb.mxu2 %v5001_v25  ;;  %v4354_v25 = vld [vmem:[%s6009_s24 + $0xd0] sm:$0xf0]  ;;  %v4361_v36 = vor.u32 %v4944_v27, %v4360_v26 }
 0x198   : > { %3818 = vmatpush.bf16.msrb.mxu3 %v5009_v28  ;;  %3695 = vmatmul.bf16.gmra.mxu0 %v4337_v39  ;;  %v4936_v28 = vld [vmem:[%s6009_s24 + $0x9c] sm:$0xf]  ;;  %v4357_v35 = vor.u32 %v4935_v24, %v4354_v25  ;;  %v5023_v39 = vld [vmem:[%s6011_s17 + $0x250] sm:$0xff] }
 0x199   : > { %3762 = vmatpush.bf16.msrb.mxu0 %v4984_v38  ;;  %3714 = vmatmul.bf16.gmra.mxu1 %v4341_v40  ;;  %v5015_v38 = vld [vmem:[%s6011_s17 + $0x210] sm:$0xff]  ;;  %v5072_v24 = vld [vmem:[%s6011_s17 + $0x3d8] sm:$0xff] }
 0x19a   : > { %3733 = vmatmul.bf16.gmra.mxu2 %v4345_v41  ;;  %3781 = vmatpush.bf16.msrb.mxu1 %v4992_v43  ;;  %v5039_v40 = vld [vmem:[%s6011_s17 + $0x2d0] sm:$0xff]  ;;  %v5030_v41 = vld [vmem:[%s6011_s17 + $0x288] sm:$0xff] }
 0x19b   : > { %3800 = vmatpush.bf16.msrb.mxu2 %v5000_v37  ;;  %3752 = vmatmul.bf16.gmra.mxu3 %v4349_v42  ;;  %v4365_v37 = vor.u32 %v4936_v28, %v4362_v30  ;;  %v5014_v42 = vld [vmem:[%s6011_s17 + $0x208] sm:$0xff]  ;;  %v5063_v25 = vld [vmem:[%s6011_s17 + $0x390] sm:$0xff] }
 0x19c   : > { %3819 = vmatpush.bf16.msrb.mxu3 %v5008_v44  ;;  %v5022_v43 = vld [vmem:[%s6011_s17 + $0x248] sm:$0xff]  ;;  %v5055_v27 = vld [vmem:[%s6011_s17 + $0x350] sm:$0xff] }
 0x19d   : > { %3763 = vmatpush.bf16.msrb.mxu0 %v4983_v46  ;;  %v5038_v44 = vld [vmem:[%s6011_s17 + $0x2c8] sm:$0xff]  ;;  %v5068_v46 = vld [vmem:[%s6011_s17 + $0x3b8] sm:$0xff] }
 0x19e   : > { %3782 = vmatpush.bf16.msrb.mxu1 %v4991_v47  ;;  %v5013_v47 = vld [vmem:[%s6011_s17 + $0x200] sm:$0xff] }
 0x19f   : > { %3801 = vmatpush.bf16.msrb.mxu2 %v4999_v45  ;;  %v5029_v45 = vld [vmem:[%s6011_s17 + $0x280] sm:$0xff] }
 0x1a0   : > { %3820 = vmatpush.bf16.msrb.mxu3 %v5007_v48  ;;  %v5021_v48 = vld [vmem:[%s6011_s17 + $0x240] sm:$0xff] }
 0x1a1   : > { %3764 = vmatpush.bf16.msrb.mxu0 %v4982_v50  ;;  %v4304_v50 = vld [vmem:[%s6009_s24 + $0x20] sm:$0xf] }
 0x1a2   : > { %3783 = vmatpush.bf16.msrb.mxu1 %v4990_v51  ;;  %v4929_v51 = vld [vmem:[%s6009_s24 + $0x5c] sm:$0xf0] }
 0x1a3   : > { %3802 = vmatpush.bf16.msrb.mxu2 %v4998_v49  ;;  %v5037_v49 = vld [vmem:[%s6011_s17 + $0x2c0] sm:$0xff]  ;;  %v4305_v62 = vor.u32 %v4929_v51, %v4304_v50 }
 0x1a4   : > { %3821 = vmatpush.bf16.msrb.mxu3 %v5006_v52  ;;  %v5052_v52 = vld [vmem:[%s6011_s17 + $0x338] sm:$0xff] }
 0x1a5   : > { %3765 = vmatpush.bf16.msrb.mxu0 %v4981_v54  ;;  %v4921_v54 = vld [vmem:[%s6009_s24 + $0x24] sm:$0xf] }
 0x1a6   : > { %3784 = vmatpush.bf16.msrb.mxu1 %v4989_v55  ;;  %v5076_v55 = vld [vmem:[%s6011_s17 + $0x3f8] sm:$0xff]  ;;  %v4309_v0 = vor.u32 %v4921_v54, %v4306_v57  ;;  %v4947_v54 = vld [vmem:[%s6009_s24 + $0xec] sm:$0xf0] }
 0x1a7   : > { %3803 = vmatpush.bf16.msrb.mxu2 %v4997_v53  ;;  %v5060_v53 = vld [vmem:[%s6011_s17 + $0x378] sm:$0xff] }
 0x1a8   : > { %3822 = vmatpush.bf16.msrb.mxu3 %v5005_v56  ;;  %3766 = vmatmul.bf16.vlgmr.msrb.gmra.mxu0 %v4289_v5  ;;  %v5067_v56 = vld [vmem:[%s6011_s17 + $0x3b0] sm:$0xff]  ;;  %v5066_v5 = vld [vmem:[%s6011_s17 + $0x3a8] sm:$0xff]  ;;  %v4392_v57 = vld [vmem:[%s6009_s24 + $0xb8] sm:$0xf] }
 0x1a9   : > { %3834 = vmatpush.bf16.msra.mxu0 %v5020_v59  ;;  %3785 = vmatmul.bf16.vlgmr.msrb.gmra.mxu1 %v4293_v7  ;;  %v4930_v59 = vld [vmem:[%s6009_s24 + $0x64] sm:$0xf0] }
 0x1aa   : > { %3853 = vmatpush.bf16.msra.mxu1 %v5028_v3  ;;  %3804 = vmatmul.bf16.vlgmr.msrb.gmra.mxu2 %v4297_v8  ;;  %v5051_v3 = vld [vmem:[%s6011_s17 + $0x330] sm:$0xff]  ;;  %v5050_v7 = vld [vmem:[%s6011_s17 + $0x328] sm:$0xff] }
 0x1ab   : > { %3872 = vmatpush.bf16.msra.mxu2 %v5036_v58  ;;  %3823 = vmatmul.bf16.vlgmr.msrb.gmra.mxu3 %v4301_v9  ;;  %v4312_v58 = vld [vmem:[%s6009_s24 + $0x28] sm:$0xf]  ;;  %v5065_v9 = vld [vmem:[%s6011_s17 + $0x3a0] sm:$0xff] }
 0x1ac   : > { %3891 = vmatpush.bf16.msra.mxu3 %v5044_v4  ;;  %v4313_v1 = vor.u32 %v4930_v59, %v4312_v58  ;;  %v5075_v4 = vld [vmem:[%s6011_s17 + $0x3f0] sm:$0xff]  ;;  %v5074_v8 = vld [vmem:[%s6011_s17 + $0x3e8] sm:$0xff]  ;;  %v4948_v58 = vld [vmem:[%s6009_s24 + $0xf4] sm:$0xf0] }
 0x1ad   : > { %3835 = vmatpush.bf16.msra.mxu0 %v5019_v10  ;;  %v5057_v10 = vld [vmem:[%s6011_s17 + $0x360] sm:$0xff]  ;;  %v4940_v59 = vld [vmem:[%s6009_s24 + $0xbc] sm:$0xf] }
 0x1ae   : > { %3854 = vmatpush.bf16.msra.mxu1 %v5027_v11  ;;  %v5049_v11 = vld [vmem:[%s6011_s17 + $0x320] sm:$0xff] }
 0x1af   : > { %3873 = vmatpush.bf16.msra.mxu2 %v5035_v6  ;;  %v5058_v6 = vld [vmem:[%s6011_s17 + $0x368] sm:$0xff] }
 0x1b0   : > { %3892 = vmatpush.bf16.msra.mxu3 %v5043_v12  ;;  %v5073_v12 = vld [vmem:[%s6011_s17 + $0x3e0] sm:$0xff] }
 0x1b1   : > { %3836 = vmatpush.bf16.msra.mxu0 %v5018_v14  ;;  %v4368_v14 = vld [vmem:[%s6009_s24 + $0xa0] sm:$0xf] }
 0x1b2   : > { %3855 = vmatpush.bf16.msra.mxu1 %v5026_v15  ;;  %v4945_v15 = vld [vmem:[%s6009_s24 + $0xdc] sm:$0xf0] }
 0x1b3   : > { %3874 = vmatpush.bf16.msra.mxu2 %v5034_v13  ;;  %v5064_v13 = vld [vmem:[%s6011_s17 + $0x398] sm:$0xff]  ;;  %v4369_v26 = vor.u32 %v4945_v15, %v4368_v14 }
 0x1b4   : > { %3893 = vmatpush.bf16.msra.mxu3 %v5042_v16  ;;  %v5056_v16 = vld [vmem:[%s6011_s17 + $0x358] sm:$0xff] }
 0x1b5   : > { %3837 = vmatpush.bf16.msra.mxu0 %v5017_v18  ;;  %v4370_v18 = vld [vmem:[%s6009_s24 + $0xe0] sm:$0xf0] }
 0x1b6   : > { %3856 = vmatpush.bf16.msra.mxu1 %v5025_v19  ;;  %v4376_v19 = vld [vmem:[%s6009_s24 + $0xa8] sm:$0xf] }
 0x1b7   : > { %3875 = vmatpush.bf16.msra.mxu2 %v5033_v17  ;;  %v4937_v17 = vld [vmem:[%s6009_s24 + $0xa4] sm:$0xf] }
 0x1b8   : > { %3894 = vmatpush.bf16.msra.mxu3 %v5041_v20  ;;  %3771 = vmatmul.bf16.gmra.mxu0 %v4353_v33  ;;  %v4946_v20 = vld [vmem:[%s6009_s24 + $0xe4] sm:$0xf0]  ;;  %v4373_v28 = vor.u32 %v4937_v17, %v4370_v18 }
 0x1b9   : > { %3838 = vmatpush.bf16.msra.mxu0 %v5016_v29  ;;  %3790 = vmatmul.bf16.gmra.mxu1 %v4357_v35  ;;  %v4377_v29 = vor.u32 %v4946_v20, %v4376_v19  ;;  %v5062_v33 = vld [vmem:[%s6011_s17 + $0x388] sm:$0xff] }
 0x1ba   : > { %3857 = vmatpush.bf16.msra.mxu1 %v5024_v31  ;;  %3809 = vmatmul.bf16.gmra.mxu2 %v4361_v36  ;;  %v5047_v31 = vld [vmem:[%s6011_s17 + $0x310] sm:$0xff]  ;;  %v5046_v35 = vld [vmem:[%s6011_s17 + $0x308] sm:$0xff] }
 0x1bb   : > { %3876 = vmatpush.bf16.msra.mxu2 %v5032_v23  ;;  %3828 = vmatmul.bf16.gmra.mxu3 %v4365_v37  ;;  %v4378_v23 = vld [vmem:[%s6009_s24 + $0xe8] sm:$0xf0]  ;;  %v5061_v37 = vld [vmem:[%s6011_s17 + $0x380] sm:$0xff] }
 0x1bc   : > { %3895 = vmatpush.bf16.msra.mxu3 %v5040_v32  ;;  %v4381_v30 = vor.u32 %v4938_v21, %v4378_v23  ;;  %v5071_v32 = vld [vmem:[%s6011_s17 + $0x3d0] sm:$0xff]  ;;  %v5070_v36 = vld [vmem:[%s6011_s17 + $0x3c8] sm:$0xff] }
 0x1bd   : > { %3839 = vmatpush.bf16.msra.mxu0 %v5015_v38  ;;  %v5053_v38 = vld [vmem:[%s6011_s17 + $0x340] sm:$0xff] }
 0x1be   : > { %3858 = vmatpush.bf16.msra.mxu1 %v5023_v39  ;;  %v5045_v39 = vld [vmem:[%s6011_s17 + $0x300] sm:$0xff] }
 0x1bf   : > { %3877 = vmatpush.bf16.msra.mxu2 %v5031_v34  ;;  %v5054_v34 = vld [vmem:[%s6011_s17 + $0x348] sm:$0xff] }
 0x1c0   : > { %3896 = vmatpush.bf16.msra.mxu3 %v5039_v40  ;;  %v5069_v40 = vld [vmem:[%s6011_s17 + $0x3c0] sm:$0xff] }
 0x1c1   : > { %3840 = vmatpush.bf16.msra.mxu0 %v5014_v42  ;;  %v4931_v42 = vld [vmem:[%s6009_s24 + $0x6c] sm:$0xf0] }
 0x1c2   : > { %3859 = vmatpush.bf16.msra.mxu1 %v5022_v43  ;;  %v4923_v43 = vld [vmem:[%s6009_s24 + $0x34] sm:$0xf] }
 0x1c3   : > { %3878 = vmatpush.bf16.msra.mxu2 %v5030_v41  ;;  %v4320_v41 = vld [vmem:[%s6009_s24 + $0x30] sm:$0xf] }
 0x1c4   : > { %3897 = vmatpush.bf16.msra.mxu3 %v5038_v44  ;;  %v4322_v44 = vld [vmem:[%s6009_s24 + $0x70] sm:$0xf0] }
 0x1c5   : > { %3841 = vmatpush.bf16.msra.mxu0 %v5013_v47  ;;  %v4924_v47 = vld [vmem:[%s6009_s24 + $0x3c] sm:$0xf]  ;;  %v4325_v50 = vor.u32 %v4923_v43, %v4322_v44 }
 0x1c6   : > { %3860 = vmatpush.bf16.msra.mxu1 %v5021_v48  ;;  %v4330_v48 = vld [vmem:[%s6009_s24 + $0x78] sm:$0xf0] }
 0x1c7   : > { %3879 = vmatpush.bf16.msra.mxu2 %v5029_v45  ;;  %v4328_v45 = vld [vmem:[%s6009_s24 + $0x38] sm:$0xf] }
 0x1c8   : > { %3898 = vmatpush.bf16.msra.mxu3 %v5037_v49  ;;  %3842 = vmatmul.bf16.vlgmr.msra.gmra.mxu0 %v4305_v62  ;;  %v4321_v49 = vor.u32 %v4931_v42, %v4320_v41 }
 0x1c9   : > { %3910 = vmatpush.bf16.msrb.mxu0 %v5052_v52  ;;  %3861 = vmatmul.bf16.vlgmr.msra.gmra.mxu1 %v4309_v0  ;;  %v4333_v52 = vor.u32 %v4924_v47, %v4330_v48  ;;  %v4397_v0 = vor.u32 %v4940_v59, %v4394_v60 }
 0x1ca   : > { %3929 = vmatpush.bf16.msrb.mxu1 %v5060_v53  ;;  %3880 = vmatmul.bf16.vlgmr.msra.gmra.mxu2 %v4313_v1  ;;  %v4384_v53 = vld [vmem:[%s6009_s24 + $0xb0] sm:$0xf] }
 0x1cb   : > { %3948 = vmatpush.bf16.msrb.mxu2 %v5068_v46  ;;  %3899 = vmatmul.bf16.vlgmr.msra.gmra.mxu3 %v4317_v2  ;;  %v4932_v46 = vld [vmem:[%s6009_s24 + $0x74] sm:$0xf0]  ;;  %v4385_v61 = vor.u32 %v4947_v54, %v4384_v53 }
 0x1cc   : > { %3967 = vmatpush.bf16.msrb.mxu3 %v5076_v55  ;;  %v4329_v51 = vor.u32 %v4932_v46, %v4328_v45  ;;  %v4939_v55 = vld [vmem:[%s6009_s24 + $0xb4] sm:$0xf] }
 0x1cd   : > { %3911 = vmatpush.bf16.msrb.mxu0 %v5051_v3 }
 0x1ce   : > { %3930 = vmatpush.bf16.msrb.mxu1 %v5059_v63  ;;  %v4393_v63 = vor.u32 %v4948_v58, %v4392_v57 }
 0x1cf   : > { %3949 = vmatpush.bf16.msrb.mxu2 %v5067_v56  ;;  %v4386_v56 = vld [vmem:[%s6009_s24 + $0xf0] sm:$0xf0] }
 0x1d0   : > { %3968 = vmatpush.bf16.msrb.mxu3 %v5075_v4  ;;  %v4389_v62 = vor.u32 %v4939_v55, %v4386_v56 }
 0x1d1   : > { %3912 = vmatpush.bf16.msrb.mxu0 %v5050_v7 }
 0x1d2   : > { %3931 = vmatpush.bf16.msrb.mxu1 %v5058_v6 }
 0x1d3   : > { %3950 = vmatpush.bf16.msrb.mxu2 %v5066_v5 }
 0x1d4   : > { %3969 = vmatpush.bf16.msrb.mxu3 %v5074_v8 }
 0x1d5   : > { %3913 = vmatpush.bf16.msrb.mxu0 %v5049_v11 }
 0x1d6   : > { %3932 = vmatpush.bf16.msrb.mxu1 %v5057_v10 }
 0x1d7   : > { %3951 = vmatpush.bf16.msrb.mxu2 %v5065_v9 }
 0x1d8   : > { %3970 = vmatpush.bf16.msrb.mxu3 %v5073_v12  ;;  %3847 = vmatmul.bf16.gmra.mxu0 %v4369_v26 }
 0x1d9   : > { %3914 = vmatpush.bf16.msrb.mxu0 %v5048_v22  ;;  %3866 = vmatmul.bf16.gmra.mxu1 %v4373_v28 }
 0x1da   : > { %3933 = vmatpush.bf16.msrb.mxu1 %v5056_v16  ;;  %3885 = vmatmul.bf16.gmra.mxu2 %v4377_v29 }
 0x1db   : > { %3952 = vmatpush.bf16.msrb.mxu2 %v5064_v13  ;;  %3904 = vmatmul.bf16.gmra.mxu3 %v4381_v30 }
 0x1dc   : > { %3971 = vmatpush.bf16.msrb.mxu3 %v5072_v24 }
 0x1dd   : > { %3915 = vmatpush.bf16.msrb.mxu0 %v5047_v31 }
 0x1de   : > { %3934 = vmatpush.bf16.msrb.mxu1 %v5055_v27 }
 0x1df   : > { %3953 = vmatpush.bf16.msrb.mxu2 %v5063_v25 }
 0x1e0   : > { %3972 = vmatpush.bf16.msrb.mxu3 %v5071_v32 }
 0x1e1   : > { %3916 = vmatpush.bf16.msrb.mxu0 %v5046_v35 }
 0x1e2   : > { %3935 = vmatpush.bf16.msrb.mxu1 %v5054_v34 }
 0x1e3   : > { %3954 = vmatpush.bf16.msrb.mxu2 %v5062_v33 }
 0x1e4   : > { %3973 = vmatpush.bf16.msrb.mxu3 %v5070_v36 }
 0x1e5   : > { %3917 = vmatpush.bf16.msrb.mxu0 %v5045_v39 }
 0x1e6   : > { %3936 = vmatpush.bf16.msrb.mxu1 %v5053_v38 }
 0x1e7   : > { %3955 = vmatpush.bf16.msrb.mxu2 %v5061_v37 }
 0x1e8   : > { %3974 = vmatpush.bf16.msrb.mxu3 %v5069_v40  ;;  %3918 = vmatmul.bf16.vlgmr.msrb.gmra.mxu0 %v4321_v49 }
 0x1e9   : > { %3937 = vmatmul.bf16.vlgmr.msrb.gmra.mxu1 %v4325_v50 }
 0x1ea   : > { %3956 = vmatmul.bf16.vlgmr.msrb.gmra.mxu2 %v4329_v51 }
 0x1eb   : > { %3975 = vmatmul.bf16.vlgmr.msrb.gmra.mxu3 %v4333_v52 }
 0x1f8   : > { %3923 = vmatmul.bf16.gmra.mxu0 %v4385_v61 }
 0x1f9   : > { %3942 = vmatmul.bf16.gmra.mxu1 %v4389_v62 }
 0x1fa   : > { %3961 = vmatmul.bf16.gmra.mxu2 %v4393_v63 }
 0x1fb   : > { %3980 = vmatmul.bf16.gmra.mxu3 %v4397_v0 }
 0x205   : > { %v3691_v1 = vpop.f32.mrf.mxu0 }
 0x206   : > { %v3710_v2 = vpop.f32.mrf.mxu1 }
 0x207   : > { %v3711_v3 = vadd.f32 %v3710_v2, %v3691_v1 }
 0x20d   : > { %v3729_v4 = vpop.f32.mrf.mxu2  ;;  %v3693_v7 = vpop.f32.mrf.mxu0 }
 0x20e   : > { %v3748_v5 = vpop.f32.mrf.mxu3  ;;  %v3730_v6 = vadd.f32 %v3729_v4, %v3711_v3  ;;  %v3712_v8 = vpop.f32.mrf.mxu1 }
 0x20f   : > { %v3713_v9 = vadd.f32 %v3712_v8, %v3693_v7 }
 0x210   : > { %v3749_v10 = vadd.f32 %v3748_v5, %v3730_v6 }
 0x215   : > { %v3731_v11 = vpop.f32.mrf.mxu2  ;;  %v3696_v14 = vpop.f32.mrf.mxu0 }
 0x216   : > { %v3750_v12 = vpop.f32.mrf.mxu3  ;;  %v3732_v13 = vadd.f32 %v3731_v11, %v3713_v9  ;;  %v3715_v15 = vpop.f32.mrf.mxu1 }
 0x217   : > { %v3716_v16 = vadd.f32 %v3715_v15, %v3696_v14 }
 0x218   : > { %v3751_v17 = vadd.f32 %v3750_v12, %v3732_v13 }
 0x21d   : > { %v3734_v18 = vpop.f32.mrf.mxu2  ;;  %v3698_v21 = vpop.f32.mrf.mxu0 }
 0x21e   : > { %v3753_v19 = vpop.f32.mrf.mxu3  ;;  %v3735_v20 = vadd.f32 %v3734_v18, %v3716_v16  ;;  %v3717_v22 = vpop.f32.mrf.mxu1 }
 0x21f   : > { %v3718_v23 = vadd.f32 %v3717_v22, %v3698_v21 }
 0x220   : > { %v3754_v24 = vadd.f32 %v3753_v19, %v3735_v20 }
 0x225   : > { %v3736_v25 = vpop.f32.mrf.mxu2  ;;  %v3767_v28 = vpop.f32.mrf.mxu0 }
 0x226   : > { %v3755_v26 = vpop.f32.mrf.mxu3  ;;  %v3737_v27 = vadd.f32 %v3736_v25, %v3718_v23  ;;  %v3786_v29 = vpop.f32.mrf.mxu1  ;;  %v3768_v51 = vadd.f32 %v3767_v28, %v3749_v10 }
 0x228   : > { %v3756_v30 = vadd.f32 %v3755_v26, %v3737_v27  ;;  %v3787_v52 = vadd.f32 %v3786_v29, %v3768_v51  ;;  %v2462_v29 = vld [vmem:[#allocation2 + $0x10] sm:$0xff] }
 0x22d   : > { %v3805_v31 = vpop.f32.mrf.mxu2  ;;  %v3769_v33 = vpop.f32.mrf.mxu0 }
 0x22e   : > { %v3824_v32 = vpop.f32.mrf.mxu3  ;;  %v3788_v34 = vpop.f32.mrf.mxu1  ;;  %v3806_v54 = vadd.f32 %v3805_v31, %v3787_v52  ;;  %v3770_v58 = vadd.f32 %v3769_v33, %v3751_v17 }
 0x230   : > { %v3825_v59 = vadd.f32 %v3824_v32, %v3806_v54  ;;  %v3789_v60 = vadd.f32 %v3788_v34, %v3770_v58 }
 0x235   : > { %v3807_v35 = vpop.f32.mrf.mxu2  ;;  %v3772_v37 = vpop.f32.mrf.mxu0 }
 0x236   : > { %v3826_v36 = vpop.f32.mrf.mxu3  ;;  %v3791_v38 = vpop.f32.mrf.mxu1  ;;  %v3808_v63 = vadd.f32 %v3807_v35, %v3789_v60  ;;  %v3773_v3 = vadd.f32 %v3772_v37, %v3754_v24 }
 0x238   : > { %v3827_v5 = vadd.f32 %v3826_v36, %v3808_v63  ;;  %v3792_v7 = vadd.f32 %v3791_v38, %v3773_v3 }
 0x23d   : > { %v3810_v39 = vpop.f32.mrf.mxu2  ;;  %v3774_v41 = vpop.f32.mrf.mxu0 }
 0x23e   : > { %v3829_v40 = vpop.f32.mrf.mxu3  ;;  %v3793_v42 = vpop.f32.mrf.mxu1  ;;  %v3811_v10 = vadd.f32 %v3810_v39, %v3792_v7  ;;  %v3775_v15 = vadd.f32 %v3774_v41, %v3756_v30 }
 0x240   : > { %v3830_v18 = vadd.f32 %v3829_v40, %v3811_v10  ;;  %v3794_v20 = vadd.f32 %v3793_v42, %v3775_v15 }
 0x245   : > { %v3812_v43 = vpop.f32.mrf.mxu2  ;;  %v3843_v45 = vpop.f32.mrf.mxu0 }
 0x246   : > { %v3831_v44 = vpop.f32.mrf.mxu3  ;;  %v3862_v46 = vpop.f32.mrf.mxu1  ;;  %v3844_v61 = vadd.f32 %v3843_v45, %v3825_v59  ;;  %v3813_v24 = vadd.f32 %v3812_v43, %v3794_v20  ;;  %v2463_v45 = vld [vmem:[#allocation2] sm:$0xff] }
 0x248   : > { %v3863_v4 = vadd.f32 %v3862_v46, %v3844_v61  ;;  %v3832_v35 = vadd.f32 %v3831_v44, %v3813_v24 }
 0x24d   : > { %v3881_v47 = vpop.f32.mrf.mxu2  ;;  %v3845_v49 = vpop.f32.mrf.mxu0 }
 0x24e   : > { %v3900_v48 = vpop.f32.mrf.mxu3  ;;  %v3864_v50 = vpop.f32.mrf.mxu1  ;;  %v3882_v6 = vadd.f32 %v3881_v47, %v3863_v4  ;;  %v3846_v8 = vadd.f32 %v3845_v49, %v3827_v5 }
 0x250   : > { %v3901_v11 = vadd.f32 %v3900_v48, %v3882_v6  ;;  %v3865_v16 = vadd.f32 %v3864_v50, %v3846_v8 }
 0x255   : > { %v3883_v53 = vpop.f32.mrf.mxu2  ;;  %v3848_v56 = vpop.f32.mrf.mxu0 }
 0x256   : > { %v3902_v55 = vpop.f32.mrf.mxu3  ;;  %v3867_v57 = vpop.f32.mrf.mxu1  ;;  %v3884_v19 = vadd.f32 %v3883_v53, %v3865_v16  ;;  %v3849_v21 = vadd.f32 %v3848_v56, %v3830_v18 }
 0x258   : > { %v3903_v25 = vadd.f32 %v3902_v55, %v3884_v19  ;;  %v3868_v32 = vadd.f32 %v3867_v57, %v3849_v21  ;;  %v2464_v57 = vld [vmem:[#allocation2 + $0x18] sm:$0xff] }
 0x25d   : > { %v3886_v62 = vpop.f32.mrf.mxu2  ;;  %v3850_v1 = vpop.f32.mrf.mxu0 }
 0x25e   : > { %v3905_v0 = vpop.f32.mrf.mxu3  ;;  %v3869_v2 = vpop.f32.mrf.mxu1  ;;  %v3887_v30 = vadd.f32 %v3886_v62, %v3868_v32  ;;  %v3851_v37 = vadd.f32 %v3850_v1, %v3832_v35  ;;  %v2465_v1 = vld [vmem:[#allocation2 + $0x8] sm:$0xff] }
 0x260   : > { %v3906_v40 = vadd.f32 %v3905_v0, %v3887_v30  ;;  %v3870_v46 = vadd.f32 %v3869_v2, %v3851_v37 }
 0x265   : > { %v3888_v9 = vpop.f32.mrf.mxu2  ;;  %v3919_v13 = vpop.f32.mrf.mxu0 }
 0x266   : > { %v3907_v12 = vpop.f32.mrf.mxu3  ;;  %v3938_v14 = vpop.f32.mrf.mxu1  ;;  %v3920_v17 = vadd.f32 %v3919_v13, %v3901_v11  ;;  %v3889_v50 = vadd.f32 %v3888_v9, %v3870_v46 }
 0x268   : > { %v3939_v22 = vadd.f32 %v3938_v14, %v3920_v17  ;;  %v3908_v53 = vadd.f32 %v3907_v12, %v3889_v50 }
 0x26d   : > { %v3957_v23 = vpop.f32.mrf.mxu2  ;;  %v3921_v28 = vpop.f32.mrf.mxu0 }
 0x26e   : > { %v3958_v26 = vadd.f32 %v3957_v23, %v3939_v22  ;;  %v3976_v27 = vpop.f32.mrf.mxu3  ;;  %v3940_v31 = vpop.f32.mrf.mxu1  ;;  %v3922_v34 = vadd.f32 %v3921_v28, %v3903_v25 }
 0x270   : > { %v3977_v33 = vadd.f32 %v3976_v27, %v3958_v26  ;;  %v3941_v38 = vadd.f32 %v3940_v31, %v3922_v34 }
 0x272   : > { %v3986_v36 = vadd.f32 %v3977_v33, %v2462_v29 }
 0x274   : > { %3990 = vst [vmem:[#allocation2 + $0x10] sm:$0xff] %v3986_v36 }
 0x275   : > { %v3959_v39 = vpop.f32.mrf.mxu2  ;;  %v3924_v43 = vpop.f32.mrf.mxu0 }
 0x276   : > { %v3960_v41 = vadd.f32 %v3959_v39, %v3941_v38  ;;  %v3978_v42 = vpop.f32.mrf.mxu3  ;;  %v3925_v48 = vadd.f32 %v3924_v43, %v3906_v40  ;;  %v3943_v49 = vpop.f32.mrf.mxu1 }
 0x278   : > { %v3979_v47 = vadd.f32 %v3978_v42, %v3960_v41  ;;  %v3944_v52 = vadd.f32 %v3943_v49, %v3925_v48 }
 0x27a   : > { %v3987_v51 = vadd.f32 %v3979_v47, %v2463_v45 }
 0x27c   : > { %3991 = vst [vmem:[#allocation2] sm:$0xff] %v3987_v51 }
 0x27d   : > { %v3962_v44 = vpop.f32.mrf.mxu2  ;;  %v3926_v56 = vpop.f32.mrf.mxu0 }
 0x27e   : > { %v3963_v54 = vadd.f32 %v3962_v44, %v3944_v52  ;;  %v3981_v55 = vpop.f32.mrf.mxu3  ;;  %v3927_v59 = vadd.f32 %v3926_v56, %v3908_v53  ;;  %v3945_v61 = vpop.f32.mrf.mxu1 }
 0x280   : > { %v3982_v58 = vadd.f32 %v3981_v55, %v3963_v54  ;;  %v3946_v62 = vadd.f32 %v3945_v61, %v3927_v59 }
 0x282   : > { %v3988_v60 = vadd.f32 %v3982_v58, %v2464_v57 }
 0x284   : > { %3992 = vst [vmem:[#allocation2 + $0x18] sm:$0xff] %v3988_v60 }
 0x285   : > { %v3964_v63 = vpop.f32.mrf.mxu2 }
 0x286   : > { %v3965_v0 = vadd.f32 %v3964_v63, %v3946_v62  ;;  %v3983_v2 = vpop.f32.mrf.mxu3 }
 0x288   : > { %v3984_v3 = vadd.f32 %v3983_v2, %v3965_v0  ;;  %3997 = sbr.rel (%p4910_p5) target bundleno = 735 (0x2df), region = 119 }
 0x28a   : > { %v3989_v4 = vadd.f32 %v3984_v3, %v2465_v1 }
 0x28c   : > { %3993 = vst [vmem:[#allocation2 + $0x8] sm:$0xff] %v3989_v4 }
 0x28d   : > { %v3998_v5 = vld [vmem:[#allocation2 + $0x10] sm:$0xff]  ;;  %v3999_v6 = vld [vmem:[#allocation2] sm:$0xff]  ;;  %v4000_v7 = vld [vmem:[#allocation2 + $0x18] sm:$0xff] }
 0x28e   : > { %v4002_v8 = vadd.f32 %v3999_v6, %v3998_v5  ;;  %v4030_v43 = vld [vmem:[%s2450_s9] sm:$0x1] }
 0x28f   : > { %v5177_v49 = vld [vmem:[%s2453_s27] ss:$0 sm:$0xff] }
 0x290   : > { %v4003_v10 = vadd.f32 %v4002_v8, %v4000_v7 }
 0x293   : > { %v4001_v9 = vld [vmem:[#allocation2 + $0x8] sm:$0xff] }
 0x294   : > { %v4004_v11 = vadd.f32 %v4003_v10, %v4001_v9 }
 0x296   : > { %v4005_v12 = vrot.slane %v4004_v11, 4 }
 0x298   : > { %v4006_v13 = vadd.f32 %v4005_v12, %v4004_v11 }
 0x29a   : > { %v4007_v14 = vrot.slane %v4006_v13, 2 }
 0x29c   : > { %v4008_v15 = vadd.f32 %v4007_v14, %v4006_v13 }
 0x29e   : > { %v4009_v16 = vrot.slane %v4008_v15, 1 }
 0x2a0   : > { %v4010_v17 = vadd.f32 %v4009_v16, %v4008_v15 }
 0x2a2   : > { %v4011_v18 = vmul.f32 0.03125, %v4010_v17 }
 0x2a4   : > { %v4012_v19 = vsub.f32 %v3998_v5, %v4011_v18  ;;  %v4013_v20 = vsub.f32 %v3999_v6, %v4011_v18  ;;  %v4014_v21 = vsub.f32 %v4000_v7, %v4011_v18  ;;  %v4015_v22 = vsub.f32 %v4001_v9, %v4011_v18 }
 0x2a6   : > { %v4016_v23 = vmul.f32 %v4012_v19, %v4012_v19  ;;  %v4017_v24 = vmul.f32 %v4013_v20, %v4013_v20  ;;  %v4018_v25 = vmul.f32 %v4014_v21, %v4014_v21  ;;  %v4019_v26 = vmul.f32 %v4015_v22, %v4015_v22 }
 0x2a8   : > { %v4020_v27 = vadd.f32 %v4017_v24, %v4016_v23 }
 0x2aa   : > { %v4021_v28 = vadd.f32 %v4020_v27, %v4018_v25 }
 0x2ac   : > { %v4022_v29 = vadd.f32 %v4021_v28, %v4019_v26 }
 0x2ae   : > { %v4023_v31 = vrot.slane %v4022_v29, 4 }
 0x2b0   : > { %v4024_v32 = vadd.f32 %v4023_v31, %v4022_v29 }
 0x2b2   : > { %v4025_v33 = vrot.slane %v4024_v32, 2 }
 0x2b4   : > { %v4026_v34 = vadd.f32 %v4025_v33, %v4024_v32 }
 0x2b6   : > { %v4027_v35 = vrot.slane %v4026_v34, 1 }
 0x2b8   : > { %v4028_v30 = vadd.f32 %v4027_v35, %v4026_v34 }
 0x2ba   : > { %v4029_v36 = vmul.f32 0.03125, %v4028_v30 }
 0x2bc   : > { %v4031_v37 = vadd.f32 1e-05, %v4029_v36 }
 0x2be   : > { %5178 = vrsqrt.f32 %v4031_v37  ;;  %vm4038_vm0 = vweird.f32 %v4031_v37 }
 0x2c4   : > { %v5179_v38 = vpop.eup %5178 }
 0x2c5   : > { %v4033_v39 = vmul.f32 %v5179_v38, %v4031_v37  ;;  %vm4039_vm1 = vweird.f32 %v5179_v38 }
 0x2c6   : > { %vm4040_vm2 = vmor %vm4038_vm0, %vm4039_vm1 }
 0x2c7   : > { %v4034_v40 = vmul.f32 %v5179_v38, %v4033_v39 }
 0x2c9   : > { %v4035_v41 = vmul.f32 0.5, %v4034_v40 }
 0x2cb   : > { %v4036_v42 = vsub.f32 1.5, %v4035_v41 }
 0x2cd   : > { %v4037_v45 = vmul.f32 %v5179_v38, %v4036_v42 }
 0x2cf   : > { %v4041_v46 = vsel %vm4040_vm2, %v5179_v38, %v4037_v45 }
 0x2d0   : > { %v4042_v47 = vmul.f32 %v4041_v46, %v4030_v43 }
 0x2d2   : > { %v4044_v48 = vperm.slane %v4042_v47, 0 }
 0x2d4   : > { %v4046_v50 = vmul.f32 %v4044_v48, %v4012_v19  ;;  %v4047_v51 = vmul.f32 %v4044_v48, %v4013_v20  ;;  %v4048_v52 = vmul.f32 %v4044_v48, %v4014_v21  ;;  %v4049_v44 = vmul.f32 %v4044_v48, %v4015_v22 }
 0x2d6   : > { %v4054_v53 = vadd.f32 %v5177_v49, %v4046_v50  ;;  %v4055_v54 = vadd.f32 %v5177_v49, %v4047_v51  ;;  %v4056_v55 = vadd.f32 %v5177_v49, %v4048_v52  ;;  %v4057_v56 = vadd.f32 %v5177_v49, %v4049_v44 }
 0x2d8   : > { %vm4058_vm3 = vcmp.gt.f32.partialorder %v4054_v53, 0.0  ;;  %vm4059_vm4 = vcmp.gt.f32.partialorder %v4055_v54, 0.0  ;;  %v4062_v57 = vmul.f32 0.2, %v4054_v53  ;;  %v4063_v58 = vmul.f32 0.2, %v4055_v54 }
 0x2d9   : > { %vm4060_vm5 = vcmp.gt.f32.partialorder %v4056_v55, 0.0  ;;  %vm4061_vm6 = vcmp.gt.f32.partialorder %v4057_v56, 0.0  ;;  %v4064_v59 = vmul.f32 0.2, %v4056_v55  ;;  %v4065_v60 = vmul.f32 0.2, %v4057_v56 }
 0x2da   : > { %v4066_v61 = vsel %vm4058_vm3, %v4054_v53, %v4062_v57  ;;  %v4067_v62 = vsel %vm4059_vm4, %v4055_v54, %v4063_v58 }
 0x2db   : > { %v5080_v63 = vpack.c.bf16 %v4067_v62, %v4066_v61  ;;  %v4068_v0 = vsel %vm4060_vm5, %v4056_v55, %v4064_v59  ;;  %v4069_v1 = vsel %vm4061_vm6, %v4057_v56, %v4065_v60 }
 0x2dc   : > { %v5085_v2 = vpack.c.bf16 %v4069_v1, %v4068_v0 }
 0x2dd   : > { %5081 = vst [vmem:[%s6013_s19] sm:$0xff] %v5080_v63  }
 0x2de   : > { %5087 = vst [vmem:[%s6013_s19 + $0x8] sm:$0xff] %v5085_v2  }
 0x2df PF: > { %4084 = sbr.rel (!%p5388_p12) target bundleno = 745 (0x2e9), region = 123  ;;  %s4912_s27 = sshll.u32 (%p5388_p12), %s5254_s22, 2 }
 0x2e0   : > { %s4086_s26 = scalar_lea.vmem (%p5388_p12), %s6268_s4, %s4912_s27 }
 0x2e4   : > { %v4103_v3 = vld [vmem:[%s6013_s19] sm:$0xf]  ;;  %v4105_v4 = vld [vmem:[%s6013_s19 + $0x4] sm:$0xf] }
 0x2e5   : > { %v4107_v5 = vld [vmem:[%s6013_s19 + $0x8] sm:$0xf]  ;;  %4104 = vst [vmem:[%s4086_s26] sm:$0xf] %v4103_v3  ;;  %v4109_v6 = vld [vmem:[%s6013_s19 + $0xc] sm:$0xf] }
 0x2e6   : > { %4106 = vst [vmem:[%s4086_s26 + $0x10] sm:$0xf] %v4105_v4 }
 0x2e7   : > { %4108 = vst [vmem:[%s4086_s26 + $0x20] sm:$0xf] %v4107_v5 }
 0x2e8   : > { %4110 = vst [vmem:[%s4086_s26 + $0x30] sm:$0xf] %v4109_v6 }
 0x2e9 PF: > { %s14_s25 = sadd.s32 1, %s5266_s25   ;;  %s6282_s22 = sld [smem:[#allocation6_spill]] }
 0x2ea   : > { %p11_p6 = scmp.ge.s32.totalorder %s14_s25, 10   ;;  %s6283_s14 = sld [smem:[#allocation7_spill]] }
 0x2eb   : > { %s6284_s24 = sld [smem:[#allocation8_spill]]  ;;  %s6285_s15 = smov %s5230_s16 }
 0x2ec   : > { %s6286_s16 = smov %s5386_s13  ;;  %s6287_s17 = smov %s5238_s18 }
 0x2ed   : > { %s6288_s18 = smov %s5383_s12  ;;  %s6289_s19 = smov %s5246_s20 }
 0x2ee   : > { %s6290_s20 = smov %s5369_s7  ;;  %s6291_s21 = smov %s5258_s23 }
 0x2ef   :  { %13 = sbr.rel (!%p11_p6) target bundleno = 9 (0x9), region = 213 }
 0x2f0   : > { %s6292_s23 = smov %s6283_s14 }

// kernel: discriminator_forward.9
= control target key start
LH: loop header
LB: loop body
LE: loop exit
PB: predicated region body
PF: predicated region fallthrough
CT: control target
= control target key end

     0   :  { %vm379_vm0 = vcmask 1041408   ;;  %vm381_vm1 = vcmask 1045508   ;;  %vm383_vm2 = vcmask 1043456   ;;  %vm771_vm6 = vcmask 1024   ;;  %s1232_s0 = inlined_call_operand.vmem [shape: bf16[2,8192], index: 0, kind: input, shape index: {}]   ;;  %s1233_s1 = inlined_call_operand.vmem [shape: bf16[1,8192], index: 1, kind: input, shape index: {}]   ;;  %s1234_s2 = inlined_call_operand.vmem [shape: f32[2,1], index: 2, kind: output, shape index: {}]  }
   0x1   :  { %v799_v0 = vld [vmem:[%s1232_s0] sm:$0xff]  ;;  %v804_v1 = vld [vmem:[%s1232_s0 + $0x8] sm:$0xff]  ;;  %v809_v2 = vld [vmem:[%s1232_s0 + $0x30] sm:$0xff] }
   0x2   :  { %v814_v3 = vld [vmem:[%s1232_s0 + $0x38] sm:$0xff]  ;;  %v35_v4 = vld [vmem:[%s1233_s1] sm:$0xff]  ;;  %v36_v5 = vld [vmem:[%s1233_s1 + $0x8] sm:$0xff] }
   0x3   :  { %v37_v10 = vld [vmem:[%s1233_s1 + $0x10] sm:$0xff]  ;;  %v38_v11 = vld [vmem:[%s1233_s1 + $0x18] sm:$0xff]  ;;  %v39_v16 = vld [vmem:[%s1233_s1 + $0x20] sm:$0xff]  ;;  %v848_v20 = vunpack.c.l.bf16 %v35_v4  ;;  %v850_v21 = vunpack.c.h.bf16 %v35_v4  ;;  %v852_v22 = vunpack.c.l.bf16 %v36_v5  ;;  %v854_v23 = vunpack.c.h.bf16 %v36_v5 }
   0x4   :  { %v40_v17 = vld [vmem:[%s1233_s1 + $0x28] sm:$0xff]  ;;  %v41_v18 = vld [vmem:[%s1233_s1 + $0x30] sm:$0xff]  ;;  %v42_v19 = vld [vmem:[%s1233_s1 + $0x38] sm:$0xff]  ;;  %v856_v24 = vunpack.c.l.bf16 %v37_v10  ;;  %v858_v25 = vunpack.c.h.bf16 %v37_v10  ;;  %v860_v26 = vunpack.c.l.bf16 %v38_v11  ;;  %v862_v27 = vunpack.c.h.bf16 %v38_v11 }
   0x5   :  { %v864_v28 = vunpack.c.l.bf16 %v39_v16  ;;  %v866_v29 = vunpack.c.h.bf16 %v39_v16  ;;  %v868_v30 = vunpack.c.l.bf16 %v40_v17  ;;  %v870_v31 = vunpack.c.h.bf16 %v40_v17 }
   0x6   :  { %v872_v32 = vunpack.c.l.bf16 %v41_v18  ;;  %v874_v33 = vunpack.c.h.bf16 %v41_v18  ;;  %v876_v34 = vunpack.c.l.bf16 %v42_v19  ;;  %v878_v35 = vunpack.c.h.bf16 %v42_v19 }
   0x7   :  { %v75_v36 = vperm.slane %v848_v20, 0  ;;  %v76_v37 = vperm.slane %v848_v20, 2  ;;  %v77_v38 = vperm.slane %v848_v20, 4  ;;  %v78_v39 = vperm.slane %v848_v20, 6 }
   0x8   :  { %v79_v40 = vperm.slane %v850_v21, 0  ;;  %v80_v41 = vperm.slane %v850_v21, 2  ;;  %v81_v42 = vperm.slane %v850_v21, 4  ;;  %v82_v43 = vperm.slane %v850_v21, 6 }
   0x9   :  { %v83_v44 = vperm.slane %v852_v22, 0  ;;  %v84_v45 = vperm.slane %v852_v22, 2  ;;  %v85_v46 = vperm.slane %v852_v22, 4  ;;  %v86_v47 = vperm.slane %v852_v22, 6 }
   0xa   :  { %v87_v48 = vperm.slane %v854_v23, 0  ;;  %v88_v49 = vperm.slane %v854_v23, 2  ;;  %v89_v50 = vperm.slane %v854_v23, 4  ;;  %v90_v51 = vperm.slane %v854_v23, 6 }
   0xb   :  { %v123_v21 = vperm.slane %v872_v32, 0  ;;  %v124_v22 = vperm.slane %v872_v32, 2  ;;  %v125_v23 = vperm.slane %v872_v32, 4  ;;  %v126_v10 = vperm.slane %v872_v32, 6 }
   0xc   :  { %v127_v11 = vperm.slane %v874_v33, 0  ;;  %v128_v16 = vperm.slane %v874_v33, 2  ;;  %v129_v17 = vperm.slane %v874_v33, 4  ;;  %v130_v18 = vperm.slane %v874_v33, 6 }
   0xd   :  { %v131_v19 = vperm.slane %v876_v34, 0  ;;  %v132_v20 = vperm.slane %v876_v34, 2  ;;  %v133_v5 = vperm.slane %v876_v34, 4  ;;  %v134_v9 = vperm.slane %v876_v34, 6 }
   0xe   :  { %v135_v8 = vperm.slane %v878_v35, 0  ;;  %v136_v32 = vperm.slane %v878_v35, 2  ;;  %v137_v4 = vperm.slane %v878_v35, 4  ;;  %v138_v63 = vperm.slane %v878_v35, 6 }
   0xf   :  { %v203_v62 = vperm.slane %v75_v36, 0  ;;  %v204_v61 = vperm.slane %v76_v37, 0  ;;  %v205_v60 = vperm.slane %v77_v38, 0  ;;  %v206_v33 = vperm.slane %v78_v39, 0 }
  0x10   :  { %v207_v56 = vperm.slane %v79_v40, 0  ;;  %v208_v52 = vperm.slane %v80_v41, 0  ;;  %v209_v15 = vperm.slane %v81_v42, 0  ;;  %v210_v14 = vperm.slane %v82_v43, 0 }
  0x11   :  { %v943_v13 = vperm.slane %v83_v44, 0  ;;  %v945_v12 = vperm.slane %v84_v45, 0  ;;  %v947_v34 = vperm.slane %v85_v46, 0  ;;  %v949_v59 = vperm.slane %v86_v47, 0 }
  0x12   :  { %v951_v58 = vperm.slane %v87_v48, 0  ;;  %v953_v57 = vperm.slane %v88_v49, 0  ;;  %v955_v35 = vperm.slane %v89_v50, 0  ;;  %v957_v36 = vperm.slane %v90_v51, 0 }
  0x13   :  { %v251_v37 = vperm.slane %v123_v21, 0  ;;  %v252_v38 = vperm.slane %v124_v22, 0  ;;  %v253_v39 = vperm.slane %v125_v23, 0  ;;  %v254_v40 = vperm.slane %v126_v10, 0 }
  0x14   :  { %v255_v41 = vperm.slane %v127_v11, 0  ;;  %v256_v42 = vperm.slane %v128_v16, 0  ;;  %v257_v43 = vperm.slane %v129_v17, 0  ;;  %v258_v44 = vperm.slane %v130_v18, 0 }
  0x15   :  { %v259_v45 = vperm.slane %v131_v19, 0  ;;  %v260_v46 = vperm.slane %v132_v20, 0  ;;  %v261_v47 = vperm.slane %v133_v5, 0  ;;  %v262_v55 = vperm.slane %v134_v9, 0 }
  0x16   :  { %v263_v48 = vperm.slane %v135_v8, 0  ;;  %v264_v7 = vperm.slane %v136_v32, 0  ;;  %v265_v49 = vperm.slane %v137_v4, 0  ;;  %v266_v54 = vperm.slane %v138_v63, 0 }
  0x17   :  { %v331_v50 = vrot.slane %v204_v61, 6  ;;  %v332_v53 = vrot.slane %v205_v60, 4  ;;  %v333_v51 = vrot.slane %v206_v33, 2  ;;  %v334_v6 = vrot.slane %v208_v52, 6 }
  0x18   :  { %v335_v21 = vrot.slane %v209_v15, 4  ;;  %v336_v22 = vrot.slane %v210_v14, 2  ;;  %v337_v10 = vrot.slane %v945_v12, 6  ;;  %v338_v11 = vrot.slane %v947_v34, 4 }
  0x19   :  { %v339_v16 = vrot.slane %v949_v59, 2  ;;  %v367_v5 = vrot.slane %v252_v38, 6  ;;  %v368_v9 = vrot.slane %v253_v39, 4  ;;  %v369_v8 = vrot.slane %v254_v40, 2 }
  0x1a   :  { %v370_v17 = vrot.slane %v256_v42, 6  ;;  %v371_v4 = vrot.slane %v257_v43, 4  ;;  %v372_v63 = vrot.slane %v258_v44, 2  ;;  %v373_v61 = vrot.slane %v260_v46, 6 }
  0x1b   :  { %v380_v60 = vsel %vm379_vm0, %v203_v62, %v331_v50  ;;  %v382_v15 = vsel %vm381_vm1, %v332_v53, %v333_v51  ;;  %v374_v14 = vrot.slane %v261_v47, 4  ;;  %v375_v12 = vrot.slane %v262_v55, 2 }
  0x1c   :  { %v385_v52 = vsel %vm379_vm0, %v207_v56, %v334_v6  ;;  %v386_v18 = vsel %vm381_vm1, %v335_v21, %v336_v22  ;;  %v340_v59 = vrot.slane %v953_v57, 6  ;;  %v376_v19 = vrot.slane %v264_v7, 6 }
  0x1d   :  { %v377_v20 = vrot.slane %v265_v49, 4  ;;  %v378_v23 = vrot.slane %v266_v54, 2  ;;  %v341_v32 = vrot.slane %v955_v35, 4  ;;  %v342_v33 = vrot.slane %v957_v36, 2 }
  0x1e   :  { %v384_v62 = vsel %vm383_vm2, %v380_v60, %v382_v15  ;;  %v418_v53 = vsel %vm379_vm0, %v251_v37, %v367_v5  ;;  %v387_v34 = vsel %vm383_vm2, %v385_v52, %v386_v18  ;;  %v419_v55 = vsel %vm381_vm1, %v368_v9, %v369_v8 }
  0x1f   :  { %v421_v6 = vsel %vm379_vm0, %v255_v41, %v370_v17  ;;  %v422_v56 = vsel %vm381_vm1, %v371_v4, %v372_v63  ;;  %v420_v7 = vsel %vm383_vm2, %v418_v53, %v419_v55  ;;  %v424_v57 = vsel %vm379_vm0, %v259_v45, %v373_v61 }
  0x20   :  { %v423_v54 = vsel %vm383_vm2, %v421_v6, %v422_v56  ;;  %v425_v35 = vsel %vm381_vm1, %v374_v14, %v375_v12  ;;  %v427_v37 = vsel %vm379_vm0, %v263_v48, %v376_v19  ;;  %v428_v38 = vsel %vm381_vm1, %v377_v20, %v378_v23  ;;  %v13_v6 = vld [vmem:[%s1232_s0 + $0x10] sm:$0xff] }
  0x21   :  { %v426_v36 = vsel %vm383_vm2, %v424_v57, %v425_v35  ;;  %v1235_v39 = vunpack.c.l.bf16 %v799_v0  ;;  %v1236_v41 = vperm.slane %v856_v24, 2  ;;  %v1237_v43 = vperm.slane %v856_v24, 4 }
  0x22   :  { %v429_v46 = vsel %vm383_vm2, %v427_v37, %v428_v38  ;;  %v1238_v45 = vunpack.c.h.bf16 %v799_v0  ;;  %v1239_v49 = vperm.slane %v856_v24, 6  ;;  %v1240_v48 = vperm.slane %v858_v25, 2 }
  0x23   :  { %v446_v40 = vmul.f32 %v384_v62, %v1235_v39  ;;  %v220_v42 = vperm.slane %v1236_v41, 0  ;;  %v221_v44 = vperm.slane %v1237_v43, 0  ;;  %v1241_v21 = vperm.slane %v858_v25, 4 }
  0x24   :  { %v447_v47 = vmul.f32 %v387_v34, %v1238_v45  ;;  %v222_v50 = vperm.slane %v1239_v49, 0  ;;  %v224_v51 = vperm.slane %v1240_v48, 0  ;;  %v1242_v5 = vperm.slane %v858_v25, 6 }
  0x25   :  { %v225_v22 = vperm.slane %v1241_v21, 0  ;;  %478 = vst [vmem:[#allocation1] ss:$4 sm:$0xff] %v446_v40  ;;  %v388_v8 = vsel %vm379_vm0, %v943_v13, %v337_v10  ;;  %v389_v17 = vsel %vm381_vm1, %v338_v11, %v339_v16  ;;  %v391_v0 = vsel %vm379_vm0, %v951_v58, %v340_v59 }
  0x26   :  { %v226_v9 = vperm.slane %v1242_v5, 0  ;;  %v392_v4 = vsel %vm381_vm1, %v341_v32, %v342_v33  ;;  %480 = vst [vmem:[#allocation1 + $0x20] ss:$4 sm:$0xff] %v447_v47  ;;  %v1243_v63 = vunpack.c.l.bf16 %v809_v2  ;;  %v1244_v60 = vunpack.c.h.bf16 %v809_v2 }
  0x27   :  { %v1245_v14 = vunpack.c.l.bf16 %v814_v3  ;;  %v1246_v13 = vunpack.c.h.bf16 %v814_v3  ;;  %v122_v58 = vperm.slane %v870_v31, 6  ;;  %v1247_v11 = vperm.slane %v856_v24, 0 }
  0x28   :  { %v1007_v61 = vmul.f32 %v420_v7, %v1243_v63  ;;  %v1011_v15 = vmul.f32 %v423_v54, %v1244_v60  ;;  %v1248_v52 = vperm.slane %v858_v25, 0  ;;  %v1249_v2 = vperm.slane %v860_v26, 0 }
  0x29   :  { %v1015_v12 = vmul.f32 %v426_v36, %v1245_v14  ;;  %v1019_v10 = vmul.f32 %v429_v46, %v1246_v13  ;;  %v219_v16 = vperm.slane %v1247_v11, 0  ;;  %v1250_v19 = vperm.slane %v860_v26, 2 }
  0x2a   :  { %v223_v18 = vperm.slane %v1248_v52, 0  ;;  %v1028_v59 = vperm.slane %v1249_v2, 0  ;;  %v1251_v3 = vperm.slane %v860_v26, 4  ;;  %v1252_v32 = vperm.slane %v860_v26, 6 }
  0x2b   :  { %v1032_v20 = vperm.slane %v1250_v19, 0  ;;  %v390_v24 = vsel %vm383_vm2, %v388_v8, %v389_v17  ;;  %v1253_v25 = vperm.slane %v862_v27, 0  ;;  %v343_v53 = vrot.slane %v220_v42, 6 }
  0x2c   :  { %v1036_v23 = vperm.slane %v1251_v3, 0  ;;  %v1040_v33 = vperm.slane %v1252_v32, 0  ;;  %v344_v34 = vrot.slane %v221_v44, 4  ;;  %v393_v55 = vsel %vm383_vm2, %v391_v0, %v392_v4  ;;  %v481_v36 = vld.sshfl [vmem:[#allocation1] sm:$0xff pattern:$0x73625140] }
  0x2d   :  { %v1045_v62 = vperm.slane %v1253_v25, 0  ;;  %v345_v56 = vrot.slane %v222_v50, 2  ;;  %v346_v7 = vrot.slane %v224_v51, 6  ;;  %v347_v54 = vrot.slane %v225_v22, 4 }
  0x2e   :  { %v348_v26 = vrot.slane %v226_v9, 2  ;;  %v1254_v57 = vunpack.c.l.bf16 %v804_v1  ;;  %v482_v37 = vld.sshfl [vmem:[#allocation1 + $0x8] sm:$0xff pattern:$0x73625140]  ;;  %v1255_v38 = vunpack.c.h.bf16 %v804_v1  ;;  %v23_v44 = vunpack.c.l.bf16 %v13_v6 }
  0x2f   :  { %v483_v40 = vld.sshfl [vmem:[#allocation1 + $0x10] sm:$0xff pattern:$0x73625140]  ;;  %v484_v41 = vld.sshfl [vmem:[#allocation1 + $0x18] sm:$0xff pattern:$0x73625140]  ;;  %v24_v46 = vunpack.c.h.bf16 %v13_v6  ;;  %v394_v5 = vsel %vm379_vm0, %v219_v16, %v343_v53  ;;  %v395_v9 = vsel %vm381_vm1, %v344_v34, %v345_v56  ;;  %v397_v4 = vsel %vm379_vm0, %v223_v18, %v346_v7 }
  0x30   :  { %v448_v35 = vmul.f32 %v390_v24, %v1254_v57  ;;  %v449_v39 = vmul.f32 %v393_v55, %v1255_v38  ;;  %v485_v42 = vld.sshfl [vmem:[#allocation1 + $0x20] sm:$0xff pattern:$0x73625140]  ;;  %v486_v43 = vld.sshfl [vmem:[#allocation1 + $0x28] sm:$0xff pattern:$0x73625140]  ;;  %v398_v63 = vsel %vm381_vm1, %v347_v54, %v348_v26  ;;  %v396_v32 = vsel %vm383_vm2, %v394_v5, %v395_v9 }
  0x31   :  { %v487_v45 = vld.sshfl [vmem:[#allocation1 + $0x30] sm:$0xff pattern:$0x73625140]  ;;  %v488_v47 = vld.sshfl [vmem:[#allocation1 + $0x38] sm:$0xff pattern:$0x73625140]  ;;  %v399_v34 = vsel %vm383_vm2, %v397_v4, %v398_v63  ;;  %v450_v54 = vmul.f32 %v396_v32, %v23_v44 }
  0x32   :  { %v1256_v49 = vperm.slane %v862_v27, 2  ;;  %489 = vst [vmem:[#allocation1] ss:$4 sm:$0xff] %v448_v35  ;;  %v623_v48 = vsel %vm379_vm0, %v481_v36, 0.0  ;;  %v624_v51 = vsel %vm379_vm0, %v482_v37, 0.0  ;;  %v626_v21 = vsel %vm379_vm0, %v483_v40, 0.0 }
  0x33   :  { %v1257_v1 = vperm.slane %v862_v27, 4  ;;  %490 = vst [vmem:[#allocation1 + $0x20] ss:$4 sm:$0xff] %v449_v39  ;;  %v625_v8 = vadd.f32 %v624_v51, %v623_v48  ;;  %v1258_v17 = vperm.slane %v862_v27, 6  ;;  %v628_v60 = vsel %vm379_vm0, %v484_v41, 0.0 }
  0x34   :  { %v232_v50 = vperm.slane %v1256_v49, 0  ;;  %v1259_v14 = vperm.slane %v864_v28, 0  ;;  %v1260_v11 = vperm.slane %v864_v28, 2  ;;  %v1261_v52 = vperm.slane %v864_v28, 4 }
  0x35   :  { %v233_v22 = vperm.slane %v1257_v1, 0  ;;  %v234_v0 = vperm.slane %v1258_v17, 0  ;;  %v627_v27 = vadd.f32 %v626_v21, %v625_v8  ;;  %v1262_v19 = vperm.slane %v864_v28, 6 }
  0x36   :  { %v1071_v13 = vperm.slane %v1259_v14, 0  ;;  %v1075_v16 = vperm.slane %v1260_v11, 0  ;;  %v1079_v2 = vperm.slane %v1261_v52, 0  ;;  %v349_v3 = vrot.slane %v1032_v20, 6  ;;  %v14_v20 = vld [vmem:[%s1232_s0 + $0x18] sm:$0xff] }
  0x37   :  { %v1083_v18 = vperm.slane %v1262_v19, 0  ;;  %v630_v24 = vsel %vm379_vm0, %v485_v42, 0.0  ;;  %v350_v25 = vrot.slane %v1036_v23, 4  ;;  %v351_v53 = vrot.slane %v1040_v33, 2 }
  0x38   :  { %v629_v55 = vadd.f32 %v628_v60, %v627_v27  ;;  %v352_v6 = vrot.slane %v232_v50, 6  ;;  %v353_v56 = vrot.slane %v233_v22, 4  ;;  %v354_v7 = vrot.slane %v234_v0, 2 }
  0x39   :  { %v632_v28 = vsel %vm379_vm0, %v486_v43, 0.0  ;;  %v491_v26 = vld.sshfl [vmem:[#allocation1] sm:$0xff pattern:$0x73625140]  ;;  %v634_v35 = vsel %vm379_vm0, %v487_v45, 0.0  ;;  %v636_v23 = vsel %vm379_vm0, %v488_v47, 0.0  ;;  %v451_v33 = vmul.f32 %v399_v34, %v24_v46 }
  0x3a   :  { %v631_v57 = vadd.f32 %v630_v24, %v629_v55  ;;  %v492_v36 = vld.sshfl [vmem:[#allocation1 + $0x8] sm:$0xff pattern:$0x73625140]  ;;  %v493_v37 = vld.sshfl [vmem:[#allocation1 + $0x10] sm:$0xff pattern:$0x73625140]  ;;  %v25_v43 = vunpack.c.l.bf16 %v14_v20  ;;  %v26_v49 = vunpack.c.h.bf16 %v14_v20  ;;  %v400_v46 = vsel %vm379_vm0, %v1028_v59, %v349_v3 }
  0x3b   :  { %v494_v38 = vld.sshfl [vmem:[#allocation1 + $0x18] sm:$0xff pattern:$0x73625140]  ;;  %v495_v39 = vld.sshfl [vmem:[#allocation1 + $0x20] sm:$0xff pattern:$0x73625140]  ;;  %v401_v21 = vsel %vm381_vm1, %v350_v25, %v351_v53  ;;  %v403_v9 = vsel %vm379_vm0, %v1045_v62, %v352_v6  ;;  %v404_v8 = vsel %vm381_vm1, %v353_v56, %v354_v7 }
  0x3c   :  { %v633_v40 = vadd.f32 %v632_v28, %v631_v57  ;;  %v496_v41 = vld.sshfl [vmem:[#allocation1 + $0x28] sm:$0xff pattern:$0x73625140]  ;;  %v497_v42 = vld.sshfl [vmem:[#allocation1 + $0x30] sm:$0xff pattern:$0x73625140]  ;;  %v405_v25 = vsel %vm383_vm2, %v403_v9, %v404_v8 }
  0x3d   :  { %v1263_v50 = vperm.slane %v866_v29, 0  ;;  %v1099_v44 = vld.sshfl [vmem:[#allocation1 + $0x38] sm:$0xff pattern:$0x73625140]  ;;  %499 = vst [vmem:[#allocation1] ss:$4 sm:$0xff] %v450_v54 }
  0x3e   :  { %v635_v51 = vadd.f32 %v634_v35, %v633_v40  ;;  %v1264_v45 = vperm.slane %v866_v29, 2  ;;  %500 = vst [vmem:[#allocation1 + $0x20] ss:$4 sm:$0xff] %v451_v33  ;;  %v638_v1 = vsel %vm379_vm0, %v491_v26, 0.0  ;;  %v1265_v22 = vperm.slane %v866_v29, 4 }
  0x3f   :  { %v239_v48 = vperm.slane %v1263_v50, 0  ;;  %v1266_v0 = vperm.slane %v866_v29, 6  ;;  %v1267_v63 = vperm.slane %v868_v30, 2  ;;  %v1268_v60 = vperm.slane %v868_v30, 4 }
  0x40   :  { %v240_v47 = vperm.slane %v1264_v45, 0  ;;  %v241_v5 = vperm.slane %v1265_v22, 0  ;;  %v637_v17 = vadd.f32 %v636_v23, %v635_v51  ;;  %v640_v11 = vsel %vm379_vm0, %v492_v36, 0.0  ;;  %v15_v23 = vld [vmem:[%s1232_s0 + $0x20] sm:$0xff] }
  0x41   :  { %v242_v4 = vperm.slane %v1266_v0, 0  ;;  %v1116_v59 = vperm.slane %v1267_v63, 0  ;;  %v1120_v14 = vperm.slane %v1268_v60, 0  ;;  %v1269_v52 = vperm.slane %v868_v30, 6 }
  0x42   :  { %v1270_v62 = vperm.slane %v870_v31, 2  ;;  %v402_v29 = vsel %vm383_vm2, %v400_v46, %v401_v21  ;;  %v639_v3 = vadd.f32 %v638_v1, %v637_v17  ;;  %v355_v32 = vrot.slane %v1075_v16, 6 }
  0x43   :  { %v1125_v27 = vperm.slane %v1269_v52, 0  ;;  %v356_v24 = vrot.slane %v1079_v2, 4  ;;  %v642_v53 = vsel %vm379_vm0, %v493_v37, 0.0  ;;  %v357_v34 = vrot.slane %v1083_v18, 2 }
  0x44   :  { %v1129_v19 = vperm.slane %v1270_v62, 0  ;;  %v358_v55 = vrot.slane %v240_v47, 6  ;;  %v359_v6 = vrot.slane %v241_v5, 4  ;;  %v641_v56 = vadd.f32 %v640_v11, %v639_v3  ;;  %v501_v57 = vld.sshfl [vmem:[#allocation1] sm:$0xff pattern:$0x73625140] }
  0x45   :  { %v360_v7 = vrot.slane %v242_v4, 2  ;;  %v452_v28 = vmul.f32 %v402_v29, %v25_v43  ;;  %v644_v20 = vsel %vm379_vm0, %v494_v38, 0.0  ;;  %v646_v54 = vsel %vm379_vm0, %v495_v39, 0.0  ;;  %v502_v16 = vld.sshfl [vmem:[#allocation1 + $0x8] sm:$0xff pattern:$0x73625140] }
  0x46   :  { %v453_v26 = vmul.f32 %v405_v25, %v26_v49  ;;  %v503_v35 = vld.sshfl [vmem:[#allocation1 + $0x10] sm:$0xff pattern:$0x73625140]  ;;  %v643_v2 = vadd.f32 %v642_v53, %v641_v56  ;;  %v504_v33 = vld.sshfl [vmem:[#allocation1 + $0x18] sm:$0xff pattern:$0x73625140]  ;;  %v406_v50 = vsel %vm379_vm0, %v1071_v13, %v355_v32  ;;  %v407_v51 = vsel %vm381_vm1, %v356_v24, %v357_v34 }
  0x47   :  { %v505_v18 = vld.sshfl [vmem:[#allocation1 + $0x20] sm:$0xff pattern:$0x73625140]  ;;  %v506_v36 = vld.sshfl [vmem:[#allocation1 + $0x28] sm:$0xff pattern:$0x73625140]  ;;  %v409_v46 = vsel %vm379_vm0, %v239_v48, %v358_v55  ;;  %v410_v21 = vsel %vm381_vm1, %v359_v6, %v360_v7  ;;  %v28_v22 = vunpack.c.h.bf16 %v15_v23  ;;  %v408_v4 = vsel %vm383_vm2, %v406_v50, %v407_v51 }
  0x48   :  { %v1142_v37 = vld.sshfl [vmem:[#allocation1 + $0x30] sm:$0xff pattern:$0x73625140]  ;;  %v645_v40 = vadd.f32 %v644_v20, %v643_v2  ;;  %v508_v43 = vld.sshfl [vmem:[#allocation1 + $0x38] sm:$0xff pattern:$0x73625140]  ;;  %v411_v63 = vsel %vm383_vm2, %v409_v46, %v410_v21 }
  0x49   :  { %509 = vst [vmem:[#allocation1] ss:$4 sm:$0xff] %v452_v28  ;;  %v648_v38 = vsel %vm379_vm0, %v496_v41, 0.0  ;;  %v1271_v39 = vperm.slane %v870_v31, 4  ;;  %v250_v47 = vperm.slane %v122_v58, 0  ;;  %v650_v1 = vsel %vm379_vm0, %v497_v42, 0.0 }
  0x4a   :  { %510 = vst [vmem:[#allocation1 + $0x20] ss:$4 sm:$0xff] %v453_v26  ;;  %v647_v45 = vadd.f32 %v646_v54, %v645_v40  ;;  %v27_v41 = vunpack.c.l.bf16 %v15_v23  ;;  %v1272_v5 = vperm.slane %v868_v30, 0  ;;  %v1273_v13 = vperm.slane %v870_v31, 0 }
  0x4b   :  { %v249_v49 = vperm.slane %v1271_v39, 0  ;;  %v361_v0 = vrot.slane %v1116_v59, 6  ;;  %v652_v58 = vsel %vm379_vm0, %v1099_v44, 0.0  ;;  %v362_v48 = vrot.slane %v1120_v14, 4 }
  0x4c   :  { %v243_v9 = vperm.slane %v1272_v5, 0  ;;  %v649_v8 = vadd.f32 %v648_v38, %v647_v45  ;;  %v247_v17 = vperm.slane %v1273_v13, 0  ;;  %v363_v42 = vrot.slane %v1125_v27, 2 }
  0x4d   :  { %v364_v30 = vrot.slane %v1129_v19, 6  ;;  %v365_v11 = vrot.slane %v249_v49, 4  ;;  %v366_v52 = vrot.slane %v250_v47, 2  ;;  %v654_v31 = vsel %vm379_vm0, %v501_v57, 0.0  ;;  %v16_v19 = vld [vmem:[%s1232_s0 + $0x28] sm:$0xff] }
  0x4e   :  { %v651_v60 = vadd.f32 %v650_v1, %v649_v8  ;;  %v454_v62 = vmul.f32 %v408_v4, %v27_v41  ;;  %v656_v29 = vsel %vm379_vm0, %v502_v16, 0.0  ;;  %v658_v3 = vsel %vm379_vm0, %v503_v35, 0.0 }
  0x4f   :  { %v455_v44 = vmul.f32 %v411_v63, %v28_v22  ;;  %v412_v7 = vsel %vm379_vm0, %v243_v9, %v361_v0  ;;  %v413_v28 = vsel %vm381_vm1, %v362_v48, %v363_v42  ;;  %v660_v20 = vsel %vm379_vm0, %v504_v33, 0.0 }
  0x50   :  { %v653_v59 = vadd.f32 %v652_v58, %v651_v60  ;;  %v511_v32 = vld.sshfl [vmem:[#allocation1] sm:$0xff pattern:$0x73625140]  ;;  %v512_v14 = vld.sshfl [vmem:[#allocation1 + $0x8] sm:$0xff pattern:$0x73625140]  ;;  %v415_v54 = vsel %vm379_vm0, %v247_v17, %v364_v30  ;;  %v416_v26 = vsel %vm381_vm1, %v365_v11, %v366_v52  ;;  %v29_v16 = vunpack.c.l.bf16 %v16_v19 }
  0x51   :  { %v513_v24 = vld.sshfl [vmem:[#allocation1 + $0x10] sm:$0xff pattern:$0x73625140]  ;;  %v514_v27 = vld.sshfl [vmem:[#allocation1 + $0x18] sm:$0xff pattern:$0x73625140]  ;;  %v30_v2 = vunpack.c.h.bf16 %v16_v19  ;;  %v414_v23 = vsel %vm383_vm2, %v412_v7, %v413_v28  ;;  %v417_v38 = vsel %vm383_vm2, %v415_v54, %v416_v26 }
  0x52   :  { %v515_v25 = vld.sshfl [vmem:[#allocation1 + $0x20] sm:$0xff pattern:$0x73625140]  ;;  %v655_v53 = vadd.f32 %v654_v31, %v653_v59  ;;  %v516_v34 = vld.sshfl [vmem:[#allocation1 + $0x28] sm:$0xff pattern:$0x73625140]  ;;  %v456_v50 = vmul.f32 %v414_v23, %v29_v16 }
  0x53   :  { %v517_v55 = vld.sshfl [vmem:[#allocation1 + $0x30] sm:$0xff pattern:$0x73625140]  ;;  %v518_v6 = vld.sshfl [vmem:[#allocation1 + $0x38] sm:$0xff pattern:$0x73625140]  ;;  %v457_v45 = vmul.f32 %v417_v38, %v30_v2 }
  0x54   :  { %519 = vst [vmem:[#allocation1] ss:$4 sm:$0xff] %v454_v62  ;;  %v657_v56 = vadd.f32 %v656_v29, %v655_v53  ;;  %v662_v35 = vsel %vm379_vm0, %v505_v18, 0.0  ;;  %v664_v39 = vsel %vm379_vm0, %v506_v36, 0.0  ;;  %v666_v33 = vsel %vm379_vm0, %v1142_v37, 0.0 }
  0x55   :  { %520 = vst [vmem:[#allocation1 + $0x20] ss:$4 sm:$0xff] %v455_v44  ;;  %v668_v51 = vsel %vm379_vm0, %v508_v43, 0.0  ;;  %v670_v36 = vsel %vm379_vm0, %v511_v32, 0.0  ;;  %v672_v37 = vsel %vm379_vm0, %v512_v14, 0.0  ;;  %v674_v43 = vsel %vm379_vm0, %v513_v24, 0.0 }
  0x56   :  { %v659_v57 = vadd.f32 %v658_v3, %v657_v56  ;;  %v676_v4 = vsel %vm379_vm0, %v514_v27, 0.0  ;;  %v678_v48 = vsel %vm379_vm0, %v515_v25, 0.0  ;;  %v680_v42 = vsel %vm379_vm0, %v516_v34, 0.0 }
  0x57   :  { %v682_v44 = vsel %vm379_vm0, %v517_v55, 0.0  ;;  %v684_v14 = vsel %vm379_vm0, %v518_v6, 0.0 }
  0x58   :  { %v661_v40 = vadd.f32 %v660_v20, %v659_v57 }
  0x5a   :  { %v663_v49 = vadd.f32 %v662_v35, %v661_v40 }
  0x5b   :  { %v521_v47 = vld.sshfl [vmem:[#allocation1] sm:$0xff pattern:$0x73625140]  ;;  %v522_v46 = vld.sshfl [vmem:[#allocation1 + $0x8] sm:$0xff pattern:$0x73625140] }
  0x5c   :  { %v523_v21 = vld.sshfl [vmem:[#allocation1 + $0x10] sm:$0xff pattern:$0x73625140]  ;;  %v665_v18 = vadd.f32 %v664_v39, %v663_v49  ;;  %v524_v1 = vld.sshfl [vmem:[#allocation1 + $0x18] sm:$0xff pattern:$0x73625140] }
  0x5d   :  { %v525_v41 = vld.sshfl [vmem:[#allocation1 + $0x20] sm:$0xff pattern:$0x73625140]  ;;  %v526_v22 = vld.sshfl [vmem:[#allocation1 + $0x28] sm:$0xff pattern:$0x73625140] }
  0x5e   :  { %v527_v5 = vld.sshfl [vmem:[#allocation1 + $0x30] sm:$0xff pattern:$0x73625140]  ;;  %v667_v9 = vadd.f32 %v666_v33, %v665_v18  ;;  %v528_v8 = vld.sshfl [vmem:[#allocation1 + $0x38] sm:$0xff pattern:$0x73625140] }
  0x5f   :  { %529 = vst [vmem:[#allocation1] ss:$4 sm:$0xff] %v456_v50  ;;  %v686_v27 = vsel %vm379_vm0, %v521_v47, 0.0  ;;  %v688_v53 = vsel %vm379_vm0, %v522_v46, 0.0  ;;  %v690_v34 = vsel %vm379_vm0, %v523_v21, 0.0  ;;  %v692_v6 = vsel %vm379_vm0, %v524_v1, 0.0 }
  0x60   :  { %530 = vst [vmem:[#allocation1 + $0x20] ss:$4 sm:$0xff] %v457_v45  ;;  %v669_v13 = vadd.f32 %v668_v51, %v667_v9  ;;  %v694_v16 = vsel %vm379_vm0, %v525_v41, 0.0  ;;  %v696_v2 = vsel %vm379_vm0, %v526_v22, 0.0  ;;  %v698_v40 = vsel %vm379_vm0, %v527_v5, 0.0 }
  0x61   :  { %v700_v39 = vsel %vm379_vm0, %v528_v8, 0.0 }
  0x62   :  { %v671_v17 = vadd.f32 %v670_v36, %v669_v13 }
  0x64   :  { %v673_v0 = vadd.f32 %v672_v37, %v671_v17 }
  0x66   :  { %v675_v58 = vadd.f32 %v674_v43, %v673_v0  ;;  %v531_v63 = vld.sshfl [vmem:[#allocation1] sm:$0xff pattern:$0x73625140]  ;;  %v532_v60 = vld.sshfl [vmem:[#allocation1 + $0x8] sm:$0xff pattern:$0x73625140] }
  0x67   :  { %v533_v30 = vld.sshfl [vmem:[#allocation1 + $0x10] sm:$0xff pattern:$0x73625140]  ;;  %v534_v11 = vld.sshfl [vmem:[#allocation1 + $0x18] sm:$0xff pattern:$0x73625140] }
  0x68   :  { %v535_v52 = vld.sshfl [vmem:[#allocation1 + $0x20] sm:$0xff pattern:$0x73625140]  ;;  %v677_v31 = vadd.f32 %v676_v4, %v675_v58  ;;  %v536_v62 = vld.sshfl [vmem:[#allocation1 + $0x28] sm:$0xff pattern:$0x73625140] }
  0x69   :  { %v537_v59 = vld.sshfl [vmem:[#allocation1 + $0x30] sm:$0xff pattern:$0x73625140]  ;;  %v538_v29 = vld.sshfl [vmem:[#allocation1 + $0x38] sm:$0xff pattern:$0x73625140] }
  0x6a   :  { %539 = vst [vmem:[#allocation1] ss:$4 sm:$0xff] %v1007_v61  ;;  %v679_v3 = vadd.f32 %v678_v48, %v677_v31  ;;  %v702_v50 = vsel %vm379_vm0, %v531_v63, 0.0  ;;  %v704_v33 = vsel %vm379_vm0, %v532_v60, 0.0  ;;  %v708_v47 = vsel %vm379_vm0, %v534_v11, 0.0 }
  0x6b   :  { %540 = vst [vmem:[#allocation1 + $0x20] ss:$4 sm:$0xff] %v1011_v15  ;;  %v710_v21 = vsel %vm379_vm0, %v535_v52, 0.0  ;;  %v712_v1 = vsel %vm379_vm0, %v536_v62, 0.0  ;;  %v714_v22 = vsel %vm379_vm0, %v537_v59, 0.0  ;;  %v716_v9 = vsel %vm379_vm0, %v538_v29, 0.0 }
  0x6c   :  { %v681_v32 = vadd.f32 %v680_v42, %v679_v3 }
  0x6e   :  { %v683_v24 = vadd.f32 %v682_v44, %v681_v32 }
  0x70   :  { %v685_v25 = vadd.f32 %v684_v14, %v683_v24 }
  0x71   :  { %v541_v19 = vld.sshfl [vmem:[#allocation1] sm:$0xff pattern:$0x73625140]  ;;  %v542_v56 = vld.sshfl [vmem:[#allocation1 + $0x8] sm:$0xff pattern:$0x73625140] }
  0x72   :  { %v543_v7 = vld.sshfl [vmem:[#allocation1 + $0x10] sm:$0xff pattern:$0x73625140]  ;;  %v687_v61 = vadd.f32 %v686_v27, %v685_v25  ;;  %v544_v28 = vld.sshfl [vmem:[#allocation1 + $0x18] sm:$0xff pattern:$0x73625140] }
  0x73   :  { %v545_v20 = vld.sshfl [vmem:[#allocation1 + $0x20] sm:$0xff pattern:$0x73625140]  ;;  %v546_v15 = vld.sshfl [vmem:[#allocation1 + $0x28] sm:$0xff pattern:$0x73625140] }
  0x74   :  { %v547_v54 = vld.sshfl [vmem:[#allocation1 + $0x30] sm:$0xff pattern:$0x73625140]  ;;  %v689_v55 = vadd.f32 %v688_v53, %v687_v61  ;;  %v548_v26 = vld.sshfl [vmem:[#allocation1 + $0x38] sm:$0xff pattern:$0x73625140] }
  0x75   :  { %549 = vst [vmem:[#allocation1] ss:$4 sm:$0xff] %v1015_v12  ;;  %v718_v36 = vsel %vm379_vm0, %v541_v19, 0.0  ;;  %v720_v37 = vsel %vm379_vm0, %v542_v56, 0.0  ;;  %v722_v43 = vsel %vm379_vm0, %v543_v7, 0.0  ;;  %v724_v4 = vsel %vm379_vm0, %v544_v28, 0.0 }
  0x76   :  { %550 = vst [vmem:[#allocation1 + $0x20] ss:$4 sm:$0xff] %v1019_v10  ;;  %v691_v57 = vadd.f32 %v690_v34, %v689_v55  ;;  %v706_v10 = vsel %vm379_vm0, %v533_v30, 0.0  ;;  %v726_v48 = vsel %vm379_vm0, %v545_v20, 0.0  ;;  %v728_v63 = vsel %vm379_vm0, %v546_v15, 0.0 }
  0x77   :  { %v730_v30 = vsel %vm379_vm0, %v547_v54, 0.0  ;;  %v732_v31 = vsel %vm379_vm0, %v548_v26, 0.0 }
  0x78   :  { %v693_v35 = vadd.f32 %v692_v6, %v691_v57 }
  0x7a   :  { %v695_v23 = vadd.f32 %v694_v16, %v693_v35 }
  0x7c   :  { %v697_v38 = vadd.f32 %v696_v2, %v695_v23  ;;  %v551_v11 = vld.sshfl [vmem:[#allocation1] sm:$0xff pattern:$0x73625140]  ;;  %v552_v62 = vld.sshfl [vmem:[#allocation1 + $0x8] sm:$0xff pattern:$0x73625140] }
  0x7d   :  { %v734_v29 = vsel %vm379_vm0, %v551_v11, 0.0  ;;  %v553_v3 = vld.sshfl [vmem:[#allocation1 + $0x10] sm:$0xff pattern:$0x73625140]  ;;  %v736_v32 = vsel %vm379_vm0, %v552_v62, 0.0 }
  0x7e   :  { %v699_v49 = vadd.f32 %v698_v40, %v697_v38  ;;  %v554_v14 = vld.sshfl [vmem:[#allocation1 + $0x18] sm:$0xff pattern:$0x73625140]  ;;  %v738_v27 = vsel %vm379_vm0, %v553_v3, 0.0 }
  0x7f   :  { %v555_v25 = vld.sshfl [vmem:[#allocation1 + $0x20] sm:$0xff pattern:$0x73625140]  ;;  %v740_v34 = vsel %vm379_vm0, %v554_v14, 0.0 }
  0x80   :  { %v701_v12 = vadd.f32 %v700_v39, %v699_v49  ;;  %v556_v19 = vld.sshfl [vmem:[#allocation1 + $0x28] sm:$0xff pattern:$0x73625140]  ;;  %v742_v7 = vsel %vm379_vm0, %v555_v25, 0.0 }
  0x81   :  { %v557_v61 = vld.sshfl [vmem:[#allocation1 + $0x30] sm:$0xff pattern:$0x73625140]  ;;  %v744_v20 = vsel %vm379_vm0, %v556_v19, 0.0 }
  0x82   :  { %v703_v51 = vadd.f32 %v702_v50, %v701_v12  ;;  %v558_v15 = vld.sshfl [vmem:[#allocation1 + $0x38] sm:$0xff pattern:$0x73625140]  ;;  %v746_v55 = vsel %vm379_vm0, %v557_v61, 0.0 }
  0x83   :  { %v748_v6 = vsel %vm379_vm0, %v558_v15, 0.0 }
  0x84   :  { %v705_v45 = vadd.f32 %v704_v33, %v703_v51 }
  0x86   :  { %v707_v46 = vadd.f32 %v706_v10, %v705_v45 }
  0x88   :  { %v709_v18 = vadd.f32 %v708_v47, %v707_v46 }
  0x8a   :  { %v711_v41 = vadd.f32 %v710_v21, %v709_v18 }
  0x8c   :  { %v713_v5 = vadd.f32 %v712_v1, %v711_v41 }
  0x8e   :  { %v715_v8 = vadd.f32 %v714_v22, %v713_v5 }
  0x90   :  { %v717_v13 = vadd.f32 %v716_v9, %v715_v8 }
  0x92   :  { %v719_v17 = vadd.f32 %v718_v36, %v717_v13 }
  0x94   :  { %v721_v0 = vadd.f32 %v720_v37, %v719_v17 }
  0x96   :  { %v723_v58 = vadd.f32 %v722_v43, %v721_v0 }
  0x98   :  { %v725_v42 = vadd.f32 %v724_v4, %v723_v58 }
  0x9a   :  { %v727_v60 = vadd.f32 %v726_v48, %v725_v42 }
  0x9c   :  { %v729_v52 = vadd.f32 %v728_v63, %v727_v60 }
  0x9e   :  { %v731_v59 = vadd.f32 %v730_v30, %v729_v52 }
  0xa0   :  { %v733_v44 = vadd.f32 %v732_v31, %v731_v59 }
  0xa2   :  { %v735_v24 = vadd.f32 %v734_v29, %v733_v44 }
  0xa4   :  { %v737_v53 = vadd.f32 %v736_v32, %v735_v24 }
  0xa6   :  { %v739_v56 = vadd.f32 %v738_v27, %v737_v53 }
  0xa8   :  { %v741_v28 = vadd.f32 %v740_v34, %v739_v56 }
  0xaa   :  { %v743_v54 = vadd.f32 %v742_v7, %v741_v28 }
  0xac   :  { %v745_v26 = vadd.f32 %v744_v20, %v743_v54 }
  0xae   :  { %v747_v57 = vadd.f32 %v746_v55, %v745_v26 }
  0xb0   :  { %v749_v16 = vadd.f32 %v748_v6, %v747_v57 }
  0xb2   :  { %750 = vadd.xlane.f32.xlu0 %v749_v16 }
 0x125   :  { %v751_v35 = vpop.xlane.xlu0 %750 }
 0x126   :  { %v752_v2 = vsub.f32 0.0, %v751_v35 }
 0x128   :  { %v753_v23 = vmul.f32 1.442695, %v752_v2 }
 0x12a   :  { %777 = vpow2.f32 %v753_v23 }
 0x130   :  { %v778_v40 = vpop.eup %777 }
 0x131   :  { %v755_v38 = vadd.f32 1.0, %v778_v40 }
 0x133   :  { %779 = vrcp.f32 %v755_v38  ;;  %v767_v12 = vand.u32 2147483648, %v755_v38  ;;  %v765_v51 = vand.u32 2147483647, %v755_v38  ;;  %vm761_vm4 = vweird.f32 %v755_v38 }
 0x135   :  { %v768_v45 = vor.u32 1.1754944e-38, %v767_v12  ;;  %vm766_vm7 = vcmp.eq.f32.partialorder %v765_v51, 8.507059e+37 }
 0x139   :  { %v780_v39 = vpop.eup %779 }
 0x13a   :  { %v757_v49 = vmul.f32 %v780_v39, %v755_v38  ;;  %vm762_vm3 = vweird.f32 %v780_v39 }
 0x13b   :  { %vm763_vm5 = vmor %vm761_vm4, %vm762_vm3 }
 0x13c   :  { %v758_v50 = vsub.f32 1.0, %v757_v49 }
 0x13e   :  { %v759_v33 = vmul.f32 %v780_v39, %v758_v50 }
 0x140   :  { %v760_v10 = vadd.f32 %v780_v39, %v759_v33 }
 0x142   :  { %v764_v47 = vsel %vm763_vm5, %v780_v39, %v760_v10 }
 0x143   :  { %v769_v46 = vsel %vm766_vm7, %v768_v45, %v764_v47 }
 0x144   :  { %772 = vst.msk [vmem:[%s1234_s2] sm:$0x3] %vm771_vm6, %v769_v46 }

</bundles_post_ra>
